<compile_context>
chip_gen: v5e
topology: v5e:2x2
jax: 0.10.0
libtpu: 0.0.40
codegen_flags: <defaults>
</compile_context>

<pallas_src>
import functools

import jax
import jax.numpy as jnp
from jax.experimental import pallas as pl
from jax.experimental.pallas import tpu as pltpu

_VMEM_LIMIT = 48 * 1024 * 1024


def _round_up(x, m):
    return (x + m - 1) // m * m


# ---------------------------------------------------------------------------
# Fused Conv3x3 (+bias, optional ReLU, optional ChannelAttention) kernel.
# In-kernel layout: channels on sublanes, flattened spatial on lanes.
# ---------------------------------------------------------------------------
def _conv3x3_ca_kernel(*refs, taps, n, cin_p, relu, use_ca, inv_count):
    if use_ca:
        (x_ref, wf_ref, b_ref, mask_ref, w1_ref, b1_ref, w2_ref, b2_ref,
         o_ref, patch_ref) = refs
    else:
        x_ref, wf_ref, b_ref, o_ref, patch_ref = refs

    # Build the fused im2col patch matrix (9*Cin, N) in VMEM scratch from
    # lane-shifted static window loads of the flat-padded input.
    for t, (cs, off) in enumerate(taps):
        patch_ref[pl.ds(t * cin_p, cin_p), :] = (
            x_ref[0, pl.ds(cs, cin_p), pl.ds(off, n)])

    # One fused MXU matmul: (Cout, 9*Cin) @ (9*Cin, N) -> (Cout, N).
    y = jnp.dot(wf_ref[...], patch_ref[...],
                preferred_element_type=jnp.float32) + b_ref[...]
    if relu:
        y = jnp.maximum(y, 0.0)

    if use_ca:
        mask = mask_ref[...]                                   # (1, N); 1 = valid pixel
        gap = jnp.sum(y * mask, axis=1, keepdims=True) * inv_count       # (C, 1)
        gmp = jnp.max(jnp.where(mask > 0.5, y, -jnp.inf), axis=1, keepdims=True)
        g = jnp.concatenate([gap, gmp], axis=1)                # (C, 2): one MLP pass
        h = jnp.maximum(
            jnp.dot(w1_ref[...], g, preferred_element_type=jnp.float32)
            + b1_ref[...], 0.0)                                # (hidden, 2)
        z = (jnp.dot(w2_ref[...], h, preferred_element_type=jnp.float32)
             + b2_ref[...])                                    # (C, 2)
        att = jax.nn.sigmoid(z[:, 0:1] + z[:, 1:2])            # (C, 1)
        y = y * att

    o_ref[0] = y.astype(o_ref.dtype)


def conv3x3_block(x, w, b, ca=None, *, stride=1, relu=True):
    """Conv2d(k=3, stride in {1,2}, pad=1) [+ReLU] [+ChannelAttention] on NCHW."""
    B, cin, H, W = x.shape
    cout = w.shape[0]
    assert w.shape == (cout, cin, 3, 3)
    assert stride in (1, 2)
    cin_p = _round_up(cin, 8)
    cout_p = _round_up(cout, 8)

    # Pad channels to sublane multiples (zeros: no effect on the result).
    xp = jnp.pad(x, ((0, 0), (0, cin_p - cin), (0, 0), (0, 0)))
    wp = jnp.pad(w, ((0, cout_p - cout), (0, cin_p - cin), (0, 0), (0, 0)))
    bp = jnp.pad(b, ((0, cout_p - cout),))

    # Conv zero-padding of 1 on both spatial dims.
    xp = jnp.pad(xp, ((0, 0), (0, 0), (1, 1), (1, 1)))

    if stride == 1:
        hg, wg = H + 2, W + 2                       # working grid = padded grid
        hout, wout, r0, c0 = H, W, 1, 1
        xw = xp.reshape(B, cin_p, hg * wg)
        pad_lo = pad_hi = wg + 1
        ck = cin_p
        taps = tuple((0, dy * wg + dx) for dy in range(3) for dx in range(3))
    else:
        assert H % 2 == 0 and W % 2 == 0
        hg, wg = H // 2 + 1, W // 2 + 1             # working grid = phase grid
        hout, wout, r0, c0 = H // 2, W // 2, 0, 0
        # Polyphase / space-to-depth: phase (py, px) -> channel slab, so every
        # tap becomes a static, unstrided window of the flattened phase image.
        xs = xp.reshape(B, cin_p, hg, 2, wg, 2)
        xw = jnp.transpose(xs, (0, 3, 5, 1, 2, 4)).reshape(B, 4 * cin_p, hg * wg)
        pad_lo, pad_hi = 0, wg + 1
        ck = 4 * cin_p
        taps = tuple((((dy % 2) * 2 + (dx % 2)) * cin_p,
                      (dy // 2) * wg + (dx // 2))
                     for dy in range(3) for dx in range(3))

    n = hg * wg
    f = n + pad_lo + pad_hi
    xw = jnp.pad(xw, ((0, 0), (0, 0), (pad_lo, pad_hi)))

    # Fused conv weight (Cout, 9*Cin), tap-major / channel-minor.
    wf = jnp.transpose(wp, (0, 2, 3, 1)).reshape(cout_p, 9 * cin_p)
    bcol = bp.reshape(cout_p, 1)

    use_ca = ca is not None
    inv_count = 1.0 / float(hout * wout)

    inputs = [xw, wf, bcol]
    in_specs = [
        pl.BlockSpec((1, ck, f), lambda i: (i, 0, 0)),
        pl.BlockSpec((cout_p, 9 * cin_p), lambda i: (0, 0)),
        pl.BlockSpec((cout_p, 1), lambda i: (0, 0)),
    ]
    if use_ca:
        w1, b1, w2, b2 = ca
        hidden = w1.shape[0]
        w1p = jnp.pad(w1, ((0, 0), (0, cout_p - cout)))
        w2p = jnp.pad(w2, ((0, cout_p - cout), (0, 0)))
        b2p = jnp.pad(b2, ((0, cout_p - cout),))
        rr = jnp.arange(hg)[:, None]
        cc = jnp.arange(wg)[None, :]
        mask = ((rr >= r0) & (rr < r0 + hout) & (cc >= c0) & (cc < c0 + wout))
        mask = mask.astype(jnp.float32).reshape(1, n)
        inputs += [mask, w1p, b1.reshape(hidden, 1), w2p, b2p.reshape(cout_p, 1)]
        in_specs += [
            pl.BlockSpec((1, n), lambda i: (0, 0)),
            pl.BlockSpec((hidden, cout_p), lambda i: (0, 0)),
            pl.BlockSpec((hidden, 1), lambda i: (0, 0)),
            pl.BlockSpec((cout_p, hidden), lambda i: (0, 0)),
            pl.BlockSpec((cout_p, 1), lambda i: (0, 0)),
        ]

    kernel = functools.partial(
        _conv3x3_ca_kernel, taps=taps, n=n, cin_p=cin_p,
        relu=relu, use_ca=use_ca, inv_count=inv_count)

    out = pl.pallas_call(
        kernel,
        out_shape=jax.ShapeDtypeStruct((B, cout_p, n), jnp.float32),
        grid_spec=pltpu.PrefetchScalarGridSpec(
            num_scalar_prefetch=0,
            grid=(B,),
            in_specs=in_specs,
            out_specs=pl.BlockSpec((1, cout_p, n), lambda i: (i, 0, 0)),
            scratch_shapes=[pltpu.VMEM((9 * cin_p, n), jnp.float32)],
        ),
        compiler_params=pltpu.CompilerParams(
            dimension_semantics=("parallel",),
            vmem_limit_bytes=_VMEM_LIMIT),
    )(*inputs)

    # Output frame is (Cout, Hg*Wg) already in NCHW order: just crop.
    out = out.reshape(B, cout_p, hg, wg)
    return out[:, :cout, r0:r0 + hout, c0:c0 + wout]


# ---------------------------------------------------------------------------
# Final 1x1 conv kernel (pure channel matmul, lane-dense spatial output).
# ---------------------------------------------------------------------------
def _conv1x1_kernel(x_ref, w_ref, b_ref, o_ref):
    o_ref[0] = (jnp.dot(w_ref[...], x_ref[0], preferred_element_type=jnp.float32)
                + b_ref[...]).astype(o_ref.dtype)


def conv1x1(x, w, b):
    B, cin, H, W = x.shape
    cout = w.shape[0]
    cin_p = _round_up(cin, 8)
    cout_p = _round_up(cout, 8)
    hw = H * W
    xp = jnp.pad(x, ((0, 0), (0, cin_p - cin), (0, 0), (0, 0))).reshape(B, cin_p, hw)
    wp = jnp.pad(w.reshape(cout, cin), ((0, cout_p - cout), (0, cin_p - cin)))
    bp = jnp.pad(b, ((0, cout_p - cout),)).reshape(cout_p, 1)
    out = pl.pallas_call(
        _conv1x1_kernel,
        out_shape=jax.ShapeDtypeStruct((B, cout_p, hw), jnp.float32),
        grid_spec=pltpu.PrefetchScalarGridSpec(
            num_scalar_prefetch=0,
            grid=(B,),
            in_specs=[
                pl.BlockSpec((1, cin_p, hw), lambda i: (i, 0, 0)),
                pl.BlockSpec((cout_p, cin_p), lambda i: (0, 0)),
                pl.BlockSpec((cout_p, 1), lambda i: (0, 0)),
            ],
            out_specs=pl.BlockSpec((1, cout_p, hw), lambda i: (i, 0, 0)),
        ),
        compiler_params=pltpu.CompilerParams(
            dimension_semantics=("parallel",),
            vmem_limit_bytes=_VMEM_LIMIT),
    )(xp, wp, bp)
    return out.reshape(B, cout_p, H, W)[:, :cout]


# ---------------------------------------------------------------------------
# UNet building blocks (Pallas kernels + plain-JAX glue).
# ---------------------------------------------------------------------------
def basic_conv_block(x, p, stride):
    w, b = p['conv']
    return conv3x3_block(x, w, b, ca=p['ca'], stride=stride, relu=True)


def res_block(x, p, res_scale):
    w1, b1 = p['conv1']
    w2, b2 = p['conv2']
    h = conv3x3_block(x, w1, b1, ca=None, stride=1, relu=True)
    # res_scale folded into conv2's weight & bias (no ReLU between them).
    h = conv3x3_block(h, w2 * res_scale, b2 * res_scale, ca=p['ca'],
                      stride=1, relu=False)
    return x + h


def resize_conv(x, p):
    x = jnp.repeat(jnp.repeat(x, 2, axis=2), 2, axis=3)   # nearest x2 (glue)
    w, b = p['conv']
    return conv3x3_block(x, w, b, ca=None, stride=1, relu=True)


def unet_forward(x, params, *, res_scale=0.1, use_residual=True):
    stack = []
    out = x
    for idx, (cp, rp) in enumerate(zip(params['down_conv'], params['down_res'])):
        out = basic_conv_block(out, cp, stride=1 if idx == 0 else 2)
        out = res_block(out, rp, res_scale)
        stack.append(out)
    middle = basic_conv_block(out, params['mid_conv'], stride=2)
    out = middle
    for rp in params['mid_res']:
        out = res_block(out, rp, res_scale)
    out = out + middle
    for rz, cv, rs in zip(params['up_resize'], params['up_conv'], params['up_res']):
        out = resize_conv(out, rz)
        out = jnp.concatenate([out, stack.pop()], axis=1)
        out = basic_conv_block(out, cv, stride=1)
        out = res_block(out, rs, res_scale)
    wf, bf = params['final']
    out = conv1x1(out, wf, bf)
    return x + out if use_residual else out


# ---------------------------------------------------------------------------
# Pure-JAX reference (mirrors the PyTorch forward exactly).
# ---------------------------------------------------------------------------
def unet_reference(x, params, *, res_scale=0.1, use_residual=True):
    def conv(x, w, b, stride=1, pad=1):
        y = jax.lax.conv_general_dilated(
            x, w, (stride, stride), ((pad, pad), (pad, pad)),
            dimension_numbers=("NCHW", "OIHW", "NCHW"))
        return y + b[None, :, None, None]

    def ca(y, p):
        w1, b1, w2, b2 = p
        gap = jnp.mean(y, axis=(2, 3))
        gmp = jnp.max(y, axis=(2, 3))
        mlp = lambda v: jnp.maximum(v @ w1.T + b1, 0.0) @ w2.T + b2
        att = jax.nn.sigmoid(mlp(gap) + mlp(gmp))
        return y * att[:, :, None, None]

    def basic(x, p, stride):
        return ca(jnp.maximum(conv(x, *p['conv'], stride=stride), 0.0), p['ca'])

    def res(x, p):
        h = jnp.maximum(conv(x, *p['conv1']), 0.0)
        h = conv(h, *p['conv2']) * res_scale
        return x + ca(h, p['ca'])

    def resize(x, p):
        x = jnp.repeat(jnp.repeat(x, 2, axis=2), 2, axis=3)
        return jnp.maximum(conv(x, *p['conv']), 0.0)

    stack = []
    out = x
    for idx, (cp, rp) in enumerate(zip(params['down_conv'], params['down_res'])):
        out = basic(out, cp, 1 if idx == 0 else 2)
        out = res(out, rp)
        stack.append(out)
    middle = basic(out, params['mid_conv'], 2)
    out = middle
    for rp in params['mid_res']:
        out = res(out, rp)
    out = out + middle
    for rz, cv, rs in zip(params['up_resize'], params['up_conv'], params['up_res']):
        out = resize(out, rz)
        out = jnp.concatenate([out, stack.pop()], axis=1)
        out = basic(out, cv, 1)
        out = res(out, rs)
    wf, bf = params['final']
    out = conv(out, wf, bf, stride=1, pad=0)
    return x + out if use_residual else out


# ---------------------------------------------------------------------------
# Parameter initialization (PyTorch-default-like uniform init).
# ---------------------------------------------------------------------------
def _init_conv(key, cout, cin, k):
    bound = (cin * k * k) ** -0.5
    kw, kb = jax.random.split(key)
    w = jax.random.uniform(kw, (cout, cin, k, k), jnp.float32, -bound, bound)
    b = jax.random.uniform(kb, (cout,), jnp.float32, -bound, bound)
    return w, b


def _init_linear(key, cout, cin):
    bound = cin ** -0.5
    kw, kb = jax.random.split(key)
    w = jax.random.uniform(kw, (cout, cin), jnp.float32, -bound, bound)
    b = jax.random.uniform(kb, (cout,), jnp.float32, -bound, bound)
    return w, b


def _init_ca(key, c, reduction):
    hidden = max(c // reduction, 1)
    k1, k2 = jax.random.split(key)
    w1, b1 = _init_linear(k1, hidden, c)
    w2, b2 = _init_linear(k2, c, hidden)
    return (w1, b1, w2, b2)


def init_unet_params(key, in_chans, out_chans, chans, num_pool_layers,
                     num_depth_blocks, reduction):
    state = {'key': key}

    def nk():
        state['key'], sub = jax.random.split(state['key'])
        return sub

    def basic(cin, cout):
        return {'conv': _init_conv(nk(), cout, cin, 3),
                'ca': _init_ca(nk(), cout, reduction)}

    def res(c):
        return {'conv1': _init_conv(nk(), c, c, 3),
                'conv2': _init_conv(nk(), c, c, 3),
                'ca': _init_ca(nk(), c, reduction)}

    params = {'down_conv': [], 'down_res': [], 'mid_res': [],
              'up_resize': [], 'up_conv': [], 'up_res': []}
    ch = chans
    params['down_conv'].append(basic(in_chans, chans))
    params['down_res'].append(res(chans))
    for _ in range(num_pool_layers - 1):
        params['down_conv'].append(basic(ch, ch * 2))
        params['down_res'].append(res(ch * 2))
        ch *= 2
    params['mid_conv'] = basic(ch, ch)
    for _ in range(num_depth_blocks):
        params['mid_res'].append(res(ch))
    for _ in range(num_pool_layers - 1):
        params['up_resize'].append({'conv': _init_conv(nk(), ch, ch, 3)})
        params['up_conv'].append(basic(ch * 2, ch // 2))
        params['up_res'].append(res(ch // 2))
        ch //= 2
    params['up_resize'].append({'conv': _init_conv(nk(), ch, ch, 3)})
    params['up_conv'].append(basic(ch * 2, ch))
    params['up_res'].append(res(ch))
    assert ch == chans, 'Channel indexing error!'
    params['final'] = _init_conv(nk(), out_chans, ch, 1)
    return params


if __name__ == "__main__":
    key = jax.random.PRNGKey(0)
    B, H, W = 2, 16, 16
    in_chans = out_chans = 2
    chans = 8
    num_pool_layers = 2
    num_depth_blocks = 2
    reduction = 4

    kx, kp = jax.random.split(key)
    x = jax.random.normal(kx, (B, in_chans, H, W), jnp.float32)
    params = init_unet_params(kp, in_chans, out_chans, chans,
                              num_pool_layers, num_depth_blocks, reduction)

    fwd = jax.jit(unet_forward)
    ref_fwd = jax.jit(unet_reference)

    out = jax.block_until_ready(fwd(x, params))
    ref = jax.block_until_ready(ref_fwd(x, params))

    assert out.shape == (B, out_chans, H, W)
    err = jnp.max(jnp.abs(out - ref))
    assert jnp.allclose(out, ref, rtol=2e-3, atol=2e-3), f"max abs err {err}"
    print("KERNEL_OK")
</pallas_src>

<mosaic_0001>
module attributes {stable_mosaic.version = 11 : i64} {
  func.func @_conv3x3_ca_kernel(%arg0: i32, %arg1: memref<1x8x362xf32, #tpu.memory_space<vmem>>, %arg2: memref<8x72xf32, #tpu.memory_space<vmem>>, %arg3: memref<8x1xf32, #tpu.memory_space<vmem>>, %arg4: memref<1x324xf32, #tpu.memory_space<vmem>>, %arg5: memref<2x8xf32, #tpu.memory_space<vmem>>, %arg6: memref<2x1xf32, #tpu.memory_space<vmem>>, %arg7: memref<8x2xf32, #tpu.memory_space<vmem>>, %arg8: memref<8x1xf32, #tpu.memory_space<vmem>>, %arg9: memref<1x8x324xf32, #tpu.memory_space<vmem>>, %arg10: memref<72x324xf32, #tpu.memory_space<vmem>>) attributes {dimension_semantics = [#tpu.dimension_semantics<parallel>], iteration_bounds = array<i64: 2>, scalar_prefetch = 0 : i64, scratch_operands = 1 : i64, tpu.core_type = #tpu.core_type<tc>, window_params = [{transform_indices = @transform_0, window_bounds = array<i64: 1, 8, 362>}, {pipeline_mode = #tpu.pipeline_mode<synchronous>, transform_indices = @transform_1, window_bounds = array<i64: 8, 72>}, {pipeline_mode = #tpu.pipeline_mode<synchronous>, transform_indices = @transform_2, window_bounds = array<i64: 8, 1>}, {pipeline_mode = #tpu.pipeline_mode<synchronous>, transform_indices = @transform_3, window_bounds = array<i64: 1, 324>}, {pipeline_mode = #tpu.pipeline_mode<synchronous>, transform_indices = @transform_4, window_bounds = array<i64: 2, 8>}, {pipeline_mode = #tpu.pipeline_mode<synchronous>, transform_indices = @transform_5, window_bounds = array<i64: 2, 1>}, {pipeline_mode = #tpu.pipeline_mode<synchronous>, transform_indices = @transform_6, window_bounds = array<i64: 8, 2>}, {pipeline_mode = #tpu.pipeline_mode<synchronous>, transform_indices = @transform_7, window_bounds = array<i64: 8, 1>}, {transform_indices = @transform_8, window_bounds = array<i64: 1, 8, 324>}]} {
    %c0 = arith.constant 0 : index
    %c0_0 = arith.constant 0 : index
    %c0_1 = arith.constant 0 : index
    %0 = vector.load %arg1[%c0, %c0_0, %c0_1] : memref<1x8x362xf32, #tpu.memory_space<vmem>>, vector<1x8x324xf32>
    %1 = vector.shape_cast %0 : vector<1x8x324xf32> to vector<8x324xf32>
    %c0_2 = arith.constant 0 : index
    %c0_3 = arith.constant 0 : index
    %2 = vector.load %arg10[%c0_2, %c0_3] : memref<72x324xf32, #tpu.memory_space<vmem>>, vector<8x324xf32>
    tpu.vector_store %arg10[%c0_2, %c0_3], %1 {strides = array<i32>} : memref<72x324xf32, #tpu.memory_space<vmem>>, vector<8x324xf32>,
    %c0_4 = arith.constant 0 : index
    %c0_5 = arith.constant 0 : index
    %c1 = arith.constant 1 : index
    %3 = vector.load %arg1[%c0_4, %c0_5, %c1] : memref<1x8x362xf32, #tpu.memory_space<vmem>>, vector<1x8x324xf32>
    %4 = vector.shape_cast %3 : vector<1x8x324xf32> to vector<8x324xf32>
    %c8 = arith.constant 8 : index
    %c0_6 = arith.constant 0 : index
    %5 = vector.load %arg10[%c8, %c0_6] : memref<72x324xf32, #tpu.memory_space<vmem>>, vector<8x324xf32>
    tpu.vector_store %arg10[%c8, %c0_6], %4 {strides = array<i32>} : memref<72x324xf32, #tpu.memory_space<vmem>>, vector<8x324xf32>,
    %c0_7 = arith.constant 0 : index
    %c0_8 = arith.constant 0 : index
    %c2 = arith.constant 2 : index
    %6 = vector.load %arg1[%c0_7, %c0_8, %c2] : memref<1x8x362xf32, #tpu.memory_space<vmem>>, vector<1x8x324xf32>
    %7 = vector.shape_cast %6 : vector<1x8x324xf32> to vector<8x324xf32>
    %c16 = arith.constant 16 : index
    %c0_9 = arith.constant 0 : index
    %8 = vector.load %arg10[%c16, %c0_9] : memref<72x324xf32, #tpu.memory_space<vmem>>, vector<8x324xf32>
    tpu.vector_store %arg10[%c16, %c0_9], %7 {strides = array<i32>} : memref<72x324xf32, #tpu.memory_space<vmem>>, vector<8x324xf32>,
    %c0_10 = arith.constant 0 : index
    %c0_11 = arith.constant 0 : index
    %c18 = arith.constant 18 : index
    %9 = vector.load %arg1[%c0_10, %c0_11, %c18] : memref<1x8x362xf32, #tpu.memory_space<vmem>>, vector<1x8x324xf32>
    %10 = vector.shape_cast %9 : vector<1x8x324xf32> to vector<8x324xf32>
    %c24 = arith.constant 24 : index
    %c0_12 = arith.constant 0 : index
    %11 = vector.load %arg10[%c24, %c0_12] : memref<72x324xf32, #tpu.memory_space<vmem>>, vector<8x324xf32>
    tpu.vector_store %arg10[%c24, %c0_12], %10 {strides = array<i32>} : memref<72x324xf32, #tpu.memory_space<vmem>>, vector<8x324xf32>,
    %c0_13 = arith.constant 0 : index
    %c0_14 = arith.constant 0 : index
    %c19 = arith.constant 19 : index
    %12 = vector.load %arg1[%c0_13, %c0_14, %c19] : memref<1x8x362xf32, #tpu.memory_space<vmem>>, vector<1x8x324xf32>
    %13 = vector.shape_cast %12 : vector<1x8x324xf32> to vector<8x324xf32>
    %c32 = arith.constant 32 : index
    %c0_15 = arith.constant 0 : index
    %14 = vector.load %arg10[%c32, %c0_15] : memref<72x324xf32, #tpu.memory_space<vmem>>, vector<8x324xf32>
    tpu.vector_store %arg10[%c32, %c0_15], %13 {strides = array<i32>} : memref<72x324xf32, #tpu.memory_space<vmem>>, vector<8x324xf32>,
    %c0_16 = arith.constant 0 : index
    %c0_17 = arith.constant 0 : index
    %c20 = arith.constant 20 : index
    %15 = vector.load %arg1[%c0_16, %c0_17, %c20] : memref<1x8x362xf32, #tpu.memory_space<vmem>>, vector<1x8x324xf32>
    %16 = vector.shape_cast %15 : vector<1x8x324xf32> to vector<8x324xf32>
    %c40 = arith.constant 40 : index
    %c0_18 = arith.constant 0 : index
    %17 = vector.load %arg10[%c40, %c0_18] : memref<72x324xf32, #tpu.memory_space<vmem>>, vector<8x324xf32>
    tpu.vector_store %arg10[%c40, %c0_18], %16 {strides = array<i32>} : memref<72x324xf32, #tpu.memory_space<vmem>>, vector<8x324xf32>,
    %c0_19 = arith.constant 0 : index
    %c0_20 = arith.constant 0 : index
    %c36 = arith.constant 36 : index
    %18 = vector.load %arg1[%c0_19, %c0_20, %c36] : memref<1x8x362xf32, #tpu.memory_space<vmem>>, vector<1x8x324xf32>
    %19 = vector.shape_cast %18 : vector<1x8x324xf32> to vector<8x324xf32>
    %c48 = arith.constant 48 : index
    %c0_21 = arith.constant 0 : index
    %20 = vector.load %arg10[%c48, %c0_21] : memref<72x324xf32, #tpu.memory_space<vmem>>, vector<8x324xf32>
    tpu.vector_store %arg10[%c48, %c0_21], %19 {strides = array<i32>} : memref<72x324xf32, #tpu.memory_space<vmem>>, vector<8x324xf32>,
    %c0_22 = arith.constant 0 : index
    %c0_23 = arith.constant 0 : index
    %c37 = arith.constant 37 : index
    %21 = vector.load %arg1[%c0_22, %c0_23, %c37] : memref<1x8x362xf32, #tpu.memory_space<vmem>>, vector<1x8x324xf32>
    %22 = vector.shape_cast %21 : vector<1x8x324xf32> to vector<8x324xf32>
    %c56 = arith.constant 56 : index
    %c0_24 = arith.constant 0 : index
    %23 = vector.load %arg10[%c56, %c0_24] : memref<72x324xf32, #tpu.memory_space<vmem>>, vector<8x324xf32>
    tpu.vector_store %arg10[%c56, %c0_24], %22 {strides = array<i32>} : memref<72x324xf32, #tpu.memory_space<vmem>>, vector<8x324xf32>,
    %c0_25 = arith.constant 0 : index
    %c0_26 = arith.constant 0 : index
    %c38 = arith.constant 38 : index
    %24 = vector.load %arg1[%c0_25, %c0_26, %c38] : memref<1x8x362xf32, #tpu.memory_space<vmem>>, vector<1x8x324xf32>
    %25 = vector.shape_cast %24 : vector<1x8x324xf32> to vector<8x324xf32>
    %c64 = arith.constant 64 : index
    %c0_27 = arith.constant 0 : index
    %26 = vector.load %arg10[%c64, %c0_27] : memref<72x324xf32, #tpu.memory_space<vmem>>, vector<8x324xf32>
    tpu.vector_store %arg10[%c64, %c0_27], %25 {strides = array<i32>} : memref<72x324xf32, #tpu.memory_space<vmem>>, vector<8x324xf32>,
    %c0_28 = arith.constant 0 : index
    %c0_29 = arith.constant 0 : index
    %27 = vector.load %arg2[%c0_28, %c0_29] : memref<8x72xf32, #tpu.memory_space<vmem>>, vector<8x72xf32>
    %c0_30 = arith.constant 0 : index
    %c0_31 = arith.constant 0 : index
    %28 = vector.load %arg10[%c0_30, %c0_31] : memref<72x324xf32, #tpu.memory_space<vmem>>, vector<72x324xf32>
    %cst = arith.constant dense<0.000000e+00> : vector<8x324xf32>
    %29 = tpu.matmul %27, %28, %cst {dimension_numbers = #tpu.dot_dimension_numbers<[1], [0], [0], [1], [0, 0, 1, 1], [], []>} : vector<8x72xf32>, vector<72x324xf32>, vector<8x324xf32> -> vector<8x324xf32>
    %c0_32 = arith.constant 0 : index
    %c0_33 = arith.constant 0 : index
    %30 = vector.load %arg3[%c0_32, %c0_33] : memref<8x1xf32, #tpu.memory_space<vmem>>, vector<8x1xf32>
    %31 = vector.broadcast %30 : vector<8x1xf32> to vector<8x324xf32>
    %32 = arith.addf %29, %31 : vector<8x324xf32>
    %cst_34 = arith.constant 0.000000e+00 : f32
    %33 = vector.broadcast %cst_34 : f32 to vector<8x324xf32>
    %34 = arith.maximumf %32, %33 : vector<8x324xf32>
    %c0_35 = arith.constant 0 : index
    %c0_36 = arith.constant 0 : index
    %35 = vector.load %arg4[%c0_35, %c0_36] : memref<1x324xf32, #tpu.memory_space<vmem>>, vector<1x324xf32>
    %36 = vector.broadcast %35 : vector<1x324xf32> to vector<8x324xf32>
    %37 = arith.mulf %34, %36 : vector<8x324xf32>
    %cst_37 = arith.constant dense<0.000000e+00> : vector<8xf32>
    %38 = vector.multi_reduction <add>, %37, %cst_37 [1] : vector<8x324xf32> to vector<8xf32>
    %39 = vector.shape_cast %38 : vector<8xf32> to vector<8x1xf32>
    %cst_38 = arith.constant 3.906250e-03 : f32
    %40 = vector.broadcast %cst_38 : f32 to vector<8x1xf32>
    %41 = arith.mulf %39, %40 : vector<8x1xf32>
    %cst_39 = arith.constant 5.000000e-01 : f32
    %42 = vector.broadcast %cst_39 : f32 to vector<1x324xf32>
    %43 = arith.cmpf ogt, %35, %42 : vector<1x324xf32>
    %cst_40 = arith.constant 0xFF800000 : f32
    %44 = vector.shape_cast %43 : vector<1x324xi1> to vector<1x324xi1>
    %45 = vector.broadcast %44 : vector<1x324xi1> to vector<8x324xi1>
    %46 = vector.broadcast %cst_40 : f32 to vector<8x324xf32>
    %47 = arith.select %45, %34, %46 : vector<8x324xi1>, vector<8x324xf32>
    %cst_41 = arith.constant dense<0xFF800000> : vector<8xf32>
    %48 = vector.multi_reduction <maximumf>, %47, %cst_41 [1] : vector<8x324xf32> to vector<8xf32>
    %49 = vector.shape_cast %48 : vector<8xf32> to vector<8x1xf32>
    %50 = tpu.concatenate %41, %49 in 1 : vector<8x1xf32>, vector<8x1xf32> -> vector<8x2xf32>
    %c0_42 = arith.constant 0 : index
    %c0_43 = arith.constant 0 : index
    %51 = vector.load %arg5[%c0_42, %c0_43] : memref<2x8xf32, #tpu.memory_space<vmem>>, vector<2x8xf32>
    %cst_44 = arith.constant dense<0.000000e+00> : vector<2x2xf32>
    %52 = tpu.matmul %51, %50, %cst_44 {dimension_numbers = #tpu.dot_dimension_numbers<[1], [0], [0], [1], [0, 0, 1, 1], [], []>} : vector<2x8xf32>, vector<8x2xf32>, vector<2x2xf32> -> vector<2x2xf32>
    %c0_45 = arith.constant 0 : index
    %c0_46 = arith.constant 0 : index
    %53 = vector.load %arg6[%c0_45, %c0_46] : memref<2x1xf32, #tpu.memory_space<vmem>>, vector<2x1xf32>
    %54 = vector.broadcast %53 : vector<2x1xf32> to vector<2x2xf32>
    %55 = arith.addf %52, %54 : vector<2x2xf32>
    %cst_47 = arith.constant 0.000000e+00 : f32
    %56 = vector.broadcast %cst_47 : f32 to vector<2x2xf32>
    %57 = arith.maximumf %55, %56 : vector<2x2xf32>
    %c0_48 = arith.constant 0 : index
    %c0_49 = arith.constant 0 : index
    %58 = vector.load %arg7[%c0_48, %c0_49] : memref<8x2xf32, #tpu.memory_space<vmem>>, vector<8x2xf32>
    %cst_50 = arith.constant dense<0.000000e+00> : vector<8x2xf32>
    %59 = tpu.matmul %58, %57, %cst_50 {dimension_numbers = #tpu.dot_dimension_numbers<[1], [0], [0], [1], [0, 0, 1, 1], [], []>} : vector<8x2xf32>, vector<2x2xf32>, vector<8x2xf32> -> vector<8x2xf32>
    %c0_51 = arith.constant 0 : index
    %c0_52 = arith.constant 0 : index
    %60 = vector.load %arg8[%c0_51, %c0_52] : memref<8x1xf32, #tpu.memory_space<vmem>>, vector<8x1xf32>
    %61 = vector.broadcast %60 : vector<8x1xf32> to vector<8x2xf32>
    %62 = arith.addf %59, %61 : vector<8x2xf32>
    %63 = vector.extract_strided_slice %62 {offsets = [0, 0], sizes = [8, 1], strides = [1, 1]} : vector<8x2xf32> to vector<8x1xf32>
    %64 = vector.extract_strided_slice %62 {offsets = [0, 1], sizes = [8, 1], strides = [1, 1]} : vector<8x2xf32> to vector<8x1xf32>
    %65 = arith.addf %63, %64 : vector<8x1xf32>
    %66 = arith.negf %65 : vector<8x1xf32>
    %67 = math.exp %66 : vector<8x1xf32>
    %cst_53 = arith.constant 1.000000e+00 : f32
    %68 = vector.broadcast %cst_53 : f32 to vector<8x1xf32>
    %69 = arith.addf %68, %67 : vector<8x1xf32>
    %70 = arith.divf %68, %69 : vector<8x1xf32>
    %71 = vector.broadcast %70 : vector<8x1xf32> to vector<8x324xf32>
    %72 = arith.mulf %34, %71 : vector<8x324xf32>
    %c0_54 = arith.constant 0 : index
    %c0_55 = arith.constant 0 : index
    %c0_56 = arith.constant 0 : index
    %73 = vector.load %arg9[%c0_54, %c0_55, %c0_56] : memref<1x8x324xf32, #tpu.memory_space<vmem>>, vector<1x8x324xf32>
    %74 = vector.shape_cast %73 : vector<1x8x324xf32> to vector<8x324xf32>
    %75 = vector.shape_cast %72 : vector<8x324xf32> to vector<1x8x324xf32>
    tpu.vector_store %arg9[%c0_54, %c0_55, %c0_56], %75 {strides = array<i32>} : memref<1x8x324xf32, #tpu.memory_space<vmem>>, vector<1x8x324xf32>,
    return
  }
  func.func @transform_0(%arg0: i32) -> (i32, i32, i32) {
    %c0_i32 = arith.constant 0 : i32
    %c0_i32_0 = arith.constant 0 : i32
    %c0_i32_1 = arith.constant 0 : i32
    return %arg0, %c0_i32, %c0_i32_0 : i32, i32, i32
  }
  func.func @transform_1(%arg0: i32) -> (i32, i32) {
    %c0_i32 = arith.constant 0 : i32
    %c0_i32_0 = arith.constant 0 : i32
    %c0_i32_1 = arith.constant 0 : i32
    return %c0_i32, %c0_i32_0 : i32, i32
  }
  func.func @transform_2(%arg0: i32) -> (i32, i32) {
    %c0_i32 = arith.constant 0 : i32
    %c0_i32_0 = arith.constant 0 : i32
    %c0_i32_1 = arith.constant 0 : i32
    return %c0_i32, %c0_i32_0 : i32, i32
  }
  func.func @transform_3(%arg0: i32) -> (i32, i32) {
    %c0_i32 = arith.constant 0 : i32
    %c0_i32_0 = arith.constant 0 : i32
    %c0_i32_1 = arith.constant 0 : i32
    return %c0_i32, %c0_i32_0 : i32, i32
  }
  func.func @transform_4(%arg0: i32) -> (i32, i32) {
    %c0_i32 = arith.constant 0 : i32
    %c0_i32_0 = arith.constant 0 : i32
    %c0_i32_1 = arith.constant 0 : i32
    return %c0_i32, %c0_i32_0 : i32, i32
  }
  func.func @transform_5(%arg0: i32) -> (i32, i32) {
    %c0_i32 = arith.constant 0 : i32
    %c0_i32_0 = arith.constant 0 : i32
    %c0_i32_1 = arith.constant 0 : i32
    return %c0_i32, %c0_i32_0 : i32, i32
  }
  func.func @transform_6(%arg0: i32) -> (i32, i32) {
    %c0_i32 = arith.constant 0 : i32
    %c0_i32_0 = arith.constant 0 : i32
    %c0_i32_1 = arith.constant 0 : i32
    return %c0_i32, %c0_i32_0 : i32, i32
  }
  func.func @transform_7(%arg0: i32) -> (i32, i32) {
    %c0_i32 = arith.constant 0 : i32
    %c0_i32_0 = arith.constant 0 : i32
    %c0_i32_1 = arith.constant 0 : i32
    return %c0_i32, %c0_i32_0 : i32, i32
  }
  func.func @transform_8(%arg0: i32) -> (i32, i32, i32) {
    %c0_i32 = arith.constant 0 : i32
    %c0_i32_0 = arith.constant 0 : i32
    %c0_i32_1 = arith.constant 0 : i32
    return %arg0, %c0_i32, %c0_i32_0 : i32, i32, i32
  }
}

module attributes {stable_mosaic.version = 11 : i64} {
  func.func @_conv3x3_ca_kernel(%arg0: i32, %arg1: memref<1x8x362xf32, #tpu.memory_space<vmem>>, %arg2: memref<8x72xf32, #tpu.memory_space<vmem>>, %arg3: memref<8x1xf32, #tpu.memory_space<vmem>>, %arg4: memref<1x8x324xf32, #tpu.memory_space<vmem>>, %arg5: memref<72x324xf32, #tpu.memory_space<vmem>>) attributes {dimension_semantics = [#tpu.dimension_semantics<parallel>], iteration_bounds = array<i64: 2>, scalar_prefetch = 0 : i64, scratch_operands = 1 : i64, tpu.core_type = #tpu.core_type<tc>, window_params = [{transform_indices = @transform_0, window_bounds = array<i64: 1, 8, 362>}, {pipeline_mode = #tpu.pipeline_mode<synchronous>, transform_indices = @transform_1, window_bounds = array<i64: 8, 72>}, {pipeline_mode = #tpu.pipeline_mode<synchronous>, transform_indices = @transform_2, window_bounds = array<i64: 8, 1>}, {transform_indices = @transform_3, window_bounds = array<i64: 1, 8, 324>}]} {
    %c0 = arith.constant 0 : index
    %c0_0 = arith.constant 0 : index
    %c0_1 = arith.constant 0 : index
    %0 = vector.load %arg1[%c0, %c0_0, %c0_1] : memref<1x8x362xf32, #tpu.memory_space<vmem>>, vector<1x8x324xf32>
    %1 = vector.shape_cast %0 : vector<1x8x324xf32> to vector<8x324xf32>
    %c0_2 = arith.constant 0 : index
    %c0_3 = arith.constant 0 : index
    %2 = vector.load %arg5[%c0_2, %c0_3] : memref<72x324xf32, #tpu.memory_space<vmem>>, vector<8x324xf32>
    tpu.vector_store %arg5[%c0_2, %c0_3], %1 {strides = array<i32>} : memref<72x324xf32, #tpu.memory_space<vmem>>, vector<8x324xf32>,
    %c0_4 = arith.constant 0 : index
    %c0_5 = arith.constant 0 : index
    %c1 = arith.constant 1 : index
    %3 = vector.load %arg1[%c0_4, %c0_5, %c1] : memref<1x8x362xf32, #tpu.memory_space<vmem>>, vector<1x8x324xf32>
    %4 = vector.shape_cast %3 : vector<1x8x324xf32> to vector<8x324xf32>
    %c8 = arith.constant 8 : index
    %c0_6 = arith.constant 0 : index
    %5 = vector.load %arg5[%c8, %c0_6] : memref<72x324xf32, #tpu.memory_space<vmem>>, vector<8x324xf32>
    tpu.vector_store %arg5[%c8, %c0_6], %4 {strides = array<i32>} : memref<72x324xf32, #tpu.memory_space<vmem>>, vector<8x324xf32>,
    %c0_7 = arith.constant 0 : index
    %c0_8 = arith.constant 0 : index
    %c2 = arith.constant 2 : index
    %6 = vector.load %arg1[%c0_7, %c0_8, %c2] : memref<1x8x362xf32, #tpu.memory_space<vmem>>, vector<1x8x324xf32>
    %7 = vector.shape_cast %6 : vector<1x8x324xf32> to vector<8x324xf32>
    %c16 = arith.constant 16 : index
    %c0_9 = arith.constant 0 : index
    %8 = vector.load %arg5[%c16, %c0_9] : memref<72x324xf32, #tpu.memory_space<vmem>>, vector<8x324xf32>
    tpu.vector_store %arg5[%c16, %c0_9], %7 {strides = array<i32>} : memref<72x324xf32, #tpu.memory_space<vmem>>, vector<8x324xf32>,
    %c0_10 = arith.constant 0 : index
    %c0_11 = arith.constant 0 : index
    %c18 = arith.constant 18 : index
    %9 = vector.load %arg1[%c0_10, %c0_11, %c18] : memref<1x8x362xf32, #tpu.memory_space<vmem>>, vector<1x8x324xf32>
    %10 = vector.shape_cast %9 : vector<1x8x324xf32> to vector<8x324xf32>
    %c24 = arith.constant 24 : index
    %c0_12 = arith.constant 0 : index
    %11 = vector.load %arg5[%c24, %c0_12] : memref<72x324xf32, #tpu.memory_space<vmem>>, vector<8x324xf32>
    tpu.vector_store %arg5[%c24, %c0_12], %10 {strides = array<i32>} : memref<72x324xf32, #tpu.memory_space<vmem>>, vector<8x324xf32>,
    %c0_13 = arith.constant 0 : index
    %c0_14 = arith.constant 0 : index
    %c19 = arith.constant 19 : index
    %12 = vector.load %arg1[%c0_13, %c0_14, %c19] : memref<1x8x362xf32, #tpu.memory_space<vmem>>, vector<1x8x324xf32>
    %13 = vector.shape_cast %12 : vector<1x8x324xf32> to vector<8x324xf32>
    %c32 = arith.constant 32 : index
    %c0_15 = arith.constant 0 : index
    %14 = vector.load %arg5[%c32, %c0_15] : memref<72x324xf32, #tpu.memory_space<vmem>>, vector<8x324xf32>
    tpu.vector_store %arg5[%c32, %c0_15], %13 {strides = array<i32>} : memref<72x324xf32, #tpu.memory_space<vmem>>, vector<8x324xf32>,
    %c0_16 = arith.constant 0 : index
    %c0_17 = arith.constant 0 : index
    %c20 = arith.constant 20 : index
    %15 = vector.load %arg1[%c0_16, %c0_17, %c20] : memref<1x8x362xf32, #tpu.memory_space<vmem>>, vector<1x8x324xf32>
    %16 = vector.shape_cast %15 : vector<1x8x324xf32> to vector<8x324xf32>
    %c40 = arith.constant 40 : index
    %c0_18 = arith.constant 0 : index
    %17 = vector.load %arg5[%c40, %c0_18] : memref<72x324xf32, #tpu.memory_space<vmem>>, vector<8x324xf32>
    tpu.vector_store %arg5[%c40, %c0_18], %16 {strides = array<i32>} : memref<72x324xf32, #tpu.memory_space<vmem>>, vector<8x324xf32>,
    %c0_19 = arith.constant 0 : index
    %c0_20 = arith.constant 0 : index
    %c36 = arith.constant 36 : index
    %18 = vector.load %arg1[%c0_19, %c0_20, %c36] : memref<1x8x362xf32, #tpu.memory_space<vmem>>, vector<1x8x324xf32>
    %19 = vector.shape_cast %18 : vector<1x8x324xf32> to vector<8x324xf32>
    %c48 = arith.constant 48 : index
    %c0_21 = arith.constant 0 : index
    %20 = vector.load %arg5[%c48, %c0_21] : memref<72x324xf32, #tpu.memory_space<vmem>>, vector<8x324xf32>
    tpu.vector_store %arg5[%c48, %c0_21], %19 {strides = array<i32>} : memref<72x324xf32, #tpu.memory_space<vmem>>, vector<8x324xf32>,
    %c0_22 = arith.constant 0 : index
    %c0_23 = arith.constant 0 : index
    %c37 = arith.constant 37 : index
    %21 = vector.load %arg1[%c0_22, %c0_23, %c37] : memref<1x8x362xf32, #tpu.memory_space<vmem>>, vector<1x8x324xf32>
    %22 = vector.shape_cast %21 : vector<1x8x324xf32> to vector<8x324xf32>
    %c56 = arith.constant 56 : index
    %c0_24 = arith.constant 0 : index
    %23 = vector.load %arg5[%c56, %c0_24] : memref<72x324xf32, #tpu.memory_space<vmem>>, vector<8x324xf32>
    tpu.vector_store %arg5[%c56, %c0_24], %22 {strides = array<i32>} : memref<72x324xf32, #tpu.memory_space<vmem>>, vector<8x324xf32>,
    %c0_25 = arith.constant 0 : index
    %c0_26 = arith.constant 0 : index
    %c38 = arith.constant 38 : index
    %24 = vector.load %arg1[%c0_25, %c0_26, %c38] : memref<1x8x362xf32, #tpu.memory_space<vmem>>, vector<1x8x324xf32>
    %25 = vector.shape_cast %24 : vector<1x8x324xf32> to vector<8x324xf32>
    %c64 = arith.constant 64 : index
    %c0_27 = arith.constant 0 : index
    %26 = vector.load %arg5[%c64, %c0_27] : memref<72x324xf32, #tpu.memory_space<vmem>>, vector<8x324xf32>
    tpu.vector_store %arg5[%c64, %c0_27], %25 {strides = array<i32>} : memref<72x324xf32, #tpu.memory_space<vmem>>, vector<8x324xf32>,
    %c0_28 = arith.constant 0 : index
    %c0_29 = arith.constant 0 : index
    %27 = vector.load %arg2[%c0_28, %c0_29] : memref<8x72xf32, #tpu.memory_space<vmem>>, vector<8x72xf32>
    %c0_30 = arith.constant 0 : index
    %c0_31 = arith.constant 0 : index
    %28 = vector.load %arg5[%c0_30, %c0_31] : memref<72x324xf32, #tpu.memory_space<vmem>>, vector<72x324xf32>
    %cst = arith.constant dense<0.000000e+00> : vector<8x324xf32>
    %29 = tpu.matmul %27, %28, %cst {dimension_numbers = #tpu.dot_dimension_numbers<[1], [0], [0], [1], [0, 0, 1, 1], [], []>} : vector<8x72xf32>, vector<72x324xf32>, vector<8x324xf32> -> vector<8x324xf32>
    %c0_32 = arith.constant 0 : index
    %c0_33 = arith.constant 0 : index
    %30 = vector.load %arg3[%c0_32, %c0_33] : memref<8x1xf32, #tpu.memory_space<vmem>>, vector<8x1xf32>
    %31 = vector.broadcast %30 : vector<8x1xf32> to vector<8x324xf32>
    %32 = arith.addf %29, %31 : vector<8x324xf32>
    %cst_34 = arith.constant 0.000000e+00 : f32
    %33 = vector.broadcast %cst_34 : f32 to vector<8x324xf32>
    %34 = arith.maximumf %32, %33 : vector<8x324xf32>
    %c0_35 = arith.constant 0 : index
    %c0_36 = arith.constant 0 : index
    %c0_37 = arith.constant 0 : index
    %35 = vector.load %arg4[%c0_35, %c0_36, %c0_37] : memref<1x8x324xf32, #tpu.memory_space<vmem>>, vector<1x8x324xf32>
    %36 = vector.shape_cast %35 : vector<1x8x324xf32> to vector<8x324xf32>
    %37 = vector.shape_cast %34 : vector<8x324xf32> to vector<1x8x324xf32>
    tpu.vector_store %arg4[%c0_35, %c0_36, %c0_37], %37 {strides = array<i32>} : memref<1x8x324xf32, #tpu.memory_space<vmem>>, vector<1x8x324xf32>,
    return
  }
  func.func @transform_0(%arg0: i32) -> (i32, i32, i32) {
    %c0_i32 = arith.constant 0 : i32
    %c0_i32_0 = arith.constant 0 : i32
    %c0_i32_1 = arith.constant 0 : i32
    return %arg0, %c0_i32, %c0_i32_0 : i32, i32, i32
  }
  func.func @transform_1(%arg0: i32) -> (i32, i32) {
    %c0_i32 = arith.constant 0 : i32
    %c0_i32_0 = arith.constant 0 : i32
    %c0_i32_1 = arith.constant 0 : i32
    return %c0_i32, %c0_i32_0 : i32, i32
  }
  func.func @transform_2(%arg0: i32) -> (i32, i32) {
    %c0_i32 = arith.constant 0 : i32
    %c0_i32_0 = arith.constant 0 : i32
    %c0_i32_1 = arith.constant 0 : i32
    return %c0_i32, %c0_i32_0 : i32, i32
  }
  func.func @transform_3(%arg0: i32) -> (i32, i32, i32) {
    %c0_i32 = arith.constant 0 : i32
    %c0_i32_0 = arith.constant 0 : i32
    %c0_i32_1 = arith.constant 0 : i32
    return %arg0, %c0_i32, %c0_i32_0 : i32, i32, i32
  }
}

module attributes {stable_mosaic.version = 11 : i64} {
  func.func @_conv3x3_ca_kernel(%arg0: i32, %arg1: memref<1x8x362xf32, #tpu.memory_space<vmem>>, %arg2: memref<8x72xf32, #tpu.memory_space<vmem>>, %arg3: memref<8x1xf32, #tpu.memory_space<vmem>>, %arg4: memref<1x324xf32, #tpu.memory_space<vmem>>, %arg5: memref<2x8xf32, #tpu.memory_space<vmem>>, %arg6: memref<2x1xf32, #tpu.memory_space<vmem>>, %arg7: memref<8x2xf32, #tpu.memory_space<vmem>>, %arg8: memref<8x1xf32, #tpu.memory_space<vmem>>, %arg9: memref<1x8x324xf32, #tpu.memory_space<vmem>>, %arg10: memref<72x324xf32, #tpu.memory_space<vmem>>) attributes {dimension_semantics = [#tpu.dimension_semantics<parallel>], iteration_bounds = array<i64: 2>, scalar_prefetch = 0 : i64, scratch_operands = 1 : i64, tpu.core_type = #tpu.core_type<tc>, window_params = [{transform_indices = @transform_0, window_bounds = array<i64: 1, 8, 362>}, {pipeline_mode = #tpu.pipeline_mode<synchronous>, transform_indices = @transform_1, window_bounds = array<i64: 8, 72>}, {pipeline_mode = #tpu.pipeline_mode<synchronous>, transform_indices = @transform_2, window_bounds = array<i64: 8, 1>}, {pipeline_mode = #tpu.pipeline_mode<synchronous>, transform_indices = @transform_3, window_bounds = array<i64: 1, 324>}, {pipeline_mode = #tpu.pipeline_mode<synchronous>, transform_indices = @transform_4, window_bounds = array<i64: 2, 8>}, {pipeline_mode = #tpu.pipeline_mode<synchronous>, transform_indices = @transform_5, window_bounds = array<i64: 2, 1>}, {pipeline_mode = #tpu.pipeline_mode<synchronous>, transform_indices = @transform_6, window_bounds = array<i64: 8, 2>}, {pipeline_mode = #tpu.pipeline_mode<synchronous>, transform_indices = @transform_7, window_bounds = array<i64: 8, 1>}, {transform_indices = @transform_8, window_bounds = array<i64: 1, 8, 324>}]} {
    %c0 = arith.constant 0 : index
    %c0_0 = arith.constant 0 : index
    %c0_1 = arith.constant 0 : index
    %0 = vector.load %arg1[%c0, %c0_0, %c0_1] : memref<1x8x362xf32, #tpu.memory_space<vmem>>, vector<1x8x324xf32>
    %1 = vector.shape_cast %0 : vector<1x8x324xf32> to vector<8x324xf32>
    %c0_2 = arith.constant 0 : index
    %c0_3 = arith.constant 0 : index
    %2 = vector.load %arg10[%c0_2, %c0_3] : memref<72x324xf32, #tpu.memory_space<vmem>>, vector<8x324xf32>
    tpu.vector_store %arg10[%c0_2, %c0_3], %1 {strides = array<i32>} : memref<72x324xf32, #tpu.memory_space<vmem>>, vector<8x324xf32>,
    %c0_4 = arith.constant 0 : index
    %c0_5 = arith.constant 0 : index
    %c1 = arith.constant 1 : index
    %3 = vector.load %arg1[%c0_4, %c0_5, %c1] : memref<1x8x362xf32, #tpu.memory_space<vmem>>, vector<1x8x324xf32>
    %4 = vector.shape_cast %3 : vector<1x8x324xf32> to vector<8x324xf32>
    %c8 = arith.constant 8 : index
    %c0_6 = arith.constant 0 : index
    %5 = vector.load %arg10[%c8, %c0_6] : memref<72x324xf32, #tpu.memory_space<vmem>>, vector<8x324xf32>
    tpu.vector_store %arg10[%c8, %c0_6], %4 {strides = array<i32>} : memref<72x324xf32, #tpu.memory_space<vmem>>, vector<8x324xf32>,
    %c0_7 = arith.constant 0 : index
    %c0_8 = arith.constant 0 : index
    %c2 = arith.constant 2 : index
    %6 = vector.load %arg1[%c0_7, %c0_8, %c2] : memref<1x8x362xf32, #tpu.memory_space<vmem>>, vector<1x8x324xf32>
    %7 = vector.shape_cast %6 : vector<1x8x324xf32> to vector<8x324xf32>
    %c16 = arith.constant 16 : index
    %c0_9 = arith.constant 0 : index
    %8 = vector.load %arg10[%c16, %c0_9] : memref<72x324xf32, #tpu.memory_space<vmem>>, vector<8x324xf32>
    tpu.vector_store %arg10[%c16, %c0_9], %7 {strides = array<i32>} : memref<72x324xf32, #tpu.memory_space<vmem>>, vector<8x324xf32>,
    %c0_10 = arith.constant 0 : index
    %c0_11 = arith.constant 0 : index
    %c18 = arith.constant 18 : index
    %9 = vector.load %arg1[%c0_10, %c0_11, %c18] : memref<1x8x362xf32, #tpu.memory_space<vmem>>, vector<1x8x324xf32>
    %10 = vector.shape_cast %9 : vector<1x8x324xf32> to vector<8x324xf32>
    %c24 = arith.constant 24 : index
    %c0_12 = arith.constant 0 : index
    %11 = vector.load %arg10[%c24, %c0_12] : memref<72x324xf32, #tpu.memory_space<vmem>>, vector<8x324xf32>
    tpu.vector_store %arg10[%c24, %c0_12], %10 {strides = array<i32>} : memref<72x324xf32, #tpu.memory_space<vmem>>, vector<8x324xf32>,
    %c0_13 = arith.constant 0 : index
    %c0_14 = arith.constant 0 : index
    %c19 = arith.constant 19 : index
    %12 = vector.load %arg1[%c0_13, %c0_14, %c19] : memref<1x8x362xf32, #tpu.memory_space<vmem>>, vector<1x8x324xf32>
    %13 = vector.shape_cast %12 : vector<1x8x324xf32> to vector<8x324xf32>
    %c32 = arith.constant 32 : index
    %c0_15 = arith.constant 0 : index
    %14 = vector.load %arg10[%c32, %c0_15] : memref<72x324xf32, #tpu.memory_space<vmem>>, vector<8x324xf32>
    tpu.vector_store %arg10[%c32, %c0_15], %13 {strides = array<i32>} : memref<72x324xf32, #tpu.memory_space<vmem>>, vector<8x324xf32>,
    %c0_16 = arith.constant 0 : index
    %c0_17 = arith.constant 0 : index
    %c20 = arith.constant 20 : index
    %15 = vector.load %arg1[%c0_16, %c0_17, %c20] : memref<1x8x362xf32, #tpu.memory_space<vmem>>, vector<1x8x324xf32>
    %16 = vector.shape_cast %15 : vector<1x8x324xf32> to vector<8x324xf32>
    %c40 = arith.constant 40 : index
    %c0_18 = arith.constant 0 : index
    %17 = vector.load %arg10[%c40, %c0_18] : memref<72x324xf32, #tpu.memory_space<vmem>>, vector<8x324xf32>
    tpu.vector_store %arg10[%c40, %c0_18], %16 {strides = array<i32>} : memref<72x324xf32, #tpu.memory_space<vmem>>, vector<8x324xf32>,
    %c0_19 = arith.constant 0 : index
    %c0_20 = arith.constant 0 : index
    %c36 = arith.constant 36 : index
    %18 = vector.load %arg1[%c0_19, %c0_20, %c36] : memref<1x8x362xf32, #tpu.memory_space<vmem>>, vector<1x8x324xf32>
    %19 = vector.shape_cast %18 : vector<1x8x324xf32> to vector<8x324xf32>
    %c48 = arith.constant 48 : index
    %c0_21 = arith.constant 0 : index
    %20 = vector.load %arg10[%c48, %c0_21] : memref<72x324xf32, #tpu.memory_space<vmem>>, vector<8x324xf32>
    tpu.vector_store %arg10[%c48, %c0_21], %19 {strides = array<i32>} : memref<72x324xf32, #tpu.memory_space<vmem>>, vector<8x324xf32>,
    %c0_22 = arith.constant 0 : index
    %c0_23 = arith.constant 0 : index
    %c37 = arith.constant 37 : index
    %21 = vector.load %arg1[%c0_22, %c0_23, %c37] : memref<1x8x362xf32, #tpu.memory_space<vmem>>, vector<1x8x324xf32>
    %22 = vector.shape_cast %21 : vector<1x8x324xf32> to vector<8x324xf32>
    %c56 = arith.constant 56 : index
    %c0_24 = arith.constant 0 : index
    %23 = vector.load %arg10[%c56, %c0_24] : memref<72x324xf32, #tpu.memory_space<vmem>>, vector<8x324xf32>
    tpu.vector_store %arg10[%c56, %c0_24], %22 {strides = array<i32>} : memref<72x324xf32, #tpu.memory_space<vmem>>, vector<8x324xf32>,
    %c0_25 = arith.constant 0 : index
    %c0_26 = arith.constant 0 : index
    %c38 = arith.constant 38 : index
    %24 = vector.load %arg1[%c0_25, %c0_26, %c38] : memref<1x8x362xf32, #tpu.memory_space<vmem>>, vector<1x8x324xf32>
    %25 = vector.shape_cast %24 : vector<1x8x324xf32> to vector<8x324xf32>
    %c64 = arith.constant 64 : index
    %c0_27 = arith.constant 0 : index
    %26 = vector.load %arg10[%c64, %c0_27] : memref<72x324xf32, #tpu.memory_space<vmem>>, vector<8x324xf32>
    tpu.vector_store %arg10[%c64, %c0_27], %25 {strides = array<i32>} : memref<72x324xf32, #tpu.memory_space<vmem>>, vector<8x324xf32>,
    %c0_28 = arith.constant 0 : index
    %c0_29 = arith.constant 0 : index
    %27 = vector.load %arg2[%c0_28, %c0_29] : memref<8x72xf32, #tpu.memory_space<vmem>>, vector<8x72xf32>
    %c0_30 = arith.constant 0 : index
    %c0_31 = arith.constant 0 : index
    %28 = vector.load %arg10[%c0_30, %c0_31] : memref<72x324xf32, #tpu.memory_space<vmem>>, vector<72x324xf32>
    %cst = arith.constant dense<0.000000e+00> : vector<8x324xf32>
    %29 = tpu.matmul %27, %28, %cst {dimension_numbers = #tpu.dot_dimension_numbers<[1], [0], [0], [1], [0, 0, 1, 1], [], []>} : vector<8x72xf32>, vector<72x324xf32>, vector<8x324xf32> -> vector<8x324xf32>
    %c0_32 = arith.constant 0 : index
    %c0_33 = arith.constant 0 : index
    %30 = vector.load %arg3[%c0_32, %c0_33] : memref<8x1xf32, #tpu.memory_space<vmem>>, vector<8x1xf32>
    %31 = vector.broadcast %30 : vector<8x1xf32> to vector<8x324xf32>
    %32 = arith.addf %29, %31 : vector<8x324xf32>
    %c0_34 = arith.constant 0 : index
    %c0_35 = arith.constant 0 : index
    %33 = vector.load %arg4[%c0_34, %c0_35] : memref<1x324xf32, #tpu.memory_space<vmem>>, vector<1x324xf32>
    %34 = vector.broadcast %33 : vector<1x324xf32> to vector<8x324xf32>
    %35 = arith.mulf %32, %34 : vector<8x324xf32>
    %cst_36 = arith.constant dense<0.000000e+00> : vector<8xf32>
    %36 = vector.multi_reduction <add>, %35, %cst_36 [1] : vector<8x324xf32> to vector<8xf32>
    %37 = vector.shape_cast %36 : vector<8xf32> to vector<8x1xf32>
    %cst_37 = arith.constant 3.906250e-03 : f32
    %38 = vector.broadcast %cst_37 : f32 to vector<8x1xf32>
    %39 = arith.mulf %37, %38 : vector<8x1xf32>
    %cst_38 = arith.constant 5.000000e-01 : f32
    %40 = vector.broadcast %cst_38 : f32 to vector<1x324xf32>
    %41 = arith.cmpf ogt, %33, %40 : vector<1x324xf32>
    %cst_39 = arith.constant 0xFF800000 : f32
    %42 = vector.shape_cast %41 : vector<1x324xi1> to vector<1x324xi1>
    %43 = vector.broadcast %42 : vector<1x324xi1> to vector<8x324xi1>
    %44 = vector.broadcast %cst_39 : f32 to vector<8x324xf32>
    %45 = arith.select %43, %32, %44 : vector<8x324xi1>, vector<8x324xf32>
    %cst_40 = arith.constant dense<0xFF800000> : vector<8xf32>
    %46 = vector.multi_reduction <maximumf>, %45, %cst_40 [1] : vector<8x324xf32> to vector<8xf32>
    %47 = vector.shape_cast %46 : vector<8xf32> to vector<8x1xf32>
    %48 = tpu.concatenate %39, %47 in 1 : vector<8x1xf32>, vector<8x1xf32> -> vector<8x2xf32>
    %c0_41 = arith.constant 0 : index
    %c0_42 = arith.constant 0 : index
    %49 = vector.load %arg5[%c0_41, %c0_42] : memref<2x8xf32, #tpu.memory_space<vmem>>, vector<2x8xf32>
    %cst_43 = arith.constant dense<0.000000e+00> : vector<2x2xf32>
    %50 = tpu.matmul %49, %48, %cst_43 {dimension_numbers = #tpu.dot_dimension_numbers<[1], [0], [0], [1], [0, 0, 1, 1], [], []>} : vector<2x8xf32>, vector<8x2xf32>, vector<2x2xf32> -> vector<2x2xf32>
    %c0_44 = arith.constant 0 : index
    %c0_45 = arith.constant 0 : index
    %51 = vector.load %arg6[%c0_44, %c0_45] : memref<2x1xf32, #tpu.memory_space<vmem>>, vector<2x1xf32>
    %52 = vector.broadcast %51 : vector<2x1xf32> to vector<2x2xf32>
    %53 = arith.addf %50, %52 : vector<2x2xf32>
    %cst_46 = arith.constant 0.000000e+00 : f32
    %54 = vector.broadcast %cst_46 : f32 to vector<2x2xf32>
    %55 = arith.maximumf %53, %54 : vector<2x2xf32>
    %c0_47 = arith.constant 0 : index
    %c0_48 = arith.constant 0 : index
    %56 = vector.load %arg7[%c0_47, %c0_48] : memref<8x2xf32, #tpu.memory_space<vmem>>, vector<8x2xf32>
    %cst_49 = arith.constant dense<0.000000e+00> : vector<8x2xf32>
    %57 = tpu.matmul %56, %55, %cst_49 {dimension_numbers = #tpu.dot_dimension_numbers<[1], [0], [0], [1], [0, 0, 1, 1], [], []>} : vector<8x2xf32>, vector<2x2xf32>, vector<8x2xf32> -> vector<8x2xf32>
    %c0_50 = arith.constant 0 : index
    %c0_51 = arith.constant 0 : index
    %58 = vector.load %arg8[%c0_50, %c0_51] : memref<8x1xf32, #tpu.memory_space<vmem>>, vector<8x1xf32>
    %59 = vector.broadcast %58 : vector<8x1xf32> to vector<8x2xf32>
    %60 = arith.addf %57, %59 : vector<8x2xf32>
    %61 = vector.extract_strided_slice %60 {offsets = [0, 0], sizes = [8, 1], strides = [1, 1]} : vector<8x2xf32> to vector<8x1xf32>
    %62 = vector.extract_strided_slice %60 {offsets = [0, 1], sizes = [8, 1], strides = [1, 1]} : vector<8x2xf32> to vector<8x1xf32>
    %63 = arith.addf %61, %62 : vector<8x1xf32>
    %64 = arith.negf %63 : vector<8x1xf32>
    %65 = math.exp %64 : vector<8x1xf32>
    %cst_52 = arith.constant 1.000000e+00 : f32
    %66 = vector.broadcast %cst_52 : f32 to vector<8x1xf32>
    %67 = arith.addf %66, %65 : vector<8x1xf32>
    %68 = arith.divf %66, %67 : vector<8x1xf32>
    %69 = vector.broadcast %68 : vector<8x1xf32> to vector<8x324xf32>
    %70 = arith.mulf %32, %69 : vector<8x324xf32>
    %c0_53 = arith.constant 0 : index
    %c0_54 = arith.constant 0 : index
    %c0_55 = arith.constant 0 : index
    %71 = vector.load %arg9[%c0_53, %c0_54, %c0_55] : memref<1x8x324xf32, #tpu.memory_space<vmem>>, vector<1x8x324xf32>
    %72 = vector.shape_cast %71 : vector<1x8x324xf32> to vector<8x324xf32>
    %73 = vector.shape_cast %70 : vector<8x324xf32> to vector<1x8x324xf32>
    tpu.vector_store %arg9[%c0_53, %c0_54, %c0_55], %73 {strides = array<i32>} : memref<1x8x324xf32, #tpu.memory_space<vmem>>, vector<1x8x324xf32>,
    return
  }
  func.func @transform_0(%arg0: i32) -> (i32, i32, i32) {
    %c0_i32 = arith.constant 0 : i32
    %c0_i32_0 = arith.constant 0 : i32
    %c0_i32_1 = arith.constant 0 : i32
    return %arg0, %c0_i32, %c0_i32_0 : i32, i32, i32
  }
  func.func @transform_1(%arg0: i32) -> (i32, i32) {
    %c0_i32 = arith.constant 0 : i32
    %c0_i32_0 = arith.constant 0 : i32
    %c0_i32_1 = arith.constant 0 : i32
    return %c0_i32, %c0_i32_0 : i32, i32
  }
  func.func @transform_2(%arg0: i32) -> (i32, i32) {
    %c0_i32 = arith.constant 0 : i32
    %c0_i32_0 = arith.constant 0 : i32
    %c0_i32_1 = arith.constant 0 : i32
    return %c0_i32, %c0_i32_0 : i32, i32
  }
  func.func @transform_3(%arg0: i32) -> (i32, i32) {
    %c0_i32 = arith.constant 0 : i32
    %c0_i32_0 = arith.constant 0 : i32
    %c0_i32_1 = arith.constant 0 : i32
    return %c0_i32, %c0_i32_0 : i32, i32
  }
  func.func @transform_4(%arg0: i32) -> (i32, i32) {
    %c0_i32 = arith.constant 0 : i32
    %c0_i32_0 = arith.constant 0 : i32
    %c0_i32_1 = arith.constant 0 : i32
    return %c0_i32, %c0_i32_0 : i32, i32
  }
  func.func @transform_5(%arg0: i32) -> (i32, i32) {
    %c0_i32 = arith.constant 0 : i32
    %c0_i32_0 = arith.constant 0 : i32
    %c0_i32_1 = arith.constant 0 : i32
    return %c0_i32, %c0_i32_0 : i32, i32
  }
  func.func @transform_6(%arg0: i32) -> (i32, i32) {
    %c0_i32 = arith.constant 0 : i32
    %c0_i32_0 = arith.constant 0 : i32
    %c0_i32_1 = arith.constant 0 : i32
    return %c0_i32, %c0_i32_0 : i32, i32
  }
  func.func @transform_7(%arg0: i32) -> (i32, i32) {
    %c0_i32 = arith.constant 0 : i32
    %c0_i32_0 = arith.constant 0 : i32
    %c0_i32_1 = arith.constant 0 : i32
    return %c0_i32, %c0_i32_0 : i32, i32
  }
  func.func @transform_8(%arg0: i32) -> (i32, i32, i32) {
    %c0_i32 = arith.constant 0 : i32
    %c0_i32_0 = arith.constant 0 : i32
    %c0_i32_1 = arith.constant 0 : i32
    return %arg0, %c0_i32, %c0_i32_0 : i32, i32, i32
  }
}

module attributes {stable_mosaic.version = 11 : i64} {
  func.func @_conv3x3_ca_kernel(%arg0: i32, %arg1: memref<1x32x91xf32, #tpu.memory_space<vmem>>, %arg2: memref<16x72xf32, #tpu.memory_space<vmem>>, %arg3: memref<16x1xf32, #tpu.memory_space<vmem>>, %arg4: memref<1x81xf32, #tpu.memory_space<vmem>>, %arg5: memref<4x16xf32, #tpu.memory_space<vmem>>, %arg6: memref<4x1xf32, #tpu.memory_space<vmem>>, %arg7: memref<16x4xf32, #tpu.memory_space<vmem>>, %arg8: memref<16x1xf32, #tpu.memory_space<vmem>>, %arg9: memref<1x16x81xf32, #tpu.memory_space<vmem>>, %arg10: memref<72x81xf32, #tpu.memory_space<vmem>>) attributes {dimension_semantics = [#tpu.dimension_semantics<parallel>], iteration_bounds = array<i64: 2>, scalar_prefetch = 0 : i64, scratch_operands = 1 : i64, tpu.core_type = #tpu.core_type<tc>, window_params = [{transform_indices = @transform_0, window_bounds = array<i64: 1, 32, 91>}, {pipeline_mode = #tpu.pipeline_mode<synchronous>, transform_indices = @transform_1, window_bounds = array<i64: 16, 72>}, {pipeline_mode = #tpu.pipeline_mode<synchronous>, transform_indices = @transform_2, window_bounds = array<i64: 16, 1>}, {pipeline_mode = #tpu.pipeline_mode<synchronous>, transform_indices = @transform_3, window_bounds = array<i64: 1, 81>}, {pipeline_mode = #tpu.pipeline_mode<synchronous>, transform_indices = @transform_4, window_bounds = array<i64: 4, 16>}, {pipeline_mode = #tpu.pipeline_mode<synchronous>, transform_indices = @transform_5, window_bounds = array<i64: 4, 1>}, {pipeline_mode = #tpu.pipeline_mode<synchronous>, transform_indices = @transform_6, window_bounds = array<i64: 16, 4>}, {pipeline_mode = #tpu.pipeline_mode<synchronous>, transform_indices = @transform_7, window_bounds = array<i64: 16, 1>}, {transform_indices = @transform_8, window_bounds = array<i64: 1, 16, 81>}]} {
    %c0 = arith.constant 0 : index
    %c0_0 = arith.constant 0 : index
    %c0_1 = arith.constant 0 : index
    %0 = vector.load %arg1[%c0, %c0_0, %c0_1] : memref<1x32x91xf32, #tpu.memory_space<vmem>>, vector<1x8x81xf32>
    %1 = vector.shape_cast %0 : vector<1x8x81xf32> to vector<8x81xf32>
    %c0_2 = arith.constant 0 : index
    %c0_3 = arith.constant 0 : index
    %2 = vector.load %arg10[%c0_2, %c0_3] : memref<72x81xf32, #tpu.memory_space<vmem>>, vector<8x81xf32>
    tpu.vector_store %arg10[%c0_2, %c0_3], %1 {strides = array<i32>} : memref<72x81xf32, #tpu.memory_space<vmem>>, vector<8x81xf32>,
    %c0_4 = arith.constant 0 : index
    %c8 = arith.constant 8 : index
    %c0_5 = arith.constant 0 : index
    %3 = vector.load %arg1[%c0_4, %c8, %c0_5] : memref<1x32x91xf32, #tpu.memory_space<vmem>>, vector<1x8x81xf32>
    %4 = vector.shape_cast %3 : vector<1x8x81xf32> to vector<8x81xf32>
    %c8_6 = arith.constant 8 : index
    %c0_7 = arith.constant 0 : index
    %5 = vector.load %arg10[%c8_6, %c0_7] : memref<72x81xf32, #tpu.memory_space<vmem>>, vector<8x81xf32>
    tpu.vector_store %arg10[%c8_6, %c0_7], %4 {strides = array<i32>} : memref<72x81xf32, #tpu.memory_space<vmem>>, vector<8x81xf32>,
    %c0_8 = arith.constant 0 : index
    %c0_9 = arith.constant 0 : index
    %c1 = arith.constant 1 : index
    %6 = vector.load %arg1[%c0_8, %c0_9, %c1] : memref<1x32x91xf32, #tpu.memory_space<vmem>>, vector<1x8x81xf32>
    %7 = vector.shape_cast %6 : vector<1x8x81xf32> to vector<8x81xf32>
    %c16 = arith.constant 16 : index
    %c0_10 = arith.constant 0 : index
    %8 = vector.load %arg10[%c16, %c0_10] : memref<72x81xf32, #tpu.memory_space<vmem>>, vector<8x81xf32>
    tpu.vector_store %arg10[%c16, %c0_10], %7 {strides = array<i32>} : memref<72x81xf32, #tpu.memory_space<vmem>>, vector<8x81xf32>,
    %c0_11 = arith.constant 0 : index
    %c16_12 = arith.constant 16 : index
    %c0_13 = arith.constant 0 : index
    %9 = vector.load %arg1[%c0_11, %c16_12, %c0_13] : memref<1x32x91xf32, #tpu.memory_space<vmem>>, vector<1x8x81xf32>
    %10 = vector.shape_cast %9 : vector<1x8x81xf32> to vector<8x81xf32>
    %c24 = arith.constant 24 : index
    %c0_14 = arith.constant 0 : index
    %11 = vector.load %arg10[%c24, %c0_14] : memref<72x81xf32, #tpu.memory_space<vmem>>, vector<8x81xf32>
    tpu.vector_store %arg10[%c24, %c0_14], %10 {strides = array<i32>} : memref<72x81xf32, #tpu.memory_space<vmem>>, vector<8x81xf32>,
    %c0_15 = arith.constant 0 : index
    %c24_16 = arith.constant 24 : index
    %c0_17 = arith.constant 0 : index
    %12 = vector.load %arg1[%c0_15, %c24_16, %c0_17] : memref<1x32x91xf32, #tpu.memory_space<vmem>>, vector<1x8x81xf32>
    %13 = vector.shape_cast %12 : vector<1x8x81xf32> to vector<8x81xf32>
    %c32 = arith.constant 32 : index
    %c0_18 = arith.constant 0 : index
    %14 = vector.load %arg10[%c32, %c0_18] : memref<72x81xf32, #tpu.memory_space<vmem>>, vector<8x81xf32>
    tpu.vector_store %arg10[%c32, %c0_18], %13 {strides = array<i32>} : memref<72x81xf32, #tpu.memory_space<vmem>>, vector<8x81xf32>,
    %c0_19 = arith.constant 0 : index
    %c16_20 = arith.constant 16 : index
    %c1_21 = arith.constant 1 : index
    %15 = vector.load %arg1[%c0_19, %c16_20, %c1_21] : memref<1x32x91xf32, #tpu.memory_space<vmem>>, vector<1x8x81xf32>
    %16 = vector.shape_cast %15 : vector<1x8x81xf32> to vector<8x81xf32>
    %c40 = arith.constant 40 : index
    %c0_22 = arith.constant 0 : index
    %17 = vector.load %arg10[%c40, %c0_22] : memref<72x81xf32, #tpu.memory_space<vmem>>, vector<8x81xf32>
    tpu.vector_store %arg10[%c40, %c0_22], %16 {strides = array<i32>} : memref<72x81xf32, #tpu.memory_space<vmem>>, vector<8x81xf32>,
    %c0_23 = arith.constant 0 : index
    %c0_24 = arith.constant 0 : index
    %c9 = arith.constant 9 : index
    %18 = vector.load %arg1[%c0_23, %c0_24, %c9] : memref<1x32x91xf32, #tpu.memory_space<vmem>>, vector<1x8x81xf32>
    %19 = vector.shape_cast %18 : vector<1x8x81xf32> to vector<8x81xf32>
    %c48 = arith.constant 48 : index
    %c0_25 = arith.constant 0 : index
    %20 = vector.load %arg10[%c48, %c0_25] : memref<72x81xf32, #tpu.memory_space<vmem>>, vector<8x81xf32>
    tpu.vector_store %arg10[%c48, %c0_25], %19 {strides = array<i32>} : memref<72x81xf32, #tpu.memory_space<vmem>>, vector<8x81xf32>,
    %c0_26 = arith.constant 0 : index
    %c8_27 = arith.constant 8 : index
    %c9_28 = arith.constant 9 : index
    %21 = vector.load %arg1[%c0_26, %c8_27, %c9_28] : memref<1x32x91xf32, #tpu.memory_space<vmem>>, vector<1x8x81xf32>
    %22 = vector.shape_cast %21 : vector<1x8x81xf32> to vector<8x81xf32>
    %c56 = arith.constant 56 : index
    %c0_29 = arith.constant 0 : index
    %23 = vector.load %arg10[%c56, %c0_29] : memref<72x81xf32, #tpu.memory_space<vmem>>, vector<8x81xf32>
    tpu.vector_store %arg10[%c56, %c0_29], %22 {strides = array<i32>} : memref<72x81xf32, #tpu.memory_space<vmem>>, vector<8x81xf32>,
    %c0_30 = arith.constant 0 : index
    %c0_31 = arith.constant 0 : index
    %c10 = arith.constant 10 : index
    %24 = vector.load %arg1[%c0_30, %c0_31, %c10] : memref<1x32x91xf32, #tpu.memory_space<vmem>>, vector<1x8x81xf32>
    %25 = vector.shape_cast %24 : vector<1x8x81xf32> to vector<8x81xf32>
    %c64 = arith.constant 64 : index
    %c0_32 = arith.constant 0 : index
    %26 = vector.load %arg10[%c64, %c0_32] : memref<72x81xf32, #tpu.memory_space<vmem>>, vector<8x81xf32>
    tpu.vector_store %arg10[%c64, %c0_32], %25 {strides = array<i32>} : memref<72x81xf32, #tpu.memory_space<vmem>>, vector<8x81xf32>,
    %c0_33 = arith.constant 0 : index
    %c0_34 = arith.constant 0 : index
    %27 = vector.load %arg2[%c0_33, %c0_34] : memref<16x72xf32, #tpu.memory_space<vmem>>, vector<16x72xf32>
    %c0_35 = arith.constant 0 : index
    %c0_36 = arith.constant 0 : index
    %28 = vector.load %arg10[%c0_35, %c0_36] : memref<72x81xf32, #tpu.memory_space<vmem>>, vector<72x81xf32>
    %cst = arith.constant dense<0.000000e+00> : vector<16x81xf32>
    %29 = tpu.matmul %27, %28, %cst {dimension_numbers = #tpu.dot_dimension_numbers<[1], [0], [0], [1], [0, 0, 1, 1], [], []>} : vector<16x72xf32>, vector<72x81xf32>, vector<16x81xf32> -> vector<16x81xf32>
    %c0_37 = arith.constant 0 : index
    %c0_38 = arith.constant 0 : index
    %30 = vector.load %arg3[%c0_37, %c0_38] : memref<16x1xf32, #tpu.memory_space<vmem>>, vector<16x1xf32>
    %31 = vector.broadcast %30 : vector<16x1xf32> to vector<16x81xf32>
    %32 = arith.addf %29, %31 : vector<16x81xf32>
    %cst_39 = arith.constant 0.000000e+00 : f32
    %33 = vector.broadcast %cst_39 : f32 to vector<16x81xf32>
    %34 = arith.maximumf %32, %33 : vector<16x81xf32>
    %c0_40 = arith.constant 0 : index
    %c0_41 = arith.constant 0 : index
    %35 = vector.load %arg4[%c0_40, %c0_41] : memref<1x81xf32, #tpu.memory_space<vmem>>, vector<1x81xf32>
    %36 = vector.broadcast %35 : vector<1x81xf32> to vector<16x81xf32>
    %37 = arith.mulf %34, %36 : vector<16x81xf32>
    %cst_42 = arith.constant dense<0.000000e+00> : vector<16xf32>
    %38 = vector.multi_reduction <add>, %37, %cst_42 [1] : vector<16x81xf32> to vector<16xf32>
    %39 = vector.shape_cast %38 : vector<16xf32> to vector<16x1xf32>
    %cst_43 = arith.constant 1.562500e-02 : f32
    %40 = vector.broadcast %cst_43 : f32 to vector<16x1xf32>
    %41 = arith.mulf %39, %40 : vector<16x1xf32>
    %cst_44 = arith.constant 5.000000e-01 : f32
    %42 = vector.broadcast %cst_44 : f32 to vector<1x81xf32>
    %43 = arith.cmpf ogt, %35, %42 : vector<1x81xf32>
    %cst_45 = arith.constant 0xFF800000 : f32
    %44 = vector.shape_cast %43 : vector<1x81xi1> to vector<1x81xi1>
    %45 = vector.broadcast %44 : vector<1x81xi1> to vector<16x81xi1>
    %46 = vector.broadcast %cst_45 : f32 to vector<16x81xf32>
    %47 = arith.select %45, %34, %46 : vector<16x81xi1>, vector<16x81xf32>
    %cst_46 = arith.constant dense<0xFF800000> : vector<16xf32>
    %48 = vector.multi_reduction <maximumf>, %47, %cst_46 [1] : vector<16x81xf32> to vector<16xf32>
    %49 = vector.shape_cast %48 : vector<16xf32> to vector<16x1xf32>
    %50 = tpu.concatenate %41, %49 in 1 : vector<16x1xf32>, vector<16x1xf32> -> vector<16x2xf32>
    %c0_47 = arith.constant 0 : index
    %c0_48 = arith.constant 0 : index
    %51 = vector.load %arg5[%c0_47, %c0_48] : memref<4x16xf32, #tpu.memory_space<vmem>>, vector<4x16xf32>
    %cst_49 = arith.constant dense<0.000000e+00> : vector<4x2xf32>
    %52 = tpu.matmul %51, %50, %cst_49 {dimension_numbers = #tpu.dot_dimension_numbers<[1], [0], [0], [1], [0, 0, 1, 1], [], []>} : vector<4x16xf32>, vector<16x2xf32>, vector<4x2xf32> -> vector<4x2xf32>
    %c0_50 = arith.constant 0 : index
    %c0_51 = arith.constant 0 : index
    %53 = vector.load %arg6[%c0_50, %c0_51] : memref<4x1xf32, #tpu.memory_space<vmem>>, vector<4x1xf32>
    %54 = vector.broadcast %53 : vector<4x1xf32> to vector<4x2xf32>
    %55 = arith.addf %52, %54 : vector<4x2xf32>
    %cst_52 = arith.constant 0.000000e+00 : f32
    %56 = vector.broadcast %cst_52 : f32 to vector<4x2xf32>
    %57 = arith.maximumf %55, %56 : vector<4x2xf32>
    %c0_53 = arith.constant 0 : index
    %c0_54 = arith.constant 0 : index
    %58 = vector.load %arg7[%c0_53, %c0_54] : memref<16x4xf32, #tpu.memory_space<vmem>>, vector<16x4xf32>
    %cst_55 = arith.constant dense<0.000000e+00> : vector<16x2xf32>
    %59 = tpu.matmul %58, %57, %cst_55 {dimension_numbers = #tpu.dot_dimension_numbers<[1], [0], [0], [1], [0, 0, 1, 1], [], []>} : vector<16x4xf32>, vector<4x2xf32>, vector<16x2xf32> -> vector<16x2xf32>
    %c0_56 = arith.constant 0 : index
    %c0_57 = arith.constant 0 : index
    %60 = vector.load %arg8[%c0_56, %c0_57] : memref<16x1xf32, #tpu.memory_space<vmem>>, vector<16x1xf32>
    %61 = vector.broadcast %60 : vector<16x1xf32> to vector<16x2xf32>
    %62 = arith.addf %59, %61 : vector<16x2xf32>
    %63 = vector.extract_strided_slice %62 {offsets = [0, 0], sizes = [16, 1], strides = [1, 1]} : vector<16x2xf32> to vector<16x1xf32>
    %64 = vector.extract_strided_slice %62 {offsets = [0, 1], sizes = [16, 1], strides = [1, 1]} : vector<16x2xf32> to vector<16x1xf32>
    %65 = arith.addf %63, %64 : vector<16x1xf32>
    %66 = arith.negf %65 : vector<16x1xf32>
    %67 = math.exp %66 : vector<16x1xf32>
    %cst_58 = arith.constant 1.000000e+00 : f32
    %68 = vector.broadcast %cst_58 : f32 to vector<16x1xf32>
    %69 = arith.addf %68, %67 : vector<16x1xf32>
    %70 = arith.divf %68, %69 : vector<16x1xf32>
    %71 = vector.broadcast %70 : vector<16x1xf32> to vector<16x81xf32>
    %72 = arith.mulf %34, %71 : vector<16x81xf32>
    %c0_59 = arith.constant 0 : index
    %c0_60 = arith.constant 0 : index
    %c0_61 = arith.constant 0 : index
    %73 = vector.load %arg9[%c0_59, %c0_60, %c0_61] : memref<1x16x81xf32, #tpu.memory_space<vmem>>, vector<1x16x81xf32>
    %74 = vector.shape_cast %73 : vector<1x16x81xf32> to vector<16x81xf32>
    %75 = vector.shape_cast %72 : vector<16x81xf32> to vector<1x16x81xf32>
    tpu.vector_store %arg9[%c0_59, %c0_60, %c0_61], %75 {strides = array<i32>} : memref<1x16x81xf32, #tpu.memory_space<vmem>>, vector<1x16x81xf32>,
    return
  }
  func.func @transform_0(%arg0: i32) -> (i32, i32, i32) {
    %c0_i32 = arith.constant 0 : i32
    %c0_i32_0 = arith.constant 0 : i32
    %c0_i32_1 = arith.constant 0 : i32
    return %arg0, %c0_i32, %c0_i32_0 : i32, i32, i32
  }
  func.func @transform_1(%arg0: i32) -> (i32, i32) {
    %c0_i32 = arith.constant 0 : i32
    %c0_i32_0 = arith.constant 0 : i32
    %c0_i32_1 = arith.constant 0 : i32
    return %c0_i32, %c0_i32_0 : i32, i32
  }
  func.func @transform_2(%arg0: i32) -> (i32, i32) {
    %c0_i32 = arith.constant 0 : i32
    %c0_i32_0 = arith.constant 0 : i32
    %c0_i32_1 = arith.constant 0 : i32
    return %c0_i32, %c0_i32_0 : i32, i32
  }
  func.func @transform_3(%arg0: i32) -> (i32, i32) {
    %c0_i32 = arith.constant 0 : i32
    %c0_i32_0 = arith.constant 0 : i32
    %c0_i32_1 = arith.constant 0 : i32
    return %c0_i32, %c0_i32_0 : i32, i32
  }
  func.func @transform_4(%arg0: i32) -> (i32, i32) {
    %c0_i32 = arith.constant 0 : i32
    %c0_i32_0 = arith.constant 0 : i32
    %c0_i32_1 = arith.constant 0 : i32
    return %c0_i32, %c0_i32_0 : i32, i32
  }
  func.func @transform_5(%arg0: i32) -> (i32, i32) {
    %c0_i32 = arith.constant 0 : i32
    %c0_i32_0 = arith.constant 0 : i32
    %c0_i32_1 = arith.constant 0 : i32
    return %c0_i32, %c0_i32_0 : i32, i32
  }
  func.func @transform_6(%arg0: i32) -> (i32, i32) {
    %c0_i32 = arith.constant 0 : i32
    %c0_i32_0 = arith.constant 0 : i32
    %c0_i32_1 = arith.constant 0 : i32
    return %c0_i32, %c0_i32_0 : i32, i32
  }
  func.func @transform_7(%arg0: i32) -> (i32, i32) {
    %c0_i32 = arith.constant 0 : i32
    %c0_i32_0 = arith.constant 0 : i32
    %c0_i32_1 = arith.constant 0 : i32
    return %c0_i32, %c0_i32_0 : i32, i32
  }
  func.func @transform_8(%arg0: i32) -> (i32, i32, i32) {
    %c0_i32 = arith.constant 0 : i32
    %c0_i32_0 = arith.constant 0 : i32
    %c0_i32_1 = arith.constant 0 : i32
    return %arg0, %c0_i32, %c0_i32_0 : i32, i32, i32
  }
}

module attributes {stable_mosaic.version = 11 : i64} {
  func.func @_conv3x3_ca_kernel(%arg0: i32, %arg1: memref<1x16x122xf32, #tpu.memory_space<vmem>>, %arg2: memref<16x144xf32, #tpu.memory_space<vmem>>, %arg3: memref<16x1xf32, #tpu.memory_space<vmem>>, %arg4: memref<1x16x100xf32, #tpu.memory_space<vmem>>, %arg5: memref<144x100xf32, #tpu.memory_space<vmem>>) attributes {dimension_semantics = [#tpu.dimension_semantics<parallel>], iteration_bounds = array<i64: 2>, scalar_prefetch = 0 : i64, scratch_operands = 1 : i64, tpu.core_type = #tpu.core_type<tc>, window_params = [{transform_indices = @transform_0, window_bounds = array<i64: 1, 16, 122>}, {pipeline_mode = #tpu.pipeline_mode<synchronous>, transform_indices = @transform_1, window_bounds = array<i64: 16, 144>}, {pipeline_mode = #tpu.pipeline_mode<synchronous>, transform_indices = @transform_2, window_bounds = array<i64: 16, 1>}, {transform_indices = @transform_3, window_bounds = array<i64: 1, 16, 100>}]} {
    %c0 = arith.constant 0 : index
    %c0_0 = arith.constant 0 : index
    %c0_1 = arith.constant 0 : index
    %0 = vector.load %arg1[%c0, %c0_0, %c0_1] : memref<1x16x122xf32, #tpu.memory_space<vmem>>, vector<1x16x100xf32>
    %1 = vector.shape_cast %0 : vector<1x16x100xf32> to vector<16x100xf32>
    %c0_2 = arith.constant 0 : index
    %c0_3 = arith.constant 0 : index
    %2 = vector.load %arg5[%c0_2, %c0_3] : memref<144x100xf32, #tpu.memory_space<vmem>>, vector<16x100xf32>
    tpu.vector_store %arg5[%c0_2, %c0_3], %1 {strides = array<i32>} : memref<144x100xf32, #tpu.memory_space<vmem>>, vector<16x100xf32>,
    %c0_4 = arith.constant 0 : index
    %c0_5 = arith.constant 0 : index
    %c1 = arith.constant 1 : index
    %3 = vector.load %arg1[%c0_4, %c0_5, %c1] : memref<1x16x122xf32, #tpu.memory_space<vmem>>, vector<1x16x100xf32>
    %4 = vector.shape_cast %3 : vector<1x16x100xf32> to vector<16x100xf32>
    %c16 = arith.constant 16 : index
    %c0_6 = arith.constant 0 : index
    %5 = vector.load %arg5[%c16, %c0_6] : memref<144x100xf32, #tpu.memory_space<vmem>>, vector<16x100xf32>
    tpu.vector_store %arg5[%c16, %c0_6], %4 {strides = array<i32>} : memref<144x100xf32, #tpu.memory_space<vmem>>, vector<16x100xf32>,
    %c0_7 = arith.constant 0 : index
    %c0_8 = arith.constant 0 : index
    %c2 = arith.constant 2 : index
    %6 = vector.load %arg1[%c0_7, %c0_8, %c2] : memref<1x16x122xf32, #tpu.memory_space<vmem>>, vector<1x16x100xf32>
    %7 = vector.shape_cast %6 : vector<1x16x100xf32> to vector<16x100xf32>
    %c32 = arith.constant 32 : index
    %c0_9 = arith.constant 0 : index
    %8 = vector.load %arg5[%c32, %c0_9] : memref<144x100xf32, #tpu.memory_space<vmem>>, vector<16x100xf32>
    tpu.vector_store %arg5[%c32, %c0_9], %7 {strides = array<i32>} : memref<144x100xf32, #tpu.memory_space<vmem>>, vector<16x100xf32>,
    %c0_10 = arith.constant 0 : index
    %c0_11 = arith.constant 0 : index
    %c10 = arith.constant 10 : index
    %9 = vector.load %arg1[%c0_10, %c0_11, %c10] : memref<1x16x122xf32, #tpu.memory_space<vmem>>, vector<1x16x100xf32>
    %10 = vector.shape_cast %9 : vector<1x16x100xf32> to vector<16x100xf32>
    %c48 = arith.constant 48 : index
    %c0_12 = arith.constant 0 : index
    %11 = vector.load %arg5[%c48, %c0_12] : memref<144x100xf32, #tpu.memory_space<vmem>>, vector<16x100xf32>
    tpu.vector_store %arg5[%c48, %c0_12], %10 {strides = array<i32>} : memref<144x100xf32, #tpu.memory_space<vmem>>, vector<16x100xf32>,
    %c0_13 = arith.constant 0 : index
    %c0_14 = arith.constant 0 : index
    %c11 = arith.constant 11 : index
    %12 = vector.load %arg1[%c0_13, %c0_14, %c11] : memref<1x16x122xf32, #tpu.memory_space<vmem>>, vector<1x16x100xf32>
    %13 = vector.shape_cast %12 : vector<1x16x100xf32> to vector<16x100xf32>
    %c64 = arith.constant 64 : index
    %c0_15 = arith.constant 0 : index
    %14 = vector.load %arg5[%c64, %c0_15] : memref<144x100xf32, #tpu.memory_space<vmem>>, vector<16x100xf32>
    tpu.vector_store %arg5[%c64, %c0_15], %13 {strides = array<i32>} : memref<144x100xf32, #tpu.memory_space<vmem>>, vector<16x100xf32>,
    %c0_16 = arith.constant 0 : index
    %c0_17 = arith.constant 0 : index
    %c12 = arith.constant 12 : index
    %15 = vector.load %arg1[%c0_16, %c0_17, %c12] : memref<1x16x122xf32, #tpu.memory_space<vmem>>, vector<1x16x100xf32>
    %16 = vector.shape_cast %15 : vector<1x16x100xf32> to vector<16x100xf32>
    %c80 = arith.constant 80 : index
    %c0_18 = arith.constant 0 : index
    %17 = vector.load %arg5[%c80, %c0_18] : memref<144x100xf32, #tpu.memory_space<vmem>>, vector<16x100xf32>
    tpu.vector_store %arg5[%c80, %c0_18], %16 {strides = array<i32>} : memref<144x100xf32, #tpu.memory_space<vmem>>, vector<16x100xf32>,
    %c0_19 = arith.constant 0 : index
    %c0_20 = arith.constant 0 : index
    %c20 = arith.constant 20 : index
    %18 = vector.load %arg1[%c0_19, %c0_20, %c20] : memref<1x16x122xf32, #tpu.memory_space<vmem>>, vector<1x16x100xf32>
    %19 = vector.shape_cast %18 : vector<1x16x100xf32> to vector<16x100xf32>
    %c96 = arith.constant 96 : index
    %c0_21 = arith.constant 0 : index
    %20 = vector.load %arg5[%c96, %c0_21] : memref<144x100xf32, #tpu.memory_space<vmem>>, vector<16x100xf32>
    tpu.vector_store %arg5[%c96, %c0_21], %19 {strides = array<i32>} : memref<144x100xf32, #tpu.memory_space<vmem>>, vector<16x100xf32>,
    %c0_22 = arith.constant 0 : index
    %c0_23 = arith.constant 0 : index
    %c21 = arith.constant 21 : index
    %21 = vector.load %arg1[%c0_22, %c0_23, %c21] : memref<1x16x122xf32, #tpu.memory_space<vmem>>, vector<1x16x100xf32>
    %22 = vector.shape_cast %21 : vector<1x16x100xf32> to vector<16x100xf32>
    %c112 = arith.constant 112 : index
    %c0_24 = arith.constant 0 : index
    %23 = vector.load %arg5[%c112, %c0_24] : memref<144x100xf32, #tpu.memory_space<vmem>>, vector<16x100xf32>
    tpu.vector_store %arg5[%c112, %c0_24], %22 {strides = array<i32>} : memref<144x100xf32, #tpu.memory_space<vmem>>, vector<16x100xf32>,
    %c0_25 = arith.constant 0 : index
    %c0_26 = arith.constant 0 : index
    %c22 = arith.constant 22 : index
    %24 = vector.load %arg1[%c0_25, %c0_26, %c22] : memref<1x16x122xf32, #tpu.memory_space<vmem>>, vector<1x16x100xf32>
    %25 = vector.shape_cast %24 : vector<1x16x100xf32> to vector<16x100xf32>
    %c128 = arith.constant 128 : index
    %c0_27 = arith.constant 0 : index
    %26 = vector.load %arg5[%c128, %c0_27] : memref<144x100xf32, #tpu.memory_space<vmem>>, vector<16x100xf32>
    tpu.vector_store %arg5[%c128, %c0_27], %25 {strides = array<i32>} : memref<144x100xf32, #tpu.memory_space<vmem>>, vector<16x100xf32>,
    %c0_28 = arith.constant 0 : index
    %c0_29 = arith.constant 0 : index
    %27 = vector.load %arg2[%c0_28, %c0_29] : memref<16x144xf32, #tpu.memory_space<vmem>>, vector<16x144xf32>
    %c0_30 = arith.constant 0 : index
    %c0_31 = arith.constant 0 : index
    %28 = vector.load %arg5[%c0_30, %c0_31] : memref<144x100xf32, #tpu.memory_space<vmem>>, vector<144x100xf32>
    %cst = arith.constant dense<0.000000e+00> : vector<16x100xf32>
    %29 = tpu.matmul %27, %28, %cst {dimension_numbers = #tpu.dot_dimension_numbers<[1], [0], [0], [1], [0, 0, 1, 1], [], []>} : vector<16x144xf32>, vector<144x100xf32>, vector<16x100xf32> -> vector<16x100xf32>
    %c0_32 = arith.constant 0 : index
    %c0_33 = arith.constant 0 : index
    %30 = vector.load %arg3[%c0_32, %c0_33] : memref<16x1xf32, #tpu.memory_space<vmem>>, vector<16x1xf32>
    %31 = vector.broadcast %30 : vector<16x1xf32> to vector<16x100xf32>
    %32 = arith.addf %29, %31 : vector<16x100xf32>
    %cst_34 = arith.constant 0.000000e+00 : f32
    %33 = vector.broadcast %cst_34 : f32 to vector<16x100xf32>
    %34 = arith.maximumf %32, %33 : vector<16x100xf32>
    %c0_35 = arith.constant 0 : index
    %c0_36 = arith.constant 0 : index
    %c0_37 = arith.constant 0 : index
    %35 = vector.load %arg4[%c0_35, %c0_36, %c0_37] : memref<1x16x100xf32, #tpu.memory_space<vmem>>, vector<1x16x100xf32>
    %36 = vector.shape_cast %35 : vector<1x16x100xf32> to vector<16x100xf32>
    %37 = vector.shape_cast %34 : vector<16x100xf32> to vector<1x16x100xf32>
    tpu.vector_store %arg4[%c0_35, %c0_36, %c0_37], %37 {strides = array<i32>} : memref<1x16x100xf32, #tpu.memory_space<vmem>>, vector<1x16x100xf32>,
    return
  }
  func.func @transform_0(%arg0: i32) -> (i32, i32, i32) {
    %c0_i32 = arith.constant 0 : i32
    %c0_i32_0 = arith.constant 0 : i32
    %c0_i32_1 = arith.constant 0 : i32
    return %arg0, %c0_i32, %c0_i32_0 : i32, i32, i32
  }
  func.func @transform_1(%arg0: i32) -> (i32, i32) {
    %c0_i32 = arith.constant 0 : i32
    %c0_i32_0 = arith.constant 0 : i32
    %c0_i32_1 = arith.constant 0 : i32
    return %c0_i32, %c0_i32_0 : i32, i32
  }
  func.func @transform_2(%arg0: i32) -> (i32, i32) {
    %c0_i32 = arith.constant 0 : i32
    %c0_i32_0 = arith.constant 0 : i32
    %c0_i32_1 = arith.constant 0 : i32
    return %c0_i32, %c0_i32_0 : i32, i32
  }
  func.func @transform_3(%arg0: i32) -> (i32, i32, i32) {
    %c0_i32 = arith.constant 0 : i32
    %c0_i32_0 = arith.constant 0 : i32
    %c0_i32_1 = arith.constant 0 : i32
    return %arg0, %c0_i32, %c0_i32_0 : i32, i32, i32
  }
}

module attributes {stable_mosaic.version = 11 : i64} {
  func.func @_conv3x3_ca_kernel(%arg0: i32, %arg1: memref<1x16x122xf32, #tpu.memory_space<vmem>>, %arg2: memref<16x144xf32, #tpu.memory_space<vmem>>, %arg3: memref<16x1xf32, #tpu.memory_space<vmem>>, %arg4: memref<1x100xf32, #tpu.memory_space<vmem>>, %arg5: memref<4x16xf32, #tpu.memory_space<vmem>>, %arg6: memref<4x1xf32, #tpu.memory_space<vmem>>, %arg7: memref<16x4xf32, #tpu.memory_space<vmem>>, %arg8: memref<16x1xf32, #tpu.memory_space<vmem>>, %arg9: memref<1x16x100xf32, #tpu.memory_space<vmem>>, %arg10: memref<144x100xf32, #tpu.memory_space<vmem>>) attributes {dimension_semantics = [#tpu.dimension_semantics<parallel>], iteration_bounds = array<i64: 2>, scalar_prefetch = 0 : i64, scratch_operands = 1 : i64, tpu.core_type = #tpu.core_type<tc>, window_params = [{transform_indices = @transform_0, window_bounds = array<i64: 1, 16, 122>}, {pipeline_mode = #tpu.pipeline_mode<synchronous>, transform_indices = @transform_1, window_bounds = array<i64: 16, 144>}, {pipeline_mode = #tpu.pipeline_mode<synchronous>, transform_indices = @transform_2, window_bounds = array<i64: 16, 1>}, {pipeline_mode = #tpu.pipeline_mode<synchronous>, transform_indices = @transform_3, window_bounds = array<i64: 1, 100>}, {pipeline_mode = #tpu.pipeline_mode<synchronous>, transform_indices = @transform_4, window_bounds = array<i64: 4, 16>}, {pipeline_mode = #tpu.pipeline_mode<synchronous>, transform_indices = @transform_5, window_bounds = array<i64: 4, 1>}, {pipeline_mode = #tpu.pipeline_mode<synchronous>, transform_indices = @transform_6, window_bounds = array<i64: 16, 4>}, {pipeline_mode = #tpu.pipeline_mode<synchronous>, transform_indices = @transform_7, window_bounds = array<i64: 16, 1>}, {transform_indices = @transform_8, window_bounds = array<i64: 1, 16, 100>}]} {
    %c0 = arith.constant 0 : index
    %c0_0 = arith.constant 0 : index
    %c0_1 = arith.constant 0 : index
    %0 = vector.load %arg1[%c0, %c0_0, %c0_1] : memref<1x16x122xf32, #tpu.memory_space<vmem>>, vector<1x16x100xf32>
    %1 = vector.shape_cast %0 : vector<1x16x100xf32> to vector<16x100xf32>
    %c0_2 = arith.constant 0 : index
    %c0_3 = arith.constant 0 : index
    %2 = vector.load %arg10[%c0_2, %c0_3] : memref<144x100xf32, #tpu.memory_space<vmem>>, vector<16x100xf32>
    tpu.vector_store %arg10[%c0_2, %c0_3], %1 {strides = array<i32>} : memref<144x100xf32, #tpu.memory_space<vmem>>, vector<16x100xf32>,
    %c0_4 = arith.constant 0 : index
    %c0_5 = arith.constant 0 : index
    %c1 = arith.constant 1 : index
    %3 = vector.load %arg1[%c0_4, %c0_5, %c1] : memref<1x16x122xf32, #tpu.memory_space<vmem>>, vector<1x16x100xf32>
    %4 = vector.shape_cast %3 : vector<1x16x100xf32> to vector<16x100xf32>
    %c16 = arith.constant 16 : index
    %c0_6 = arith.constant 0 : index
    %5 = vector.load %arg10[%c16, %c0_6] : memref<144x100xf32, #tpu.memory_space<vmem>>, vector<16x100xf32>
    tpu.vector_store %arg10[%c16, %c0_6], %4 {strides = array<i32>} : memref<144x100xf32, #tpu.memory_space<vmem>>, vector<16x100xf32>,
    %c0_7 = arith.constant 0 : index
    %c0_8 = arith.constant 0 : index
    %c2 = arith.constant 2 : index
    %6 = vector.load %arg1[%c0_7, %c0_8, %c2] : memref<1x16x122xf32, #tpu.memory_space<vmem>>, vector<1x16x100xf32>
    %7 = vector.shape_cast %6 : vector<1x16x100xf32> to vector<16x100xf32>
    %c32 = arith.constant 32 : index
    %c0_9 = arith.constant 0 : index
    %8 = vector.load %arg10[%c32, %c0_9] : memref<144x100xf32, #tpu.memory_space<vmem>>, vector<16x100xf32>
    tpu.vector_store %arg10[%c32, %c0_9], %7 {strides = array<i32>} : memref<144x100xf32, #tpu.memory_space<vmem>>, vector<16x100xf32>,
    %c0_10 = arith.constant 0 : index
    %c0_11 = arith.constant 0 : index
    %c10 = arith.constant 10 : index
    %9 = vector.load %arg1[%c0_10, %c0_11, %c10] : memref<1x16x122xf32, #tpu.memory_space<vmem>>, vector<1x16x100xf32>
    %10 = vector.shape_cast %9 : vector<1x16x100xf32> to vector<16x100xf32>
    %c48 = arith.constant 48 : index
    %c0_12 = arith.constant 0 : index
    %11 = vector.load %arg10[%c48, %c0_12] : memref<144x100xf32, #tpu.memory_space<vmem>>, vector<16x100xf32>
    tpu.vector_store %arg10[%c48, %c0_12], %10 {strides = array<i32>} : memref<144x100xf32, #tpu.memory_space<vmem>>, vector<16x100xf32>,
    %c0_13 = arith.constant 0 : index
    %c0_14 = arith.constant 0 : index
    %c11 = arith.constant 11 : index
    %12 = vector.load %arg1[%c0_13, %c0_14, %c11] : memref<1x16x122xf32, #tpu.memory_space<vmem>>, vector<1x16x100xf32>
    %13 = vector.shape_cast %12 : vector<1x16x100xf32> to vector<16x100xf32>
    %c64 = arith.constant 64 : index
    %c0_15 = arith.constant 0 : index
    %14 = vector.load %arg10[%c64, %c0_15] : memref<144x100xf32, #tpu.memory_space<vmem>>, vector<16x100xf32>
    tpu.vector_store %arg10[%c64, %c0_15], %13 {strides = array<i32>} : memref<144x100xf32, #tpu.memory_space<vmem>>, vector<16x100xf32>,
    %c0_16 = arith.constant 0 : index
    %c0_17 = arith.constant 0 : index
    %c12 = arith.constant 12 : index
    %15 = vector.load %arg1[%c0_16, %c0_17, %c12] : memref<1x16x122xf32, #tpu.memory_space<vmem>>, vector<1x16x100xf32>
    %16 = vector.shape_cast %15 : vector<1x16x100xf32> to vector<16x100xf32>
    %c80 = arith.constant 80 : index
    %c0_18 = arith.constant 0 : index
    %17 = vector.load %arg10[%c80, %c0_18] : memref<144x100xf32, #tpu.memory_space<vmem>>, vector<16x100xf32>
    tpu.vector_store %arg10[%c80, %c0_18], %16 {strides = array<i32>} : memref<144x100xf32, #tpu.memory_space<vmem>>, vector<16x100xf32>,
    %c0_19 = arith.constant 0 : index
    %c0_20 = arith.constant 0 : index
    %c20 = arith.constant 20 : index
    %18 = vector.load %arg1[%c0_19, %c0_20, %c20] : memref<1x16x122xf32, #tpu.memory_space<vmem>>, vector<1x16x100xf32>
    %19 = vector.shape_cast %18 : vector<1x16x100xf32> to vector<16x100xf32>
    %c96 = arith.constant 96 : index
    %c0_21 = arith.constant 0 : index
    %20 = vector.load %arg10[%c96, %c0_21] : memref<144x100xf32, #tpu.memory_space<vmem>>, vector<16x100xf32>
    tpu.vector_store %arg10[%c96, %c0_21], %19 {strides = array<i32>} : memref<144x100xf32, #tpu.memory_space<vmem>>, vector<16x100xf32>,
    %c0_22 = arith.constant 0 : index
    %c0_23 = arith.constant 0 : index
    %c21 = arith.constant 21 : index
    %21 = vector.load %arg1[%c0_22, %c0_23, %c21] : memref<1x16x122xf32, #tpu.memory_space<vmem>>, vector<1x16x100xf32>
    %22 = vector.shape_cast %21 : vector<1x16x100xf32> to vector<16x100xf32>
    %c112 = arith.constant 112 : index
    %c0_24 = arith.constant 0 : index
    %23 = vector.load %arg10[%c112, %c0_24] : memref<144x100xf32, #tpu.memory_space<vmem>>, vector<16x100xf32>
    tpu.vector_store %arg10[%c112, %c0_24], %22 {strides = array<i32>} : memref<144x100xf32, #tpu.memory_space<vmem>>, vector<16x100xf32>,
    %c0_25 = arith.constant 0 : index
    %c0_26 = arith.constant 0 : index
    %c22 = arith.constant 22 : index
    %24 = vector.load %arg1[%c0_25, %c0_26, %c22] : memref<1x16x122xf32, #tpu.memory_space<vmem>>, vector<1x16x100xf32>
    %25 = vector.shape_cast %24 : vector<1x16x100xf32> to vector<16x100xf32>
    %c128 = arith.constant 128 : index
    %c0_27 = arith.constant 0 : index
    %26 = vector.load %arg10[%c128, %c0_27] : memref<144x100xf32, #tpu.memory_space<vmem>>, vector<16x100xf32>
    tpu.vector_store %arg10[%c128, %c0_27], %25 {strides = array<i32>} : memref<144x100xf32, #tpu.memory_space<vmem>>, vector<16x100xf32>,
    %c0_28 = arith.constant 0 : index
    %c0_29 = arith.constant 0 : index
    %27 = vector.load %arg2[%c0_28, %c0_29] : memref<16x144xf32, #tpu.memory_space<vmem>>, vector<16x144xf32>
    %c0_30 = arith.constant 0 : index
    %c0_31 = arith.constant 0 : index
    %28 = vector.load %arg10[%c0_30, %c0_31] : memref<144x100xf32, #tpu.memory_space<vmem>>, vector<144x100xf32>
    %cst = arith.constant dense<0.000000e+00> : vector<16x100xf32>
    %29 = tpu.matmul %27, %28, %cst {dimension_numbers = #tpu.dot_dimension_numbers<[1], [0], [0], [1], [0, 0, 1, 1], [], []>} : vector<16x144xf32>, vector<144x100xf32>, vector<16x100xf32> -> vector<16x100xf32>
    %c0_32 = arith.constant 0 : index
    %c0_33 = arith.constant 0 : index
    %30 = vector.load %arg3[%c0_32, %c0_33] : memref<16x1xf32, #tpu.memory_space<vmem>>, vector<16x1xf32>
    %31 = vector.broadcast %30 : vector<16x1xf32> to vector<16x100xf32>
    %32 = arith.addf %29, %31 : vector<16x100xf32>
    %c0_34 = arith.constant 0 : index
    %c0_35 = arith.constant 0 : index
    %33 = vector.load %arg4[%c0_34, %c0_35] : memref<1x100xf32, #tpu.memory_space<vmem>>, vector<1x100xf32>
    %34 = vector.broadcast %33 : vector<1x100xf32> to vector<16x100xf32>
    %35 = arith.mulf %32, %34 : vector<16x100xf32>
    %cst_36 = arith.constant dense<0.000000e+00> : vector<16xf32>
    %36 = vector.multi_reduction <add>, %35, %cst_36 [1] : vector<16x100xf32> to vector<16xf32>
    %37 = vector.shape_cast %36 : vector<16xf32> to vector<16x1xf32>
    %cst_37 = arith.constant 1.562500e-02 : f32
    %38 = vector.broadcast %cst_37 : f32 to vector<16x1xf32>
    %39 = arith.mulf %37, %38 : vector<16x1xf32>
    %cst_38 = arith.constant 5.000000e-01 : f32
    %40 = vector.broadcast %cst_38 : f32 to vector<1x100xf32>
    %41 = arith.cmpf ogt, %33, %40 : vector<1x100xf32>
    %cst_39 = arith.constant 0xFF800000 : f32
    %42 = vector.shape_cast %41 : vector<1x100xi1> to vector<1x100xi1>
    %43 = vector.broadcast %42 : vector<1x100xi1> to vector<16x100xi1>
    %44 = vector.broadcast %cst_39 : f32 to vector<16x100xf32>
    %45 = arith.select %43, %32, %44 : vector<16x100xi1>, vector<16x100xf32>
    %cst_40 = arith.constant dense<0xFF800000> : vector<16xf32>
    %46 = vector.multi_reduction <maximumf>, %45, %cst_40 [1] : vector<16x100xf32> to vector<16xf32>
    %47 = vector.shape_cast %46 : vector<16xf32> to vector<16x1xf32>
    %48 = tpu.concatenate %39, %47 in 1 : vector<16x1xf32>, vector<16x1xf32> -> vector<16x2xf32>
    %c0_41 = arith.constant 0 : index
    %c0_42 = arith.constant 0 : index
    %49 = vector.load %arg5[%c0_41, %c0_42] : memref<4x16xf32, #tpu.memory_space<vmem>>, vector<4x16xf32>
    %cst_43 = arith.constant dense<0.000000e+00> : vector<4x2xf32>
    %50 = tpu.matmul %49, %48, %cst_43 {dimension_numbers = #tpu.dot_dimension_numbers<[1], [0], [0], [1], [0, 0, 1, 1], [], []>} : vector<4x16xf32>, vector<16x2xf32>, vector<4x2xf32> -> vector<4x2xf32>
    %c0_44 = arith.constant 0 : index
    %c0_45 = arith.constant 0 : index
    %51 = vector.load %arg6[%c0_44, %c0_45] : memref<4x1xf32, #tpu.memory_space<vmem>>, vector<4x1xf32>
    %52 = vector.broadcast %51 : vector<4x1xf32> to vector<4x2xf32>
    %53 = arith.addf %50, %52 : vector<4x2xf32>
    %cst_46 = arith.constant 0.000000e+00 : f32
    %54 = vector.broadcast %cst_46 : f32 to vector<4x2xf32>
    %55 = arith.maximumf %53, %54 : vector<4x2xf32>
    %c0_47 = arith.constant 0 : index
    %c0_48 = arith.constant 0 : index
    %56 = vector.load %arg7[%c0_47, %c0_48] : memref<16x4xf32, #tpu.memory_space<vmem>>, vector<16x4xf32>
    %cst_49 = arith.constant dense<0.000000e+00> : vector<16x2xf32>
    %57 = tpu.matmul %56, %55, %cst_49 {dimension_numbers = #tpu.dot_dimension_numbers<[1], [0], [0], [1], [0, 0, 1, 1], [], []>} : vector<16x4xf32>, vector<4x2xf32>, vector<16x2xf32> -> vector<16x2xf32>
    %c0_50 = arith.constant 0 : index
    %c0_51 = arith.constant 0 : index
    %58 = vector.load %arg8[%c0_50, %c0_51] : memref<16x1xf32, #tpu.memory_space<vmem>>, vector<16x1xf32>
    %59 = vector.broadcast %58 : vector<16x1xf32> to vector<16x2xf32>
    %60 = arith.addf %57, %59 : vector<16x2xf32>
    %61 = vector.extract_strided_slice %60 {offsets = [0, 0], sizes = [16, 1], strides = [1, 1]} : vector<16x2xf32> to vector<16x1xf32>
    %62 = vector.extract_strided_slice %60 {offsets = [0, 1], sizes = [16, 1], strides = [1, 1]} : vector<16x2xf32> to vector<16x1xf32>
    %63 = arith.addf %61, %62 : vector<16x1xf32>
    %64 = arith.negf %63 : vector<16x1xf32>
    %65 = math.exp %64 : vector<16x1xf32>
    %cst_52 = arith.constant 1.000000e+00 : f32
    %66 = vector.broadcast %cst_52 : f32 to vector<16x1xf32>
    %67 = arith.addf %66, %65 : vector<16x1xf32>
    %68 = arith.divf %66, %67 : vector<16x1xf32>
    %69 = vector.broadcast %68 : vector<16x1xf32> to vector<16x100xf32>
    %70 = arith.mulf %32, %69 : vector<16x100xf32>
    %c0_53 = arith.constant 0 : index
    %c0_54 = arith.constant 0 : index
    %c0_55 = arith.constant 0 : index
    %71 = vector.load %arg9[%c0_53, %c0_54, %c0_55] : memref<1x16x100xf32, #tpu.memory_space<vmem>>, vector<1x16x100xf32>
    %72 = vector.shape_cast %71 : vector<1x16x100xf32> to vector<16x100xf32>
    %73 = vector.shape_cast %70 : vector<16x100xf32> to vector<1x16x100xf32>
    tpu.vector_store %arg9[%c0_53, %c0_54, %c0_55], %73 {strides = array<i32>} : memref<1x16x100xf32, #tpu.memory_space<vmem>>, vector<1x16x100xf32>,
    return
  }
  func.func @transform_0(%arg0: i32) -> (i32, i32, i32) {
    %c0_i32 = arith.constant 0 : i32
    %c0_i32_0 = arith.constant 0 : i32
    %c0_i32_1 = arith.constant 0 : i32
    return %arg0, %c0_i32, %c0_i32_0 : i32, i32, i32
  }
  func.func @transform_1(%arg0: i32) -> (i32, i32) {
    %c0_i32 = arith.constant 0 : i32
    %c0_i32_0 = arith.constant 0 : i32
    %c0_i32_1 = arith.constant 0 : i32
    return %c0_i32, %c0_i32_0 : i32, i32
  }
  func.func @transform_2(%arg0: i32) -> (i32, i32) {
    %c0_i32 = arith.constant 0 : i32
    %c0_i32_0 = arith.constant 0 : i32
    %c0_i32_1 = arith.constant 0 : i32
    return %c0_i32, %c0_i32_0 : i32, i32
  }
  func.func @transform_3(%arg0: i32) -> (i32, i32) {
    %c0_i32 = arith.constant 0 : i32
    %c0_i32_0 = arith.constant 0 : i32
    %c0_i32_1 = arith.constant 0 : i32
    return %c0_i32, %c0_i32_0 : i32, i32
  }
  func.func @transform_4(%arg0: i32) -> (i32, i32) {
    %c0_i32 = arith.constant 0 : i32
    %c0_i32_0 = arith.constant 0 : i32
    %c0_i32_1 = arith.constant 0 : i32
    return %c0_i32, %c0_i32_0 : i32, i32
  }
  func.func @transform_5(%arg0: i32) -> (i32, i32) {
    %c0_i32 = arith.constant 0 : i32
    %c0_i32_0 = arith.constant 0 : i32
    %c0_i32_1 = arith.constant 0 : i32
    return %c0_i32, %c0_i32_0 : i32, i32
  }
  func.func @transform_6(%arg0: i32) -> (i32, i32) {
    %c0_i32 = arith.constant 0 : i32
    %c0_i32_0 = arith.constant 0 : i32
    %c0_i32_1 = arith.constant 0 : i32
    return %c0_i32, %c0_i32_0 : i32, i32
  }
  func.func @transform_7(%arg0: i32) -> (i32, i32) {
    %c0_i32 = arith.constant 0 : i32
    %c0_i32_0 = arith.constant 0 : i32
    %c0_i32_1 = arith.constant 0 : i32
    return %c0_i32, %c0_i32_0 : i32, i32
  }
  func.func @transform_8(%arg0: i32) -> (i32, i32, i32) {
    %c0_i32 = arith.constant 0 : i32
    %c0_i32_0 = arith.constant 0 : i32
    %c0_i32_1 = arith.constant 0 : i32
    return %arg0, %c0_i32, %c0_i32_0 : i32, i32, i32
  }
}

module attributes {stable_mosaic.version = 11 : i64} {
  func.func @_conv3x3_ca_kernel(%arg0: i32, %arg1: memref<1x64x31xf32, #tpu.memory_space<vmem>>, %arg2: memref<16x144xf32, #tpu.memory_space<vmem>>, %arg3: memref<16x1xf32, #tpu.memory_space<vmem>>, %arg4: memref<1x25xf32, #tpu.memory_space<vmem>>, %arg5: memref<4x16xf32, #tpu.memory_space<vmem>>, %arg6: memref<4x1xf32, #tpu.memory_space<vmem>>, %arg7: memref<16x4xf32, #tpu.memory_space<vmem>>, %arg8: memref<16x1xf32, #tpu.memory_space<vmem>>, %arg9: memref<1x16x25xf32, #tpu.memory_space<vmem>>, %arg10: memref<144x25xf32, #tpu.memory_space<vmem>>) attributes {dimension_semantics = [#tpu.dimension_semantics<parallel>], iteration_bounds = array<i64: 2>, scalar_prefetch = 0 : i64, scratch_operands = 1 : i64, tpu.core_type = #tpu.core_type<tc>, window_params = [{transform_indices = @transform_0, window_bounds = array<i64: 1, 64, 31>}, {pipeline_mode = #tpu.pipeline_mode<synchronous>, transform_indices = @transform_1, window_bounds = array<i64: 16, 144>}, {pipeline_mode = #tpu.pipeline_mode<synchronous>, transform_indices = @transform_2, window_bounds = array<i64: 16, 1>}, {pipeline_mode = #tpu.pipeline_mode<synchronous>, transform_indices = @transform_3, window_bounds = array<i64: 1, 25>}, {pipeline_mode = #tpu.pipeline_mode<synchronous>, transform_indices = @transform_4, window_bounds = array<i64: 4, 16>}, {pipeline_mode = #tpu.pipeline_mode<synchronous>, transform_indices = @transform_5, window_bounds = array<i64: 4, 1>}, {pipeline_mode = #tpu.pipeline_mode<synchronous>, transform_indices = @transform_6, window_bounds = array<i64: 16, 4>}, {pipeline_mode = #tpu.pipeline_mode<synchronous>, transform_indices = @transform_7, window_bounds = array<i64: 16, 1>}, {transform_indices = @transform_8, window_bounds = array<i64: 1, 16, 25>}]} {
    %c0 = arith.constant 0 : index
    %c0_0 = arith.constant 0 : index
    %c0_1 = arith.constant 0 : index
    %0 = vector.load %arg1[%c0, %c0_0, %c0_1] : memref<1x64x31xf32, #tpu.memory_space<vmem>>, vector<1x16x25xf32>
    %1 = vector.shape_cast %0 : vector<1x16x25xf32> to vector<16x25xf32>
    %c0_2 = arith.constant 0 : index
    %c0_3 = arith.constant 0 : index
    %2 = vector.load %arg10[%c0_2, %c0_3] : memref<144x25xf32, #tpu.memory_space<vmem>>, vector<16x25xf32>
    tpu.vector_store %arg10[%c0_2, %c0_3], %1 {strides = array<i32>} : memref<144x25xf32, #tpu.memory_space<vmem>>, vector<16x25xf32>,
    %c0_4 = arith.constant 0 : index
    %c16 = arith.constant 16 : index
    %c0_5 = arith.constant 0 : index
    %3 = vector.load %arg1[%c0_4, %c16, %c0_5] : memref<1x64x31xf32, #tpu.memory_space<vmem>>, vector<1x16x25xf32>
    %4 = vector.shape_cast %3 : vector<1x16x25xf32> to vector<16x25xf32>
    %c16_6 = arith.constant 16 : index
    %c0_7 = arith.constant 0 : index
    %5 = vector.load %arg10[%c16_6, %c0_7] : memref<144x25xf32, #tpu.memory_space<vmem>>, vector<16x25xf32>
    tpu.vector_store %arg10[%c16_6, %c0_7], %4 {strides = array<i32>} : memref<144x25xf32, #tpu.memory_space<vmem>>, vector<16x25xf32>,
    %c0_8 = arith.constant 0 : index
    %c0_9 = arith.constant 0 : index
    %c1 = arith.constant 1 : index
    %6 = vector.load %arg1[%c0_8, %c0_9, %c1] : memref<1x64x31xf32, #tpu.memory_space<vmem>>, vector<1x16x25xf32>
    %7 = vector.shape_cast %6 : vector<1x16x25xf32> to vector<16x25xf32>
    %c32 = arith.constant 32 : index
    %c0_10 = arith.constant 0 : index
    %8 = vector.load %arg10[%c32, %c0_10] : memref<144x25xf32, #tpu.memory_space<vmem>>, vector<16x25xf32>
    tpu.vector_store %arg10[%c32, %c0_10], %7 {strides = array<i32>} : memref<144x25xf32, #tpu.memory_space<vmem>>, vector<16x25xf32>,
    %c0_11 = arith.constant 0 : index
    %c32_12 = arith.constant 32 : index
    %c0_13 = arith.constant 0 : index
    %9 = vector.load %arg1[%c0_11, %c32_12, %c0_13] : memref<1x64x31xf32, #tpu.memory_space<vmem>>, vector<1x16x25xf32>
    %10 = vector.shape_cast %9 : vector<1x16x25xf32> to vector<16x25xf32>
    %c48 = arith.constant 48 : index
    %c0_14 = arith.constant 0 : index
    %11 = vector.load %arg10[%c48, %c0_14] : memref<144x25xf32, #tpu.memory_space<vmem>>, vector<16x25xf32>
    tpu.vector_store %arg10[%c48, %c0_14], %10 {strides = array<i32>} : memref<144x25xf32, #tpu.memory_space<vmem>>, vector<16x25xf32>,
    %c0_15 = arith.constant 0 : index
    %c48_16 = arith.constant 48 : index
    %c0_17 = arith.constant 0 : index
    %12 = vector.load %arg1[%c0_15, %c48_16, %c0_17] : memref<1x64x31xf32, #tpu.memory_space<vmem>>, vector<1x16x25xf32>
    %13 = vector.shape_cast %12 : vector<1x16x25xf32> to vector<16x25xf32>
    %c64 = arith.constant 64 : index
    %c0_18 = arith.constant 0 : index
    %14 = vector.load %arg10[%c64, %c0_18] : memref<144x25xf32, #tpu.memory_space<vmem>>, vector<16x25xf32>
    tpu.vector_store %arg10[%c64, %c0_18], %13 {strides = array<i32>} : memref<144x25xf32, #tpu.memory_space<vmem>>, vector<16x25xf32>,
    %c0_19 = arith.constant 0 : index
    %c32_20 = arith.constant 32 : index
    %c1_21 = arith.constant 1 : index
    %15 = vector.load %arg1[%c0_19, %c32_20, %c1_21] : memref<1x64x31xf32, #tpu.memory_space<vmem>>, vector<1x16x25xf32>
    %16 = vector.shape_cast %15 : vector<1x16x25xf32> to vector<16x25xf32>
    %c80 = arith.constant 80 : index
    %c0_22 = arith.constant 0 : index
    %17 = vector.load %arg10[%c80, %c0_22] : memref<144x25xf32, #tpu.memory_space<vmem>>, vector<16x25xf32>
    tpu.vector_store %arg10[%c80, %c0_22], %16 {strides = array<i32>} : memref<144x25xf32, #tpu.memory_space<vmem>>, vector<16x25xf32>,
    %c0_23 = arith.constant 0 : index
    %c0_24 = arith.constant 0 : index
    %c5 = arith.constant 5 : index
    %18 = vector.load %arg1[%c0_23, %c0_24, %c5] : memref<1x64x31xf32, #tpu.memory_space<vmem>>, vector<1x16x25xf32>
    %19 = vector.shape_cast %18 : vector<1x16x25xf32> to vector<16x25xf32>
    %c96 = arith.constant 96 : index
    %c0_25 = arith.constant 0 : index
    %20 = vector.load %arg10[%c96, %c0_25] : memref<144x25xf32, #tpu.memory_space<vmem>>, vector<16x25xf32>
    tpu.vector_store %arg10[%c96, %c0_25], %19 {strides = array<i32>} : memref<144x25xf32, #tpu.memory_space<vmem>>, vector<16x25xf32>,
    %c0_26 = arith.constant 0 : index
    %c16_27 = arith.constant 16 : index
    %c5_28 = arith.constant 5 : index
    %21 = vector.load %arg1[%c0_26, %c16_27, %c5_28] : memref<1x64x31xf32, #tpu.memory_space<vmem>>, vector<1x16x25xf32>
    %22 = vector.shape_cast %21 : vector<1x16x25xf32> to vector<16x25xf32>
    %c112 = arith.constant 112 : index
    %c0_29 = arith.constant 0 : index
    %23 = vector.load %arg10[%c112, %c0_29] : memref<144x25xf32, #tpu.memory_space<vmem>>, vector<16x25xf32>
    tpu.vector_store %arg10[%c112, %c0_29], %22 {strides = array<i32>} : memref<144x25xf32, #tpu.memory_space<vmem>>, vector<16x25xf32>,
    %c0_30 = arith.constant 0 : index
    %c0_31 = arith.constant 0 : index
    %c6 = arith.constant 6 : index
    %24 = vector.load %arg1[%c0_30, %c0_31, %c6] : memref<1x64x31xf32, #tpu.memory_space<vmem>>, vector<1x16x25xf32>
    %25 = vector.shape_cast %24 : vector<1x16x25xf32> to vector<16x25xf32>
    %c128 = arith.constant 128 : index
    %c0_32 = arith.constant 0 : index
    %26 = vector.load %arg10[%c128, %c0_32] : memref<144x25xf32, #tpu.memory_space<vmem>>, vector<16x25xf32>
    tpu.vector_store %arg10[%c128, %c0_32], %25 {strides = array<i32>} : memref<144x25xf32, #tpu.memory_space<vmem>>, vector<16x25xf32>,
    %c0_33 = arith.constant 0 : index
    %c0_34 = arith.constant 0 : index
    %27 = vector.load %arg2[%c0_33, %c0_34] : memref<16x144xf32, #tpu.memory_space<vmem>>, vector<16x144xf32>
    %c0_35 = arith.constant 0 : index
    %c0_36 = arith.constant 0 : index
    %28 = vector.load %arg10[%c0_35, %c0_36] : memref<144x25xf32, #tpu.memory_space<vmem>>, vector<144x25xf32>
    %cst = arith.constant dense<0.000000e+00> : vector<16x25xf32>
    %29 = tpu.matmul %27, %28, %cst {dimension_numbers = #tpu.dot_dimension_numbers<[1], [0], [0], [1], [0, 0, 1, 1], [], []>} : vector<16x144xf32>, vector<144x25xf32>, vector<16x25xf32> -> vector<16x25xf32>
    %c0_37 = arith.constant 0 : index
    %c0_38 = arith.constant 0 : index
    %30 = vector.load %arg3[%c0_37, %c0_38] : memref<16x1xf32, #tpu.memory_space<vmem>>, vector<16x1xf32>
    %31 = vector.broadcast %30 : vector<16x1xf32> to vector<16x25xf32>
    %32 = arith.addf %29, %31 : vector<16x25xf32>
    %cst_39 = arith.constant 0.000000e+00 : f32
    %33 = vector.broadcast %cst_39 : f32 to vector<16x25xf32>
    %34 = arith.maximumf %32, %33 : vector<16x25xf32>
    %c0_40 = arith.constant 0 : index
    %c0_41 = arith.constant 0 : index
    %35 = vector.load %arg4[%c0_40, %c0_41] : memref<1x25xf32, #tpu.memory_space<vmem>>, vector<1x25xf32>
    %36 = vector.broadcast %35 : vector<1x25xf32> to vector<16x25xf32>
    %37 = arith.mulf %34, %36 : vector<16x25xf32>
    %cst_42 = arith.constant dense<0.000000e+00> : vector<16xf32>
    %38 = vector.multi_reduction <add>, %37, %cst_42 [1] : vector<16x25xf32> to vector<16xf32>
    %39 = vector.shape_cast %38 : vector<16xf32> to vector<16x1xf32>
    %cst_43 = arith.constant 6.250000e-02 : f32
    %40 = vector.broadcast %cst_43 : f32 to vector<16x1xf32>
    %41 = arith.mulf %39, %40 : vector<16x1xf32>
    %cst_44 = arith.constant 5.000000e-01 : f32
    %42 = vector.broadcast %cst_44 : f32 to vector<1x25xf32>
    %43 = arith.cmpf ogt, %35, %42 : vector<1x25xf32>
    %cst_45 = arith.constant 0xFF800000 : f32
    %44 = vector.shape_cast %43 : vector<1x25xi1> to vector<1x25xi1>
    %45 = vector.broadcast %44 : vector<1x25xi1> to vector<16x25xi1>
    %46 = vector.broadcast %cst_45 : f32 to vector<16x25xf32>
    %47 = arith.select %45, %34, %46 : vector<16x25xi1>, vector<16x25xf32>
    %cst_46 = arith.constant dense<0xFF800000> : vector<16xf32>
    %48 = vector.multi_reduction <maximumf>, %47, %cst_46 [1] : vector<16x25xf32> to vector<16xf32>
    %49 = vector.shape_cast %48 : vector<16xf32> to vector<16x1xf32>
    %50 = tpu.concatenate %41, %49 in 1 : vector<16x1xf32>, vector<16x1xf32> -> vector<16x2xf32>
    %c0_47 = arith.constant 0 : index
    %c0_48 = arith.constant 0 : index
    %51 = vector.load %arg5[%c0_47, %c0_48] : memref<4x16xf32, #tpu.memory_space<vmem>>, vector<4x16xf32>
    %cst_49 = arith.constant dense<0.000000e+00> : vector<4x2xf32>
    %52 = tpu.matmul %51, %50, %cst_49 {dimension_numbers = #tpu.dot_dimension_numbers<[1], [0], [0], [1], [0, 0, 1, 1], [], []>} : vector<4x16xf32>, vector<16x2xf32>, vector<4x2xf32> -> vector<4x2xf32>
    %c0_50 = arith.constant 0 : index
    %c0_51 = arith.constant 0 : index
    %53 = vector.load %arg6[%c0_50, %c0_51] : memref<4x1xf32, #tpu.memory_space<vmem>>, vector<4x1xf32>
    %54 = vector.broadcast %53 : vector<4x1xf32> to vector<4x2xf32>
    %55 = arith.addf %52, %54 : vector<4x2xf32>
    %cst_52 = arith.constant 0.000000e+00 : f32
    %56 = vector.broadcast %cst_52 : f32 to vector<4x2xf32>
    %57 = arith.maximumf %55, %56 : vector<4x2xf32>
    %c0_53 = arith.constant 0 : index
    %c0_54 = arith.constant 0 : index
    %58 = vector.load %arg7[%c0_53, %c0_54] : memref<16x4xf32, #tpu.memory_space<vmem>>, vector<16x4xf32>
    %cst_55 = arith.constant dense<0.000000e+00> : vector<16x2xf32>
    %59 = tpu.matmul %58, %57, %cst_55 {dimension_numbers = #tpu.dot_dimension_numbers<[1], [0], [0], [1], [0, 0, 1, 1], [], []>} : vector<16x4xf32>, vector<4x2xf32>, vector<16x2xf32> -> vector<16x2xf32>
    %c0_56 = arith.constant 0 : index
    %c0_57 = arith.constant 0 : index
    %60 = vector.load %arg8[%c0_56, %c0_57] : memref<16x1xf32, #tpu.memory_space<vmem>>, vector<16x1xf32>
    %61 = vector.broadcast %60 : vector<16x1xf32> to vector<16x2xf32>
    %62 = arith.addf %59, %61 : vector<16x2xf32>
    %63 = vector.extract_strided_slice %62 {offsets = [0, 0], sizes = [16, 1], strides = [1, 1]} : vector<16x2xf32> to vector<16x1xf32>
    %64 = vector.extract_strided_slice %62 {offsets = [0, 1], sizes = [16, 1], strides = [1, 1]} : vector<16x2xf32> to vector<16x1xf32>
    %65 = arith.addf %63, %64 : vector<16x1xf32>
    %66 = arith.negf %65 : vector<16x1xf32>
    %67 = math.exp %66 : vector<16x1xf32>
    %cst_58 = arith.constant 1.000000e+00 : f32
    %68 = vector.broadcast %cst_58 : f32 to vector<16x1xf32>
    %69 = arith.addf %68, %67 : vector<16x1xf32>
    %70 = arith.divf %68, %69 : vector<16x1xf32>
    %71 = vector.broadcast %70 : vector<16x1xf32> to vector<16x25xf32>
    %72 = arith.mulf %34, %71 : vector<16x25xf32>
    %c0_59 = arith.constant 0 : index
    %c0_60 = arith.constant 0 : index
    %c0_61 = arith.constant 0 : index
    %73 = vector.load %arg9[%c0_59, %c0_60, %c0_61] : memref<1x16x25xf32, #tpu.memory_space<vmem>>, vector<1x16x25xf32>
    %74 = vector.shape_cast %73 : vector<1x16x25xf32> to vector<16x25xf32>
    %75 = vector.shape_cast %72 : vector<16x25xf32> to vector<1x16x25xf32>
    tpu.vector_store %arg9[%c0_59, %c0_60, %c0_61], %75 {strides = array<i32>} : memref<1x16x25xf32, #tpu.memory_space<vmem>>, vector<1x16x25xf32>,
    return
  }
  func.func @transform_0(%arg0: i32) -> (i32, i32, i32) {
    %c0_i32 = arith.constant 0 : i32
    %c0_i32_0 = arith.constant 0 : i32
    %c0_i32_1 = arith.constant 0 : i32
    return %arg0, %c0_i32, %c0_i32_0 : i32, i32, i32
  }
  func.func @transform_1(%arg0: i32) -> (i32, i32) {
    %c0_i32 = arith.constant 0 : i32
    %c0_i32_0 = arith.constant 0 : i32
    %c0_i32_1 = arith.constant 0 : i32
    return %c0_i32, %c0_i32_0 : i32, i32
  }
  func.func @transform_2(%arg0: i32) -> (i32, i32) {
    %c0_i32 = arith.constant 0 : i32
    %c0_i32_0 = arith.constant 0 : i32
    %c0_i32_1 = arith.constant 0 : i32
    return %c0_i32, %c0_i32_0 : i32, i32
  }
  func.func @transform_3(%arg0: i32) -> (i32, i32) {
    %c0_i32 = arith.constant 0 : i32
    %c0_i32_0 = arith.constant 0 : i32
    %c0_i32_1 = arith.constant 0 : i32
    return %c0_i32, %c0_i32_0 : i32, i32
  }
  func.func @transform_4(%arg0: i32) -> (i32, i32) {
    %c0_i32 = arith.constant 0 : i32
    %c0_i32_0 = arith.constant 0 : i32
    %c0_i32_1 = arith.constant 0 : i32
    return %c0_i32, %c0_i32_0 : i32, i32
  }
  func.func @transform_5(%arg0: i32) -> (i32, i32) {
    %c0_i32 = arith.constant 0 : i32
    %c0_i32_0 = arith.constant 0 : i32
    %c0_i32_1 = arith.constant 0 : i32
    return %c0_i32, %c0_i32_0 : i32, i32
  }
  func.func @transform_6(%arg0: i32) -> (i32, i32) {
    %c0_i32 = arith.constant 0 : i32
    %c0_i32_0 = arith.constant 0 : i32
    %c0_i32_1 = arith.constant 0 : i32
    return %c0_i32, %c0_i32_0 : i32, i32
  }
  func.func @transform_7(%arg0: i32) -> (i32, i32) {
    %c0_i32 = arith.constant 0 : i32
    %c0_i32_0 = arith.constant 0 : i32
    %c0_i32_1 = arith.constant 0 : i32
    return %c0_i32, %c0_i32_0 : i32, i32
  }
  func.func @transform_8(%arg0: i32) -> (i32, i32, i32) {
    %c0_i32 = arith.constant 0 : i32
    %c0_i32_0 = arith.constant 0 : i32
    %c0_i32_1 = arith.constant 0 : i32
    return %arg0, %c0_i32, %c0_i32_0 : i32, i32, i32
  }
}

module attributes {stable_mosaic.version = 11 : i64} {
  func.func @_conv3x3_ca_kernel(%arg0: i32, %arg1: memref<1x16x50xf32, #tpu.memory_space<vmem>>, %arg2: memref<16x144xf32, #tpu.memory_space<vmem>>, %arg3: memref<16x1xf32, #tpu.memory_space<vmem>>, %arg4: memref<1x16x36xf32, #tpu.memory_space<vmem>>, %arg5: memref<144x36xf32, #tpu.memory_space<vmem>>) attributes {dimension_semantics = [#tpu.dimension_semantics<parallel>], iteration_bounds = array<i64: 2>, scalar_prefetch = 0 : i64, scratch_operands = 1 : i64, tpu.core_type = #tpu.core_type<tc>, window_params = [{transform_indices = @transform_0, window_bounds = array<i64: 1, 16, 50>}, {pipeline_mode = #tpu.pipeline_mode<synchronous>, transform_indices = @transform_1, window_bounds = array<i64: 16, 144>}, {pipeline_mode = #tpu.pipeline_mode<synchronous>, transform_indices = @transform_2, window_bounds = array<i64: 16, 1>}, {transform_indices = @transform_3, window_bounds = array<i64: 1, 16, 36>}]} {
    %c0 = arith.constant 0 : index
    %c0_0 = arith.constant 0 : index
    %c0_1 = arith.constant 0 : index
    %0 = vector.load %arg1[%c0, %c0_0, %c0_1] : memref<1x16x50xf32, #tpu.memory_space<vmem>>, vector<1x16x36xf32>
    %1 = vector.shape_cast %0 : vector<1x16x36xf32> to vector<16x36xf32>
    %c0_2 = arith.constant 0 : index
    %c0_3 = arith.constant 0 : index
    %2 = vector.load %arg5[%c0_2, %c0_3] : memref<144x36xf32, #tpu.memory_space<vmem>>, vector<16x36xf32>
    tpu.vector_store %arg5[%c0_2, %c0_3], %1 {strides = array<i32>} : memref<144x36xf32, #tpu.memory_space<vmem>>, vector<16x36xf32>,
    %c0_4 = arith.constant 0 : index
    %c0_5 = arith.constant 0 : index
    %c1 = arith.constant 1 : index
    %3 = vector.load %arg1[%c0_4, %c0_5, %c1] : memref<1x16x50xf32, #tpu.memory_space<vmem>>, vector<1x16x36xf32>
    %4 = vector.shape_cast %3 : vector<1x16x36xf32> to vector<16x36xf32>
    %c16 = arith.constant 16 : index
    %c0_6 = arith.constant 0 : index
    %5 = vector.load %arg5[%c16, %c0_6] : memref<144x36xf32, #tpu.memory_space<vmem>>, vector<16x36xf32>
    tpu.vector_store %arg5[%c16, %c0_6], %4 {strides = array<i32>} : memref<144x36xf32, #tpu.memory_space<vmem>>, vector<16x36xf32>,
    %c0_7 = arith.constant 0 : index
    %c0_8 = arith.constant 0 : index
    %c2 = arith.constant 2 : index
    %6 = vector.load %arg1[%c0_7, %c0_8, %c2] : memref<1x16x50xf32, #tpu.memory_space<vmem>>, vector<1x16x36xf32>
    %7 = vector.shape_cast %6 : vector<1x16x36xf32> to vector<16x36xf32>
    %c32 = arith.constant 32 : index
    %c0_9 = arith.constant 0 : index
    %8 = vector.load %arg5[%c32, %c0_9] : memref<144x36xf32, #tpu.memory_space<vmem>>, vector<16x36xf32>
    tpu.vector_store %arg5[%c32, %c0_9], %7 {strides = array<i32>} : memref<144x36xf32, #tpu.memory_space<vmem>>, vector<16x36xf32>,
    %c0_10 = arith.constant 0 : index
    %c0_11 = arith.constant 0 : index
    %c6 = arith.constant 6 : index
    %9 = vector.load %arg1[%c0_10, %c0_11, %c6] : memref<1x16x50xf32, #tpu.memory_space<vmem>>, vector<1x16x36xf32>
    %10 = vector.shape_cast %9 : vector<1x16x36xf32> to vector<16x36xf32>
    %c48 = arith.constant 48 : index
    %c0_12 = arith.constant 0 : index
    %11 = vector.load %arg5[%c48, %c0_12] : memref<144x36xf32, #tpu.memory_space<vmem>>, vector<16x36xf32>
    tpu.vector_store %arg5[%c48, %c0_12], %10 {strides = array<i32>} : memref<144x36xf32, #tpu.memory_space<vmem>>, vector<16x36xf32>,
    %c0_13 = arith.constant 0 : index
    %c0_14 = arith.constant 0 : index
    %c7 = arith.constant 7 : index
    %12 = vector.load %arg1[%c0_13, %c0_14, %c7] : memref<1x16x50xf32, #tpu.memory_space<vmem>>, vector<1x16x36xf32>
    %13 = vector.shape_cast %12 : vector<1x16x36xf32> to vector<16x36xf32>
    %c64 = arith.constant 64 : index
    %c0_15 = arith.constant 0 : index
    %14 = vector.load %arg5[%c64, %c0_15] : memref<144x36xf32, #tpu.memory_space<vmem>>, vector<16x36xf32>
    tpu.vector_store %arg5[%c64, %c0_15], %13 {strides = array<i32>} : memref<144x36xf32, #tpu.memory_space<vmem>>, vector<16x36xf32>,
    %c0_16 = arith.constant 0 : index
    %c0_17 = arith.constant 0 : index
    %c8 = arith.constant 8 : index
    %15 = vector.load %arg1[%c0_16, %c0_17, %c8] : memref<1x16x50xf32, #tpu.memory_space<vmem>>, vector<1x16x36xf32>
    %16 = vector.shape_cast %15 : vector<1x16x36xf32> to vector<16x36xf32>
    %c80 = arith.constant 80 : index
    %c0_18 = arith.constant 0 : index
    %17 = vector.load %arg5[%c80, %c0_18] : memref<144x36xf32, #tpu.memory_space<vmem>>, vector<16x36xf32>
    tpu.vector_store %arg5[%c80, %c0_18], %16 {strides = array<i32>} : memref<144x36xf32, #tpu.memory_space<vmem>>, vector<16x36xf32>,
    %c0_19 = arith.constant 0 : index
    %c0_20 = arith.constant 0 : index
    %c12 = arith.constant 12 : index
    %18 = vector.load %arg1[%c0_19, %c0_20, %c12] : memref<1x16x50xf32, #tpu.memory_space<vmem>>, vector<1x16x36xf32>
    %19 = vector.shape_cast %18 : vector<1x16x36xf32> to vector<16x36xf32>
    %c96 = arith.constant 96 : index
    %c0_21 = arith.constant 0 : index
    %20 = vector.load %arg5[%c96, %c0_21] : memref<144x36xf32, #tpu.memory_space<vmem>>, vector<16x36xf32>
    tpu.vector_store %arg5[%c96, %c0_21], %19 {strides = array<i32>} : memref<144x36xf32, #tpu.memory_space<vmem>>, vector<16x36xf32>,
    %c0_22 = arith.constant 0 : index
    %c0_23 = arith.constant 0 : index
    %c13 = arith.constant 13 : index
    %21 = vector.load %arg1[%c0_22, %c0_23, %c13] : memref<1x16x50xf32, #tpu.memory_space<vmem>>, vector<1x16x36xf32>
    %22 = vector.shape_cast %21 : vector<1x16x36xf32> to vector<16x36xf32>
    %c112 = arith.constant 112 : index
    %c0_24 = arith.constant 0 : index
    %23 = vector.load %arg5[%c112, %c0_24] : memref<144x36xf32, #tpu.memory_space<vmem>>, vector<16x36xf32>
    tpu.vector_store %arg5[%c112, %c0_24], %22 {strides = array<i32>} : memref<144x36xf32, #tpu.memory_space<vmem>>, vector<16x36xf32>,
    %c0_25 = arith.constant 0 : index
    %c0_26 = arith.constant 0 : index
    %c14 = arith.constant 14 : index
    %24 = vector.load %arg1[%c0_25, %c0_26, %c14] : memref<1x16x50xf32, #tpu.memory_space<vmem>>, vector<1x16x36xf32>
    %25 = vector.shape_cast %24 : vector<1x16x36xf32> to vector<16x36xf32>
    %c128 = arith.constant 128 : index
    %c0_27 = arith.constant 0 : index
    %26 = vector.load %arg5[%c128, %c0_27] : memref<144x36xf32, #tpu.memory_space<vmem>>, vector<16x36xf32>
    tpu.vector_store %arg5[%c128, %c0_27], %25 {strides = array<i32>} : memref<144x36xf32, #tpu.memory_space<vmem>>, vector<16x36xf32>,
    %c0_28 = arith.constant 0 : index
    %c0_29 = arith.constant 0 : index
    %27 = vector.load %arg2[%c0_28, %c0_29] : memref<16x144xf32, #tpu.memory_space<vmem>>, vector<16x144xf32>
    %c0_30 = arith.constant 0 : index
    %c0_31 = arith.constant 0 : index
    %28 = vector.load %arg5[%c0_30, %c0_31] : memref<144x36xf32, #tpu.memory_space<vmem>>, vector<144x36xf32>
    %cst = arith.constant dense<0.000000e+00> : vector<16x36xf32>
    %29 = tpu.matmul %27, %28, %cst {dimension_numbers = #tpu.dot_dimension_numbers<[1], [0], [0], [1], [0, 0, 1, 1], [], []>} : vector<16x144xf32>, vector<144x36xf32>, vector<16x36xf32> -> vector<16x36xf32>
    %c0_32 = arith.constant 0 : index
    %c0_33 = arith.constant 0 : index
    %30 = vector.load %arg3[%c0_32, %c0_33] : memref<16x1xf32, #tpu.memory_space<vmem>>, vector<16x1xf32>
    %31 = vector.broadcast %30 : vector<16x1xf32> to vector<16x36xf32>
    %32 = arith.addf %29, %31 : vector<16x36xf32>
    %cst_34 = arith.constant 0.000000e+00 : f32
    %33 = vector.broadcast %cst_34 : f32 to vector<16x36xf32>
    %34 = arith.maximumf %32, %33 : vector<16x36xf32>
    %c0_35 = arith.constant 0 : index
    %c0_36 = arith.constant 0 : index
    %c0_37 = arith.constant 0 : index
    %35 = vector.load %arg4[%c0_35, %c0_36, %c0_37] : memref<1x16x36xf32, #tpu.memory_space<vmem>>, vector<1x16x36xf32>
    %36 = vector.shape_cast %35 : vector<1x16x36xf32> to vector<16x36xf32>
    %37 = vector.shape_cast %34 : vector<16x36xf32> to vector<1x16x36xf32>
    tpu.vector_store %arg4[%c0_35, %c0_36, %c0_37], %37 {strides = array<i32>} : memref<1x16x36xf32, #tpu.memory_space<vmem>>, vector<1x16x36xf32>,
    return
  }
  func.func @transform_0(%arg0: i32) -> (i32, i32, i32) {
    %c0_i32 = arith.constant 0 : i32
    %c0_i32_0 = arith.constant 0 : i32
    %c0_i32_1 = arith.constant 0 : i32
    return %arg0, %c0_i32, %c0_i32_0 : i32, i32, i32
  }
  func.func @transform_1(%arg0: i32) -> (i32, i32) {
    %c0_i32 = arith.constant 0 : i32
    %c0_i32_0 = arith.constant 0 : i32
    %c0_i32_1 = arith.constant 0 : i32
    return %c0_i32, %c0_i32_0 : i32, i32
  }
  func.func @transform_2(%arg0: i32) -> (i32, i32) {
    %c0_i32 = arith.constant 0 : i32
    %c0_i32_0 = arith.constant 0 : i32
    %c0_i32_1 = arith.constant 0 : i32
    return %c0_i32, %c0_i32_0 : i32, i32
  }
  func.func @transform_3(%arg0: i32) -> (i32, i32, i32) {
    %c0_i32 = arith.constant 0 : i32
    %c0_i32_0 = arith.constant 0 : i32
    %c0_i32_1 = arith.constant 0 : i32
    return %arg0, %c0_i32, %c0_i32_0 : i32, i32, i32
  }
}

module attributes {stable_mosaic.version = 11 : i64} {
  func.func @_conv3x3_ca_kernel(%arg0: i32, %arg1: memref<1x16x50xf32, #tpu.memory_space<vmem>>, %arg2: memref<16x144xf32, #tpu.memory_space<vmem>>, %arg3: memref<16x1xf32, #tpu.memory_space<vmem>>, %arg4: memref<1x36xf32, #tpu.memory_space<vmem>>, %arg5: memref<4x16xf32, #tpu.memory_space<vmem>>, %arg6: memref<4x1xf32, #tpu.memory_space<vmem>>, %arg7: memref<16x4xf32, #tpu.memory_space<vmem>>, %arg8: memref<16x1xf32, #tpu.memory_space<vmem>>, %arg9: memref<1x16x36xf32, #tpu.memory_space<vmem>>, %arg10: memref<144x36xf32, #tpu.memory_space<vmem>>) attributes {dimension_semantics = [#tpu.dimension_semantics<parallel>], iteration_bounds = array<i64: 2>, scalar_prefetch = 0 : i64, scratch_operands = 1 : i64, tpu.core_type = #tpu.core_type<tc>, window_params = [{transform_indices = @transform_0, window_bounds = array<i64: 1, 16, 50>}, {pipeline_mode = #tpu.pipeline_mode<synchronous>, transform_indices = @transform_1, window_bounds = array<i64: 16, 144>}, {pipeline_mode = #tpu.pipeline_mode<synchronous>, transform_indices = @transform_2, window_bounds = array<i64: 16, 1>}, {pipeline_mode = #tpu.pipeline_mode<synchronous>, transform_indices = @transform_3, window_bounds = array<i64: 1, 36>}, {pipeline_mode = #tpu.pipeline_mode<synchronous>, transform_indices = @transform_4, window_bounds = array<i64: 4, 16>}, {pipeline_mode = #tpu.pipeline_mode<synchronous>, transform_indices = @transform_5, window_bounds = array<i64: 4, 1>}, {pipeline_mode = #tpu.pipeline_mode<synchronous>, transform_indices = @transform_6, window_bounds = array<i64: 16, 4>}, {pipeline_mode = #tpu.pipeline_mode<synchronous>, transform_indices = @transform_7, window_bounds = array<i64: 16, 1>}, {transform_indices = @transform_8, window_bounds = array<i64: 1, 16, 36>}]} {
    %c0 = arith.constant 0 : index
    %c0_0 = arith.constant 0 : index
    %c0_1 = arith.constant 0 : index
    %0 = vector.load %arg1[%c0, %c0_0, %c0_1] : memref<1x16x50xf32, #tpu.memory_space<vmem>>, vector<1x16x36xf32>
    %1 = vector.shape_cast %0 : vector<1x16x36xf32> to vector<16x36xf32>
    %c0_2 = arith.constant 0 : index
    %c0_3 = arith.constant 0 : index
    %2 = vector.load %arg10[%c0_2, %c0_3] : memref<144x36xf32, #tpu.memory_space<vmem>>, vector<16x36xf32>
    tpu.vector_store %arg10[%c0_2, %c0_3], %1 {strides = array<i32>} : memref<144x36xf32, #tpu.memory_space<vmem>>, vector<16x36xf32>,
    %c0_4 = arith.constant 0 : index
    %c0_5 = arith.constant 0 : index
    %c1 = arith.constant 1 : index
    %3 = vector.load %arg1[%c0_4, %c0_5, %c1] : memref<1x16x50xf32, #tpu.memory_space<vmem>>, vector<1x16x36xf32>
    %4 = vector.shape_cast %3 : vector<1x16x36xf32> to vector<16x36xf32>
    %c16 = arith.constant 16 : index
    %c0_6 = arith.constant 0 : index
    %5 = vector.load %arg10[%c16, %c0_6] : memref<144x36xf32, #tpu.memory_space<vmem>>, vector<16x36xf32>
    tpu.vector_store %arg10[%c16, %c0_6], %4 {strides = array<i32>} : memref<144x36xf32, #tpu.memory_space<vmem>>, vector<16x36xf32>,
    %c0_7 = arith.constant 0 : index
    %c0_8 = arith.constant 0 : index
    %c2 = arith.constant 2 : index
    %6 = vector.load %arg1[%c0_7, %c0_8, %c2] : memref<1x16x50xf32, #tpu.memory_space<vmem>>, vector<1x16x36xf32>
    %7 = vector.shape_cast %6 : vector<1x16x36xf32> to vector<16x36xf32>
    %c32 = arith.constant 32 : index
    %c0_9 = arith.constant 0 : index
    %8 = vector.load %arg10[%c32, %c0_9] : memref<144x36xf32, #tpu.memory_space<vmem>>, vector<16x36xf32>
    tpu.vector_store %arg10[%c32, %c0_9], %7 {strides = array<i32>} : memref<144x36xf32, #tpu.memory_space<vmem>>, vector<16x36xf32>,
    %c0_10 = arith.constant 0 : index
    %c0_11 = arith.constant 0 : index
    %c6 = arith.constant 6 : index
    %9 = vector.load %arg1[%c0_10, %c0_11, %c6] : memref<1x16x50xf32, #tpu.memory_space<vmem>>, vector<1x16x36xf32>
    %10 = vector.shape_cast %9 : vector<1x16x36xf32> to vector<16x36xf32>
    %c48 = arith.constant 48 : index
    %c0_12 = arith.constant 0 : index
    %11 = vector.load %arg10[%c48, %c0_12] : memref<144x36xf32, #tpu.memory_space<vmem>>, vector<16x36xf32>
    tpu.vector_store %arg10[%c48, %c0_12], %10 {strides = array<i32>} : memref<144x36xf32, #tpu.memory_space<vmem>>, vector<16x36xf32>,
    %c0_13 = arith.constant 0 : index
    %c0_14 = arith.constant 0 : index
    %c7 = arith.constant 7 : index
    %12 = vector.load %arg1[%c0_13, %c0_14, %c7] : memref<1x16x50xf32, #tpu.memory_space<vmem>>, vector<1x16x36xf32>
    %13 = vector.shape_cast %12 : vector<1x16x36xf32> to vector<16x36xf32>
    %c64 = arith.constant 64 : index
    %c0_15 = arith.constant 0 : index
    %14 = vector.load %arg10[%c64, %c0_15] : memref<144x36xf32, #tpu.memory_space<vmem>>, vector<16x36xf32>
    tpu.vector_store %arg10[%c64, %c0_15], %13 {strides = array<i32>} : memref<144x36xf32, #tpu.memory_space<vmem>>, vector<16x36xf32>,
    %c0_16 = arith.constant 0 : index
    %c0_17 = arith.constant 0 : index
    %c8 = arith.constant 8 : index
    %15 = vector.load %arg1[%c0_16, %c0_17, %c8] : memref<1x16x50xf32, #tpu.memory_space<vmem>>, vector<1x16x36xf32>
    %16 = vector.shape_cast %15 : vector<1x16x36xf32> to vector<16x36xf32>
    %c80 = arith.constant 80 : index
    %c0_18 = arith.constant 0 : index
    %17 = vector.load %arg10[%c80, %c0_18] : memref<144x36xf32, #tpu.memory_space<vmem>>, vector<16x36xf32>
    tpu.vector_store %arg10[%c80, %c0_18], %16 {strides = array<i32>} : memref<144x36xf32, #tpu.memory_space<vmem>>, vector<16x36xf32>,
    %c0_19 = arith.constant 0 : index
    %c0_20 = arith.constant 0 : index
    %c12 = arith.constant 12 : index
    %18 = vector.load %arg1[%c0_19, %c0_20, %c12] : memref<1x16x50xf32, #tpu.memory_space<vmem>>, vector<1x16x36xf32>
    %19 = vector.shape_cast %18 : vector<1x16x36xf32> to vector<16x36xf32>
    %c96 = arith.constant 96 : index
    %c0_21 = arith.constant 0 : index
    %20 = vector.load %arg10[%c96, %c0_21] : memref<144x36xf32, #tpu.memory_space<vmem>>, vector<16x36xf32>
    tpu.vector_store %arg10[%c96, %c0_21], %19 {strides = array<i32>} : memref<144x36xf32, #tpu.memory_space<vmem>>, vector<16x36xf32>,
    %c0_22 = arith.constant 0 : index
    %c0_23 = arith.constant 0 : index
    %c13 = arith.constant 13 : index
    %21 = vector.load %arg1[%c0_22, %c0_23, %c13] : memref<1x16x50xf32, #tpu.memory_space<vmem>>, vector<1x16x36xf32>
    %22 = vector.shape_cast %21 : vector<1x16x36xf32> to vector<16x36xf32>
    %c112 = arith.constant 112 : index
    %c0_24 = arith.constant 0 : index
    %23 = vector.load %arg10[%c112, %c0_24] : memref<144x36xf32, #tpu.memory_space<vmem>>, vector<16x36xf32>
    tpu.vector_store %arg10[%c112, %c0_24], %22 {strides = array<i32>} : memref<144x36xf32, #tpu.memory_space<vmem>>, vector<16x36xf32>,
    %c0_25 = arith.constant 0 : index
    %c0_26 = arith.constant 0 : index
    %c14 = arith.constant 14 : index
    %24 = vector.load %arg1[%c0_25, %c0_26, %c14] : memref<1x16x50xf32, #tpu.memory_space<vmem>>, vector<1x16x36xf32>
    %25 = vector.shape_cast %24 : vector<1x16x36xf32> to vector<16x36xf32>
    %c128 = arith.constant 128 : index
    %c0_27 = arith.constant 0 : index
    %26 = vector.load %arg10[%c128, %c0_27] : memref<144x36xf32, #tpu.memory_space<vmem>>, vector<16x36xf32>
    tpu.vector_store %arg10[%c128, %c0_27], %25 {strides = array<i32>} : memref<144x36xf32, #tpu.memory_space<vmem>>, vector<16x36xf32>,
    %c0_28 = arith.constant 0 : index
    %c0_29 = arith.constant 0 : index
    %27 = vector.load %arg2[%c0_28, %c0_29] : memref<16x144xf32, #tpu.memory_space<vmem>>, vector<16x144xf32>
    %c0_30 = arith.constant 0 : index
    %c0_31 = arith.constant 0 : index
    %28 = vector.load %arg10[%c0_30, %c0_31] : memref<144x36xf32, #tpu.memory_space<vmem>>, vector<144x36xf32>
    %cst = arith.constant dense<0.000000e+00> : vector<16x36xf32>
    %29 = tpu.matmul %27, %28, %cst {dimension_numbers = #tpu.dot_dimension_numbers<[1], [0], [0], [1], [0, 0, 1, 1], [], []>} : vector<16x144xf32>, vector<144x36xf32>, vector<16x36xf32> -> vector<16x36xf32>
    %c0_32 = arith.constant 0 : index
    %c0_33 = arith.constant 0 : index
    %30 = vector.load %arg3[%c0_32, %c0_33] : memref<16x1xf32, #tpu.memory_space<vmem>>, vector<16x1xf32>
    %31 = vector.broadcast %30 : vector<16x1xf32> to vector<16x36xf32>
    %32 = arith.addf %29, %31 : vector<16x36xf32>
    %c0_34 = arith.constant 0 : index
    %c0_35 = arith.constant 0 : index
    %33 = vector.load %arg4[%c0_34, %c0_35] : memref<1x36xf32, #tpu.memory_space<vmem>>, vector<1x36xf32>
    %34 = vector.broadcast %33 : vector<1x36xf32> to vector<16x36xf32>
    %35 = arith.mulf %32, %34 : vector<16x36xf32>
    %cst_36 = arith.constant dense<0.000000e+00> : vector<16xf32>
    %36 = vector.multi_reduction <add>, %35, %cst_36 [1] : vector<16x36xf32> to vector<16xf32>
    %37 = vector.shape_cast %36 : vector<16xf32> to vector<16x1xf32>
    %cst_37 = arith.constant 6.250000e-02 : f32
    %38 = vector.broadcast %cst_37 : f32 to vector<16x1xf32>
    %39 = arith.mulf %37, %38 : vector<16x1xf32>
    %cst_38 = arith.constant 5.000000e-01 : f32
    %40 = vector.broadcast %cst_38 : f32 to vector<1x36xf32>
    %41 = arith.cmpf ogt, %33, %40 : vector<1x36xf32>
    %cst_39 = arith.constant 0xFF800000 : f32
    %42 = vector.shape_cast %41 : vector<1x36xi1> to vector<1x36xi1>
    %43 = vector.broadcast %42 : vector<1x36xi1> to vector<16x36xi1>
    %44 = vector.broadcast %cst_39 : f32 to vector<16x36xf32>
    %45 = arith.select %43, %32, %44 : vector<16x36xi1>, vector<16x36xf32>
    %cst_40 = arith.constant dense<0xFF800000> : vector<16xf32>
    %46 = vector.multi_reduction <maximumf>, %45, %cst_40 [1] : vector<16x36xf32> to vector<16xf32>
    %47 = vector.shape_cast %46 : vector<16xf32> to vector<16x1xf32>
    %48 = tpu.concatenate %39, %47 in 1 : vector<16x1xf32>, vector<16x1xf32> -> vector<16x2xf32>
    %c0_41 = arith.constant 0 : index
    %c0_42 = arith.constant 0 : index
    %49 = vector.load %arg5[%c0_41, %c0_42] : memref<4x16xf32, #tpu.memory_space<vmem>>, vector<4x16xf32>
    %cst_43 = arith.constant dense<0.000000e+00> : vector<4x2xf32>
    %50 = tpu.matmul %49, %48, %cst_43 {dimension_numbers = #tpu.dot_dimension_numbers<[1], [0], [0], [1], [0, 0, 1, 1], [], []>} : vector<4x16xf32>, vector<16x2xf32>, vector<4x2xf32> -> vector<4x2xf32>
    %c0_44 = arith.constant 0 : index
    %c0_45 = arith.constant 0 : index
    %51 = vector.load %arg6[%c0_44, %c0_45] : memref<4x1xf32, #tpu.memory_space<vmem>>, vector<4x1xf32>
    %52 = vector.broadcast %51 : vector<4x1xf32> to vector<4x2xf32>
    %53 = arith.addf %50, %52 : vector<4x2xf32>
    %cst_46 = arith.constant 0.000000e+00 : f32
    %54 = vector.broadcast %cst_46 : f32 to vector<4x2xf32>
    %55 = arith.maximumf %53, %54 : vector<4x2xf32>
    %c0_47 = arith.constant 0 : index
    %c0_48 = arith.constant 0 : index
    %56 = vector.load %arg7[%c0_47, %c0_48] : memref<16x4xf32, #tpu.memory_space<vmem>>, vector<16x4xf32>
    %cst_49 = arith.constant dense<0.000000e+00> : vector<16x2xf32>
    %57 = tpu.matmul %56, %55, %cst_49 {dimension_numbers = #tpu.dot_dimension_numbers<[1], [0], [0], [1], [0, 0, 1, 1], [], []>} : vector<16x4xf32>, vector<4x2xf32>, vector<16x2xf32> -> vector<16x2xf32>
    %c0_50 = arith.constant 0 : index
    %c0_51 = arith.constant 0 : index
    %58 = vector.load %arg8[%c0_50, %c0_51] : memref<16x1xf32, #tpu.memory_space<vmem>>, vector<16x1xf32>
    %59 = vector.broadcast %58 : vector<16x1xf32> to vector<16x2xf32>
    %60 = arith.addf %57, %59 : vector<16x2xf32>
    %61 = vector.extract_strided_slice %60 {offsets = [0, 0], sizes = [16, 1], strides = [1, 1]} : vector<16x2xf32> to vector<16x1xf32>
    %62 = vector.extract_strided_slice %60 {offsets = [0, 1], sizes = [16, 1], strides = [1, 1]} : vector<16x2xf32> to vector<16x1xf32>
    %63 = arith.addf %61, %62 : vector<16x1xf32>
    %64 = arith.negf %63 : vector<16x1xf32>
    %65 = math.exp %64 : vector<16x1xf32>
    %cst_52 = arith.constant 1.000000e+00 : f32
    %66 = vector.broadcast %cst_52 : f32 to vector<16x1xf32>
    %67 = arith.addf %66, %65 : vector<16x1xf32>
    %68 = arith.divf %66, %67 : vector<16x1xf32>
    %69 = vector.broadcast %68 : vector<16x1xf32> to vector<16x36xf32>
    %70 = arith.mulf %32, %69 : vector<16x36xf32>
    %c0_53 = arith.constant 0 : index
    %c0_54 = arith.constant 0 : index
    %c0_55 = arith.constant 0 : index
    %71 = vector.load %arg9[%c0_53, %c0_54, %c0_55] : memref<1x16x36xf32, #tpu.memory_space<vmem>>, vector<1x16x36xf32>
    %72 = vector.shape_cast %71 : vector<1x16x36xf32> to vector<16x36xf32>
    %73 = vector.shape_cast %70 : vector<16x36xf32> to vector<1x16x36xf32>
    tpu.vector_store %arg9[%c0_53, %c0_54, %c0_55], %73 {strides = array<i32>} : memref<1x16x36xf32, #tpu.memory_space<vmem>>, vector<1x16x36xf32>,
    return
  }
  func.func @transform_0(%arg0: i32) -> (i32, i32, i32) {
    %c0_i32 = arith.constant 0 : i32
    %c0_i32_0 = arith.constant 0 : i32
    %c0_i32_1 = arith.constant 0 : i32
    return %arg0, %c0_i32, %c0_i32_0 : i32, i32, i32
  }
  func.func @transform_1(%arg0: i32) -> (i32, i32) {
    %c0_i32 = arith.constant 0 : i32
    %c0_i32_0 = arith.constant 0 : i32
    %c0_i32_1 = arith.constant 0 : i32
    return %c0_i32, %c0_i32_0 : i32, i32
  }
  func.func @transform_2(%arg0: i32) -> (i32, i32) {
    %c0_i32 = arith.constant 0 : i32
    %c0_i32_0 = arith.constant 0 : i32
    %c0_i32_1 = arith.constant 0 : i32
    return %c0_i32, %c0_i32_0 : i32, i32
  }
  func.func @transform_3(%arg0: i32) -> (i32, i32) {
    %c0_i32 = arith.constant 0 : i32
    %c0_i32_0 = arith.constant 0 : i32
    %c0_i32_1 = arith.constant 0 : i32
    return %c0_i32, %c0_i32_0 : i32, i32
  }
  func.func @transform_4(%arg0: i32) -> (i32, i32) {
    %c0_i32 = arith.constant 0 : i32
    %c0_i32_0 = arith.constant 0 : i32
    %c0_i32_1 = arith.constant 0 : i32
    return %c0_i32, %c0_i32_0 : i32, i32
  }
  func.func @transform_5(%arg0: i32) -> (i32, i32) {
    %c0_i32 = arith.constant 0 : i32
    %c0_i32_0 = arith.constant 0 : i32
    %c0_i32_1 = arith.constant 0 : i32
    return %c0_i32, %c0_i32_0 : i32, i32
  }
  func.func @transform_6(%arg0: i32) -> (i32, i32) {
    %c0_i32 = arith.constant 0 : i32
    %c0_i32_0 = arith.constant 0 : i32
    %c0_i32_1 = arith.constant 0 : i32
    return %c0_i32, %c0_i32_0 : i32, i32
  }
  func.func @transform_7(%arg0: i32) -> (i32, i32) {
    %c0_i32 = arith.constant 0 : i32
    %c0_i32_0 = arith.constant 0 : i32
    %c0_i32_1 = arith.constant 0 : i32
    return %c0_i32, %c0_i32_0 : i32, i32
  }
  func.func @transform_8(%arg0: i32) -> (i32, i32, i32) {
    %c0_i32 = arith.constant 0 : i32
    %c0_i32_0 = arith.constant 0 : i32
    %c0_i32_1 = arith.constant 0 : i32
    return %arg0, %c0_i32, %c0_i32_0 : i32, i32, i32
  }
}

module attributes {stable_mosaic.version = 11 : i64} {
  func.func @_conv3x3_ca_kernel(%arg0: i32, %arg1: memref<1x32x122xf32, #tpu.memory_space<vmem>>, %arg2: memref<8x288xf32, #tpu.memory_space<vmem>>, %arg3: memref<8x1xf32, #tpu.memory_space<vmem>>, %arg4: memref<1x100xf32, #tpu.memory_space<vmem>>, %arg5: memref<2x8xf32, #tpu.memory_space<vmem>>, %arg6: memref<2x1xf32, #tpu.memory_space<vmem>>, %arg7: memref<8x2xf32, #tpu.memory_space<vmem>>, %arg8: memref<8x1xf32, #tpu.memory_space<vmem>>, %arg9: memref<1x8x100xf32, #tpu.memory_space<vmem>>, %arg10: memref<288x100xf32, #tpu.memory_space<vmem>>) attributes {dimension_semantics = [#tpu.dimension_semantics<parallel>], iteration_bounds = array<i64: 2>, scalar_prefetch = 0 : i64, scratch_operands = 1 : i64, tpu.core_type = #tpu.core_type<tc>, window_params = [{transform_indices = @transform_0, window_bounds = array<i64: 1, 32, 122>}, {pipeline_mode = #tpu.pipeline_mode<synchronous>, transform_indices = @transform_1, window_bounds = array<i64: 8, 288>}, {pipeline_mode = #tpu.pipeline_mode<synchronous>, transform_indices = @transform_2, window_bounds = array<i64: 8, 1>}, {pipeline_mode = #tpu.pipeline_mode<synchronous>, transform_indices = @transform_3, window_bounds = array<i64: 1, 100>}, {pipeline_mode = #tpu.pipeline_mode<synchronous>, transform_indices = @transform_4, window_bounds = array<i64: 2, 8>}, {pipeline_mode = #tpu.pipeline_mode<synchronous>, transform_indices = @transform_5, window_bounds = array<i64: 2, 1>}, {pipeline_mode = #tpu.pipeline_mode<synchronous>, transform_indices = @transform_6, window_bounds = array<i64: 8, 2>}, {pipeline_mode = #tpu.pipeline_mode<synchronous>, transform_indices = @transform_7, window_bounds = array<i64: 8, 1>}, {transform_indices = @transform_8, window_bounds = array<i64: 1, 8, 100>}]} {
    %c0 = arith.constant 0 : index
    %c0_0 = arith.constant 0 : index
    %c0_1 = arith.constant 0 : index
    %0 = vector.load %arg1[%c0, %c0_0, %c0_1] : memref<1x32x122xf32, #tpu.memory_space<vmem>>, vector<1x32x100xf32>
    %1 = vector.shape_cast %0 : vector<1x32x100xf32> to vector<32x100xf32>
    %c0_2 = arith.constant 0 : index
    %c0_3 = arith.constant 0 : index
    %2 = vector.load %arg10[%c0_2, %c0_3] : memref<288x100xf32, #tpu.memory_space<vmem>>, vector<32x100xf32>
    tpu.vector_store %arg10[%c0_2, %c0_3], %1 {strides = array<i32>} : memref<288x100xf32, #tpu.memory_space<vmem>>, vector<32x100xf32>,
    %c0_4 = arith.constant 0 : index
    %c0_5 = arith.constant 0 : index
    %c1 = arith.constant 1 : index
    %3 = vector.load %arg1[%c0_4, %c0_5, %c1] : memref<1x32x122xf32, #tpu.memory_space<vmem>>, vector<1x32x100xf32>
    %4 = vector.shape_cast %3 : vector<1x32x100xf32> to vector<32x100xf32>
    %c32 = arith.constant 32 : index
    %c0_6 = arith.constant 0 : index
    %5 = vector.load %arg10[%c32, %c0_6] : memref<288x100xf32, #tpu.memory_space<vmem>>, vector<32x100xf32>
    tpu.vector_store %arg10[%c32, %c0_6], %4 {strides = array<i32>} : memref<288x100xf32, #tpu.memory_space<vmem>>, vector<32x100xf32>,
    %c0_7 = arith.constant 0 : index
    %c0_8 = arith.constant 0 : index
    %c2 = arith.constant 2 : index
    %6 = vector.load %arg1[%c0_7, %c0_8, %c2] : memref<1x32x122xf32, #tpu.memory_space<vmem>>, vector<1x32x100xf32>
    %7 = vector.shape_cast %6 : vector<1x32x100xf32> to vector<32x100xf32>
    %c64 = arith.constant 64 : index
    %c0_9 = arith.constant 0 : index
    %8 = vector.load %arg10[%c64, %c0_9] : memref<288x100xf32, #tpu.memory_space<vmem>>, vector<32x100xf32>
    tpu.vector_store %arg10[%c64, %c0_9], %7 {strides = array<i32>} : memref<288x100xf32, #tpu.memory_space<vmem>>, vector<32x100xf32>,
    %c0_10 = arith.constant 0 : index
    %c0_11 = arith.constant 0 : index
    %c10 = arith.constant 10 : index
    %9 = vector.load %arg1[%c0_10, %c0_11, %c10] : memref<1x32x122xf32, #tpu.memory_space<vmem>>, vector<1x32x100xf32>
    %10 = vector.shape_cast %9 : vector<1x32x100xf32> to vector<32x100xf32>
    %c96 = arith.constant 96 : index
    %c0_12 = arith.constant 0 : index
    %11 = vector.load %arg10[%c96, %c0_12] : memref<288x100xf32, #tpu.memory_space<vmem>>, vector<32x100xf32>
    tpu.vector_store %arg10[%c96, %c0_12], %10 {strides = array<i32>} : memref<288x100xf32, #tpu.memory_space<vmem>>, vector<32x100xf32>,
    %c0_13 = arith.constant 0 : index
    %c0_14 = arith.constant 0 : index
    %c11 = arith.constant 11 : index
    %12 = vector.load %arg1[%c0_13, %c0_14, %c11] : memref<1x32x122xf32, #tpu.memory_space<vmem>>, vector<1x32x100xf32>
    %13 = vector.shape_cast %12 : vector<1x32x100xf32> to vector<32x100xf32>
    %c128 = arith.constant 128 : index
    %c0_15 = arith.constant 0 : index
    %14 = vector.load %arg10[%c128, %c0_15] : memref<288x100xf32, #tpu.memory_space<vmem>>, vector<32x100xf32>
    tpu.vector_store %arg10[%c128, %c0_15], %13 {strides = array<i32>} : memref<288x100xf32, #tpu.memory_space<vmem>>, vector<32x100xf32>,
    %c0_16 = arith.constant 0 : index
    %c0_17 = arith.constant 0 : index
    %c12 = arith.constant 12 : index
    %15 = vector.load %arg1[%c0_16, %c0_17, %c12] : memref<1x32x122xf32, #tpu.memory_space<vmem>>, vector<1x32x100xf32>
    %16 = vector.shape_cast %15 : vector<1x32x100xf32> to vector<32x100xf32>
    %c160 = arith.constant 160 : index
    %c0_18 = arith.constant 0 : index
    %17 = vector.load %arg10[%c160, %c0_18] : memref<288x100xf32, #tpu.memory_space<vmem>>, vector<32x100xf32>
    tpu.vector_store %arg10[%c160, %c0_18], %16 {strides = array<i32>} : memref<288x100xf32, #tpu.memory_space<vmem>>, vector<32x100xf32>,
    %c0_19 = arith.constant 0 : index
    %c0_20 = arith.constant 0 : index
    %c20 = arith.constant 20 : index
    %18 = vector.load %arg1[%c0_19, %c0_20, %c20] : memref<1x32x122xf32, #tpu.memory_space<vmem>>, vector<1x32x100xf32>
    %19 = vector.shape_cast %18 : vector<1x32x100xf32> to vector<32x100xf32>
    %c192 = arith.constant 192 : index
    %c0_21 = arith.constant 0 : index
    %20 = vector.load %arg10[%c192, %c0_21] : memref<288x100xf32, #tpu.memory_space<vmem>>, vector<32x100xf32>
    tpu.vector_store %arg10[%c192, %c0_21], %19 {strides = array<i32>} : memref<288x100xf32, #tpu.memory_space<vmem>>, vector<32x100xf32>,
    %c0_22 = arith.constant 0 : index
    %c0_23 = arith.constant 0 : index
    %c21 = arith.constant 21 : index
    %21 = vector.load %arg1[%c0_22, %c0_23, %c21] : memref<1x32x122xf32, #tpu.memory_space<vmem>>, vector<1x32x100xf32>
    %22 = vector.shape_cast %21 : vector<1x32x100xf32> to vector<32x100xf32>
    %c224 = arith.constant 224 : index
    %c0_24 = arith.constant 0 : index
    %23 = vector.load %arg10[%c224, %c0_24] : memref<288x100xf32, #tpu.memory_space<vmem>>, vector<32x100xf32>
    tpu.vector_store %arg10[%c224, %c0_24], %22 {strides = array<i32>} : memref<288x100xf32, #tpu.memory_space<vmem>>, vector<32x100xf32>,
    %c0_25 = arith.constant 0 : index
    %c0_26 = arith.constant 0 : index
    %c22 = arith.constant 22 : index
    %24 = vector.load %arg1[%c0_25, %c0_26, %c22] : memref<1x32x122xf32, #tpu.memory_space<vmem>>, vector<1x32x100xf32>
    %25 = vector.shape_cast %24 : vector<1x32x100xf32> to vector<32x100xf32>
    %c256 = arith.constant 256 : index
    %c0_27 = arith.constant 0 : index
    %26 = vector.load %arg10[%c256, %c0_27] : memref<288x100xf32, #tpu.memory_space<vmem>>, vector<32x100xf32>
    tpu.vector_store %arg10[%c256, %c0_27], %25 {strides = array<i32>} : memref<288x100xf32, #tpu.memory_space<vmem>>, vector<32x100xf32>,
    %c0_28 = arith.constant 0 : index
    %c0_29 = arith.constant 0 : index
    %27 = vector.load %arg2[%c0_28, %c0_29] : memref<8x288xf32, #tpu.memory_space<vmem>>, vector<8x288xf32>
    %c0_30 = arith.constant 0 : index
    %c0_31 = arith.constant 0 : index
    %28 = vector.load %arg10[%c0_30, %c0_31] : memref<288x100xf32, #tpu.memory_space<vmem>>, vector<288x100xf32>
    %cst = arith.constant dense<0.000000e+00> : vector<8x100xf32>
    %29 = tpu.matmul %27, %28, %cst {dimension_numbers = #tpu.dot_dimension_numbers<[1], [0], [0], [1], [0, 0, 1, 1], [], []>} : vector<8x288xf32>, vector<288x100xf32>, vector<8x100xf32> -> vector<8x100xf32>
    %c0_32 = arith.constant 0 : index
    %c0_33 = arith.constant 0 : index
    %30 = vector.load %arg3[%c0_32, %c0_33] : memref<8x1xf32, #tpu.memory_space<vmem>>, vector<8x1xf32>
    %31 = vector.broadcast %30 : vector<8x1xf32> to vector<8x100xf32>
    %32 = arith.addf %29, %31 : vector<8x100xf32>
    %cst_34 = arith.constant 0.000000e+00 : f32
    %33 = vector.broadcast %cst_34 : f32 to vector<8x100xf32>
    %34 = arith.maximumf %32, %33 : vector<8x100xf32>
    %c0_35 = arith.constant 0 : index
    %c0_36 = arith.constant 0 : index
    %35 = vector.load %arg4[%c0_35, %c0_36] : memref<1x100xf32, #tpu.memory_space<vmem>>, vector<1x100xf32>
    %36 = vector.broadcast %35 : vector<1x100xf32> to vector<8x100xf32>
    %37 = arith.mulf %34, %36 : vector<8x100xf32>
    %cst_37 = arith.constant dense<0.000000e+00> : vector<8xf32>
    %38 = vector.multi_reduction <add>, %37, %cst_37 [1] : vector<8x100xf32> to vector<8xf32>
    %39 = vector.shape_cast %38 : vector<8xf32> to vector<8x1xf32>
    %cst_38 = arith.constant 1.562500e-02 : f32
    %40 = vector.broadcast %cst_38 : f32 to vector<8x1xf32>
    %41 = arith.mulf %39, %40 : vector<8x1xf32>
    %cst_39 = arith.constant 5.000000e-01 : f32
    %42 = vector.broadcast %cst_39 : f32 to vector<1x100xf32>
    %43 = arith.cmpf ogt, %35, %42 : vector<1x100xf32>
    %cst_40 = arith.constant 0xFF800000 : f32
    %44 = vector.shape_cast %43 : vector<1x100xi1> to vector<1x100xi1>
    %45 = vector.broadcast %44 : vector<1x100xi1> to vector<8x100xi1>
    %46 = vector.broadcast %cst_40 : f32 to vector<8x100xf32>
    %47 = arith.select %45, %34, %46 : vector<8x100xi1>, vector<8x100xf32>
    %cst_41 = arith.constant dense<0xFF800000> : vector<8xf32>
    %48 = vector.multi_reduction <maximumf>, %47, %cst_41 [1] : vector<8x100xf32> to vector<8xf32>
    %49 = vector.shape_cast %48 : vector<8xf32> to vector<8x1xf32>
    %50 = tpu.concatenate %41, %49 in 1 : vector<8x1xf32>, vector<8x1xf32> -> vector<8x2xf32>
    %c0_42 = arith.constant 0 : index
    %c0_43 = arith.constant 0 : index
    %51 = vector.load %arg5[%c0_42, %c0_43] : memref<2x8xf32, #tpu.memory_space<vmem>>, vector<2x8xf32>
    %cst_44 = arith.constant dense<0.000000e+00> : vector<2x2xf32>
    %52 = tpu.matmul %51, %50, %cst_44 {dimension_numbers = #tpu.dot_dimension_numbers<[1], [0], [0], [1], [0, 0, 1, 1], [], []>} : vector<2x8xf32>, vector<8x2xf32>, vector<2x2xf32> -> vector<2x2xf32>
    %c0_45 = arith.constant 0 : index
    %c0_46 = arith.constant 0 : index
    %53 = vector.load %arg6[%c0_45, %c0_46] : memref<2x1xf32, #tpu.memory_space<vmem>>, vector<2x1xf32>
    %54 = vector.broadcast %53 : vector<2x1xf32> to vector<2x2xf32>
    %55 = arith.addf %52, %54 : vector<2x2xf32>
    %cst_47 = arith.constant 0.000000e+00 : f32
    %56 = vector.broadcast %cst_47 : f32 to vector<2x2xf32>
    %57 = arith.maximumf %55, %56 : vector<2x2xf32>
    %c0_48 = arith.constant 0 : index
    %c0_49 = arith.constant 0 : index
    %58 = vector.load %arg7[%c0_48, %c0_49] : memref<8x2xf32, #tpu.memory_space<vmem>>, vector<8x2xf32>
    %cst_50 = arith.constant dense<0.000000e+00> : vector<8x2xf32>
    %59 = tpu.matmul %58, %57, %cst_50 {dimension_numbers = #tpu.dot_dimension_numbers<[1], [0], [0], [1], [0, 0, 1, 1], [], []>} : vector<8x2xf32>, vector<2x2xf32>, vector<8x2xf32> -> vector<8x2xf32>
    %c0_51 = arith.constant 0 : index
    %c0_52 = arith.constant 0 : index
    %60 = vector.load %arg8[%c0_51, %c0_52] : memref<8x1xf32, #tpu.memory_space<vmem>>, vector<8x1xf32>
    %61 = vector.broadcast %60 : vector<8x1xf32> to vector<8x2xf32>
    %62 = arith.addf %59, %61 : vector<8x2xf32>
    %63 = vector.extract_strided_slice %62 {offsets = [0, 0], sizes = [8, 1], strides = [1, 1]} : vector<8x2xf32> to vector<8x1xf32>
    %64 = vector.extract_strided_slice %62 {offsets = [0, 1], sizes = [8, 1], strides = [1, 1]} : vector<8x2xf32> to vector<8x1xf32>
    %65 = arith.addf %63, %64 : vector<8x1xf32>
    %66 = arith.negf %65 : vector<8x1xf32>
    %67 = math.exp %66 : vector<8x1xf32>
    %cst_53 = arith.constant 1.000000e+00 : f32
    %68 = vector.broadcast %cst_53 : f32 to vector<8x1xf32>
    %69 = arith.addf %68, %67 : vector<8x1xf32>
    %70 = arith.divf %68, %69 : vector<8x1xf32>
    %71 = vector.broadcast %70 : vector<8x1xf32> to vector<8x100xf32>
    %72 = arith.mulf %34, %71 : vector<8x100xf32>
    %c0_54 = arith.constant 0 : index
    %c0_55 = arith.constant 0 : index
    %c0_56 = arith.constant 0 : index
    %73 = vector.load %arg9[%c0_54, %c0_55, %c0_56] : memref<1x8x100xf32, #tpu.memory_space<vmem>>, vector<1x8x100xf32>
    %74 = vector.shape_cast %73 : vector<1x8x100xf32> to vector<8x100xf32>
    %75 = vector.shape_cast %72 : vector<8x100xf32> to vector<1x8x100xf32>
    tpu.vector_store %arg9[%c0_54, %c0_55, %c0_56], %75 {strides = array<i32>} : memref<1x8x100xf32, #tpu.memory_space<vmem>>, vector<1x8x100xf32>,
    return
  }
  func.func @transform_0(%arg0: i32) -> (i32, i32, i32) {
    %c0_i32 = arith.constant 0 : i32
    %c0_i32_0 = arith.constant 0 : i32
    %c0_i32_1 = arith.constant 0 : i32
    return %arg0, %c0_i32, %c0_i32_0 : i32, i32, i32
  }
  func.func @transform_1(%arg0: i32) -> (i32, i32) {
    %c0_i32 = arith.constant 0 : i32
    %c0_i32_0 = arith.constant 0 : i32
    %c0_i32_1 = arith.constant 0 : i32
    return %c0_i32, %c0_i32_0 : i32, i32
  }
  func.func @transform_2(%arg0: i32) -> (i32, i32) {
    %c0_i32 = arith.constant 0 : i32
    %c0_i32_0 = arith.constant 0 : i32
    %c0_i32_1 = arith.constant 0 : i32
    return %c0_i32, %c0_i32_0 : i32, i32
  }
  func.func @transform_3(%arg0: i32) -> (i32, i32) {
    %c0_i32 = arith.constant 0 : i32
    %c0_i32_0 = arith.constant 0 : i32
    %c0_i32_1 = arith.constant 0 : i32
    return %c0_i32, %c0_i32_0 : i32, i32
  }
  func.func @transform_4(%arg0: i32) -> (i32, i32) {
    %c0_i32 = arith.constant 0 : i32
    %c0_i32_0 = arith.constant 0 : i32
    %c0_i32_1 = arith.constant 0 : i32
    return %c0_i32, %c0_i32_0 : i32, i32
  }
  func.func @transform_5(%arg0: i32) -> (i32, i32) {
    %c0_i32 = arith.constant 0 : i32
    %c0_i32_0 = arith.constant 0 : i32
    %c0_i32_1 = arith.constant 0 : i32
    return %c0_i32, %c0_i32_0 : i32, i32
  }
  func.func @transform_6(%arg0: i32) -> (i32, i32) {
    %c0_i32 = arith.constant 0 : i32
    %c0_i32_0 = arith.constant 0 : i32
    %c0_i32_1 = arith.constant 0 : i32
    return %c0_i32, %c0_i32_0 : i32, i32
  }
  func.func @transform_7(%arg0: i32) -> (i32, i32) {
    %c0_i32 = arith.constant 0 : i32
    %c0_i32_0 = arith.constant 0 : i32
    %c0_i32_1 = arith.constant 0 : i32
    return %c0_i32, %c0_i32_0 : i32, i32
  }
  func.func @transform_8(%arg0: i32) -> (i32, i32, i32) {
    %c0_i32 = arith.constant 0 : i32
    %c0_i32_0 = arith.constant 0 : i32
    %c0_i32_1 = arith.constant 0 : i32
    return %arg0, %c0_i32, %c0_i32_0 : i32, i32, i32
  }
}

module attributes {stable_mosaic.version = 11 : i64} {
  func.func @_conv3x3_ca_kernel(%arg0: i32, %arg1: memref<1x8x122xf32, #tpu.memory_space<vmem>>, %arg2: memref<8x72xf32, #tpu.memory_space<vmem>>, %arg3: memref<8x1xf32, #tpu.memory_space<vmem>>, %arg4: memref<1x8x100xf32, #tpu.memory_space<vmem>>, %arg5: memref<72x100xf32, #tpu.memory_space<vmem>>) attributes {dimension_semantics = [#tpu.dimension_semantics<parallel>], iteration_bounds = array<i64: 2>, scalar_prefetch = 0 : i64, scratch_operands = 1 : i64, tpu.core_type = #tpu.core_type<tc>, window_params = [{transform_indices = @transform_0, window_bounds = array<i64: 1, 8, 122>}, {pipeline_mode = #tpu.pipeline_mode<synchronous>, transform_indices = @transform_1, window_bounds = array<i64: 8, 72>}, {pipeline_mode = #tpu.pipeline_mode<synchronous>, transform_indices = @transform_2, window_bounds = array<i64: 8, 1>}, {transform_indices = @transform_3, window_bounds = array<i64: 1, 8, 100>}]} {
    %c0 = arith.constant 0 : index
    %c0_0 = arith.constant 0 : index
    %c0_1 = arith.constant 0 : index
    %0 = vector.load %arg1[%c0, %c0_0, %c0_1] : memref<1x8x122xf32, #tpu.memory_space<vmem>>, vector<1x8x100xf32>
    %1 = vector.shape_cast %0 : vector<1x8x100xf32> to vector<8x100xf32>
    %c0_2 = arith.constant 0 : index
    %c0_3 = arith.constant 0 : index
    %2 = vector.load %arg5[%c0_2, %c0_3] : memref<72x100xf32, #tpu.memory_space<vmem>>, vector<8x100xf32>
    tpu.vector_store %arg5[%c0_2, %c0_3], %1 {strides = array<i32>} : memref<72x100xf32, #tpu.memory_space<vmem>>, vector<8x100xf32>,
    %c0_4 = arith.constant 0 : index
    %c0_5 = arith.constant 0 : index
    %c1 = arith.constant 1 : index
    %3 = vector.load %arg1[%c0_4, %c0_5, %c1] : memref<1x8x122xf32, #tpu.memory_space<vmem>>, vector<1x8x100xf32>
    %4 = vector.shape_cast %3 : vector<1x8x100xf32> to vector<8x100xf32>
    %c8 = arith.constant 8 : index
    %c0_6 = arith.constant 0 : index
    %5 = vector.load %arg5[%c8, %c0_6] : memref<72x100xf32, #tpu.memory_space<vmem>>, vector<8x100xf32>
    tpu.vector_store %arg5[%c8, %c0_6], %4 {strides = array<i32>} : memref<72x100xf32, #tpu.memory_space<vmem>>, vector<8x100xf32>,
    %c0_7 = arith.constant 0 : index
    %c0_8 = arith.constant 0 : index
    %c2 = arith.constant 2 : index
    %6 = vector.load %arg1[%c0_7, %c0_8, %c2] : memref<1x8x122xf32, #tpu.memory_space<vmem>>, vector<1x8x100xf32>
    %7 = vector.shape_cast %6 : vector<1x8x100xf32> to vector<8x100xf32>
    %c16 = arith.constant 16 : index
    %c0_9 = arith.constant 0 : index
    %8 = vector.load %arg5[%c16, %c0_9] : memref<72x100xf32, #tpu.memory_space<vmem>>, vector<8x100xf32>
    tpu.vector_store %arg5[%c16, %c0_9], %7 {strides = array<i32>} : memref<72x100xf32, #tpu.memory_space<vmem>>, vector<8x100xf32>,
    %c0_10 = arith.constant 0 : index
    %c0_11 = arith.constant 0 : index
    %c10 = arith.constant 10 : index
    %9 = vector.load %arg1[%c0_10, %c0_11, %c10] : memref<1x8x122xf32, #tpu.memory_space<vmem>>, vector<1x8x100xf32>
    %10 = vector.shape_cast %9 : vector<1x8x100xf32> to vector<8x100xf32>
    %c24 = arith.constant 24 : index
    %c0_12 = arith.constant 0 : index
    %11 = vector.load %arg5[%c24, %c0_12] : memref<72x100xf32, #tpu.memory_space<vmem>>, vector<8x100xf32>
    tpu.vector_store %arg5[%c24, %c0_12], %10 {strides = array<i32>} : memref<72x100xf32, #tpu.memory_space<vmem>>, vector<8x100xf32>,
    %c0_13 = arith.constant 0 : index
    %c0_14 = arith.constant 0 : index
    %c11 = arith.constant 11 : index
    %12 = vector.load %arg1[%c0_13, %c0_14, %c11] : memref<1x8x122xf32, #tpu.memory_space<vmem>>, vector<1x8x100xf32>
    %13 = vector.shape_cast %12 : vector<1x8x100xf32> to vector<8x100xf32>
    %c32 = arith.constant 32 : index
    %c0_15 = arith.constant 0 : index
    %14 = vector.load %arg5[%c32, %c0_15] : memref<72x100xf32, #tpu.memory_space<vmem>>, vector<8x100xf32>
    tpu.vector_store %arg5[%c32, %c0_15], %13 {strides = array<i32>} : memref<72x100xf32, #tpu.memory_space<vmem>>, vector<8x100xf32>,
    %c0_16 = arith.constant 0 : index
    %c0_17 = arith.constant 0 : index
    %c12 = arith.constant 12 : index
    %15 = vector.load %arg1[%c0_16, %c0_17, %c12] : memref<1x8x122xf32, #tpu.memory_space<vmem>>, vector<1x8x100xf32>
    %16 = vector.shape_cast %15 : vector<1x8x100xf32> to vector<8x100xf32>
    %c40 = arith.constant 40 : index
    %c0_18 = arith.constant 0 : index
    %17 = vector.load %arg5[%c40, %c0_18] : memref<72x100xf32, #tpu.memory_space<vmem>>, vector<8x100xf32>
    tpu.vector_store %arg5[%c40, %c0_18], %16 {strides = array<i32>} : memref<72x100xf32, #tpu.memory_space<vmem>>, vector<8x100xf32>,
    %c0_19 = arith.constant 0 : index
    %c0_20 = arith.constant 0 : index
    %c20 = arith.constant 20 : index
    %18 = vector.load %arg1[%c0_19, %c0_20, %c20] : memref<1x8x122xf32, #tpu.memory_space<vmem>>, vector<1x8x100xf32>
    %19 = vector.shape_cast %18 : vector<1x8x100xf32> to vector<8x100xf32>
    %c48 = arith.constant 48 : index
    %c0_21 = arith.constant 0 : index
    %20 = vector.load %arg5[%c48, %c0_21] : memref<72x100xf32, #tpu.memory_space<vmem>>, vector<8x100xf32>
    tpu.vector_store %arg5[%c48, %c0_21], %19 {strides = array<i32>} : memref<72x100xf32, #tpu.memory_space<vmem>>, vector<8x100xf32>,
    %c0_22 = arith.constant 0 : index
    %c0_23 = arith.constant 0 : index
    %c21 = arith.constant 21 : index
    %21 = vector.load %arg1[%c0_22, %c0_23, %c21] : memref<1x8x122xf32, #tpu.memory_space<vmem>>, vector<1x8x100xf32>
    %22 = vector.shape_cast %21 : vector<1x8x100xf32> to vector<8x100xf32>
    %c56 = arith.constant 56 : index
    %c0_24 = arith.constant 0 : index
    %23 = vector.load %arg5[%c56, %c0_24] : memref<72x100xf32, #tpu.memory_space<vmem>>, vector<8x100xf32>
    tpu.vector_store %arg5[%c56, %c0_24], %22 {strides = array<i32>} : memref<72x100xf32, #tpu.memory_space<vmem>>, vector<8x100xf32>,
    %c0_25 = arith.constant 0 : index
    %c0_26 = arith.constant 0 : index
    %c22 = arith.constant 22 : index
    %24 = vector.load %arg1[%c0_25, %c0_26, %c22] : memref<1x8x122xf32, #tpu.memory_space<vmem>>, vector<1x8x100xf32>
    %25 = vector.shape_cast %24 : vector<1x8x100xf32> to vector<8x100xf32>
    %c64 = arith.constant 64 : index
    %c0_27 = arith.constant 0 : index
    %26 = vector.load %arg5[%c64, %c0_27] : memref<72x100xf32, #tpu.memory_space<vmem>>, vector<8x100xf32>
    tpu.vector_store %arg5[%c64, %c0_27], %25 {strides = array<i32>} : memref<72x100xf32, #tpu.memory_space<vmem>>, vector<8x100xf32>,
    %c0_28 = arith.constant 0 : index
    %c0_29 = arith.constant 0 : index
    %27 = vector.load %arg2[%c0_28, %c0_29] : memref<8x72xf32, #tpu.memory_space<vmem>>, vector<8x72xf32>
    %c0_30 = arith.constant 0 : index
    %c0_31 = arith.constant 0 : index
    %28 = vector.load %arg5[%c0_30, %c0_31] : memref<72x100xf32, #tpu.memory_space<vmem>>, vector<72x100xf32>
    %cst = arith.constant dense<0.000000e+00> : vector<8x100xf32>
    %29 = tpu.matmul %27, %28, %cst {dimension_numbers = #tpu.dot_dimension_numbers<[1], [0], [0], [1], [0, 0, 1, 1], [], []>} : vector<8x72xf32>, vector<72x100xf32>, vector<8x100xf32> -> vector<8x100xf32>
    %c0_32 = arith.constant 0 : index
    %c0_33 = arith.constant 0 : index
    %30 = vector.load %arg3[%c0_32, %c0_33] : memref<8x1xf32, #tpu.memory_space<vmem>>, vector<8x1xf32>
    %31 = vector.broadcast %30 : vector<8x1xf32> to vector<8x100xf32>
    %32 = arith.addf %29, %31 : vector<8x100xf32>
    %cst_34 = arith.constant 0.000000e+00 : f32
    %33 = vector.broadcast %cst_34 : f32 to vector<8x100xf32>
    %34 = arith.maximumf %32, %33 : vector<8x100xf32>
    %c0_35 = arith.constant 0 : index
    %c0_36 = arith.constant 0 : index
    %c0_37 = arith.constant 0 : index
    %35 = vector.load %arg4[%c0_35, %c0_36, %c0_37] : memref<1x8x100xf32, #tpu.memory_space<vmem>>, vector<1x8x100xf32>
    %36 = vector.shape_cast %35 : vector<1x8x100xf32> to vector<8x100xf32>
    %37 = vector.shape_cast %34 : vector<8x100xf32> to vector<1x8x100xf32>
    tpu.vector_store %arg4[%c0_35, %c0_36, %c0_37], %37 {strides = array<i32>} : memref<1x8x100xf32, #tpu.memory_space<vmem>>, vector<1x8x100xf32>,
    return
  }
  func.func @transform_0(%arg0: i32) -> (i32, i32, i32) {
    %c0_i32 = arith.constant 0 : i32
    %c0_i32_0 = arith.constant 0 : i32
    %c0_i32_1 = arith.constant 0 : i32
    return %arg0, %c0_i32, %c0_i32_0 : i32, i32, i32
  }
  func.func @transform_1(%arg0: i32) -> (i32, i32) {
    %c0_i32 = arith.constant 0 : i32
    %c0_i32_0 = arith.constant 0 : i32
    %c0_i32_1 = arith.constant 0 : i32
    return %c0_i32, %c0_i32_0 : i32, i32
  }
  func.func @transform_2(%arg0: i32) -> (i32, i32) {
    %c0_i32 = arith.constant 0 : i32
    %c0_i32_0 = arith.constant 0 : i32
    %c0_i32_1 = arith.constant 0 : i32
    return %c0_i32, %c0_i32_0 : i32, i32
  }
  func.func @transform_3(%arg0: i32) -> (i32, i32, i32) {
    %c0_i32 = arith.constant 0 : i32
    %c0_i32_0 = arith.constant 0 : i32
    %c0_i32_1 = arith.constant 0 : i32
    return %arg0, %c0_i32, %c0_i32_0 : i32, i32, i32
  }
}

module attributes {stable_mosaic.version = 11 : i64} {
  func.func @_conv3x3_ca_kernel(%arg0: i32, %arg1: memref<1x8x122xf32, #tpu.memory_space<vmem>>, %arg2: memref<8x72xf32, #tpu.memory_space<vmem>>, %arg3: memref<8x1xf32, #tpu.memory_space<vmem>>, %arg4: memref<1x100xf32, #tpu.memory_space<vmem>>, %arg5: memref<2x8xf32, #tpu.memory_space<vmem>>, %arg6: memref<2x1xf32, #tpu.memory_space<vmem>>, %arg7: memref<8x2xf32, #tpu.memory_space<vmem>>, %arg8: memref<8x1xf32, #tpu.memory_space<vmem>>, %arg9: memref<1x8x100xf32, #tpu.memory_space<vmem>>, %arg10: memref<72x100xf32, #tpu.memory_space<vmem>>) attributes {dimension_semantics = [#tpu.dimension_semantics<parallel>], iteration_bounds = array<i64: 2>, scalar_prefetch = 0 : i64, scratch_operands = 1 : i64, tpu.core_type = #tpu.core_type<tc>, window_params = [{transform_indices = @transform_0, window_bounds = array<i64: 1, 8, 122>}, {pipeline_mode = #tpu.pipeline_mode<synchronous>, transform_indices = @transform_1, window_bounds = array<i64: 8, 72>}, {pipeline_mode = #tpu.pipeline_mode<synchronous>, transform_indices = @transform_2, window_bounds = array<i64: 8, 1>}, {pipeline_mode = #tpu.pipeline_mode<synchronous>, transform_indices = @transform_3, window_bounds = array<i64: 1, 100>}, {pipeline_mode = #tpu.pipeline_mode<synchronous>, transform_indices = @transform_4, window_bounds = array<i64: 2, 8>}, {pipeline_mode = #tpu.pipeline_mode<synchronous>, transform_indices = @transform_5, window_bounds = array<i64: 2, 1>}, {pipeline_mode = #tpu.pipeline_mode<synchronous>, transform_indices = @transform_6, window_bounds = array<i64: 8, 2>}, {pipeline_mode = #tpu.pipeline_mode<synchronous>, transform_indices = @transform_7, window_bounds = array<i64: 8, 1>}, {transform_indices = @transform_8, window_bounds = array<i64: 1, 8, 100>}]} {
    %c0 = arith.constant 0 : index
    %c0_0 = arith.constant 0 : index
    %c0_1 = arith.constant 0 : index
    %0 = vector.load %arg1[%c0, %c0_0, %c0_1] : memref<1x8x122xf32, #tpu.memory_space<vmem>>, vector<1x8x100xf32>
    %1 = vector.shape_cast %0 : vector<1x8x100xf32> to vector<8x100xf32>
    %c0_2 = arith.constant 0 : index
    %c0_3 = arith.constant 0 : index
    %2 = vector.load %arg10[%c0_2, %c0_3] : memref<72x100xf32, #tpu.memory_space<vmem>>, vector<8x100xf32>
    tpu.vector_store %arg10[%c0_2, %c0_3], %1 {strides = array<i32>} : memref<72x100xf32, #tpu.memory_space<vmem>>, vector<8x100xf32>,
    %c0_4 = arith.constant 0 : index
    %c0_5 = arith.constant 0 : index
    %c1 = arith.constant 1 : index
    %3 = vector.load %arg1[%c0_4, %c0_5, %c1] : memref<1x8x122xf32, #tpu.memory_space<vmem>>, vector<1x8x100xf32>
    %4 = vector.shape_cast %3 : vector<1x8x100xf32> to vector<8x100xf32>
    %c8 = arith.constant 8 : index
    %c0_6 = arith.constant 0 : index
    %5 = vector.load %arg10[%c8, %c0_6] : memref<72x100xf32, #tpu.memory_space<vmem>>, vector<8x100xf32>
    tpu.vector_store %arg10[%c8, %c0_6], %4 {strides = array<i32>} : memref<72x100xf32, #tpu.memory_space<vmem>>, vector<8x100xf32>,
    %c0_7 = arith.constant 0 : index
    %c0_8 = arith.constant 0 : index
    %c2 = arith.constant 2 : index
    %6 = vector.load %arg1[%c0_7, %c0_8, %c2] : memref<1x8x122xf32, #tpu.memory_space<vmem>>, vector<1x8x100xf32>
    %7 = vector.shape_cast %6 : vector<1x8x100xf32> to vector<8x100xf32>
    %c16 = arith.constant 16 : index
    %c0_9 = arith.constant 0 : index
    %8 = vector.load %arg10[%c16, %c0_9] : memref<72x100xf32, #tpu.memory_space<vmem>>, vector<8x100xf32>
    tpu.vector_store %arg10[%c16, %c0_9], %7 {strides = array<i32>} : memref<72x100xf32, #tpu.memory_space<vmem>>, vector<8x100xf32>,
    %c0_10 = arith.constant 0 : index
    %c0_11 = arith.constant 0 : index
    %c10 = arith.constant 10 : index
    %9 = vector.load %arg1[%c0_10, %c0_11, %c10] : memref<1x8x122xf32, #tpu.memory_space<vmem>>, vector<1x8x100xf32>
    %10 = vector.shape_cast %9 : vector<1x8x100xf32> to vector<8x100xf32>
    %c24 = arith.constant 24 : index
    %c0_12 = arith.constant 0 : index
    %11 = vector.load %arg10[%c24, %c0_12] : memref<72x100xf32, #tpu.memory_space<vmem>>, vector<8x100xf32>
    tpu.vector_store %arg10[%c24, %c0_12], %10 {strides = array<i32>} : memref<72x100xf32, #tpu.memory_space<vmem>>, vector<8x100xf32>,
    %c0_13 = arith.constant 0 : index
    %c0_14 = arith.constant 0 : index
    %c11 = arith.constant 11 : index
    %12 = vector.load %arg1[%c0_13, %c0_14, %c11] : memref<1x8x122xf32, #tpu.memory_space<vmem>>, vector<1x8x100xf32>
    %13 = vector.shape_cast %12 : vector<1x8x100xf32> to vector<8x100xf32>
    %c32 = arith.constant 32 : index
    %c0_15 = arith.constant 0 : index
    %14 = vector.load %arg10[%c32, %c0_15] : memref<72x100xf32, #tpu.memory_space<vmem>>, vector<8x100xf32>
    tpu.vector_store %arg10[%c32, %c0_15], %13 {strides = array<i32>} : memref<72x100xf32, #tpu.memory_space<vmem>>, vector<8x100xf32>,
    %c0_16 = arith.constant 0 : index
    %c0_17 = arith.constant 0 : index
    %c12 = arith.constant 12 : index
    %15 = vector.load %arg1[%c0_16, %c0_17, %c12] : memref<1x8x122xf32, #tpu.memory_space<vmem>>, vector<1x8x100xf32>
    %16 = vector.shape_cast %15 : vector<1x8x100xf32> to vector<8x100xf32>
    %c40 = arith.constant 40 : index
    %c0_18 = arith.constant 0 : index
    %17 = vector.load %arg10[%c40, %c0_18] : memref<72x100xf32, #tpu.memory_space<vmem>>, vector<8x100xf32>
    tpu.vector_store %arg10[%c40, %c0_18], %16 {strides = array<i32>} : memref<72x100xf32, #tpu.memory_space<vmem>>, vector<8x100xf32>,
    %c0_19 = arith.constant 0 : index
    %c0_20 = arith.constant 0 : index
    %c20 = arith.constant 20 : index
    %18 = vector.load %arg1[%c0_19, %c0_20, %c20] : memref<1x8x122xf32, #tpu.memory_space<vmem>>, vector<1x8x100xf32>
    %19 = vector.shape_cast %18 : vector<1x8x100xf32> to vector<8x100xf32>
    %c48 = arith.constant 48 : index
    %c0_21 = arith.constant 0 : index
    %20 = vector.load %arg10[%c48, %c0_21] : memref<72x100xf32, #tpu.memory_space<vmem>>, vector<8x100xf32>
    tpu.vector_store %arg10[%c48, %c0_21], %19 {strides = array<i32>} : memref<72x100xf32, #tpu.memory_space<vmem>>, vector<8x100xf32>,
    %c0_22 = arith.constant 0 : index
    %c0_23 = arith.constant 0 : index
    %c21 = arith.constant 21 : index
    %21 = vector.load %arg1[%c0_22, %c0_23, %c21] : memref<1x8x122xf32, #tpu.memory_space<vmem>>, vector<1x8x100xf32>
    %22 = vector.shape_cast %21 : vector<1x8x100xf32> to vector<8x100xf32>
    %c56 = arith.constant 56 : index
    %c0_24 = arith.constant 0 : index
    %23 = vector.load %arg10[%c56, %c0_24] : memref<72x100xf32, #tpu.memory_space<vmem>>, vector<8x100xf32>
    tpu.vector_store %arg10[%c56, %c0_24], %22 {strides = array<i32>} : memref<72x100xf32, #tpu.memory_space<vmem>>, vector<8x100xf32>,
    %c0_25 = arith.constant 0 : index
    %c0_26 = arith.constant 0 : index
    %c22 = arith.constant 22 : index
    %24 = vector.load %arg1[%c0_25, %c0_26, %c22] : memref<1x8x122xf32, #tpu.memory_space<vmem>>, vector<1x8x100xf32>
    %25 = vector.shape_cast %24 : vector<1x8x100xf32> to vector<8x100xf32>
    %c64 = arith.constant 64 : index
    %c0_27 = arith.constant 0 : index
    %26 = vector.load %arg10[%c64, %c0_27] : memref<72x100xf32, #tpu.memory_space<vmem>>, vector<8x100xf32>
    tpu.vector_store %arg10[%c64, %c0_27], %25 {strides = array<i32>} : memref<72x100xf32, #tpu.memory_space<vmem>>, vector<8x100xf32>,
    %c0_28 = arith.constant 0 : index
    %c0_29 = arith.constant 0 : index
    %27 = vector.load %arg2[%c0_28, %c0_29] : memref<8x72xf32, #tpu.memory_space<vmem>>, vector<8x72xf32>
    %c0_30 = arith.constant 0 : index
    %c0_31 = arith.constant 0 : index
    %28 = vector.load %arg10[%c0_30, %c0_31] : memref<72x100xf32, #tpu.memory_space<vmem>>, vector<72x100xf32>
    %cst = arith.constant dense<0.000000e+00> : vector<8x100xf32>
    %29 = tpu.matmul %27, %28, %cst {dimension_numbers = #tpu.dot_dimension_numbers<[1], [0], [0], [1], [0, 0, 1, 1], [], []>} : vector<8x72xf32>, vector<72x100xf32>, vector<8x100xf32> -> vector<8x100xf32>
    %c0_32 = arith.constant 0 : index
    %c0_33 = arith.constant 0 : index
    %30 = vector.load %arg3[%c0_32, %c0_33] : memref<8x1xf32, #tpu.memory_space<vmem>>, vector<8x1xf32>
    %31 = vector.broadcast %30 : vector<8x1xf32> to vector<8x100xf32>
    %32 = arith.addf %29, %31 : vector<8x100xf32>
    %c0_34 = arith.constant 0 : index
    %c0_35 = arith.constant 0 : index
    %33 = vector.load %arg4[%c0_34, %c0_35] : memref<1x100xf32, #tpu.memory_space<vmem>>, vector<1x100xf32>
    %34 = vector.broadcast %33 : vector<1x100xf32> to vector<8x100xf32>
    %35 = arith.mulf %32, %34 : vector<8x100xf32>
    %cst_36 = arith.constant dense<0.000000e+00> : vector<8xf32>
    %36 = vector.multi_reduction <add>, %35, %cst_36 [1] : vector<8x100xf32> to vector<8xf32>
    %37 = vector.shape_cast %36 : vector<8xf32> to vector<8x1xf32>
    %cst_37 = arith.constant 1.562500e-02 : f32
    %38 = vector.broadcast %cst_37 : f32 to vector<8x1xf32>
    %39 = arith.mulf %37, %38 : vector<8x1xf32>
    %cst_38 = arith.constant 5.000000e-01 : f32
    %40 = vector.broadcast %cst_38 : f32 to vector<1x100xf32>
    %41 = arith.cmpf ogt, %33, %40 : vector<1x100xf32>
    %cst_39 = arith.constant 0xFF800000 : f32
    %42 = vector.shape_cast %41 : vector<1x100xi1> to vector<1x100xi1>
    %43 = vector.broadcast %42 : vector<1x100xi1> to vector<8x100xi1>
    %44 = vector.broadcast %cst_39 : f32 to vector<8x100xf32>
    %45 = arith.select %43, %32, %44 : vector<8x100xi1>, vector<8x100xf32>
    %cst_40 = arith.constant dense<0xFF800000> : vector<8xf32>
    %46 = vector.multi_reduction <maximumf>, %45, %cst_40 [1] : vector<8x100xf32> to vector<8xf32>
    %47 = vector.shape_cast %46 : vector<8xf32> to vector<8x1xf32>
    %48 = tpu.concatenate %39, %47 in 1 : vector<8x1xf32>, vector<8x1xf32> -> vector<8x2xf32>
    %c0_41 = arith.constant 0 : index
    %c0_42 = arith.constant 0 : index
    %49 = vector.load %arg5[%c0_41, %c0_42] : memref<2x8xf32, #tpu.memory_space<vmem>>, vector<2x8xf32>
    %cst_43 = arith.constant dense<0.000000e+00> : vector<2x2xf32>
    %50 = tpu.matmul %49, %48, %cst_43 {dimension_numbers = #tpu.dot_dimension_numbers<[1], [0], [0], [1], [0, 0, 1, 1], [], []>} : vector<2x8xf32>, vector<8x2xf32>, vector<2x2xf32> -> vector<2x2xf32>
    %c0_44 = arith.constant 0 : index
    %c0_45 = arith.constant 0 : index
    %51 = vector.load %arg6[%c0_44, %c0_45] : memref<2x1xf32, #tpu.memory_space<vmem>>, vector<2x1xf32>
    %52 = vector.broadcast %51 : vector<2x1xf32> to vector<2x2xf32>
    %53 = arith.addf %50, %52 : vector<2x2xf32>
    %cst_46 = arith.constant 0.000000e+00 : f32
    %54 = vector.broadcast %cst_46 : f32 to vector<2x2xf32>
    %55 = arith.maximumf %53, %54 : vector<2x2xf32>
    %c0_47 = arith.constant 0 : index
    %c0_48 = arith.constant 0 : index
    %56 = vector.load %arg7[%c0_47, %c0_48] : memref<8x2xf32, #tpu.memory_space<vmem>>, vector<8x2xf32>
    %cst_49 = arith.constant dense<0.000000e+00> : vector<8x2xf32>
    %57 = tpu.matmul %56, %55, %cst_49 {dimension_numbers = #tpu.dot_dimension_numbers<[1], [0], [0], [1], [0, 0, 1, 1], [], []>} : vector<8x2xf32>, vector<2x2xf32>, vector<8x2xf32> -> vector<8x2xf32>
    %c0_50 = arith.constant 0 : index
    %c0_51 = arith.constant 0 : index
    %58 = vector.load %arg8[%c0_50, %c0_51] : memref<8x1xf32, #tpu.memory_space<vmem>>, vector<8x1xf32>
    %59 = vector.broadcast %58 : vector<8x1xf32> to vector<8x2xf32>
    %60 = arith.addf %57, %59 : vector<8x2xf32>
    %61 = vector.extract_strided_slice %60 {offsets = [0, 0], sizes = [8, 1], strides = [1, 1]} : vector<8x2xf32> to vector<8x1xf32>
    %62 = vector.extract_strided_slice %60 {offsets = [0, 1], sizes = [8, 1], strides = [1, 1]} : vector<8x2xf32> to vector<8x1xf32>
    %63 = arith.addf %61, %62 : vector<8x1xf32>
    %64 = arith.negf %63 : vector<8x1xf32>
    %65 = math.exp %64 : vector<8x1xf32>
    %cst_52 = arith.constant 1.000000e+00 : f32
    %66 = vector.broadcast %cst_52 : f32 to vector<8x1xf32>
    %67 = arith.addf %66, %65 : vector<8x1xf32>
    %68 = arith.divf %66, %67 : vector<8x1xf32>
    %69 = vector.broadcast %68 : vector<8x1xf32> to vector<8x100xf32>
    %70 = arith.mulf %32, %69 : vector<8x100xf32>
    %c0_53 = arith.constant 0 : index
    %c0_54 = arith.constant 0 : index
    %c0_55 = arith.constant 0 : index
    %71 = vector.load %arg9[%c0_53, %c0_54, %c0_55] : memref<1x8x100xf32, #tpu.memory_space<vmem>>, vector<1x8x100xf32>
    %72 = vector.shape_cast %71 : vector<1x8x100xf32> to vector<8x100xf32>
    %73 = vector.shape_cast %70 : vector<8x100xf32> to vector<1x8x100xf32>
    tpu.vector_store %arg9[%c0_53, %c0_54, %c0_55], %73 {strides = array<i32>} : memref<1x8x100xf32, #tpu.memory_space<vmem>>, vector<1x8x100xf32>,
    return
  }
  func.func @transform_0(%arg0: i32) -> (i32, i32, i32) {
    %c0_i32 = arith.constant 0 : i32
    %c0_i32_0 = arith.constant 0 : i32
    %c0_i32_1 = arith.constant 0 : i32
    return %arg0, %c0_i32, %c0_i32_0 : i32, i32, i32
  }
  func.func @transform_1(%arg0: i32) -> (i32, i32) {
    %c0_i32 = arith.constant 0 : i32
    %c0_i32_0 = arith.constant 0 : i32
    %c0_i32_1 = arith.constant 0 : i32
    return %c0_i32, %c0_i32_0 : i32, i32
  }
  func.func @transform_2(%arg0: i32) -> (i32, i32) {
    %c0_i32 = arith.constant 0 : i32
    %c0_i32_0 = arith.constant 0 : i32
    %c0_i32_1 = arith.constant 0 : i32
    return %c0_i32, %c0_i32_0 : i32, i32
  }
  func.func @transform_3(%arg0: i32) -> (i32, i32) {
    %c0_i32 = arith.constant 0 : i32
    %c0_i32_0 = arith.constant 0 : i32
    %c0_i32_1 = arith.constant 0 : i32
    return %c0_i32, %c0_i32_0 : i32, i32
  }
  func.func @transform_4(%arg0: i32) -> (i32, i32) {
    %c0_i32 = arith.constant 0 : i32
    %c0_i32_0 = arith.constant 0 : i32
    %c0_i32_1 = arith.constant 0 : i32
    return %c0_i32, %c0_i32_0 : i32, i32
  }
  func.func @transform_5(%arg0: i32) -> (i32, i32) {
    %c0_i32 = arith.constant 0 : i32
    %c0_i32_0 = arith.constant 0 : i32
    %c0_i32_1 = arith.constant 0 : i32
    return %c0_i32, %c0_i32_0 : i32, i32
  }
  func.func @transform_6(%arg0: i32) -> (i32, i32) {
    %c0_i32 = arith.constant 0 : i32
    %c0_i32_0 = arith.constant 0 : i32
    %c0_i32_1 = arith.constant 0 : i32
    return %c0_i32, %c0_i32_0 : i32, i32
  }
  func.func @transform_7(%arg0: i32) -> (i32, i32) {
    %c0_i32 = arith.constant 0 : i32
    %c0_i32_0 = arith.constant 0 : i32
    %c0_i32_1 = arith.constant 0 : i32
    return %c0_i32, %c0_i32_0 : i32, i32
  }
  func.func @transform_8(%arg0: i32) -> (i32, i32, i32) {
    %c0_i32 = arith.constant 0 : i32
    %c0_i32_0 = arith.constant 0 : i32
    %c0_i32_1 = arith.constant 0 : i32
    return %arg0, %c0_i32, %c0_i32_0 : i32, i32, i32
  }
}

module attributes {stable_mosaic.version = 11 : i64} {
  func.func @_conv3x3_ca_kernel(%arg0: i32, %arg1: memref<1x16x362xf32, #tpu.memory_space<vmem>>, %arg2: memref<8x144xf32, #tpu.memory_space<vmem>>, %arg3: memref<8x1xf32, #tpu.memory_space<vmem>>, %arg4: memref<1x324xf32, #tpu.memory_space<vmem>>, %arg5: memref<2x8xf32, #tpu.memory_space<vmem>>, %arg6: memref<2x1xf32, #tpu.memory_space<vmem>>, %arg7: memref<8x2xf32, #tpu.memory_space<vmem>>, %arg8: memref<8x1xf32, #tpu.memory_space<vmem>>, %arg9: memref<1x8x324xf32, #tpu.memory_space<vmem>>, %arg10: memref<144x324xf32, #tpu.memory_space<vmem>>) attributes {dimension_semantics = [#tpu.dimension_semantics<parallel>], iteration_bounds = array<i64: 2>, scalar_prefetch = 0 : i64, scratch_operands = 1 : i64, tpu.core_type = #tpu.core_type<tc>, window_params = [{transform_indices = @transform_0, window_bounds = array<i64: 1, 16, 362>}, {pipeline_mode = #tpu.pipeline_mode<synchronous>, transform_indices = @transform_1, window_bounds = array<i64: 8, 144>}, {pipeline_mode = #tpu.pipeline_mode<synchronous>, transform_indices = @transform_2, window_bounds = array<i64: 8, 1>}, {pipeline_mode = #tpu.pipeline_mode<synchronous>, transform_indices = @transform_3, window_bounds = array<i64: 1, 324>}, {pipeline_mode = #tpu.pipeline_mode<synchronous>, transform_indices = @transform_4, window_bounds = array<i64: 2, 8>}, {pipeline_mode = #tpu.pipeline_mode<synchronous>, transform_indices = @transform_5, window_bounds = array<i64: 2, 1>}, {pipeline_mode = #tpu.pipeline_mode<synchronous>, transform_indices = @transform_6, window_bounds = array<i64: 8, 2>}, {pipeline_mode = #tpu.pipeline_mode<synchronous>, transform_indices = @transform_7, window_bounds = array<i64: 8, 1>}, {transform_indices = @transform_8, window_bounds = array<i64: 1, 8, 324>}]} {
    %c0 = arith.constant 0 : index
    %c0_0 = arith.constant 0 : index
    %c0_1 = arith.constant 0 : index
    %0 = vector.load %arg1[%c0, %c0_0, %c0_1] : memref<1x16x362xf32, #tpu.memory_space<vmem>>, vector<1x16x324xf32>
    %1 = vector.shape_cast %0 : vector<1x16x324xf32> to vector<16x324xf32>
    %c0_2 = arith.constant 0 : index
    %c0_3 = arith.constant 0 : index
    %2 = vector.load %arg10[%c0_2, %c0_3] : memref<144x324xf32, #tpu.memory_space<vmem>>, vector<16x324xf32>
    tpu.vector_store %arg10[%c0_2, %c0_3], %1 {strides = array<i32>} : memref<144x324xf32, #tpu.memory_space<vmem>>, vector<16x324xf32>,
    %c0_4 = arith.constant 0 : index
    %c0_5 = arith.constant 0 : index
    %c1 = arith.constant 1 : index
    %3 = vector.load %arg1[%c0_4, %c0_5, %c1] : memref<1x16x362xf32, #tpu.memory_space<vmem>>, vector<1x16x324xf32>
    %4 = vector.shape_cast %3 : vector<1x16x324xf32> to vector<16x324xf32>
    %c16 = arith.constant 16 : index
    %c0_6 = arith.constant 0 : index
    %5 = vector.load %arg10[%c16, %c0_6] : memref<144x324xf32, #tpu.memory_space<vmem>>, vector<16x324xf32>
    tpu.vector_store %arg10[%c16, %c0_6], %4 {strides = array<i32>} : memref<144x324xf32, #tpu.memory_space<vmem>>, vector<16x324xf32>,
    %c0_7 = arith.constant 0 : index
    %c0_8 = arith.constant 0 : index
    %c2 = arith.constant 2 : index
    %6 = vector.load %arg1[%c0_7, %c0_8, %c2] : memref<1x16x362xf32, #tpu.memory_space<vmem>>, vector<1x16x324xf32>
    %7 = vector.shape_cast %6 : vector<1x16x324xf32> to vector<16x324xf32>
    %c32 = arith.constant 32 : index
    %c0_9 = arith.constant 0 : index
    %8 = vector.load %arg10[%c32, %c0_9] : memref<144x324xf32, #tpu.memory_space<vmem>>, vector<16x324xf32>
    tpu.vector_store %arg10[%c32, %c0_9], %7 {strides = array<i32>} : memref<144x324xf32, #tpu.memory_space<vmem>>, vector<16x324xf32>,
    %c0_10 = arith.constant 0 : index
    %c0_11 = arith.constant 0 : index
    %c18 = arith.constant 18 : index
    %9 = vector.load %arg1[%c0_10, %c0_11, %c18] : memref<1x16x362xf32, #tpu.memory_space<vmem>>, vector<1x16x324xf32>
    %10 = vector.shape_cast %9 : vector<1x16x324xf32> to vector<16x324xf32>
    %c48 = arith.constant 48 : index
    %c0_12 = arith.constant 0 : index
    %11 = vector.load %arg10[%c48, %c0_12] : memref<144x324xf32, #tpu.memory_space<vmem>>, vector<16x324xf32>
    tpu.vector_store %arg10[%c48, %c0_12], %10 {strides = array<i32>} : memref<144x324xf32, #tpu.memory_space<vmem>>, vector<16x324xf32>,
    %c0_13 = arith.constant 0 : index
    %c0_14 = arith.constant 0 : index
    %c19 = arith.constant 19 : index
    %12 = vector.load %arg1[%c0_13, %c0_14, %c19] : memref<1x16x362xf32, #tpu.memory_space<vmem>>, vector<1x16x324xf32>
    %13 = vector.shape_cast %12 : vector<1x16x324xf32> to vector<16x324xf32>
    %c64 = arith.constant 64 : index
    %c0_15 = arith.constant 0 : index
    %14 = vector.load %arg10[%c64, %c0_15] : memref<144x324xf32, #tpu.memory_space<vmem>>, vector<16x324xf32>
    tpu.vector_store %arg10[%c64, %c0_15], %13 {strides = array<i32>} : memref<144x324xf32, #tpu.memory_space<vmem>>, vector<16x324xf32>,
    %c0_16 = arith.constant 0 : index
    %c0_17 = arith.constant 0 : index
    %c20 = arith.constant 20 : index
    %15 = vector.load %arg1[%c0_16, %c0_17, %c20] : memref<1x16x362xf32, #tpu.memory_space<vmem>>, vector<1x16x324xf32>
    %16 = vector.shape_cast %15 : vector<1x16x324xf32> to vector<16x324xf32>
    %c80 = arith.constant 80 : index
    %c0_18 = arith.constant 0 : index
    %17 = vector.load %arg10[%c80, %c0_18] : memref<144x324xf32, #tpu.memory_space<vmem>>, vector<16x324xf32>
    tpu.vector_store %arg10[%c80, %c0_18], %16 {strides = array<i32>} : memref<144x324xf32, #tpu.memory_space<vmem>>, vector<16x324xf32>,
    %c0_19 = arith.constant 0 : index
    %c0_20 = arith.constant 0 : index
    %c36 = arith.constant 36 : index
    %18 = vector.load %arg1[%c0_19, %c0_20, %c36] : memref<1x16x362xf32, #tpu.memory_space<vmem>>, vector<1x16x324xf32>
    %19 = vector.shape_cast %18 : vector<1x16x324xf32> to vector<16x324xf32>
    %c96 = arith.constant 96 : index
    %c0_21 = arith.constant 0 : index
    %20 = vector.load %arg10[%c96, %c0_21] : memref<144x324xf32, #tpu.memory_space<vmem>>, vector<16x324xf32>
    tpu.vector_store %arg10[%c96, %c0_21], %19 {strides = array<i32>} : memref<144x324xf32, #tpu.memory_space<vmem>>, vector<16x324xf32>,
    %c0_22 = arith.constant 0 : index
    %c0_23 = arith.constant 0 : index
    %c37 = arith.constant 37 : index
    %21 = vector.load %arg1[%c0_22, %c0_23, %c37] : memref<1x16x362xf32, #tpu.memory_space<vmem>>, vector<1x16x324xf32>
    %22 = vector.shape_cast %21 : vector<1x16x324xf32> to vector<16x324xf32>
    %c112 = arith.constant 112 : index
    %c0_24 = arith.constant 0 : index
    %23 = vector.load %arg10[%c112, %c0_24] : memref<144x324xf32, #tpu.memory_space<vmem>>, vector<16x324xf32>
    tpu.vector_store %arg10[%c112, %c0_24], %22 {strides = array<i32>} : memref<144x324xf32, #tpu.memory_space<vmem>>, vector<16x324xf32>,
    %c0_25 = arith.constant 0 : index
    %c0_26 = arith.constant 0 : index
    %c38 = arith.constant 38 : index
    %24 = vector.load %arg1[%c0_25, %c0_26, %c38] : memref<1x16x362xf32, #tpu.memory_space<vmem>>, vector<1x16x324xf32>
    %25 = vector.shape_cast %24 : vector<1x16x324xf32> to vector<16x324xf32>
    %c128 = arith.constant 128 : index
    %c0_27 = arith.constant 0 : index
    %26 = vector.load %arg10[%c128, %c0_27] : memref<144x324xf32, #tpu.memory_space<vmem>>, vector<16x324xf32>
    tpu.vector_store %arg10[%c128, %c0_27], %25 {strides = array<i32>} : memref<144x324xf32, #tpu.memory_space<vmem>>, vector<16x324xf32>,
    %c0_28 = arith.constant 0 : index
    %c0_29 = arith.constant 0 : index
    %27 = vector.load %arg2[%c0_28, %c0_29] : memref<8x144xf32, #tpu.memory_space<vmem>>, vector<8x144xf32>
    %c0_30 = arith.constant 0 : index
    %c0_31 = arith.constant 0 : index
    %28 = vector.load %arg10[%c0_30, %c0_31] : memref<144x324xf32, #tpu.memory_space<vmem>>, vector<144x324xf32>
    %cst = arith.constant dense<0.000000e+00> : vector<8x324xf32>
    %29 = tpu.matmul %27, %28, %cst {dimension_numbers = #tpu.dot_dimension_numbers<[1], [0], [0], [1], [0, 0, 1, 1], [], []>} : vector<8x144xf32>, vector<144x324xf32>, vector<8x324xf32> -> vector<8x324xf32>
    %c0_32 = arith.constant 0 : index
    %c0_33 = arith.constant 0 : index
    %30 = vector.load %arg3[%c0_32, %c0_33] : memref<8x1xf32, #tpu.memory_space<vmem>>, vector<8x1xf32>
    %31 = vector.broadcast %30 : vector<8x1xf32> to vector<8x324xf32>
    %32 = arith.addf %29, %31 : vector<8x324xf32>
    %cst_34 = arith.constant 0.000000e+00 : f32
    %33 = vector.broadcast %cst_34 : f32 to vector<8x324xf32>
    %34 = arith.maximumf %32, %33 : vector<8x324xf32>
    %c0_35 = arith.constant 0 : index
    %c0_36 = arith.constant 0 : index
    %35 = vector.load %arg4[%c0_35, %c0_36] : memref<1x324xf32, #tpu.memory_space<vmem>>, vector<1x324xf32>
    %36 = vector.broadcast %35 : vector<1x324xf32> to vector<8x324xf32>
    %37 = arith.mulf %34, %36 : vector<8x324xf32>
    %cst_37 = arith.constant dense<0.000000e+00> : vector<8xf32>
    %38 = vector.multi_reduction <add>, %37, %cst_37 [1] : vector<8x324xf32> to vector<8xf32>
    %39 = vector.shape_cast %38 : vector<8xf32> to vector<8x1xf32>
    %cst_38 = arith.constant 3.906250e-03 : f32
    %40 = vector.broadcast %cst_38 : f32 to vector<8x1xf32>
    %41 = arith.mulf %39, %40 : vector<8x1xf32>
    %cst_39 = arith.constant 5.000000e-01 : f32
    %42 = vector.broadcast %cst_39 : f32 to vector<1x324xf32>
    %43 = arith.cmpf ogt, %35, %42 : vector<1x324xf32>
    %cst_40 = arith.constant 0xFF800000 : f32
    %44 = vector.shape_cast %43 : vector<1x324xi1> to vector<1x324xi1>
    %45 = vector.broadcast %44 : vector<1x324xi1> to vector<8x324xi1>
    %46 = vector.broadcast %cst_40 : f32 to vector<8x324xf32>
    %47 = arith.select %45, %34, %46 : vector<8x324xi1>, vector<8x324xf32>
    %cst_41 = arith.constant dense<0xFF800000> : vector<8xf32>
    %48 = vector.multi_reduction <maximumf>, %47, %cst_41 [1] : vector<8x324xf32> to vector<8xf32>
    %49 = vector.shape_cast %48 : vector<8xf32> to vector<8x1xf32>
    %50 = tpu.concatenate %41, %49 in 1 : vector<8x1xf32>, vector<8x1xf32> -> vector<8x2xf32>
    %c0_42 = arith.constant 0 : index
    %c0_43 = arith.constant 0 : index
    %51 = vector.load %arg5[%c0_42, %c0_43] : memref<2x8xf32, #tpu.memory_space<vmem>>, vector<2x8xf32>
    %cst_44 = arith.constant dense<0.000000e+00> : vector<2x2xf32>
    %52 = tpu.matmul %51, %50, %cst_44 {dimension_numbers = #tpu.dot_dimension_numbers<[1], [0], [0], [1], [0, 0, 1, 1], [], []>} : vector<2x8xf32>, vector<8x2xf32>, vector<2x2xf32> -> vector<2x2xf32>
    %c0_45 = arith.constant 0 : index
    %c0_46 = arith.constant 0 : index
    %53 = vector.load %arg6[%c0_45, %c0_46] : memref<2x1xf32, #tpu.memory_space<vmem>>, vector<2x1xf32>
    %54 = vector.broadcast %53 : vector<2x1xf32> to vector<2x2xf32>
    %55 = arith.addf %52, %54 : vector<2x2xf32>
    %cst_47 = arith.constant 0.000000e+00 : f32
    %56 = vector.broadcast %cst_47 : f32 to vector<2x2xf32>
    %57 = arith.maximumf %55, %56 : vector<2x2xf32>
    %c0_48 = arith.constant 0 : index
    %c0_49 = arith.constant 0 : index
    %58 = vector.load %arg7[%c0_48, %c0_49] : memref<8x2xf32, #tpu.memory_space<vmem>>, vector<8x2xf32>
    %cst_50 = arith.constant dense<0.000000e+00> : vector<8x2xf32>
    %59 = tpu.matmul %58, %57, %cst_50 {dimension_numbers = #tpu.dot_dimension_numbers<[1], [0], [0], [1], [0, 0, 1, 1], [], []>} : vector<8x2xf32>, vector<2x2xf32>, vector<8x2xf32> -> vector<8x2xf32>
    %c0_51 = arith.constant 0 : index
    %c0_52 = arith.constant 0 : index
    %60 = vector.load %arg8[%c0_51, %c0_52] : memref<8x1xf32, #tpu.memory_space<vmem>>, vector<8x1xf32>
    %61 = vector.broadcast %60 : vector<8x1xf32> to vector<8x2xf32>
    %62 = arith.addf %59, %61 : vector<8x2xf32>
    %63 = vector.extract_strided_slice %62 {offsets = [0, 0], sizes = [8, 1], strides = [1, 1]} : vector<8x2xf32> to vector<8x1xf32>
    %64 = vector.extract_strided_slice %62 {offsets = [0, 1], sizes = [8, 1], strides = [1, 1]} : vector<8x2xf32> to vector<8x1xf32>
    %65 = arith.addf %63, %64 : vector<8x1xf32>
    %66 = arith.negf %65 : vector<8x1xf32>
    %67 = math.exp %66 : vector<8x1xf32>
    %cst_53 = arith.constant 1.000000e+00 : f32
    %68 = vector.broadcast %cst_53 : f32 to vector<8x1xf32>
    %69 = arith.addf %68, %67 : vector<8x1xf32>
    %70 = arith.divf %68, %69 : vector<8x1xf32>
    %71 = vector.broadcast %70 : vector<8x1xf32> to vector<8x324xf32>
    %72 = arith.mulf %34, %71 : vector<8x324xf32>
    %c0_54 = arith.constant 0 : index
    %c0_55 = arith.constant 0 : index
    %c0_56 = arith.constant 0 : index
    %73 = vector.load %arg9[%c0_54, %c0_55, %c0_56] : memref<1x8x324xf32, #tpu.memory_space<vmem>>, vector<1x8x324xf32>
    %74 = vector.shape_cast %73 : vector<1x8x324xf32> to vector<8x324xf32>
    %75 = vector.shape_cast %72 : vector<8x324xf32> to vector<1x8x324xf32>
    tpu.vector_store %arg9[%c0_54, %c0_55, %c0_56], %75 {strides = array<i32>} : memref<1x8x324xf32, #tpu.memory_space<vmem>>, vector<1x8x324xf32>,
    return
  }
  func.func @transform_0(%arg0: i32) -> (i32, i32, i32) {
    %c0_i32 = arith.constant 0 : i32
    %c0_i32_0 = arith.constant 0 : i32
    %c0_i32_1 = arith.constant 0 : i32
    return %arg0, %c0_i32, %c0_i32_0 : i32, i32, i32
  }
  func.func @transform_1(%arg0: i32) -> (i32, i32) {
    %c0_i32 = arith.constant 0 : i32
    %c0_i32_0 = arith.constant 0 : i32
    %c0_i32_1 = arith.constant 0 : i32
    return %c0_i32, %c0_i32_0 : i32, i32
  }
  func.func @transform_2(%arg0: i32) -> (i32, i32) {
    %c0_i32 = arith.constant 0 : i32
    %c0_i32_0 = arith.constant 0 : i32
    %c0_i32_1 = arith.constant 0 : i32
    return %c0_i32, %c0_i32_0 : i32, i32
  }
  func.func @transform_3(%arg0: i32) -> (i32, i32) {
    %c0_i32 = arith.constant 0 : i32
    %c0_i32_0 = arith.constant 0 : i32
    %c0_i32_1 = arith.constant 0 : i32
    return %c0_i32, %c0_i32_0 : i32, i32
  }
  func.func @transform_4(%arg0: i32) -> (i32, i32) {
    %c0_i32 = arith.constant 0 : i32
    %c0_i32_0 = arith.constant 0 : i32
    %c0_i32_1 = arith.constant 0 : i32
    return %c0_i32, %c0_i32_0 : i32, i32
  }
  func.func @transform_5(%arg0: i32) -> (i32, i32) {
    %c0_i32 = arith.constant 0 : i32
    %c0_i32_0 = arith.constant 0 : i32
    %c0_i32_1 = arith.constant 0 : i32
    return %c0_i32, %c0_i32_0 : i32, i32
  }
  func.func @transform_6(%arg0: i32) -> (i32, i32) {
    %c0_i32 = arith.constant 0 : i32
    %c0_i32_0 = arith.constant 0 : i32
    %c0_i32_1 = arith.constant 0 : i32
    return %c0_i32, %c0_i32_0 : i32, i32
  }
  func.func @transform_7(%arg0: i32) -> (i32, i32) {
    %c0_i32 = arith.constant 0 : i32
    %c0_i32_0 = arith.constant 0 : i32
    %c0_i32_1 = arith.constant 0 : i32
    return %c0_i32, %c0_i32_0 : i32, i32
  }
  func.func @transform_8(%arg0: i32) -> (i32, i32, i32) {
    %c0_i32 = arith.constant 0 : i32
    %c0_i32_0 = arith.constant 0 : i32
    %c0_i32_1 = arith.constant 0 : i32
    return %arg0, %c0_i32, %c0_i32_0 : i32, i32, i32
  }
}

module attributes {stable_mosaic.version = 11 : i64} {
  func.func @_conv1x1_kernel(%arg0: i32, %arg1: memref<1x8x256xf32, #tpu.memory_space<vmem>>, %arg2: memref<8x8xf32, #tpu.memory_space<vmem>>, %arg3: memref<8x1xf32, #tpu.memory_space<vmem>>, %arg4: memref<1x8x256xf32, #tpu.memory_space<vmem>>) attributes {dimension_semantics = [#tpu.dimension_semantics<parallel>], iteration_bounds = array<i64: 2>, scalar_prefetch = 0 : i64, scratch_operands = 0 : i64, tpu.core_type = #tpu.core_type<tc>, window_params = [{transform_indices = @transform_0, window_bounds = array<i64: 1, 8, 256>}, {pipeline_mode = #tpu.pipeline_mode<synchronous>, transform_indices = @transform_1, window_bounds = array<i64: 8, 8>}, {pipeline_mode = #tpu.pipeline_mode<synchronous>, transform_indices = @transform_2, window_bounds = array<i64: 8, 1>}, {transform_indices = @transform_3, window_bounds = array<i64: 1, 8, 256>}]} {
    %c0 = arith.constant 0 : index
    %c0_0 = arith.constant 0 : index
    %0 = vector.load %arg2[%c0, %c0_0] : memref<8x8xf32, #tpu.memory_space<vmem>>, vector<8x8xf32>
    %c0_1 = arith.constant 0 : index
    %c0_2 = arith.constant 0 : index
    %c0_3 = arith.constant 0 : index
    %1 = vector.load %arg1[%c0_1, %c0_2, %c0_3] : memref<1x8x256xf32, #tpu.memory_space<vmem>>, vector<1x8x256xf32>
    %2 = vector.shape_cast %1 : vector<1x8x256xf32> to vector<8x256xf32>
    %cst = arith.constant dense<0.000000e+00> : vector<8x256xf32>
    %3 = tpu.matmul %0, %2, %cst {dimension_numbers = #tpu.dot_dimension_numbers<[1], [0], [0], [1], [0, 0, 1, 1], [], []>} : vector<8x8xf32>, vector<8x256xf32>, vector<8x256xf32> -> vector<8x256xf32>
    %c0_4 = arith.constant 0 : index
    %c0_5 = arith.constant 0 : index
    %4 = vector.load %arg3[%c0_4, %c0_5] : memref<8x1xf32, #tpu.memory_space<vmem>>, vector<8x1xf32>
    %5 = vector.broadcast %4 : vector<8x1xf32> to vector<8x256xf32>
    %6 = arith.addf %3, %5 : vector<8x256xf32>
    %c0_6 = arith.constant 0 : index
    %c0_7 = arith.constant 0 : index
    %c0_8 = arith.constant 0 : index
    %7 = vector.load %arg4[%c0_6, %c0_7, %c0_8] : memref<1x8x256xf32, #tpu.memory_space<vmem>>, vector<1x8x256xf32>
    %8 = vector.shape_cast %7 : vector<1x8x256xf32> to vector<8x256xf32>
    %9 = vector.shape_cast %6 : vector<8x256xf32> to vector<1x8x256xf32>
    tpu.vector_store %arg4[%c0_6, %c0_7, %c0_8], %9 {strides = array<i32>} : memref<1x8x256xf32, #tpu.memory_space<vmem>>, vector<1x8x256xf32>,
    return
  }
  func.func @transform_0(%arg0: i32) -> (i32, i32, i32) {
    %c0_i32 = arith.constant 0 : i32
    %c0_i32_0 = arith.constant 0 : i32
    %c0_i32_1 = arith.constant 0 : i32
    return %arg0, %c0_i32, %c0_i32_0 : i32, i32, i32
  }
  func.func @transform_1(%arg0: i32) -> (i32, i32) {
    %c0_i32 = arith.constant 0 : i32
    %c0_i32_0 = arith.constant 0 : i32
    %c0_i32_1 = arith.constant 0 : i32
    return %c0_i32, %c0_i32_0 : i32, i32
  }
  func.func @transform_2(%arg0: i32) -> (i32, i32) {
    %c0_i32 = arith.constant 0 : i32
    %c0_i32_0 = arith.constant 0 : i32
    %c0_i32_1 = arith.constant 0 : i32
    return %c0_i32, %c0_i32_0 : i32, i32
  }
  func.func @transform_3(%arg0: i32) -> (i32, i32, i32) {
    %c0_i32 = arith.constant 0 : i32
    %c0_i32_0 = arith.constant 0 : i32
    %c0_i32_1 = arith.constant 0 : i32
    return %arg0, %c0_i32, %c0_i32_0 : i32, i32, i32
  }
}

</mosaic_0001>

<bundles_post_ra>
// kernel: unet_forward.21
= control target key start
LH: loop header
LB: loop body
LE: loop exit
PB: predicated region body
PF: predicated region fallthrough
CT: control target
= control target key end

     0   :  { %s573_s12 = smov 0   ;;  %s656_s0 = inlined_call_operand.vmem [shape: f32[2,8,362], index: 0, kind: input, shape index: {}]   ;;  %s657_s1 = inlined_call_operand.vmem [shape: f32[8,72], index: 1, kind: input, shape index: {}]   ;;  %s658_s2 = inlined_call_operand.vmem [shape: f32[8,1], index: 2, kind: input, shape index: {}]   ;;  %s659_s3 = inlined_call_operand.vmem [shape: f32[2,8,324], index: 3, kind: output, shape index: {}]  }
   0x1 LB: > { %s505_s13 = sadd.s32 4294967295, %s542_s12   ;;  %p509_p0 = scmp.ge.s32.totalorder %s542_s12, 1  ;;  %s542_s12 = sphi %s573_s12, %s13_s12  }
   0x2   : > { %p137_p1 = scmp.lt.s32.totalorder %s542_s12, 3 }
   0x4   : > { %p138_p2 = pnand %p509_p0, %p137_p1 }
   0x5   : > { %p161_p3 = scmp.lt.s32.totalorder (!%p138_p2), %s505_s13, 1  ;;  %s544_s18 = smov (!%p138_p2), 90  }
   0x6   : > { %141 = sbr.rel (%p138_p2) target bundleno = 325 (0x145), region = 32  ;;  %s545_s19 = smov (!%p138_p2), 92  }
   0x7   : > { %s546_s20 = smov (!%p138_p2), 91   ;;  %s547_s21 = smov (!%p138_p2), 108  }
   0x8   : > { %s548_s22 = smov (!%p138_p2), 109   ;;  %s549_s23 = smov (!%p138_p2), 110  }
   0x9   : > { %s550_s24 = smov (!%p138_p2), 126   ;;  %s551_s25 = smov (!%p138_p2), 127  }
   0xb   : > { %s661_s13 = smov (!%p161_p3, %s505_s13), 1  ;;  %vm176_vm0 = vcmask 556032   ;;  %vm337_vm1 = vcmask 736256   ;;  %vm316_vm2 = vcmask 744448   ;;  %vm295_vm3 = vcmask 752640   ;;  %v346_v33 = vld [vmem:[%s657_s1] sm:$0xff] }
   0xc   : > { %s517_s14 = smul.u32 24, %s661_s13  ;;  %vm380_vm4 = vcmask 588800   ;;  %vm274_vm5 = vcmask 883712   ;;  %vm190_vm6 = vcmask 1039360   ;;  %v374_v34 = vld [vmem:[%s658_s2] sm:$0xff]  ;;  %v552_v37 = vmov 0  }
   0xd   : > { %535 = vset.pattern.permute.xlu0 %v552_v37  ;;  %vm253_vm7 = vcmask 891904   ;;  %vm232_vm8 = vcmask 900096   ;;  %vm211_vm9 = vcmask 1031168  }
   0xe   : > { %s165_s17 = scalar_lea.vmem %s656_s0, %s517_s14  ;;  %s170_s5 = scalar_lea.vmem %s659_s3, %s517_s14 }
   0xf   : > { %v327_v0 = vld [vmem:[%s165_s17 + $0x10] sm:$0xff]  ;;  %v589_v1 = vld [vmem:[%s165_s17] sm:$0xff]  ;;  %v591_v2 = vld [vmem:[%s165_s17 + $0x8] sm:$0xff] }
  0x10   : > { %335 = vrot.lane.b32.xlu0 %v327_v0, %s544_s18  ;;  %293 = vrot.lane.b32.xlu1 %v327_v0, %s545_s19  ;;  %177 = vst.msk [vmem:[#allocation2 + $0x10] sm:$0xff] %vm176_vm0, %v327_v0 }
  0x11   : > { %333 = vrot.lane.b32.xlu2 %v591_v2, %s544_s18 }
  0x17   : > { %v349_v32 = vld [vmem:[#allocation2 + $0x10] sm:$0xff] }
  0x18   : > { %314 = vrot.lane.b32.xlu0 %v327_v0, %s546_s20  ;;  %331 = vrot.lane.b32.xlu1 %v589_v1, %s544_s18 }
  0x19   : > { %272 = vrot.lane.b32.xlu2 %v327_v0, %s547_s21 }
  0x20   : > { %310 = vrot.lane.b32.xlu0 %v589_v1, %s546_s20  ;;  %312 = vrot.lane.b32.xlu1 %v591_v2, %s546_s20 }
  0x21   : > { %251 = vrot.lane.b32.xlu2 %v327_v0, %s548_s22 }
  0x28   : > { %291 = vrot.lane.b32.xlu1 %v591_v2, %s545_s19  ;;  %289 = vrot.lane.b32.xlu0 %v589_v1, %s545_s19 }
  0x29   : > { %230 = vrot.lane.b32.xlu2 %v327_v0, %s549_s23 }
  0x30   : > { %270 = vrot.lane.b32.xlu1 %v591_v2, %s547_s21  ;;  %268 = vrot.lane.b32.xlu0 %v589_v1, %s547_s21 }
  0x31   : > { %209 = vrot.lane.b32.xlu2 %v327_v0, %s550_s24 }
  0x38   : > { %249 = vrot.lane.b32.xlu1 %v591_v2, %s548_s22  ;;  %247 = vrot.lane.b32.xlu0 %v589_v1, %s548_s22 }
  0x39   : > { %188 = vrot.lane.b32.xlu2 %v327_v0, %s551_s25 }
  0x40   : > { %228 = vrot.lane.b32.xlu1 %v591_v2, %s549_s23  ;;  %226 = vrot.lane.b32.xlu0 %v589_v1, %s549_s23 }
  0x41   : > { %205 = vrot.lane.b32.xlu2 %v589_v1, %s550_s24 }
  0x48   : > { %207 = vrot.lane.b32.xlu0 %v591_v2, %s550_s24  ;;  %184 = vrot.lane.b32.xlu1 %v589_v1, %s551_s25 }
  0x49   : > { %186 = vrot.lane.b32.xlu2 %v591_v2, %s551_s25 }
  0x50   : > { %377 = vperm.xlu0 %535, %v374_v34  }
  0x6b   : > { %v334_v3 = vpop.permute.xlu2 %333 }
  0x73   : > { %v610_v4 = vpop.permute.xlu2 %272 }
  0x74   : > { %282 = vst.msk [vmem:[#allocation2 + $0x88] sm:$0xff] %vm176_vm0, %v610_v4 }
  0x7b   : > { %v614_v5 = vpop.permute.xlu2 %251  ;;  %v364_v22 = vld [vmem:[#allocation2 + $0x88] sm:$0xff] }
  0x7c   : > { %261 = vst.msk [vmem:[#allocation2 + $0x70] sm:$0xff] %vm176_vm0, %v614_v5 }
  0x82   : > { %v336_v6 = vpop.permute.xlu0 %335  ;;  %v294_v7 = vpop.permute.xlu1 %293 }
  0x83   : > { %v339_v8 = vsel %vm337_vm1, %v334_v3, %v336_v6  ;;  %345 = vst.msk [vmem:[#allocation2 + $0xd0] sm:$0xff] %vm176_vm0, %v336_v6  ;;  %v619_v9 = vpop.permute.xlu2 %230  ;;  %v361_v23 = vld [vmem:[#allocation2 + $0x70] sm:$0xff] }
  0x84   : > { %411 = vmatpush.msra.mxu1 %v339_v8  ;;  %303 = vst.msk [vmem:[#allocation2 + $0xa0] sm:$0xff] %vm176_vm0, %v294_v7 }
  0x85   : > { %240 = vst.msk [vmem:[#allocation2 + $0x58] sm:$0xff] %vm176_vm0, %v619_v9 }
  0x8a   : > { %v315_v10 = vpop.permute.xlu0 %314  ;;  %v332_v11 = vpop.permute.xlu1 %331  ;;  %v373_v12 = vld [vmem:[#allocation2 + $0xd0] sm:$0xff] }
  0x8b   : > { %324 = vst.msk [vmem:[#allocation2 + $0xb8] sm:$0xff] %vm176_vm0, %v315_v10  ;;  %v338_v13 = vsel %vm337_vm1, %v332_v11, %v334_v3  ;;  %431 = vmatpush.msra.mxu2 %v373_v12  ;;  %v625_v14 = vpop.permute.xlu2 %209  ;;  %v367_v21 = vld [vmem:[#allocation2 + $0xa0] sm:$0xff] }
  0x8c   : > { %391 = vmatpush.msra.mxu0 %v338_v13  ;;  %219 = vst.msk [vmem:[#allocation2 + $0x40] sm:$0xff] %vm176_vm0, %v625_v14  ;;  %v358_v24 = vld [vmem:[#allocation2 + $0x58] sm:$0xff] }
  0x92   : > { %v311_v15 = vpop.permute.xlu0 %310  ;;  %v313_v16 = vpop.permute.xlu1 %312  ;;  %v370_v17 = vld [vmem:[#allocation2 + $0xb8] sm:$0xff] }
  0x93   : > { %v317_v18 = vsel %vm316_vm2, %v311_v15, %v313_v16  ;;  %v318_v19 = vsel %vm316_vm2, %v313_v16, %v315_v10  ;;  %432 = vmatpush.msra.mxu2 %v370_v17  ;;  %v189_v20 = vpop.permute.xlu2 %188  ;;  %v355_v27 = vld [vmem:[#allocation2 + $0x40] sm:$0xff] }
  0x94   : > { %392 = vmatpush.msra.mxu0 %v317_v18  ;;  %412 = vmatpush.msra.mxu1 %v318_v19  ;;  %198 = vst.msk [vmem:[#allocation2 + $0x28] sm:$0xff] %vm176_vm0, %v189_v20 }
  0x95   : > { %433 = vmatpush.msra.mxu2 %v367_v21 }
  0x97   : > { %434 = vmatpush.msra.mxu2 %v364_v22 }
  0x99   : > { %435 = vmatpush.msra.mxu2 %v361_v23 }
  0x9a   : > { %v292_v25 = vpop.permute.xlu1 %291  ;;  %v290_v26 = vpop.permute.xlu0 %289 }
  0x9b   : > { %v297_v28 = vsel %vm295_vm3, %v292_v25, %v294_v7  ;;  %v296_v29 = vsel %vm295_vm3, %v290_v26, %v292_v25  ;;  %v206_v30 = vpop.permute.xlu2 %205  ;;  %436 = vmatpush.msra.mxu2 %v358_v24  ;;  %v352_v31 = vld [vmem:[#allocation2 + $0x28] sm:$0xff] }
  0x9c   : > { %393 = vmatpush.msra.mxu0 %v296_v29  ;;  %413 = vmatpush.msra.mxu1 %v297_v28 }
  0x9d   : > { %437 = vmatpush.msra.mxu2 %v355_v27 }
  0x9f   : > { %438 = vmatpush.msra.mxu2 %v352_v31 }
  0xa1   : > { %439 = vmatpush.msra.mxu2 %v349_v32 }
  0xa2   : > { %v271_v35 = vpop.permute.xlu1 %270  ;;  %v269_v36 = vpop.permute.xlu0 %268  ;;  %514 = vmatmul.msk.f32.vlgmr.msra.gmra.mxu2 %vm380_vm4, %v346_v33 }
  0xa3   : > { %v276_v38 = vsel %vm274_vm5, %v271_v35, %v610_v4  ;;  %v275_v39 = vsel %vm274_vm5, %v269_v36, %v271_v35  ;;  %v187_v40 = vpop.permute.xlu2 %186 }
  0xa4   : > { %394 = vmatpush.msra.mxu0 %v275_v39  ;;  %414 = vmatpush.msra.mxu1 %v276_v38  ;;  %v192_v41 = vsel %vm190_vm6, %v187_v40, %v189_v20 }
  0xaa   : > { %v250_v42 = vpop.permute.xlu1 %249  ;;  %v248_v43 = vpop.permute.xlu0 %247 }
  0xab   : > { %v255_v44 = vsel %vm253_vm7, %v250_v42, %v614_v5  ;;  %v254_v45 = vsel %vm253_vm7, %v248_v43, %v250_v42 }
  0xac   : > { %395 = vmatpush.msra.mxu0 %v254_v45  ;;  %415 = vmatpush.msra.mxu1 %v255_v44 }
  0xb2   : > { %v229_v46 = vpop.permute.xlu1 %228  ;;  %v227_v47 = vpop.permute.xlu0 %226 }
  0xb3   : > { %v234_v48 = vsel %vm232_vm8, %v229_v46, %v619_v9  ;;  %v233_v49 = vsel %vm232_vm8, %v227_v47, %v229_v46 }
  0xb4   : > { %396 = vmatpush.msra.mxu0 %v233_v49  ;;  %416 = vmatpush.msra.mxu1 %v234_v48 }
  0xba   : > { %v208_v50 = vpop.permute.xlu0 %207  ;;  %v185_v51 = vpop.permute.xlu1 %184 }
  0xbb   : > { %v212_v52 = vsel %vm211_vm9, %v206_v30, %v208_v50  ;;  %v213_v53 = vsel %vm211_vm9, %v208_v50, %v625_v14  ;;  %v191_v54 = vsel %vm190_vm6, %v185_v51, %v187_v40 }
  0xbc   : > { %397 = vmatpush.msra.mxu0 %v212_v52  ;;  %417 = vmatpush.msra.mxu1 %v213_v53 }
  0xbe   : > { %398 = vmatpush.msra.mxu0 %v191_v54  ;;  %418 = vmatpush.msra.mxu1 %v192_v41 }
  0xc0   : > { %399 = vmatpush.msra.mxu0 %v589_v1  ;;  %419 = vmatpush.msra.mxu1 %v591_v2 }
  0xc1   : > { %512 = vmatmul.msk.f32.vlgmr.msra.gmra.mxu0 %vm380_vm4, %v346_v33  ;;  %513 = vmatmul.msk.f32.vlgmr.msra.gmra.mxu1 %vm380_vm4, %v346_v33 }
  0xc2   : > { %v378_v55 = vpop.permute.xlu0 %377 }
 0x125   : > { %v441_v56 = vpop.f32.mrf.mxu2 }
 0x126   : > { %v442_v57 = vadd.f32 %v441_v56, %v378_v55 }
 0x128   : > { %v446_v58 = vmax.f32 %v442_v57, 0.0 }
 0x12a   : > { %449 = vst.msk [vmem:[%s170_s5 + $0x10] sm:$0xff] %vm176_vm0, %v446_v58 }
 0x13e   : > { %v401_v59 = vpop.f32.mrf.mxu0  ;;  %v421_v60 = vpop.f32.mrf.mxu1 }
 0x13f   : > { %v402_v61 = vadd.f32 %v401_v59, %v378_v55  ;;  %v422_v62 = vadd.f32 %v421_v60, %v378_v55 }
 0x141   : > { %v444_v63 = vmax.f32 %v402_v61, 0.0  ;;  %v445_v0 = vmax.f32 %v422_v62, 0.0 }
 0x143   : > { %447 = vst [vmem:[%s170_s5] sm:$0xff] %v444_v63 }
 0x144   : > { %448 = vst [vmem:[%s170_s5 + $0x8] sm:$0xff] %v445_v0 }
 0x145 PF: > { %s13_s12 = sadd.s32 1, %s542_s12  }
 0x146   : > { %p10_p4 = scmp.ge.s32.totalorder %s13_s12, 4  }
 0x148   :  { %12 = sbr.rel (!%p10_p4) target bundleno = 1 (0x1), region = 62 }

// kernel: unet_forward.22
= control target key start
LH: loop header
LB: loop body
LE: loop exit
PB: predicated region body
PF: predicated region fallthrough
CT: control target
= control target key end

     0   :  { %s872_s27 = smov 0   ;;  %s981_s0 = inlined_call_operand.vmem [shape: f32[2,8,362], index: 0, kind: input, shape index: {}]   ;;  %s982_s1 = inlined_call_operand.vmem [shape: f32[8,72], index: 1, kind: input, shape index: {}]   ;;  %s983_s2 = inlined_call_operand.vmem [shape: f32[8,1], index: 2, kind: input, shape index: {}]   ;;  %s984_s3 = inlined_call_operand.vmem [shape: f32[1,324], index: 3, kind: input, shape index: {}]   ;;  %s985_s4 = inlined_call_operand.vmem [shape: f32[2,8], index: 4, kind: input, shape index: {}]   ;;  %s986_s5 = inlined_call_operand.vmem [shape: f32[2,1], index: 5, kind: input, shape index: {}]   ;;  %s987_s6 = inlined_call_operand.vmem [shape: f32[8,2], index: 6, kind: input, shape index: {}]   ;;  %s988_s7 = inlined_call_operand.vmem [shape: f32[8,1], index: 7, kind: input, shape index: {}]   ;;  %s989_s8 = inlined_call_operand.vmem [shape: f32[2,8,324], index: 8, kind: output, shape index: {}]  }
   0x1 LB: > { %s771_s28 = sadd.s32 4294967295, %s816_s27   ;;  %p775_p0 = scmp.ge.s32.totalorder %s816_s27, 1  ;;  %s816_s27 = sphi %s872_s27, %s18_s27  }
   0x2   : > { %p262_p1 = scmp.lt.s32.totalorder %s816_s27, 3 }
   0x4   : > { %p263_p2 = pnand %p775_p0, %p262_p1 }
   0x5   : > { %p296_p3 = scmp.lt.s32.totalorder (!%p263_p2), %s771_s28, 1  ;;  %s818_s11 = smov (!%p263_p2), 90  }
   0x6   : > { %266 = sbr.rel (%p263_p2) target bundleno = 983 (0x3d7), region = 52  ;;  %s819_s12 = smov (!%p263_p2), 92  }
   0x7   : > { %s820_s13 = smov (!%p263_p2), 91   ;;  %s821_s14 = smov (!%p263_p2), 108  }
   0x8   : > { %s822_s15 = smov (!%p263_p2), 109   ;;  %s823_s16 = smov (!%p263_p2), 110  }
   0x9   : > { %s824_s17 = smov (!%p263_p2), 126   ;;  %s825_s18 = smov (!%p263_p2), 127  }
   0xb   : > { %s991_s28 = smov (!%p296_p3, %s771_s28), 1  ;;  %vm311_vm0 = vcmask 556032   ;;  %vm472_vm1 = vcmask 736256   ;;  %vm451_vm2 = vcmask 744448   ;;  %vm430_vm3 = vcmask 752640   ;;  %v509_v31 = vld [vmem:[%s983_s2] sm:$0xff] }
   0xc   : > { %s787_s29 = smul.u32 24, %s991_s28  ;;  %v826_v33 = vmov 0   ;;  %v481_v35 = vld [vmem:[%s982_s1] sm:$0xff]  ;;  %vm515_vm4 = vcmask 588800   ;;  %vm409_vm5 = vcmask 883712   ;;  %vm325_vm6 = vcmask 1039360  }
   0xd   : > { %805 = vset.pattern.permute.xlu0 %v826_v33  ;;  %v615_v41 = vld [vmem:[%s986_s5] sm:$0x3]  ;;  %vm388_vm7 = vcmask 891904   ;;  %vm367_vm8 = vcmask 900096   ;;  %vm346_vm9 = vcmask 1031168   ;;  %vm612_vm14 = vcmask 7168  }
   0xe   : > { %s300_s10 = scalar_lea.vmem %s981_s0, %s787_s29  ;;  %v647_v47 = vld [vmem:[%s988_s7] sm:$0xff]  ;;  %vm621_vm15 = vcmask 64512  }
   0xf   : > { %v462_v0 = vld [vmem:[%s300_s10 + $0x10] sm:$0xff]  ;;  %v888_v1 = vld [vmem:[%s300_s10] sm:$0xff]  ;;  %v890_v2 = vld [vmem:[%s300_s10 + $0x8] sm:$0xff] }
  0x10   : > { %470 = vrot.lane.b32.xlu0 %v462_v0, %s818_s11  ;;  %428 = vrot.lane.b32.xlu1 %v462_v0, %s819_s12  ;;  %312 = vst.msk [vmem:[#allocation2 + $0x10] sm:$0xff] %vm311_vm0, %v462_v0  ;;  %v579_v57 = vld [vmem:[%s984_s3] sm:$0x7] }
  0x11   : > { %468 = vrot.lane.b32.xlu2 %v890_v2, %s818_s11  ;;  %vm596_vm10 = vcmp.gt.f32.partialorder %v579_v57, 0.5 }
  0x12   : > { %v597_v58 = vsel %vm596_vm10, 1, %v826_v33 }
  0x13   : > { %v600_v59 = vperm.slane %v597_v58, 2  ;;  %v598_v63 = vperm.slane %v597_v58, 0 }
  0x15   : > { %vm603_vm11 = vcmp.eq.s32.totalorder %v600_v59, 1  ;;  %vm601_vm12 = vcmp.eq.s32.totalorder %v598_v63, 1 }
  0x17   : > { %v484_v34 = vld [vmem:[#allocation2 + $0x10] sm:$0xff] }
  0x18   : > { %449 = vrot.lane.b32.xlu0 %v462_v0, %s820_s13  ;;  %466 = vrot.lane.b32.xlu1 %v888_v1, %s818_s11 }
  0x19   : > { %407 = vrot.lane.b32.xlu2 %v462_v0, %s821_s14 }
  0x20   : > { %445 = vrot.lane.b32.xlu0 %v888_v1, %s820_s13  ;;  %447 = vrot.lane.b32.xlu1 %v890_v2, %s820_s13 }
  0x21   : > { %386 = vrot.lane.b32.xlu2 %v462_v0, %s822_s15 }
  0x28   : > { %426 = vrot.lane.b32.xlu1 %v890_v2, %s819_s12  ;;  %424 = vrot.lane.b32.xlu0 %v888_v1, %s819_s12 }
  0x29   : > { %365 = vrot.lane.b32.xlu2 %v462_v0, %s823_s16 }
  0x30   : > { %405 = vrot.lane.b32.xlu1 %v890_v2, %s821_s14  ;;  %403 = vrot.lane.b32.xlu0 %v888_v1, %s821_s14 }
  0x31   : > { %344 = vrot.lane.b32.xlu2 %v462_v0, %s824_s17 }
  0x38   : > { %384 = vrot.lane.b32.xlu1 %v890_v2, %s822_s15  ;;  %382 = vrot.lane.b32.xlu0 %v888_v1, %s822_s15 }
  0x39   : > { %323 = vrot.lane.b32.xlu2 %v462_v0, %s825_s18  ;;  %v599_v0 = vperm.slane %v597_v58, 1 }
  0x3b   : > { %vm602_vm13 = vcmp.eq.s32.totalorder %v599_v0, 1 }
  0x40   : > { %363 = vrot.lane.b32.xlu1 %v890_v2, %s823_s16  ;;  %361 = vrot.lane.b32.xlu0 %v888_v1, %s823_s16  ;;  %s305_s16 = scalar_lea.vmem %s989_s8, %s787_s29 }
  0x41   : > { %340 = vrot.lane.b32.xlu2 %v888_v1, %s824_s17 }
  0x48   : > { %342 = vrot.lane.b32.xlu0 %v890_v2, %s824_s17  ;;  %319 = vrot.lane.b32.xlu1 %v888_v1, %s825_s18 }
  0x49   : > { %321 = vrot.lane.b32.xlu2 %v890_v2, %s825_s18 }
  0x50   : > { %512 = vperm.xlu0 %805, %v509_v31  }
  0x58   : > { %618 = vperm.xlu0 %805, %v615_v41  }
  0x60   : > { %650 = vperm.xlu0 %805, %v647_v47  }
  0x6b   : > { %v469_v3 = vpop.permute.xlu2 %468 }
  0x73   : > { %v912_v4 = vpop.permute.xlu2 %407 }
  0x74   : > { %417 = vst.msk [vmem:[#allocation2 + $0x88] sm:$0xff] %vm311_vm0, %v912_v4 }
  0x7b   : > { %v916_v5 = vpop.permute.xlu2 %386  ;;  %v499_v22 = vld [vmem:[#allocation2 + $0x88] sm:$0xff] }
  0x7c   : > { %396 = vst.msk [vmem:[#allocation2 + $0x70] sm:$0xff] %vm311_vm0, %v916_v5 }
  0x82   : > { %v471_v6 = vpop.permute.xlu0 %470  ;;  %v429_v7 = vpop.permute.xlu1 %428 }
  0x83   : > { %v474_v8 = vsel %vm472_vm1, %v469_v3, %v471_v6  ;;  %480 = vst.msk [vmem:[#allocation2 + $0xd0] sm:$0xff] %vm311_vm0, %v471_v6  ;;  %v921_v9 = vpop.permute.xlu2 %365  ;;  %v496_v23 = vld [vmem:[#allocation2 + $0x70] sm:$0xff] }
  0x84   : > { %546 = vmatpush.msra.mxu1 %v474_v8  ;;  %438 = vst.msk [vmem:[#allocation2 + $0xa0] sm:$0xff] %vm311_vm0, %v429_v7 }
  0x85   : > { %375 = vst.msk [vmem:[#allocation2 + $0x58] sm:$0xff] %vm311_vm0, %v921_v9 }
  0x8a   : > { %v450_v10 = vpop.permute.xlu0 %449  ;;  %v467_v11 = vpop.permute.xlu1 %466  ;;  %v508_v12 = vld [vmem:[#allocation2 + $0xd0] sm:$0xff] }
  0x8b   : > { %459 = vst.msk [vmem:[#allocation2 + $0xb8] sm:$0xff] %vm311_vm0, %v450_v10  ;;  %v473_v13 = vsel %vm472_vm1, %v467_v11, %v469_v3  ;;  %566 = vmatpush.msra.mxu2 %v508_v12  ;;  %v927_v14 = vpop.permute.xlu2 %344  ;;  %v502_v21 = vld [vmem:[#allocation2 + $0xa0] sm:$0xff]  ;;  %v582_v3 = vperm.slane %v579_v57, 1  ;;  %vm657_vm1 = vcmask 1041408  }
  0x8c   : > { %526 = vmatpush.msra.mxu0 %v473_v13  ;;  %354 = vst.msk [vmem:[#allocation2 + $0x40] sm:$0xff] %vm311_vm0, %v927_v14  ;;  %v493_v24 = vld [vmem:[#allocation2 + $0x58] sm:$0xff] }
  0x92   : > { %v446_v15 = vpop.permute.xlu0 %445  ;;  %v448_v16 = vpop.permute.xlu1 %447  ;;  %v505_v17 = vld [vmem:[#allocation2 + $0xb8] sm:$0xff] }
  0x93   : > { %v452_v18 = vsel %vm451_vm2, %v446_v15, %v448_v16  ;;  %v453_v19 = vsel %vm451_vm2, %v448_v16, %v450_v10  ;;  %567 = vmatpush.msra.mxu2 %v505_v17  ;;  %v324_v20 = vpop.permute.xlu2 %323  ;;  %v490_v27 = vld [vmem:[#allocation2 + $0x40] sm:$0xff]  ;;  %vm653_vm2 = vcmask 15360  }
  0x94   : > { %527 = vmatpush.msra.mxu0 %v452_v18  ;;  %547 = vmatpush.msra.mxu1 %v453_v19  ;;  %333 = vst.msk [vmem:[#allocation2 + $0x28] sm:$0xff] %vm311_vm0, %v324_v20 }
  0x95   : > { %568 = vmatpush.msra.mxu2 %v502_v21 }
  0x97   : > { %569 = vmatpush.msra.mxu2 %v499_v22 }
  0x99   : > { %570 = vmatpush.msra.mxu2 %v496_v23  ;;  %v614_v23 = vld [vmem:[%s985_s4] sm:$0x3] }
  0x9a   : > { %v427_v25 = vpop.permute.xlu1 %426  ;;  %v425_v26 = vpop.permute.xlu0 %424 }
  0x9b   : > { %v432_v28 = vsel %vm430_vm3, %v427_v25, %v429_v7  ;;  %v431_v29 = vsel %vm430_vm3, %v425_v26, %v427_v25  ;;  %v341_v30 = vpop.permute.xlu2 %340  ;;  %571 = vmatpush.msra.mxu2 %v493_v24  ;;  %v487_v32 = vld [vmem:[#allocation2 + $0x28] sm:$0xff] }
  0x9c   : > { %528 = vmatpush.msra.mxu0 %v431_v29  ;;  %548 = vmatpush.msra.mxu1 %v432_v28  ;;  %v646_v29 = vld [vmem:[%s987_s6] sm:$0xff] }
  0x9d   : > { %572 = vmatpush.msra.mxu2 %v490_v27 }
  0x9f   : > { %573 = vmatpush.msra.mxu2 %v487_v32 }
  0xa1   : > { %574 = vmatpush.msra.mxu2 %v484_v34 }
  0xa2   : > { %v406_v36 = vpop.permute.xlu1 %405  ;;  %v404_v37 = vpop.permute.xlu0 %403  ;;  %780 = vmatmul.msk.f32.vlgmr.msra.gmra.mxu2 %vm515_vm4, %v481_v35 }
  0xa3   : > { %v411_v38 = vsel %vm409_vm5, %v406_v36, %v912_v4  ;;  %v410_v39 = vsel %vm409_vm5, %v404_v37, %v406_v36  ;;  %v322_v40 = vpop.permute.xlu2 %321 }
  0xa4   : > { %529 = vmatpush.msra.mxu0 %v410_v39  ;;  %549 = vmatpush.msra.mxu1 %v411_v38  ;;  %v327_v42 = vsel %vm325_vm6, %v322_v40, %v324_v20 }
  0xaa   : > { %v385_v43 = vpop.permute.xlu1 %384  ;;  %v383_v44 = vpop.permute.xlu0 %382 }
  0xab   : > { %v390_v45 = vsel %vm388_vm7, %v385_v43, %v916_v5  ;;  %v389_v46 = vsel %vm388_vm7, %v383_v44, %v385_v43 }
  0xac   : > { %530 = vmatpush.msra.mxu0 %v389_v46  ;;  %550 = vmatpush.msra.mxu1 %v390_v45 }
  0xb2   : > { %v364_v48 = vpop.permute.xlu1 %363  ;;  %v362_v49 = vpop.permute.xlu0 %361 }
  0xb3   : > { %v369_v50 = vsel %vm367_vm8, %v364_v48, %v921_v9  ;;  %v368_v51 = vsel %vm367_vm8, %v362_v49, %v364_v48 }
  0xb4   : > { %531 = vmatpush.msra.mxu0 %v368_v51  ;;  %551 = vmatpush.msra.mxu1 %v369_v50 }
  0xba   : > { %v343_v52 = vpop.permute.xlu0 %342  ;;  %v320_v53 = vpop.permute.xlu1 %319 }
  0xbb   : > { %v347_v54 = vsel %vm346_vm9, %v341_v30, %v343_v52  ;;  %v348_v55 = vsel %vm346_vm9, %v343_v52, %v927_v14  ;;  %v326_v56 = vsel %vm325_vm6, %v320_v53, %v322_v40 }
  0xbc   : > { %532 = vmatpush.msra.mxu0 %v347_v54  ;;  %552 = vmatpush.msra.mxu1 %v348_v55 }
  0xbe   : > { %533 = vmatpush.msra.mxu0 %v326_v56  ;;  %553 = vmatpush.msra.mxu1 %v327_v42 }
  0xc0   : > { %534 = vmatpush.msra.mxu0 %v888_v1  ;;  %554 = vmatpush.msra.mxu1 %v890_v2  ;;  %v583_v1 = vperm.slane %v579_v57, 2  ;;  %v581_v2 = vperm.slane %v579_v57, 0 }
  0xc1   : > { %778 = vmatmul.msk.f32.vlgmr.msra.gmra.mxu0 %vm515_vm4, %v481_v35  ;;  %779 = vmatmul.msk.f32.vlgmr.msra.gmra.mxu1 %vm515_vm4, %v481_v35 }
  0xc2   : > { %v513_v61 = vpop.permute.xlu0 %512 }
  0xca   : > { %v619_v25 = vpop.permute.xlu0 %618 }
  0xd2   : > { %v651_v30 = vpop.permute.xlu0 %650 }
 0x125   : > { %v576_v60 = vpop.f32.mrf.mxu2 }
 0x126   : > { %v958_v62 = vadd.f32 %v576_v60, %v513_v61 }
 0x128   : > { %v606_v4 = vsel %vm603_vm11, %v958_v62, -inf  ;;  %v589_v7 = vmul.f32 %v583_v1, %v958_v62 }
 0x129   : > { %v607_v10 = vsel %vm311_vm0, %v606_v4, -inf }
 0x12a   : > { %v591_v16 = vsel %vm311_vm0, %v589_v7, 0.0 }
 0x13e   : > { %v536_v5 = vpop.f32.mrf.mxu0  ;;  %v556_v6 = vpop.f32.mrf.mxu1 }
 0x13f   : > { %v537_v8 = vadd.f32 %v536_v5, %v513_v61  ;;  %v557_v9 = vadd.f32 %v556_v6, %v513_v61 }
 0x141   : > { %v587_v11 = vmul.f32 %v581_v2, %v537_v8  ;;  %v588_v12 = vmul.f32 %v582_v3, %v557_v9  ;;  %v604_v13 = vsel %vm601_vm12, %v537_v8, -inf  ;;  %v605_v14 = vsel %vm602_vm13, %v557_v9, -inf }
 0x142   : > { %v608_v15 = vmax.f32 %v604_v13, %v605_v14 }
 0x143   : > { %v590_v17 = vadd.f32 %v588_v12, %v587_v11 }
 0x144   : > { %v609_v18 = vmax.f32 %v608_v15, %v607_v10 }
 0x145   : > { %v592_v19 = vadd.f32 %v591_v16, %v590_v17 }
 0x146   : > { %610 = vmax.xlane.f32.xlu2 %v609_v18 }
 0x147   : > { %593 = vadd.xlane.f32.xlu1 %v592_v19 }
 0x1b9   : > { %v611_v22 = vpop.xlane.xlu2 %610 }
 0x1ba   : > { %v594_v20 = vpop.xlane.xlu1 %593 }
 0x1bb   : > { %v595_v21 = vmul.f32 0.00390625, %v594_v20 }
 0x1bd   : > { %v613_v24 = vsel %vm612_vm14, %v595_v21, %v611_v22 }
 0x1be   : > { %640 = vmatpush.msra.mxu3 %v613_v24 }
 0x1bf   : > { %781 = vmatmul.msk.f32.vlgmr.msra.gmra.mxu3 %vm621_vm15, %v614_v23 }
 0x242   : > { %v642_v26 = vpop.f32.mrf.mxu3 }
 0x243   : > { %v643_v27 = vadd.f32 %v642_v26, %v619_v25 }
 0x245   : > { %v645_v28 = vmax.f32 %v643_v27, 0.0 }
 0x247   : > { %782 = vmatpush.msk.msrb.mxu3 %vm657_vm1, %v645_v28 }
 0x248   : > { %783 = vmatmul.msk.f32.vlgmr.msrb.gmra.mxu3 %vm653_vm2, %v646_v29 }
 0x2cb   : > { %v678_v31 = vpop.f32.mrf.mxu3 }
 0x2cc   : > { %v679_v32 = vadd.f32 %v678_v31, %v651_v30 }
 0x2ce   : > { %682 = vrot.lane.b32.xlu0 %v679_v32, %s825_s18 }
 0x340   : > { %v683_v33 = vpop.permute.xlu0 %682 }
 0x341   : > { %v685_v34 = vadd.f32 %v683_v33, %v679_v32 }
 0x343   : > { %v784_v35 = vmul.f32 -1.442695, %v685_v34 }
 0x345   : > { %806 = vpow2.f32 %v784_v35 }
 0x34b   : > { %v807_v36 = vpop.eup %806 }
 0x34c   : > { %v689_v37 = vadd.f32 1.0, %v807_v36 }
 0x34e   : > { %808 = vrcp.f32 %v689_v37  ;;  %v701_v41 = vand.u32 2147483648, %v689_v37  ;;  %v699_v43 = vand.u32 2147483647, %v689_v37  ;;  %vm695_vm4 = vweird.f32 %v689_v37 }
 0x350   : > { %v702_v45 = vor.u32 1.1754944e-38, %v701_v41  ;;  %vm700_vm6 = vcmp.eq.f32.partialorder %v699_v43, 8.507059e+37 }
 0x354   : > { %v809_v38 = vpop.eup %808 }
 0x355   : > { %v691_v39 = vmul.f32 %v809_v38, %v689_v37  ;;  %vm696_vm3 = vweird.f32 %v809_v38 }
 0x356   : > { %vm697_vm5 = vmor %vm695_vm4, %vm696_vm3 }
 0x357   : > { %v692_v40 = vsub.f32 1.0, %v691_v39 }
 0x359   : > { %v693_v42 = vmul.f32 %v809_v38, %v692_v40 }
 0x35b   : > { %v694_v44 = vadd.f32 %v809_v38, %v693_v42 }
 0x35d   : > { %v698_v46 = vsel %vm697_vm5, %v809_v38, %v694_v44 }
 0x35e   : > { %v703_v47 = vsel %vm700_vm6, %v702_v45, %v698_v46 }
 0x35f   : > { %707 = vperm.xlu0 %805, %v703_v47  }
 0x3d1   : > { %v708_v48 = vpop.permute.xlu0 %707 }
 0x3d2   : > { %v710_v49 = vmul.f32 %v708_v48, %v537_v8  ;;  %v711_v50 = vmul.f32 %v708_v48, %v557_v9  ;;  %v712_v51 = vmul.f32 %v708_v48, %v958_v62 }
 0x3d4   : > { %713 = vst [vmem:[%s305_s16] sm:$0xff] %v710_v49 }
 0x3d5   : > { %714 = vst [vmem:[%s305_s16 + $0x8] sm:$0xff] %v711_v50 }
 0x3d6   : > { %715 = vst.msk [vmem:[%s305_s16 + $0x10] sm:$0xff] %vm311_vm0, %v712_v51 }
 0x3d7 PF: > { %s18_s27 = sadd.s32 1, %s816_s27  }
 0x3d8   : > { %p15_p4 = scmp.ge.s32.totalorder %s18_s27, 4  }
 0x3da   :  { %17 = sbr.rel (!%p15_p4) target bundleno = 1 (0x1), region = 82 }

// kernel: unet_forward.20
= control target key start
LH: loop header
LB: loop body
LE: loop exit
PB: predicated region body
PF: predicated region fallthrough
CT: control target
= control target key end

     0   :  { %s875_s27 = smov 0   ;;  %s984_s0 = inlined_call_operand.vmem [shape: f32[2,8,362], index: 0, kind: input, shape index: {}]   ;;  %s985_s1 = inlined_call_operand.vmem [shape: f32[8,72], index: 1, kind: input, shape index: {}]   ;;  %s986_s2 = inlined_call_operand.vmem [shape: f32[8,1], index: 2, kind: input, shape index: {}]   ;;  %s987_s3 = inlined_call_operand.vmem [shape: f32[1,324], index: 3, kind: input, shape index: {}]   ;;  %s988_s4 = inlined_call_operand.vmem [shape: f32[2,8], index: 4, kind: input, shape index: {}]   ;;  %s989_s5 = inlined_call_operand.vmem [shape: f32[2,1], index: 5, kind: input, shape index: {}]   ;;  %s990_s6 = inlined_call_operand.vmem [shape: f32[8,2], index: 6, kind: input, shape index: {}]   ;;  %s991_s7 = inlined_call_operand.vmem [shape: f32[8,1], index: 7, kind: input, shape index: {}]   ;;  %s992_s8 = inlined_call_operand.vmem [shape: f32[2,8,324], index: 8, kind: output, shape index: {}]  }
   0x1 LB: > { %s774_s28 = sadd.s32 4294967295, %s819_s27   ;;  %p778_p0 = scmp.ge.s32.totalorder %s819_s27, 1  ;;  %s819_s27 = sphi %s875_s27, %s18_s27  }
   0x2   : > { %p262_p1 = scmp.lt.s32.totalorder %s819_s27, 3 }
   0x4   : > { %p263_p2 = pnand %p778_p0, %p262_p1 }
   0x5   : > { %p296_p3 = scmp.lt.s32.totalorder (!%p263_p2), %s774_s28, 1  ;;  %s821_s11 = smov (!%p263_p2), 90  }
   0x6   : > { %266 = sbr.rel (%p263_p2) target bundleno = 985 (0x3d9), region = 52  ;;  %s822_s12 = smov (!%p263_p2), 92  }
   0x7   : > { %s823_s13 = smov (!%p263_p2), 91   ;;  %s824_s14 = smov (!%p263_p2), 108  }
   0x8   : > { %s825_s15 = smov (!%p263_p2), 109   ;;  %s826_s16 = smov (!%p263_p2), 110  }
   0x9   : > { %s827_s17 = smov (!%p263_p2), 126   ;;  %s828_s18 = smov (!%p263_p2), 127  }
   0xb   : > { %s994_s28 = smov (!%p296_p3, %s774_s28), 1  ;;  %vm311_vm0 = vcmask 556032   ;;  %vm472_vm1 = vcmask 736256   ;;  %vm451_vm2 = vcmask 744448   ;;  %vm430_vm3 = vcmask 752640   ;;  %v509_v31 = vld [vmem:[%s986_s2] sm:$0xff] }
   0xc   : > { %s790_s29 = smul.u32 24, %s994_s28  ;;  %v829_v33 = vmov 0   ;;  %v481_v35 = vld [vmem:[%s985_s1] sm:$0xff]  ;;  %vm515_vm4 = vcmask 588800   ;;  %vm409_vm5 = vcmask 883712   ;;  %vm325_vm6 = vcmask 1039360  }
   0xd   : > { %808 = vset.pattern.permute.xlu0 %v829_v33  ;;  %v618_v41 = vld [vmem:[%s989_s5] sm:$0x3]  ;;  %vm388_vm7 = vcmask 891904   ;;  %vm367_vm8 = vcmask 900096   ;;  %vm346_vm9 = vcmask 1031168   ;;  %vm615_vm14 = vcmask 7168  }
   0xe   : > { %s300_s10 = scalar_lea.vmem %s984_s0, %s790_s29  ;;  %v650_v47 = vld [vmem:[%s991_s7] sm:$0xff]  ;;  %vm624_vm15 = vcmask 64512  }
   0xf   : > { %v462_v0 = vld [vmem:[%s300_s10 + $0x10] sm:$0xff]  ;;  %v891_v1 = vld [vmem:[%s300_s10] sm:$0xff]  ;;  %v893_v2 = vld [vmem:[%s300_s10 + $0x8] sm:$0xff] }
  0x10   : > { %470 = vrot.lane.b32.xlu0 %v462_v0, %s821_s11  ;;  %428 = vrot.lane.b32.xlu1 %v462_v0, %s822_s12  ;;  %312 = vst.msk [vmem:[#allocation2 + $0x10] sm:$0xff] %vm311_vm0, %v462_v0  ;;  %v582_v57 = vld [vmem:[%s987_s3] sm:$0x7] }
  0x11   : > { %468 = vrot.lane.b32.xlu2 %v893_v2, %s821_s11  ;;  %vm599_vm10 = vcmp.gt.f32.partialorder %v582_v57, 0.5 }
  0x12   : > { %v600_v59 = vsel %vm599_vm10, 1, %v829_v33 }
  0x13   : > { %v603_v62 = vperm.slane %v600_v59, 2 }
  0x15   : > { %vm606_vm11 = vcmp.eq.s32.totalorder %v603_v62, 1 }
  0x17   : > { %v484_v34 = vld [vmem:[#allocation2 + $0x10] sm:$0xff] }
  0x18   : > { %449 = vrot.lane.b32.xlu0 %v462_v0, %s823_s13  ;;  %466 = vrot.lane.b32.xlu1 %v891_v1, %s821_s11 }
  0x19   : > { %407 = vrot.lane.b32.xlu2 %v462_v0, %s824_s14 }
  0x20   : > { %445 = vrot.lane.b32.xlu0 %v891_v1, %s823_s13  ;;  %447 = vrot.lane.b32.xlu1 %v893_v2, %s823_s13 }
  0x21   : > { %386 = vrot.lane.b32.xlu2 %v462_v0, %s825_s15 }
  0x28   : > { %426 = vrot.lane.b32.xlu1 %v893_v2, %s822_s12  ;;  %424 = vrot.lane.b32.xlu0 %v891_v1, %s822_s12 }
  0x29   : > { %365 = vrot.lane.b32.xlu2 %v462_v0, %s826_s16 }
  0x30   : > { %405 = vrot.lane.b32.xlu1 %v893_v2, %s824_s14  ;;  %403 = vrot.lane.b32.xlu0 %v891_v1, %s824_s14 }
  0x31   : > { %344 = vrot.lane.b32.xlu2 %v462_v0, %s827_s17 }
  0x38   : > { %384 = vrot.lane.b32.xlu1 %v893_v2, %s825_s15  ;;  %382 = vrot.lane.b32.xlu0 %v891_v1, %s825_s15 }
  0x39   : > { %323 = vrot.lane.b32.xlu2 %v462_v0, %s828_s18  ;;  %v601_v0 = vperm.slane %v600_v59, 0 }
  0x3b   : > { %vm604_vm12 = vcmp.eq.s32.totalorder %v601_v0, 1 }
  0x40   : > { %363 = vrot.lane.b32.xlu1 %v893_v2, %s826_s16  ;;  %361 = vrot.lane.b32.xlu0 %v891_v1, %s826_s16  ;;  %s305_s16 = scalar_lea.vmem %s992_s8, %s790_s29 }
  0x41   : > { %340 = vrot.lane.b32.xlu2 %v891_v1, %s827_s17 }
  0x48   : > { %342 = vrot.lane.b32.xlu0 %v893_v2, %s827_s17  ;;  %319 = vrot.lane.b32.xlu1 %v891_v1, %s828_s18 }
  0x49   : > { %321 = vrot.lane.b32.xlu2 %v893_v2, %s828_s18 }
  0x50   : > { %512 = vperm.xlu0 %808, %v509_v31  }
  0x58   : > { %621 = vperm.xlu0 %808, %v618_v41  }
  0x60   : > { %653 = vperm.xlu0 %808, %v650_v47  }
  0x6b   : > { %v469_v3 = vpop.permute.xlu2 %468 }
  0x73   : > { %v915_v4 = vpop.permute.xlu2 %407 }
  0x74   : > { %417 = vst.msk [vmem:[#allocation2 + $0x88] sm:$0xff] %vm311_vm0, %v915_v4 }
  0x7b   : > { %v919_v5 = vpop.permute.xlu2 %386  ;;  %v499_v22 = vld [vmem:[#allocation2 + $0x88] sm:$0xff] }
  0x7c   : > { %396 = vst.msk [vmem:[#allocation2 + $0x70] sm:$0xff] %vm311_vm0, %v919_v5 }
  0x82   : > { %v471_v6 = vpop.permute.xlu0 %470  ;;  %v429_v7 = vpop.permute.xlu1 %428 }
  0x83   : > { %v474_v8 = vsel %vm472_vm1, %v469_v3, %v471_v6  ;;  %480 = vst.msk [vmem:[#allocation2 + $0xd0] sm:$0xff] %vm311_vm0, %v471_v6  ;;  %v924_v9 = vpop.permute.xlu2 %365  ;;  %v496_v23 = vld [vmem:[#allocation2 + $0x70] sm:$0xff] }
  0x84   : > { %546 = vmatpush.msra.mxu1 %v474_v8  ;;  %438 = vst.msk [vmem:[#allocation2 + $0xa0] sm:$0xff] %vm311_vm0, %v429_v7 }
  0x85   : > { %375 = vst.msk [vmem:[#allocation2 + $0x58] sm:$0xff] %vm311_vm0, %v924_v9 }
  0x8a   : > { %v450_v10 = vpop.permute.xlu0 %449  ;;  %v467_v11 = vpop.permute.xlu1 %466  ;;  %v508_v12 = vld [vmem:[#allocation2 + $0xd0] sm:$0xff] }
  0x8b   : > { %459 = vst.msk [vmem:[#allocation2 + $0xb8] sm:$0xff] %vm311_vm0, %v450_v10  ;;  %v473_v13 = vsel %vm472_vm1, %v467_v11, %v469_v3  ;;  %566 = vmatpush.msra.mxu2 %v508_v12  ;;  %v930_v14 = vpop.permute.xlu2 %344  ;;  %v502_v21 = vld [vmem:[#allocation2 + $0xa0] sm:$0xff]  ;;  %vm660_vm1 = vcmask 1041408  }
  0x8c   : > { %526 = vmatpush.msra.mxu0 %v473_v13  ;;  %354 = vst.msk [vmem:[#allocation2 + $0x40] sm:$0xff] %vm311_vm0, %v930_v14  ;;  %v493_v24 = vld [vmem:[#allocation2 + $0x58] sm:$0xff] }
  0x92   : > { %v446_v15 = vpop.permute.xlu0 %445  ;;  %v448_v16 = vpop.permute.xlu1 %447  ;;  %v505_v17 = vld [vmem:[#allocation2 + $0xb8] sm:$0xff] }
  0x93   : > { %v452_v18 = vsel %vm451_vm2, %v446_v15, %v448_v16  ;;  %v453_v19 = vsel %vm451_vm2, %v448_v16, %v450_v10  ;;  %567 = vmatpush.msra.mxu2 %v505_v17  ;;  %v324_v20 = vpop.permute.xlu2 %323  ;;  %v490_v27 = vld [vmem:[#allocation2 + $0x40] sm:$0xff]  ;;  %vm656_vm2 = vcmask 15360  }
  0x94   : > { %527 = vmatpush.msra.mxu0 %v452_v18  ;;  %547 = vmatpush.msra.mxu1 %v453_v19  ;;  %333 = vst.msk [vmem:[#allocation2 + $0x28] sm:$0xff] %vm311_vm0, %v324_v20 }
  0x95   : > { %568 = vmatpush.msra.mxu2 %v502_v21 }
  0x97   : > { %569 = vmatpush.msra.mxu2 %v499_v22 }
  0x99   : > { %570 = vmatpush.msra.mxu2 %v496_v23 }
  0x9a   : > { %v427_v25 = vpop.permute.xlu1 %426  ;;  %v425_v26 = vpop.permute.xlu0 %424 }
  0x9b   : > { %v432_v28 = vsel %vm430_vm3, %v427_v25, %v429_v7  ;;  %v431_v29 = vsel %vm430_vm3, %v425_v26, %v427_v25  ;;  %v341_v30 = vpop.permute.xlu2 %340  ;;  %571 = vmatpush.msra.mxu2 %v493_v24  ;;  %v487_v32 = vld [vmem:[#allocation2 + $0x28] sm:$0xff]  ;;  %v617_v26 = vld [vmem:[%s988_s4] sm:$0x3] }
  0x9c   : > { %528 = vmatpush.msra.mxu0 %v431_v29  ;;  %548 = vmatpush.msra.mxu1 %v432_v28 }
  0x9d   : > { %572 = vmatpush.msra.mxu2 %v490_v27 }
  0x9f   : > { %573 = vmatpush.msra.mxu2 %v487_v32  ;;  %v649_v32 = vld [vmem:[%s990_s6] sm:$0xff] }
  0xa1   : > { %574 = vmatpush.msra.mxu2 %v484_v34 }
  0xa2   : > { %v406_v36 = vpop.permute.xlu1 %405  ;;  %v404_v37 = vpop.permute.xlu0 %403  ;;  %783 = vmatmul.msk.f32.vlgmr.msra.gmra.mxu2 %vm515_vm4, %v481_v35 }
  0xa3   : > { %v411_v38 = vsel %vm409_vm5, %v406_v36, %v915_v4  ;;  %v410_v39 = vsel %vm409_vm5, %v404_v37, %v406_v36  ;;  %v322_v40 = vpop.permute.xlu2 %321 }
  0xa4   : > { %529 = vmatpush.msra.mxu0 %v410_v39  ;;  %549 = vmatpush.msra.mxu1 %v411_v38  ;;  %v327_v42 = vsel %vm325_vm6, %v322_v40, %v324_v20 }
  0xaa   : > { %v385_v43 = vpop.permute.xlu1 %384  ;;  %v383_v44 = vpop.permute.xlu0 %382 }
  0xab   : > { %v390_v45 = vsel %vm388_vm7, %v385_v43, %v919_v5  ;;  %v389_v46 = vsel %vm388_vm7, %v383_v44, %v385_v43  ;;  %v584_v5 = vperm.slane %v582_v57, 0 }
  0xac   : > { %530 = vmatpush.msra.mxu0 %v389_v46  ;;  %550 = vmatpush.msra.mxu1 %v390_v45 }
  0xb2   : > { %v364_v48 = vpop.permute.xlu1 %363  ;;  %v362_v49 = vpop.permute.xlu0 %361 }
  0xb3   : > { %v369_v50 = vsel %vm367_vm8, %v364_v48, %v924_v9  ;;  %v368_v51 = vsel %vm367_vm8, %v362_v49, %v364_v48  ;;  %v585_v9 = vperm.slane %v582_v57, 1 }
  0xb4   : > { %531 = vmatpush.msra.mxu0 %v368_v51  ;;  %551 = vmatpush.msra.mxu1 %v369_v50 }
  0xba   : > { %v343_v52 = vpop.permute.xlu0 %342  ;;  %v320_v53 = vpop.permute.xlu1 %319 }
  0xbb   : > { %v347_v54 = vsel %vm346_vm9, %v341_v30, %v343_v52  ;;  %v348_v55 = vsel %vm346_vm9, %v343_v52, %v930_v14  ;;  %v326_v56 = vsel %vm325_vm6, %v320_v53, %v322_v40 }
  0xbc   : > { %532 = vmatpush.msra.mxu0 %v347_v54  ;;  %552 = vmatpush.msra.mxu1 %v348_v55 }
  0xbe   : > { %533 = vmatpush.msra.mxu0 %v326_v56  ;;  %553 = vmatpush.msra.mxu1 %v327_v42 }
  0xc0   : > { %534 = vmatpush.msra.mxu0 %v891_v1  ;;  %554 = vmatpush.msra.mxu1 %v893_v2  ;;  %v602_v1 = vperm.slane %v600_v59, 1  ;;  %v586_v2 = vperm.slane %v582_v57, 2 }
  0xc1   : > { %781 = vmatmul.msk.f32.vlgmr.msra.gmra.mxu0 %vm515_vm4, %v481_v35  ;;  %782 = vmatmul.msk.f32.vlgmr.msra.gmra.mxu1 %vm515_vm4, %v481_v35 }
  0xc2   : > { %v513_v60 = vpop.permute.xlu0 %512  ;;  %vm605_vm13 = vcmp.eq.s32.totalorder %v602_v1, 1 }
  0xca   : > { %v622_v28 = vpop.permute.xlu0 %621 }
  0xd2   : > { %v654_v33 = vpop.permute.xlu0 %653 }
 0x125   : > { %v576_v58 = vpop.f32.mrf.mxu2 }
 0x126   : > { %v577_v61 = vadd.f32 %v576_v58, %v513_v60 }
 0x128   : > { %v961_v63 = vmax.f32 %v577_v61, 0.0 }
 0x12a   : > { %v609_v8 = vsel %vm606_vm11, %v961_v63, -inf  ;;  %v592_v10 = vmul.f32 %v586_v2, %v961_v63 }
 0x12b   : > { %v610_v13 = vsel %vm311_vm0, %v609_v8, -inf }
 0x12c   : > { %v594_v19 = vsel %vm311_vm0, %v592_v10, 0.0 }
 0x13e   : > { %v536_v3 = vpop.f32.mrf.mxu0  ;;  %v556_v4 = vpop.f32.mrf.mxu1 }
 0x13f   : > { %v537_v6 = vadd.f32 %v536_v3, %v513_v60  ;;  %v557_v7 = vadd.f32 %v556_v4, %v513_v60 }
 0x141   : > { %v579_v11 = vmax.f32 %v537_v6, 0.0  ;;  %v580_v12 = vmax.f32 %v557_v7, 0.0 }
 0x143   : > { %v607_v14 = vsel %vm604_vm12, %v579_v11, -inf  ;;  %v608_v15 = vsel %vm605_vm13, %v580_v12, -inf  ;;  %v590_v16 = vmul.f32 %v584_v5, %v579_v11  ;;  %v591_v17 = vmul.f32 %v585_v9, %v580_v12 }
 0x144   : > { %v611_v18 = vmax.f32 %v607_v14, %v608_v15 }
 0x145   : > { %v593_v20 = vadd.f32 %v591_v17, %v590_v16 }
 0x146   : > { %v612_v21 = vmax.f32 %v611_v18, %v610_v13 }
 0x147   : > { %v595_v22 = vadd.f32 %v594_v19, %v593_v20 }
 0x148   : > { %613 = vmax.xlane.f32.xlu2 %v612_v21 }
 0x149   : > { %596 = vadd.xlane.f32.xlu1 %v595_v22 }
 0x1bb   : > { %v614_v25 = vpop.xlane.xlu2 %613 }
 0x1bc   : > { %v597_v23 = vpop.xlane.xlu1 %596 }
 0x1bd   : > { %v598_v24 = vmul.f32 0.00390625, %v597_v23 }
 0x1bf   : > { %v616_v27 = vsel %vm615_vm14, %v598_v24, %v614_v25 }
 0x1c0   : > { %643 = vmatpush.msra.mxu3 %v616_v27 }
 0x1c1   : > { %784 = vmatmul.msk.f32.vlgmr.msra.gmra.mxu3 %vm624_vm15, %v617_v26 }
 0x244   : > { %v645_v29 = vpop.f32.mrf.mxu3 }
 0x245   : > { %v646_v30 = vadd.f32 %v645_v29, %v622_v28 }
 0x247   : > { %v648_v31 = vmax.f32 %v646_v30, 0.0 }
 0x249   : > { %785 = vmatpush.msk.msrb.mxu3 %vm660_vm1, %v648_v31 }
 0x24a   : > { %786 = vmatmul.msk.f32.vlgmr.msrb.gmra.mxu3 %vm656_vm2, %v649_v32 }
 0x2cd   : > { %v681_v34 = vpop.f32.mrf.mxu3 }
 0x2ce   : > { %v682_v35 = vadd.f32 %v681_v34, %v654_v33 }
 0x2d0   : > { %685 = vrot.lane.b32.xlu0 %v682_v35, %s828_s18 }
 0x342   : > { %v686_v36 = vpop.permute.xlu0 %685 }
 0x343   : > { %v688_v37 = vadd.f32 %v686_v36, %v682_v35 }
 0x345   : > { %v787_v38 = vmul.f32 -1.442695, %v688_v37 }
 0x347   : > { %809 = vpow2.f32 %v787_v38 }
 0x34d   : > { %v810_v39 = vpop.eup %809 }
 0x34e   : > { %v692_v40 = vadd.f32 1.0, %v810_v39 }
 0x350   : > { %811 = vrcp.f32 %v692_v40  ;;  %v704_v44 = vand.u32 2147483648, %v692_v40  ;;  %v702_v46 = vand.u32 2147483647, %v692_v40  ;;  %vm698_vm4 = vweird.f32 %v692_v40 }
 0x352   : > { %v705_v48 = vor.u32 1.1754944e-38, %v704_v44  ;;  %vm703_vm6 = vcmp.eq.f32.partialorder %v702_v46, 8.507059e+37 }
 0x356   : > { %v812_v41 = vpop.eup %811 }
 0x357   : > { %v694_v42 = vmul.f32 %v812_v41, %v692_v40  ;;  %vm699_vm3 = vweird.f32 %v812_v41 }
 0x358   : > { %vm700_vm5 = vmor %vm698_vm4, %vm699_vm3 }
 0x359   : > { %v695_v43 = vsub.f32 1.0, %v694_v42 }
 0x35b   : > { %v696_v45 = vmul.f32 %v812_v41, %v695_v43 }
 0x35d   : > { %v697_v47 = vadd.f32 %v812_v41, %v696_v45 }
 0x35f   : > { %v701_v49 = vsel %vm700_vm5, %v812_v41, %v697_v47 }
 0x360   : > { %v706_v50 = vsel %vm703_vm6, %v705_v48, %v701_v49 }
 0x361   : > { %710 = vperm.xlu0 %808, %v706_v50  }
 0x3d3   : > { %v711_v51 = vpop.permute.xlu0 %710 }
 0x3d4   : > { %v713_v52 = vmul.f32 %v711_v51, %v579_v11  ;;  %v714_v53 = vmul.f32 %v711_v51, %v580_v12  ;;  %v715_v54 = vmul.f32 %v711_v51, %v961_v63 }
 0x3d6   : > { %716 = vst [vmem:[%s305_s16] sm:$0xff] %v713_v52 }
 0x3d7   : > { %717 = vst [vmem:[%s305_s16 + $0x8] sm:$0xff] %v714_v53 }
 0x3d8   : > { %718 = vst.msk [vmem:[%s305_s16 + $0x10] sm:$0xff] %vm311_vm0, %v715_v54 }
 0x3d9 PF: > { %s18_s27 = sadd.s32 1, %s819_s27  }
 0x3da   : > { %p15_p4 = scmp.ge.s32.totalorder %s18_s27, 4  }
 0x3dc   :  { %17 = sbr.rel (!%p15_p4) target bundleno = 1 (0x1), region = 82 }

// kernel: unet_forward.23
= control target key start
LH: loop header
LB: loop body
LE: loop exit
PB: predicated region body
PF: predicated region fallthrough
CT: control target
= control target key end

     0   :  { %s737_s27 = smov 0   ;;  %s823_s0 = inlined_call_operand.vmem [shape: f32[2,32,91], index: 0, kind: input, shape index: {}]   ;;  %s824_s1 = inlined_call_operand.vmem [shape: f32[16,72], index: 1, kind: input, shape index: {}]   ;;  %s825_s2 = inlined_call_operand.vmem [shape: f32[16,1], index: 2, kind: input, shape index: {}]   ;;  %s826_s3 = inlined_call_operand.vmem [shape: f32[1,81], index: 3, kind: input, shape index: {}]   ;;  %s827_s4 = inlined_call_operand.vmem [shape: f32[4,16], index: 4, kind: input, shape index: {}]   ;;  %s828_s5 = inlined_call_operand.vmem [shape: f32[4,1], index: 5, kind: input, shape index: {}]   ;;  %s829_s6 = inlined_call_operand.vmem [shape: f32[16,4], index: 6, kind: input, shape index: {}]   ;;  %s830_s7 = inlined_call_operand.vmem [shape: f32[16,1], index: 7, kind: input, shape index: {}]   ;;  %s831_s8 = inlined_call_operand.vmem [shape: f32[2,16,81], index: 8, kind: output, shape index: {}]  }
   0x1 LB: > { %s626_s28 = sadd.s32 4294967295, %s686_s27   ;;  %p630_p0 = scmp.ge.s32.totalorder %s686_s27, 1  ;;  %s686_s27 = sphi %s737_s27, %s18_s27  }
   0x2   : > { %p262_p1 = scmp.lt.s32.totalorder %s686_s27, 3 }
   0x4   : > { %p263_p2 = pnand %p630_p0, %p262_p1 }
   0x5   : > { %p296_p3 = scmp.lt.s32.totalorder (!%p263_p2), %s626_s28, 1  ;;  %s688_s11 = smov (!%p263_p2), 118  }
   0x6   : > { %266 = sbr.rel (%p263_p2) target bundleno = 950 (0x3b6), region = 52  ;;  %s689_s12 = smov (!%p263_p2), 119  }
   0x7   : > { %s690_s13 = smov (!%p263_p2), 127  }
   0xb   : > { %s833_s28 = smov (!%p296_p3, %s626_s28), 1  ;;  %vm307_vm0 = vcmask 662528   ;;  %v356_v7 = vld [vmem:[%s825_s2] sm:$0xff]  ;;  %v357_v8 = vld [vmem:[%s825_s2 + $0x8] sm:$0xff]  ;;  %v691_v9 = vmov 0   ;;  %vm368_vm1 = vcmask 588800  }
   0xc   : > { %s645_s29 = sshll.u32 %s833_s28, 5  ;;  %669 = vset.pattern.permute.xlu0 %v691_v9  ;;  %668 = vset.pattern.permute.xlu2 %v691_v9  ;;  %v345_v21 = vld [vmem:[%s824_s1] sm:$0xff]  ;;  %v346_v22 = vld [vmem:[%s824_s1 + $0x8] sm:$0xff]  ;;  %vm426_vm4 = vcmask 7168   ;;  %vm436_vm5 = vcmask 130048   ;;  %vm482_vm6 = vcmask 1043456  }
   0xd   : > { %s300_s10 = scalar_lea.vmem %s823_s0, %s645_s29  ;;  %670 = vset.pattern.permute.xlu1 %v691_v9  ;;  %v400_v23 = vld [vmem:[%s826_s3] sm:$0x1]  ;;  %v464_v43 = vld [vmem:[%s830_s7 + $0x8] sm:$0xff]  ;;  %vm475_vm7 = vcmask 31744  }
   0xe   : > { %v339_v0 = vld [vmem:[%s300_s10] sm:$0xff]  ;;  %v321_v1 = vld [vmem:[%s300_s10 + $0x10] sm:$0xff]  ;;  %v333_v2 = vld [vmem:[%s300_s10 + $0x8] sm:$0xff]  ;;  %vm414_vm2 = vcmp.gt.f32.partialorder %v400_v23, 0.5 }
   0xf   : > { %341 = vrot.lane.b32.xlu0 %v339_v0, %s688_s11  ;;  %329 = vrot.lane.b32.xlu1 %v339_v0, %s689_s12  ;;  %318 = vst.msk [vmem:[#allocation2 + $0x18] sm:$0xff] %vm307_vm0, %v321_v1  ;;  %v319_v3 = vld [vmem:[%s300_s10 + $0x18] sm:$0xff]  ;;  %v671_v27 = vld [vmem:[%s826_s3] ss:$0 sm:$0xff]  ;;  %v415_v28 = vsel %vm414_vm2, 1, %v691_v9 }
  0x10   : > { %313 = vrot.lane.b32.xlu2 %v339_v0, %s690_s13  ;;  %310 = vst.msk [vmem:[#allocation2 + $0x8] sm:$0xff] %vm307_vm0, %v333_v2  ;;  %v416_v32 = vperm.slane %v415_v28, 0  ;;  %v463_v44 = vld [vmem:[%s830_s7] sm:$0xff]  ;;  %v462_v60 = vld [vmem:[%s829_s6 + $0x8] sm:$0xff] }
  0x11   : > { %308 = vst.msk [vmem:[#allocation2] sm:$0xff] %vm307_vm0, %v339_v0  ;;  %v430_v45 = vld [vmem:[%s828_s5] sm:$0xf] }
  0x12   : > { %320 = vst.msk [vmem:[#allocation2 + $0x20] sm:$0xff] %vm307_vm0, %v319_v3  ;;  %vm417_vm3 = vcmp.eq.s32.totalorder %v416_v32, 1  ;;  %v429_v53 = vld [vmem:[%s827_s4] sm:$0xf] }
  0x13   : > { %v461_v59 = vld [vmem:[%s829_s6] sm:$0xff] }
  0x16   : > { %v350_v17 = vld [vmem:[#allocation2 + $0x18] sm:$0xff] }
  0x17   : > { %335 = vrot.lane.b32.xlu0 %v333_v2, %s689_s12  ;;  %323 = vrot.lane.b32.xlu1 %v321_v1, %s690_s13  ;;  %v348_v19 = vld [vmem:[#allocation2 + $0x8] sm:$0xff] }
  0x18   : > { %365 = vperm.xlu2 %668, %v357_v8   ;;  %v347_v20 = vld [vmem:[#allocation2] sm:$0xff] }
  0x19   : > { %v351_v16 = vld [vmem:[#allocation2 + $0x20] sm:$0xff] }
  0x1f   : > { %360 = vperm.xlu0 %669, %v356_v7  }
  0x6a   : > { %v314_v4 = vpop.permute.xlu2 %313 }
  0x6b   : > { %316 = vst.msk [vmem:[#allocation2 + $0x10] sm:$0xff] %vm307_vm0, %v314_v4 }
  0x72   : > { %v349_v18 = vld [vmem:[#allocation2 + $0x10] sm:$0xff]  ;;  %v366_v30 = vpop.permute.xlu2 %365 }
  0x81   : > { %v342_v5 = vpop.permute.xlu0 %341  ;;  %v330_v6 = vpop.permute.xlu1 %329 }
  0x82   : > { %344 = vst.msk [vmem:[#allocation2 + $0x40] sm:$0xff] %vm307_vm0, %v342_v5 }
  0x83   : > { %332 = vst.msk [vmem:[#allocation2 + $0x30] sm:$0xff] %vm307_vm0, %v330_v6 }
  0x89   : > { %v336_v10 = vpop.permute.xlu0 %335  ;;  %v355_v11 = vld [vmem:[#allocation2 + $0x40] sm:$0xff]  ;;  %v324_v12 = vpop.permute.xlu1 %323 }
  0x8a   : > { %338 = vst.msk [vmem:[#allocation2 + $0x38] sm:$0xff] %vm307_vm0, %v336_v10  ;;  %382 = vmatpush.msra.mxu0 %v355_v11  ;;  %647 = vmatpush.msra.mxu3 %v355_v11  ;;  %v353_v14 = vld [vmem:[#allocation2 + $0x30] sm:$0xff] }
  0x8b   : > { %326 = vst.msk [vmem:[#allocation2 + $0x28] sm:$0xff] %vm307_vm0, %v324_v12 }
  0x91   : > { %v354_v13 = vld [vmem:[#allocation2 + $0x38] sm:$0xff]  ;;  %v361_v24 = vpop.permute.xlu0 %360 }
  0x92   : > { %383 = vmatpush.msra.mxu0 %v354_v13  ;;  %648 = vmatpush.msra.mxu3 %v354_v13  ;;  %v352_v15 = vld [vmem:[#allocation2 + $0x28] sm:$0xff] }
  0x94   : > { %384 = vmatpush.msra.mxu0 %v353_v14  ;;  %649 = vmatpush.msra.mxu3 %v353_v14 }
  0x96   : > { %385 = vmatpush.msra.mxu0 %v352_v15  ;;  %650 = vmatpush.msra.mxu3 %v352_v15 }
  0x98   : > { %386 = vmatpush.msra.mxu0 %v351_v16  ;;  %651 = vmatpush.msra.mxu3 %v351_v16 }
  0x9a   : > { %387 = vmatpush.msra.mxu0 %v350_v17  ;;  %652 = vmatpush.msra.mxu3 %v350_v17 }
  0x9c   : > { %388 = vmatpush.msra.mxu0 %v349_v18  ;;  %653 = vmatpush.msra.mxu3 %v349_v18 }
  0x9e   : > { %389 = vmatpush.msra.mxu0 %v348_v19  ;;  %654 = vmatpush.msra.mxu3 %v348_v19 }
  0xa0   : > { %390 = vmatpush.msra.mxu0 %v347_v20  ;;  %655 = vmatpush.msra.mxu3 %v347_v20 }
  0xa1   : > { %635 = vmatmul.msk.f32.vlgmr.msra.gmra.mxu0 %vm368_vm1, %v345_v21  ;;  %636 = vmatmul.msk.f32.vlgmr.msra.gmra.mxu3 %vm368_vm1, %v346_v22 }
 0x11e   : > { %v392_v25 = vpop.f32.mrf.mxu0 }
 0x11f   : > { %v393_v26 = vadd.f32 %v392_v25, %v361_v24 }
 0x121   : > { %v780_v29 = vmax.f32 %v393_v26, 0.0 }
 0x123   : > { %v404_v31 = vmul.f32 %v671_v27, %v780_v29  ;;  %v418_v40 = vsel %vm417_vm3, %v780_v29, -inf }
 0x124   : > { %v395_v33 = vpop.f32.mrf.mxu3  ;;  %v420_v42 = vsel %vm307_vm0, %v418_v40, -inf }
 0x125   : > { %v396_v34 = vadd.f32 %v395_v33, %v366_v30  ;;  %v406_v35 = vsel %vm307_vm0, %v404_v31, 0.0 }
 0x126   : > { %407 = vadd.xlane.f32.xlu2 %v406_v35 }
 0x127   : > { %v784_v36 = vmax.f32 %v396_v34, 0.0 }
 0x129   : > { %v419_v37 = vsel %vm417_vm3, %v784_v36, -inf  ;;  %v405_v38 = vmul.f32 %v671_v27, %v784_v36 }
 0x12a   : > { %v423_v39 = vsel %vm307_vm0, %v419_v37, -inf }
 0x12b   : > { %424 = vmax.xlane.f32.xlu0 %v423_v39  ;;  %v409_v41 = vsel %vm307_vm0, %v405_v38, 0.0 }
 0x12c   : > { %410 = vadd.xlane.f32.xlu1 %v409_v41 }
 0x12e   : > { %421 = vmax.xlane.f32.xlu2 %v420_v42 }
 0x13f   : > { %472 = vperm.xlu0 %669, %v464_v43  }
 0x145   : > { %433 = vperm.xlu1 %670, %v430_v45  }
 0x146   : > { %467 = vperm.xlu2 %668, %v463_v44  }
 0x199   : > { %v408_v46 = vpop.xlane.xlu2 %407 }
 0x19a   : > { %v412_v51 = vmul.f32 0.015625, %v408_v46 }
 0x19e   : > { %v425_v49 = vpop.xlane.xlu0 %424 }
 0x19f   : > { %v411_v47 = vpop.xlane.xlu1 %410 }
 0x1a0   : > { %v413_v48 = vmul.f32 0.015625, %v411_v47 }
 0x1a1   : > { %v422_v50 = vpop.xlane.xlu2 %421 }
 0x1a2   : > { %v428_v52 = vsel %vm426_vm4, %v413_v48, %v425_v49  ;;  %v427_v54 = vsel %vm426_vm4, %v412_v51, %v422_v50 }
 0x1a3   : > { %454 = vmatpush.msra.mxu1 %v428_v52 }
 0x1a5   : > { %455 = vmatpush.msra.mxu1 %v427_v54 }
 0x1a6   : > { %637 = vmatmul.msk.f32.vlgmr.msra.gmra.mxu1 %vm436_vm5, %v429_v53 }
 0x1a9   : > { %v468_v61 = vpop.permute.xlu2 %467 }
 0x1b1   : > { %v473_v0 = vpop.permute.xlu0 %472 }
 0x1b7   : > { %v434_v55 = vpop.permute.xlu1 %433 }
 0x223   : > { %v457_v56 = vpop.f32.mrf.mxu1 }
 0x224   : > { %v458_v57 = vadd.f32 %v457_v56, %v434_v55 }
 0x226   : > { %v460_v58 = vmax.f32 %v458_v57, 0.0 }
 0x228   : > { %638 = vmatpush.msk.msra.mxu2 %vm482_vm6, %v460_v58 }
 0x229   : > { %639 = vmatmul.msk.f32.vlgmr.msra.gmra.mxu2 %vm475_vm7, %v461_v59 }
 0x231   : > { %640 = vmatmul.msk.f32.gmra.mxu2 %vm475_vm7, %v462_v60 }
 0x2ac   : > { %v503_v62 = vpop.f32.mrf.mxu2 }
 0x2ad   : > { %v504_v63 = vadd.f32 %v503_v62, %v468_v61 }
 0x2af   : > { %511 = vrot.lane.b32.xlu1 %v504_v63, %s690_s13 }
 0x2b4   : > { %v506_v1 = vpop.f32.mrf.mxu2 }
 0x2b5   : > { %v507_v2 = vadd.f32 %v506_v1, %v473_v0 }
 0x2b7   : > { %513 = vrot.lane.b32.xlu2 %v507_v2, %s690_s13  ;;  %s646_s13 = sshll.u32 %s833_s28, 4 }
 0x2b8   : > { %s305_s21 = scalar_lea.vmem %s831_s8, %s646_s13 }
 0x311   : > { %v514_v3 = vpop.permute.xlu2 %513 }
 0x312   : > { %v518_v4 = vadd.f32 %v514_v3, %v507_v2 }
 0x314   : > { %v642_v5 = vmul.f32 -1.442695, %v518_v4 }
 0x316   : > { %672 = vpow2.f32 %v642_v5 }
 0x31c   : > { %v673_v6 = vpop.eup %672 }
 0x31d   : > { %v526_v7 = vadd.f32 1.0, %v673_v6 }
 0x31f   : > { %674 = vrcp.f32 %v526_v7  ;;  %v553_v14 = vand.u32 2147483648, %v526_v7  ;;  %v551_v16 = vand.u32 2147483647, %v526_v7  ;;  %vm547_vm9 = vweird.f32 %v526_v7 }
 0x321   : > { %v512_v8 = vpop.permute.xlu1 %511  ;;  %v554_v20 = vor.u32 1.1754944e-38, %v553_v14  ;;  %vm552_vm11 = vcmp.eq.f32.partialorder %v551_v16, 8.507059e+37 }
 0x322   : > { %v517_v9 = vadd.f32 %v512_v8, %v504_v63 }
 0x324   : > { %v641_v10 = vmul.f32 -1.442695, %v517_v9 }
 0x325   : > { %v675_v11 = vpop.eup %674 }
 0x326   : > { %676 = vpow2.f32 %v641_v10  ;;  %v543_v12 = vmul.f32 %v675_v11, %v526_v7  ;;  %vm548_vm8 = vweird.f32 %v675_v11 }
 0x327   : > { %vm549_vm10 = vmor %vm547_vm9, %vm548_vm8 }
 0x328   : > { %v544_v13 = vsub.f32 1.0, %v543_v12 }
 0x32a   : > { %v545_v15 = vmul.f32 %v675_v11, %v544_v13 }
 0x32c   : > { %v677_v17 = vpop.eup %676  ;;  %v546_v18 = vadd.f32 %v675_v11, %v545_v15 }
 0x32d   : > { %v525_v19 = vadd.f32 1.0, %v677_v17 }
 0x32e   : > { %v550_v21 = vsel %vm549_vm10, %v675_v11, %v546_v18 }
 0x32f   : > { %678 = vrcp.f32 %v525_v19  ;;  %v555_v22 = vsel %vm552_vm11, %v554_v20, %v550_v21  ;;  %v538_v26 = vand.u32 2147483648, %v525_v19  ;;  %v536_v28 = vand.u32 2147483647, %v525_v19 }
 0x330   : > { %564 = vperm.xlu0 %669, %v555_v22   ;;  %vm532_vm13 = vweird.f32 %v525_v19 }
 0x331   : > { %v539_v31 = vor.u32 1.1754944e-38, %v538_v26  ;;  %vm537_vm15 = vcmp.eq.f32.partialorder %v536_v28, 8.507059e+37 }
 0x335   : > { %v679_v23 = vpop.eup %678 }
 0x336   : > { %v528_v24 = vmul.f32 %v679_v23, %v525_v19  ;;  %vm533_vm12 = vweird.f32 %v679_v23 }
 0x337   : > { %vm534_vm14 = vmor %vm532_vm13, %vm533_vm12 }
 0x338   : > { %v529_v25 = vsub.f32 1.0, %v528_v24 }
 0x33a   : > { %v530_v27 = vmul.f32 %v679_v23, %v529_v25 }
 0x33c   : > { %v531_v30 = vadd.f32 %v679_v23, %v530_v27 }
 0x33e   : > { %v535_v32 = vsel %vm534_vm14, %v679_v23, %v531_v30 }
 0x33f   : > { %v540_v33 = vsel %vm537_vm15, %v539_v31, %v535_v32 }
 0x340   : > { %559 = vperm.xlu1 %670, %v540_v33  }
 0x3a2   : > { %v565_v34 = vpop.permute.xlu0 %564 }
 0x3a3   : > { %v568_v35 = vmul.f32 %v565_v34, %v784_v36 }
 0x3a5   : > { %570 = vst.msk [vmem:[%s305_s21 + $0x8] sm:$0xff] %vm307_vm0, %v568_v35 }
 0x3b2   : > { %v560_v37 = vpop.permute.xlu1 %559 }
 0x3b3   : > { %v567_v38 = vmul.f32 %v560_v37, %v780_v29 }
 0x3b5   : > { %569 = vst.msk [vmem:[%s305_s21] sm:$0xff] %vm307_vm0, %v567_v38 }
 0x3b6 PF: > { %s18_s27 = sadd.s32 1, %s686_s27  }
 0x3b7   : > { %p15_p4 = scmp.ge.s32.totalorder %s18_s27, 4  }
 0x3b9   :  { %17 = sbr.rel (!%p15_p4) target bundleno = 1 (0x1), region = 82 }

// kernel: unet_forward.24
= control target key start
LH: loop header
LB: loop body
LE: loop exit
PB: predicated region body
PF: predicated region fallthrough
CT: control target
= control target key end

     0   :  { %s506_s12 = smov 0   ;;  %s568_s0 = inlined_call_operand.vmem [shape: f32[2,16,122], index: 0, kind: input, shape index: {}]   ;;  %s569_s1 = inlined_call_operand.vmem [shape: f32[16,144], index: 1, kind: input, shape index: {}]   ;;  %s570_s2 = inlined_call_operand.vmem [shape: f32[16,1], index: 2, kind: input, shape index: {}]   ;;  %s571_s3 = inlined_call_operand.vmem [shape: f32[2,16,100], index: 3, kind: output, shape index: {}]  }
   0x1 LB: > { %s418_s13 = sadd.s32 4294967295, %s475_s12   ;;  %p422_p0 = scmp.ge.s32.totalorder %s475_s12, 1  ;;  %s475_s12 = sphi %s506_s12, %s13_s12  }
   0x2   : > { %p137_p1 = scmp.lt.s32.totalorder %s475_s12, 3 }
   0x4   : > { %p138_p2 = pnand %p422_p0, %p137_p1 }
   0x5   : > { %p161_p3 = scmp.lt.s32.totalorder (!%p138_p2), %s418_s13, 1  ;;  %s477_s18 = smov (!%p138_p2), 107  }
   0x6   : > { %141 = sbr.rel (%p138_p2) target bundleno = 318 (0x13e), region = 32  ;;  %s478_s19 = smov (!%p138_p2), 108  }
   0x7   : > { %s479_s20 = smov (!%p138_p2), 116   ;;  %s480_s21 = smov (!%p138_p2), 117  }
   0x8   : > { %s481_s22 = smov (!%p138_p2), 118   ;;  %s482_s23 = smov (!%p138_p2), 126  }
   0x9   : > { %s483_s24 = smov (!%p138_p2), 127   ;;  %s484_s25 = smov (!%p138_p2), 106  }
   0xb   : > { %s573_s13 = smov (!%p161_p3, %s418_s13), 1  ;;  %vm173_vm0 = vcmask 818176   ;;  %v485_v18 = vmov 0   ;;  %v294_v25 = vld [vmem:[%s570_s2] sm:$0xff]  ;;  %v295_v26 = vld [vmem:[%s570_s2 + $0x8] sm:$0xff]  ;;  %v274_v39 = vld [vmem:[%s569_s1 + $0x10] sm:$0xff] }
   0xc   : > { %s431_s14 = sshll.u32 %s573_s13, 4  ;;  %466 = vset.pattern.permute.xlu1 %v485_v18  ;;  %467 = vset.pattern.permute.xlu2 %v485_v18  ;;  %v272_v38 = vld [vmem:[%s569_s1] sm:$0xff]  ;;  %v273_v40 = vld [vmem:[%s569_s1 + $0x8] sm:$0xff]  ;;  %vm306_vm1 = vcmask 130048   ;;  %v275_v42 = vld [vmem:[%s569_s1 + $0x18] sm:$0xff] }
   0xd   : > { %s165_s17 = scalar_lea.vmem %s568_s0, %s431_s14  ;;  %468 = vset.pattern.permute.xlu0 %v485_v18  ;;  %s170_s16 = scalar_lea.vmem %s571_s3, %s431_s14 }
   0xe   : > { %v249_v0 = vld [vmem:[%s165_s17 + $0x8] sm:$0xff]  ;;  %v248_v1 = vld [vmem:[%s165_s17] sm:$0xff] }
   0xf   : > { %254 = vrot.lane.b32.xlu0 %v249_v0, %s477_s18  ;;  %242 = vrot.lane.b32.xlu1 %v249_v0, %s478_s19  ;;  %175 = vst.msk [vmem:[#allocation2 + $0x8] sm:$0xff] %vm173_vm0, %v249_v0 }
  0x10   : > { %230 = vrot.lane.b32.xlu2 %v249_v0, %s479_s20  ;;  %174 = vst.msk [vmem:[#allocation2] sm:$0xff] %vm173_vm0, %v248_v1 }
  0x16   : > { %v277_v36 = vld [vmem:[#allocation2 + $0x8] sm:$0xff] }
  0x17   : > { %252 = vrot.lane.b32.xlu0 %v248_v1, %s477_s18  ;;  %240 = vrot.lane.b32.xlu1 %v248_v1, %s478_s19  ;;  %v276_v37 = vld [vmem:[#allocation2] sm:$0xff] }
  0x18   : > { %228 = vrot.lane.b32.xlu2 %v248_v1, %s479_s20 }
  0x1f   : > { %218 = vrot.lane.b32.xlu0 %v249_v0, %s480_s21  ;;  %216 = vrot.lane.b32.xlu1 %v248_v1, %s480_s21 }
  0x20   : > { %206 = vrot.lane.b32.xlu2 %v249_v0, %s481_s22 }
  0x27   : > { %204 = vrot.lane.b32.xlu0 %v248_v1, %s481_s22  ;;  %194 = vrot.lane.b32.xlu1 %v249_v0, %s482_s23 }
  0x28   : > { %192 = vrot.lane.b32.xlu2 %v248_v1, %s482_s23 }
  0x2f   : > { %182 = vrot.lane.b32.xlu0 %v249_v0, %s483_s24  ;;  %180 = vrot.lane.b32.xlu1 %v248_v1, %s483_s24 }
  0x30   : > { %266 = vrot.lane.b32.xlu2 %v249_v0, %s484_s25 }
  0x37   : > { %264 = vrot.lane.b32.xlu0 %v248_v1, %s484_s25  ;;  %298 = vperm.xlu1 %466, %v294_v25  }
  0x38   : > { %303 = vperm.xlu2 %467, %v295_v26  }
  0x6a   : > { %v231_v2 = vpop.permute.xlu2 %230 }
  0x6b   : > { %235 = vst.msk [vmem:[#allocation2 + $0x58] sm:$0xff] %vm173_vm0, %v231_v2 }
  0x72   : > { %v229_v3 = vpop.permute.xlu2 %228  ;;  %v287_v19 = vld [vmem:[#allocation2 + $0x58] sm:$0xff] }
  0x73   : > { %234 = vst.msk [vmem:[#allocation2 + $0x50] sm:$0xff] %vm173_vm0, %v229_v3 }
  0x7a   : > { %v207_v4 = vpop.permute.xlu2 %206  ;;  %v286_v21 = vld [vmem:[#allocation2 + $0x50] sm:$0xff] }
  0x7b   : > { %211 = vst.msk [vmem:[#allocation2 + $0x38] sm:$0xff] %vm173_vm0, %v207_v4 }
  0x81   : > { %v255_v5 = vpop.permute.xlu0 %254  ;;  %v243_v6 = vpop.permute.xlu1 %242 }
  0x82   : > { %259 = vst.msk [vmem:[#allocation2 + $0x78] sm:$0xff] %vm173_vm0, %v255_v5  ;;  %v193_v7 = vpop.permute.xlu2 %192  ;;  %v283_v27 = vld [vmem:[#allocation2 + $0x38] sm:$0xff] }
  0x83   : > { %247 = vst.msk [vmem:[#allocation2 + $0x68] sm:$0xff] %vm173_vm0, %v243_v6 }
  0x84   : > { %198 = vst.msk [vmem:[#allocation2 + $0x20] sm:$0xff] %vm173_vm0, %v193_v7 }
  0x89   : > { %v253_v8 = vpop.permute.xlu0 %252  ;;  %v291_v9 = vld [vmem:[#allocation2 + $0x78] sm:$0xff]  ;;  %v241_v10 = vpop.permute.xlu1 %240 }
  0x8a   : > { %258 = vst.msk [vmem:[#allocation2 + $0x70] sm:$0xff] %vm173_vm0, %v253_v8  ;;  %313 = vmatpush.msra.mxu0 %v291_v9  ;;  %433 = vmatpush.msra.mxu2 %v291_v9  ;;  %v267_v11 = vpop.permute.xlu2 %266  ;;  %v289_v15 = vld [vmem:[#allocation2 + $0x68] sm:$0xff] }
  0x8b   : > { %246 = vst.msk [vmem:[#allocation2 + $0x60] sm:$0xff] %vm173_vm0, %v241_v10  ;;  %v280_v32 = vld [vmem:[#allocation2 + $0x20] sm:$0xff] }
  0x8c   : > { %271 = vst.msk [vmem:[#allocation2 + $0x88] sm:$0xff] %vm173_vm0, %v267_v11 }
  0x91   : > { %v219_v12 = vpop.permute.xlu0 %218  ;;  %v290_v13 = vld [vmem:[#allocation2 + $0x70] sm:$0xff]  ;;  %v217_v14 = vpop.permute.xlu1 %216 }
  0x92   : > { %223 = vst.msk [vmem:[#allocation2 + $0x48] sm:$0xff] %vm173_vm0, %v219_v12  ;;  %314 = vmatpush.msra.mxu0 %v290_v13  ;;  %434 = vmatpush.msra.mxu2 %v290_v13  ;;  %v288_v16 = vld [vmem:[#allocation2 + $0x60] sm:$0xff]  ;;  %v304_v48 = vpop.permute.xlu2 %303 }
  0x93   : > { %222 = vst.msk [vmem:[#allocation2 + $0x40] sm:$0xff] %vm173_vm0, %v217_v14  ;;  %v293_v17 = vld [vmem:[#allocation2 + $0x88] sm:$0xff] }
  0x94   : > { %315 = vmatpush.msra.mxu0 %v289_v15  ;;  %435 = vmatpush.msra.mxu2 %v289_v15 }
  0x95   : > { %350 = vmatpush.msra.mxu1 %v293_v17 }
  0x96   : > { %316 = vmatpush.msra.mxu0 %v288_v16  ;;  %436 = vmatpush.msra.mxu2 %v288_v16 }
  0x98   : > { %317 = vmatpush.msra.mxu0 %v287_v19  ;;  %437 = vmatpush.msra.mxu2 %v287_v19 }
  0x99   : > { %v205_v20 = vpop.permute.xlu0 %204  ;;  %v195_v22 = vpop.permute.xlu1 %194  ;;  %v285_v23 = vld [vmem:[#allocation2 + $0x48] sm:$0xff] }
  0x9a   : > { %210 = vst.msk [vmem:[#allocation2 + $0x30] sm:$0xff] %vm173_vm0, %v205_v20  ;;  %318 = vmatpush.msra.mxu0 %v286_v21  ;;  %438 = vmatpush.msra.mxu2 %v286_v21  ;;  %v284_v24 = vld [vmem:[#allocation2 + $0x40] sm:$0xff] }
  0x9b   : > { %199 = vst.msk [vmem:[#allocation2 + $0x28] sm:$0xff] %vm173_vm0, %v195_v22 }
  0x9c   : > { %319 = vmatpush.msra.mxu0 %v285_v23  ;;  %439 = vmatpush.msra.mxu2 %v285_v23 }
  0x9e   : > { %320 = vmatpush.msra.mxu0 %v284_v24  ;;  %440 = vmatpush.msra.mxu2 %v284_v24 }
  0xa0   : > { %321 = vmatpush.msra.mxu0 %v283_v27  ;;  %441 = vmatpush.msra.mxu2 %v283_v27 }
  0xa1   : > { %v183_v28 = vpop.permute.xlu0 %182  ;;  %v282_v29 = vld [vmem:[#allocation2 + $0x30] sm:$0xff]  ;;  %v181_v30 = vpop.permute.xlu1 %180 }
  0xa2   : > { %187 = vst.msk [vmem:[#allocation2 + $0x18] sm:$0xff] %vm173_vm0, %v183_v28  ;;  %322 = vmatpush.msra.mxu0 %v282_v29  ;;  %442 = vmatpush.msra.mxu2 %v282_v29  ;;  %v281_v31 = vld [vmem:[#allocation2 + $0x28] sm:$0xff] }
  0xa3   : > { %186 = vst.msk [vmem:[#allocation2 + $0x10] sm:$0xff] %vm173_vm0, %v181_v30 }
  0xa4   : > { %323 = vmatpush.msra.mxu0 %v281_v31  ;;  %443 = vmatpush.msra.mxu2 %v281_v31 }
  0xa6   : > { %324 = vmatpush.msra.mxu0 %v280_v32  ;;  %444 = vmatpush.msra.mxu2 %v280_v32 }
  0xa9   : > { %v265_v33 = vpop.permute.xlu0 %264  ;;  %v279_v34 = vld [vmem:[#allocation2 + $0x18] sm:$0xff]  ;;  %v299_v43 = vpop.permute.xlu1 %298 }
  0xaa   : > { %270 = vst.msk [vmem:[#allocation2 + $0x80] sm:$0xff] %vm173_vm0, %v265_v33  ;;  %325 = vmatpush.msra.mxu0 %v279_v34  ;;  %445 = vmatpush.msra.mxu2 %v279_v34  ;;  %v278_v35 = vld [vmem:[#allocation2 + $0x10] sm:$0xff] }
  0xac   : > { %326 = vmatpush.msra.mxu0 %v278_v35  ;;  %446 = vmatpush.msra.mxu2 %v278_v35 }
  0xae   : > { %327 = vmatpush.msra.mxu0 %v277_v36  ;;  %447 = vmatpush.msra.mxu2 %v277_v36 }
  0xb0   : > { %328 = vmatpush.msra.mxu0 %v276_v37  ;;  %448 = vmatpush.msra.mxu2 %v276_v37 }
  0xb1   : > { %329 = vmatmul.f32.vlgmr.msra.gmra.mxu0 %v272_v38  ;;  %v292_v41 = vld [vmem:[#allocation2 + $0x80] sm:$0xff]  ;;  %332 = vmatmul.f32.vlgmr.msra.gmra.mxu2 %v274_v39 }
  0xb2   : > { %351 = vmatpush.msra.mxu1 %v292_v41 }
  0xb3   : > { %427 = vmatmul.msk.f32.vlgmr.msra.gmra.mxu1 %vm306_vm1, %v273_v40 }
  0xbb   : > { %428 = vmatmul.msk.f32.gmra.mxu1 %vm306_vm1, %v275_v42 }
 0x12e   : > { %v330_v44 = vpop.f32.mrf.mxu0 }
 0x12f   : > { %v331_v45 = vadd.f32 %v330_v44, %v299_v43 }
 0x130   : > { %v353_v46 = vpop.f32.mrf.mxu1 }
 0x131   : > { %v354_v47 = vadd.f32 %v353_v46, %v331_v45 }
 0x133   : > { %v359_v49 = vmax.f32 %v354_v47, 0.0 }
 0x134   : > { %v333_v50 = vpop.f32.mrf.mxu2 }
 0x135   : > { %361 = vst.msk [vmem:[%s170_s16] sm:$0xff] %vm173_vm0, %v359_v49  ;;  %v334_v51 = vadd.f32 %v333_v50, %v304_v48 }
 0x138   : > { %v356_v52 = vpop.f32.mrf.mxu1 }
 0x139   : > { %v357_v53 = vadd.f32 %v356_v52, %v334_v51 }
 0x13b   : > { %v360_v54 = vmax.f32 %v357_v53, 0.0 }
 0x13d   : > { %362 = vst.msk [vmem:[%s170_s16 + $0x8] sm:$0xff] %vm173_vm0, %v360_v54 }
 0x13e PF: > { %s13_s12 = sadd.s32 1, %s475_s12  }
 0x13f   : > { %p10_p4 = scmp.ge.s32.totalorder %s13_s12, 4  }
 0x141   :  { %12 = sbr.rel (!%p10_p4) target bundleno = 1 (0x1), region = 62 }

// kernel: unet_forward.25
= control target key start
LH: loop header
LB: loop body
LE: loop exit
PB: predicated region body
PF: predicated region fallthrough
CT: control target
= control target key end

     0   :  { %s831_s27 = smov 0   ;;  %s938_s0 = inlined_call_operand.vmem [shape: f32[2,16,122], index: 0, kind: input, shape index: {}]   ;;  %s939_s1 = inlined_call_operand.vmem [shape: f32[16,144], index: 1, kind: input, shape index: {}]   ;;  %s940_s2 = inlined_call_operand.vmem [shape: f32[16,1], index: 2, kind: input, shape index: {}]   ;;  %s941_s3 = inlined_call_operand.vmem [shape: f32[1,100], index: 3, kind: input, shape index: {}]   ;;  %s942_s4 = inlined_call_operand.vmem [shape: f32[4,16], index: 4, kind: input, shape index: {}]   ;;  %s943_s5 = inlined_call_operand.vmem [shape: f32[4,1], index: 5, kind: input, shape index: {}]   ;;  %s944_s6 = inlined_call_operand.vmem [shape: f32[16,4], index: 6, kind: input, shape index: {}]   ;;  %s945_s7 = inlined_call_operand.vmem [shape: f32[16,1], index: 7, kind: input, shape index: {}]   ;;  %s946_s8 = inlined_call_operand.vmem [shape: f32[2,16,100], index: 8, kind: output, shape index: {}]  }
   0x1 LB: > { %s719_s28 = sadd.s32 4294967295, %s775_s27   ;;  %p723_p0 = scmp.ge.s32.totalorder %s775_s27, 1  ;;  %s775_s27 = sphi %s831_s27, %s18_s27  }
   0x2   : > { %p262_p1 = scmp.lt.s32.totalorder %s775_s27, 3 }
   0x4   : > { %p263_p2 = pnand %p723_p0, %p262_p1 }
   0x5   : > { %p296_p3 = scmp.lt.s32.totalorder (!%p263_p2), %s719_s28, 1  ;;  %s777_s11 = smov (!%p263_p2), 107  }
   0x6   : > { %266 = sbr.rel (%p263_p2) target bundleno = 977 (0x3d1), region = 52  ;;  %s778_s12 = smov (!%p263_p2), 108  }
   0x7   : > { %s779_s13 = smov (!%p263_p2), 116   ;;  %s780_s14 = smov (!%p263_p2), 117  }
   0x8   : > { %s781_s15 = smov (!%p263_p2), 118   ;;  %s782_s16 = smov (!%p263_p2), 126  }
   0x9   : > { %s783_s17 = smov (!%p263_p2), 127   ;;  %s784_s18 = smov (!%p263_p2), 106  }
   0xb   : > { %s948_s28 = smov (!%p296_p3, %s719_s28), 1  ;;  %vm308_vm0 = vcmask 818176   ;;  %v430_v23 = vld [vmem:[%s940_s2 + $0x8] sm:$0xff]  ;;  %v429_v24 = vld [vmem:[%s940_s2] sm:$0xff]  ;;  %v785_v25 = vmov 0   ;;  %vm441_vm1 = vcmask 130048  }
   0xc   : > { %s738_s29 = sshll.u32 %s948_s28, 4  ;;  %757 = vset.pattern.permute.xlu1 %v785_v25  ;;  %758 = vset.pattern.permute.xlu2 %v785_v25  ;;  %v407_v38 = vld [vmem:[%s939_s1] sm:$0xff]  ;;  %v408_v39 = vld [vmem:[%s939_s1 + $0x8] sm:$0xff]  ;;  %v409_v41 = vld [vmem:[%s939_s1 + $0x10] sm:$0xff]  ;;  %vm520_vm4 = vcmask 7168   ;;  %vm575_vm5 = vcmask 1043456  }
   0xd   : > { %s300_s10 = scalar_lea.vmem %s938_s0, %s738_s29  ;;  %759 = vset.pattern.permute.xlu0 %v785_v25  ;;  %v410_v42 = vld [vmem:[%s939_s1 + $0x18] sm:$0xff]  ;;  %v494_v44 = vld [vmem:[%s941_s3] sm:$0x1]  ;;  %vm568_vm6 = vcmask 31744  }
   0xe   : > { %v384_v0 = vld [vmem:[%s300_s10 + $0x8] sm:$0xff]  ;;  %v383_v1 = vld [vmem:[%s300_s10] sm:$0xff]  ;;  %vm508_vm2 = vcmp.gt.f32.partialorder %v494_v44, 0.5 }
   0xf   : > { %389 = vrot.lane.b32.xlu0 %v384_v0, %s777_s11  ;;  %377 = vrot.lane.b32.xlu1 %v384_v0, %s778_s12  ;;  %310 = vst.msk [vmem:[#allocation2 + $0x8] sm:$0xff] %vm308_vm0, %v384_v0  ;;  %v760_v47 = vld [vmem:[%s941_s3] ss:$0 sm:$0xff]  ;;  %v509_v51 = vsel %vm508_vm2, 1, %v785_v25 }
  0x10   : > { %365 = vrot.lane.b32.xlu2 %v384_v0, %s779_s13  ;;  %309 = vst.msk [vmem:[#allocation2] sm:$0xff] %vm308_vm0, %v383_v1  ;;  %v510_v55 = vperm.slane %v509_v51, 0 }
  0x12   : > { %vm511_vm3 = vcmp.eq.s32.totalorder %v510_v55, 1 }
  0x16   : > { %v412_v36 = vld [vmem:[#allocation2 + $0x8] sm:$0xff] }
  0x17   : > { %387 = vrot.lane.b32.xlu0 %v383_v1, %s777_s11  ;;  %375 = vrot.lane.b32.xlu1 %v383_v1, %s778_s12  ;;  %v411_v37 = vld [vmem:[#allocation2] sm:$0xff]  ;;  %s305_s11 = scalar_lea.vmem %s946_s8, %s738_s29 }
  0x18   : > { %363 = vrot.lane.b32.xlu2 %v383_v1, %s779_s13 }
  0x1f   : > { %353 = vrot.lane.b32.xlu0 %v384_v0, %s780_s14  ;;  %351 = vrot.lane.b32.xlu1 %v383_v1, %s780_s14 }
  0x20   : > { %341 = vrot.lane.b32.xlu2 %v384_v0, %s781_s15 }
  0x27   : > { %339 = vrot.lane.b32.xlu0 %v383_v1, %s781_s15  ;;  %329 = vrot.lane.b32.xlu1 %v384_v0, %s782_s16 }
  0x28   : > { %327 = vrot.lane.b32.xlu2 %v383_v1, %s782_s16 }
  0x2f   : > { %317 = vrot.lane.b32.xlu0 %v384_v0, %s783_s17  ;;  %315 = vrot.lane.b32.xlu1 %v383_v1, %s783_s17 }
  0x30   : > { %401 = vrot.lane.b32.xlu2 %v384_v0, %s784_s18 }
  0x37   : > { %399 = vrot.lane.b32.xlu0 %v383_v1, %s784_s18  ;;  %438 = vperm.xlu1 %757, %v430_v23   ;;  %v556_v1 = vld [vmem:[%s945_s7] sm:$0xff] }
  0x38   : > { %433 = vperm.xlu2 %758, %v429_v24  }
  0x6a   : > { %v366_v2 = vpop.permute.xlu2 %365 }
  0x6b   : > { %370 = vst.msk [vmem:[#allocation2 + $0x58] sm:$0xff] %vm308_vm0, %v366_v2  ;;  %v557_v2 = vld [vmem:[%s945_s7 + $0x8] sm:$0xff] }
  0x72   : > { %v364_v3 = vpop.permute.xlu2 %363  ;;  %v422_v18 = vld [vmem:[#allocation2 + $0x58] sm:$0xff] }
  0x73   : > { %369 = vst.msk [vmem:[#allocation2 + $0x50] sm:$0xff] %vm308_vm0, %v364_v3  ;;  %v524_v3 = vld [vmem:[%s943_s5] sm:$0xf] }
  0x7a   : > { %v342_v4 = vpop.permute.xlu2 %341  ;;  %v421_v20 = vld [vmem:[#allocation2 + $0x50] sm:$0xff] }
  0x7b   : > { %346 = vst.msk [vmem:[#allocation2 + $0x38] sm:$0xff] %vm308_vm0, %v342_v4 }
  0x81   : > { %v390_v5 = vpop.permute.xlu0 %389  ;;  %v378_v6 = vpop.permute.xlu1 %377 }
  0x82   : > { %394 = vst.msk [vmem:[#allocation2 + $0x78] sm:$0xff] %vm308_vm0, %v390_v5  ;;  %v328_v7 = vpop.permute.xlu2 %327  ;;  %v418_v27 = vld [vmem:[#allocation2 + $0x38] sm:$0xff] }
  0x83   : > { %382 = vst.msk [vmem:[#allocation2 + $0x68] sm:$0xff] %vm308_vm0, %v378_v6 }
  0x84   : > { %333 = vst.msk [vmem:[#allocation2 + $0x20] sm:$0xff] %vm308_vm0, %v328_v7 }
  0x89   : > { %v388_v8 = vpop.permute.xlu0 %387  ;;  %v426_v9 = vld [vmem:[#allocation2 + $0x78] sm:$0xff]  ;;  %v376_v10 = vpop.permute.xlu1 %375 }
  0x8a   : > { %393 = vst.msk [vmem:[#allocation2 + $0x70] sm:$0xff] %vm308_vm0, %v388_v8  ;;  %448 = vmatpush.msra.mxu0 %v426_v9  ;;  %v402_v11 = vpop.permute.xlu2 %401  ;;  %v424_v15 = vld [vmem:[#allocation2 + $0x68] sm:$0xff] }
  0x8b   : > { %381 = vst.msk [vmem:[#allocation2 + $0x60] sm:$0xff] %vm308_vm0, %v376_v10  ;;  %v415_v32 = vld [vmem:[#allocation2 + $0x20] sm:$0xff] }
  0x8c   : > { %406 = vst.msk [vmem:[#allocation2 + $0x88] sm:$0xff] %vm308_vm0, %v402_v11  ;;  %v523_v11 = vld [vmem:[%s942_s4] sm:$0xf] }
  0x91   : > { %v354_v12 = vpop.permute.xlu0 %353  ;;  %v425_v13 = vld [vmem:[#allocation2 + $0x70] sm:$0xff]  ;;  %v352_v14 = vpop.permute.xlu1 %351 }
  0x92   : > { %358 = vst.msk [vmem:[#allocation2 + $0x48] sm:$0xff] %vm308_vm0, %v354_v12  ;;  %449 = vmatpush.msra.mxu0 %v425_v13  ;;  %v423_v17 = vld [vmem:[#allocation2 + $0x60] sm:$0xff]  ;;  %v434_v43 = vpop.permute.xlu2 %433 }
  0x93   : > { %357 = vst.msk [vmem:[#allocation2 + $0x40] sm:$0xff] %vm308_vm0, %v352_v14  ;;  %v428_v16 = vld [vmem:[#allocation2 + $0x88] sm:$0xff] }
  0x94   : > { %450 = vmatpush.msra.mxu0 %v424_v15  ;;  %485 = vmatpush.msra.mxu1 %v428_v16 }
  0x96   : > { %451 = vmatpush.msra.mxu0 %v423_v17  ;;  %v554_v17 = vld [vmem:[%s944_s6] sm:$0xff] }
  0x98   : > { %452 = vmatpush.msra.mxu0 %v422_v18  ;;  %v555_v18 = vld [vmem:[%s944_s6 + $0x8] sm:$0xff] }
  0x99   : > { %v340_v19 = vpop.permute.xlu0 %339  ;;  %v330_v21 = vpop.permute.xlu1 %329  ;;  %v420_v22 = vld [vmem:[#allocation2 + $0x48] sm:$0xff] }
  0x9a   : > { %345 = vst.msk [vmem:[#allocation2 + $0x30] sm:$0xff] %vm308_vm0, %v340_v19  ;;  %453 = vmatpush.msra.mxu0 %v421_v20  ;;  %v419_v26 = vld [vmem:[#allocation2 + $0x40] sm:$0xff] }
  0x9b   : > { %334 = vst.msk [vmem:[#allocation2 + $0x28] sm:$0xff] %vm308_vm0, %v330_v21 }
  0x9c   : > { %454 = vmatpush.msra.mxu0 %v420_v22 }
  0x9e   : > { %455 = vmatpush.msra.mxu0 %v419_v26 }
  0xa0   : > { %456 = vmatpush.msra.mxu0 %v418_v27 }
  0xa1   : > { %v318_v28 = vpop.permute.xlu0 %317  ;;  %v417_v29 = vld [vmem:[#allocation2 + $0x30] sm:$0xff]  ;;  %v316_v30 = vpop.permute.xlu1 %315 }
  0xa2   : > { %322 = vst.msk [vmem:[#allocation2 + $0x18] sm:$0xff] %vm308_vm0, %v318_v28  ;;  %457 = vmatpush.msra.mxu0 %v417_v29  ;;  %v416_v31 = vld [vmem:[#allocation2 + $0x28] sm:$0xff] }
  0xa3   : > { %321 = vst.msk [vmem:[#allocation2 + $0x10] sm:$0xff] %vm308_vm0, %v316_v30 }
  0xa4   : > { %458 = vmatpush.msra.mxu0 %v416_v31 }
  0xa6   : > { %459 = vmatpush.msra.mxu0 %v415_v32 }
  0xa9   : > { %v400_v33 = vpop.permute.xlu0 %399  ;;  %v414_v34 = vld [vmem:[#allocation2 + $0x18] sm:$0xff]  ;;  %v439_v52 = vpop.permute.xlu1 %438 }
  0xaa   : > { %405 = vst.msk [vmem:[#allocation2 + $0x80] sm:$0xff] %vm308_vm0, %v400_v33  ;;  %460 = vmatpush.msra.mxu0 %v414_v34  ;;  %v413_v35 = vld [vmem:[#allocation2 + $0x10] sm:$0xff] }
  0xac   : > { %461 = vmatpush.msra.mxu0 %v413_v35 }
  0xae   : > { %462 = vmatpush.msra.mxu0 %v412_v36 }
  0xb0   : > { %463 = vmatpush.msra.mxu0 %v411_v37 }
  0xb1   : > { %464 = vmatmul.f32.vlgmr.msra.gmra.mxu0 %v407_v38  ;;  %v427_v40 = vld [vmem:[#allocation2 + $0x80] sm:$0xff] }
  0xb2   : > { %486 = vmatpush.msra.mxu1 %v427_v40 }
  0xb3   : > { %728 = vmatmul.msk.f32.vlgmr.msra.gmra.mxu1 %vm441_vm1, %v408_v39 }
  0xb9   : > { %467 = vmatmul.f32.gmra.mxu0 %v409_v41 }
  0xbb   : > { %729 = vmatmul.msk.f32.gmra.mxu1 %vm441_vm1, %v410_v42 }
 0x12e   : > { %v465_v45 = vpop.f32.mrf.mxu0 }
 0x12f   : > { %v466_v46 = vadd.f32 %v465_v45, %v434_v43 }
 0x130   : > { %v488_v48 = vpop.f32.mrf.mxu1 }
 0x131   : > { %v893_v49 = vadd.f32 %v488_v48, %v466_v46 }
 0x133   : > { %v498_v50 = vmul.f32 %v760_v47, %v893_v49  ;;  %v512_v63 = vsel %vm511_vm3, %v893_v49, -inf }
 0x134   : > { %v514_v0 = vsel %vm308_vm0, %v512_v63, -inf }
 0x135   : > { %v500_v53 = vsel %vm308_vm0, %v498_v50, 0.0 }
 0x136   : > { %v468_v54 = vpop.f32.mrf.mxu0  ;;  %501 = vadd.xlane.f32.xlu1 %v500_v53 }
 0x137   : > { %v469_v56 = vadd.f32 %v468_v54, %v439_v52 }
 0x138   : > { %v491_v57 = vpop.f32.mrf.mxu1 }
 0x139   : > { %v897_v58 = vadd.f32 %v491_v57, %v469_v56 }
 0x13b   : > { %v513_v59 = vsel %vm511_vm3, %v897_v58, -inf  ;;  %v499_v60 = vmul.f32 %v760_v47, %v897_v58 }
 0x13c   : > { %v517_v61 = vsel %vm308_vm0, %v513_v59, -inf }
 0x13d   : > { %518 = vmax.xlane.f32.xlu2 %v517_v61  ;;  %v503_v62 = vsel %vm308_vm0, %v499_v60, 0.0 }
 0x13e   : > { %504 = vadd.xlane.f32.xlu0 %v503_v62 }
 0x145   : > { %515 = vmax.xlane.f32.xlu2 %v514_v0 }
 0x14f   : > { %560 = vperm.xlu1 %757, %v556_v1  }
 0x152   : > { %527 = vperm.xlu0 %759, %v524_v3  }
 0x15d   : > { %565 = vperm.xlu2 %758, %v557_v2  }
 0x1a9   : > { %v502_v7 = vpop.xlane.xlu1 %501 }
 0x1aa   : > { %v506_v9 = vmul.f32 0.015625, %v502_v7 }
 0x1b0   : > { %v519_v4 = vpop.xlane.xlu2 %518 }
 0x1b1   : > { %v505_v5 = vpop.xlane.xlu0 %504 }
 0x1b2   : > { %v507_v6 = vmul.f32 0.015625, %v505_v5 }
 0x1b4   : > { %v522_v8 = vsel %vm520_vm4, %v507_v6, %v519_v4 }
 0x1b5   : > { %547 = vmatpush.msra.mxu2 %v522_v8 }
 0x1b8   : > { %v516_v10 = vpop.xlane.xlu2 %515 }
 0x1b9   : > { %v521_v12 = vsel %vm520_vm4, %v506_v9, %v516_v10 }
 0x1ba   : > { %548 = vmatpush.msra.mxu2 %v521_v12 }
 0x1bb   : > { %730 = vmatmul.msk.f32.vlgmr.msra.gmra.mxu2 %vm441_vm1, %v523_v11 }
 0x1c0   : > { %v566_v22 = vpop.permute.xlu2 %565 }
 0x1c1   : > { %v561_v19 = vpop.permute.xlu1 %560 }
 0x1c4   : > { %v528_v13 = vpop.permute.xlu0 %527 }
 0x23e   : > { %v550_v14 = vpop.f32.mrf.mxu2 }
 0x23f   : > { %v551_v15 = vadd.f32 %v550_v14, %v528_v13 }
 0x241   : > { %v553_v16 = vmax.f32 %v551_v15, 0.0 }
 0x243   : > { %731 = vmatpush.msk.msra.mxu3 %vm575_vm5, %v553_v16 }
 0x244   : > { %732 = vmatmul.msk.f32.vlgmr.msra.gmra.mxu3 %vm568_vm6, %v554_v17 }
 0x24c   : > { %733 = vmatmul.msk.f32.gmra.mxu3 %vm568_vm6, %v555_v18 }
 0x2c7   : > { %v596_v20 = vpop.f32.mrf.mxu3 }
 0x2c8   : > { %v597_v21 = vadd.f32 %v596_v20, %v561_v19 }
 0x2ca   : > { %604 = vrot.lane.b32.xlu1 %v597_v21, %s783_s17 }
 0x2cf   : > { %v599_v23 = vpop.f32.mrf.mxu3 }
 0x2d0   : > { %v600_v24 = vadd.f32 %v599_v23, %v566_v22 }
 0x2d2   : > { %606 = vrot.lane.b32.xlu2 %v600_v24, %s783_s17 }
 0x32c   : > { %v607_v25 = vpop.permute.xlu2 %606 }
 0x32d   : > { %v611_v26 = vadd.f32 %v607_v25, %v600_v24 }
 0x32f   : > { %v735_v27 = vmul.f32 -1.442695, %v611_v26 }
 0x331   : > { %761 = vpow2.f32 %v735_v27 }
 0x337   : > { %v762_v28 = vpop.eup %761 }
 0x338   : > { %v619_v29 = vadd.f32 1.0, %v762_v28 }
 0x33a   : > { %763 = vrcp.f32 %v619_v29  ;;  %v646_v36 = vand.u32 2147483648, %v619_v29  ;;  %v644_v38 = vand.u32 2147483647, %v619_v29  ;;  %vm640_vm8 = vweird.f32 %v619_v29 }
 0x33c   : > { %v605_v30 = vpop.permute.xlu1 %604  ;;  %v647_v42 = vor.u32 1.1754944e-38, %v646_v36  ;;  %vm645_vm10 = vcmp.eq.f32.partialorder %v644_v38, 8.507059e+37 }
 0x33d   : > { %v610_v31 = vadd.f32 %v605_v30, %v597_v21 }
 0x33f   : > { %v734_v32 = vmul.f32 -1.442695, %v610_v31 }
 0x340   : > { %v764_v33 = vpop.eup %763 }
 0x341   : > { %765 = vpow2.f32 %v734_v32  ;;  %v636_v34 = vmul.f32 %v764_v33, %v619_v29  ;;  %vm641_vm7 = vweird.f32 %v764_v33 }
 0x342   : > { %vm642_vm9 = vmor %vm640_vm8, %vm641_vm7 }
 0x343   : > { %v637_v35 = vsub.f32 1.0, %v636_v34 }
 0x345   : > { %v638_v37 = vmul.f32 %v764_v33, %v637_v35 }
 0x347   : > { %v766_v39 = vpop.eup %765  ;;  %v639_v40 = vadd.f32 %v764_v33, %v638_v37 }
 0x348   : > { %v618_v41 = vadd.f32 1.0, %v766_v39 }
 0x349   : > { %v643_v43 = vsel %vm642_vm9, %v764_v33, %v639_v40 }
 0x34a   : > { %767 = vrcp.f32 %v618_v41  ;;  %v648_v44 = vsel %vm645_vm10, %v647_v42, %v643_v43  ;;  %v631_v48 = vand.u32 2147483648, %v618_v41  ;;  %v629_v51 = vand.u32 2147483647, %v618_v41 }
 0x34b   : > { %657 = vperm.xlu2 %758, %v648_v44   ;;  %vm625_vm12 = vweird.f32 %v618_v41 }
 0x34c   : > { %v632_v53 = vor.u32 1.1754944e-38, %v631_v48  ;;  %vm630_vm14 = vcmp.eq.f32.partialorder %v629_v51, 8.507059e+37 }
 0x350   : > { %v768_v45 = vpop.eup %767 }
 0x351   : > { %v621_v46 = vmul.f32 %v768_v45, %v618_v41  ;;  %vm626_vm11 = vweird.f32 %v768_v45 }
 0x352   : > { %vm627_vm13 = vmor %vm625_vm12, %vm626_vm11 }
 0x353   : > { %v622_v47 = vsub.f32 1.0, %v621_v46 }
 0x355   : > { %v623_v50 = vmul.f32 %v768_v45, %v622_v47 }
 0x357   : > { %v624_v52 = vadd.f32 %v768_v45, %v623_v50 }
 0x359   : > { %v628_v54 = vsel %vm627_vm13, %v768_v45, %v624_v52 }
 0x35a   : > { %v633_v55 = vsel %vm630_vm14, %v632_v53, %v628_v54 }
 0x35b   : > { %652 = vperm.xlu1 %757, %v633_v55  }
 0x3a5   : > { %v658_v56 = vpop.permute.xlu2 %657 }
 0x3a6   : > { %v661_v57 = vmul.f32 %v658_v56, %v897_v58 }
 0x3a8   : > { %663 = vst.msk [vmem:[%s305_s11 + $0x8] sm:$0xff] %vm308_vm0, %v661_v57 }
 0x3cd   : > { %v653_v59 = vpop.permute.xlu1 %652 }
 0x3ce   : > { %v660_v60 = vmul.f32 %v653_v59, %v893_v49 }
 0x3d0   : > { %662 = vst.msk [vmem:[%s305_s11] sm:$0xff] %vm308_vm0, %v660_v60 }
 0x3d1 PF: > { %s18_s27 = sadd.s32 1, %s775_s27  }
 0x3d2   : > { %p15_p4 = scmp.ge.s32.totalorder %s18_s27, 4  }
 0x3d4   :  { %17 = sbr.rel (!%p15_p4) target bundleno = 1 (0x1), region = 82 }

// kernel: unet_forward.26
= control target key start
LH: loop header
LB: loop body
LE: loop exit
PB: predicated region body
PF: predicated region fallthrough
CT: control target
= control target key end

     0   :  { %s799_s27 = smov 0   ;;  %s915_s0 = inlined_call_operand.vmem [shape: f32[2,64,31], index: 0, kind: input, shape index: {}]   ;;  %s916_s1 = inlined_call_operand.vmem [shape: f32[16,144], index: 1, kind: input, shape index: {}]   ;;  %s917_s2 = inlined_call_operand.vmem [shape: f32[16,1], index: 2, kind: input, shape index: {}]   ;;  %s918_s3 = inlined_call_operand.vmem [shape: f32[1,25], index: 3, kind: input, shape index: {}]   ;;  %s919_s4 = inlined_call_operand.vmem [shape: f32[4,16], index: 4, kind: input, shape index: {}]   ;;  %s920_s5 = inlined_call_operand.vmem [shape: f32[4,1], index: 5, kind: input, shape index: {}]   ;;  %s921_s6 = inlined_call_operand.vmem [shape: f32[16,4], index: 6, kind: input, shape index: {}]   ;;  %s922_s7 = inlined_call_operand.vmem [shape: f32[16,1], index: 7, kind: input, shape index: {}]   ;;  %s923_s8 = inlined_call_operand.vmem [shape: f32[2,16,25], index: 8, kind: output, shape index: {}]  }
   0x1 LB: > { %s697_s28 = sadd.s32 4294967295, %s748_s27   ;;  %p701_p0 = scmp.ge.s32.totalorder %s748_s27, 1  ;;  %s748_s27 = sphi %s799_s27, %s18_s27  }
   0x2   : > { %p262_p1 = scmp.lt.s32.totalorder %s748_s27, 3 }
   0x4   : > { %p263_p2 = pnand %p701_p0, %p262_p1 }
   0x5   : > { %p296_p3 = scmp.lt.s32.totalorder (!%p263_p2), %s697_s28, 1  ;;  %s750_s11 = smov (!%p263_p2), 123  }
   0x6   : > { %266 = sbr.rel (%p263_p2) target bundleno = 977 (0x3d1), region = 52  ;;  %s751_s12 = smov (!%p263_p2), 127  }
   0x7   : > { %s752_s13 = smov (!%p263_p2), 122  }
   0xb   : > { %s925_s28 = smov (!%p296_p3, %s697_s28), 1  ;;  %vm308_vm0 = vcmask 203776   ;;  %v406_v24 = vld [vmem:[%s917_s2 + $0x8] sm:$0xff]  ;;  %v405_v25 = vld [vmem:[%s917_s2] sm:$0xff]  ;;  %v753_v26 = vmov 0   ;;  %vm417_vm1 = vcmask 130048  }
   0xc   : > { %s716_s29 = sshll.u32 %s925_s28, 6  ;;  %730 = vset.pattern.permute.xlu1 %v753_v26  ;;  %731 = vset.pattern.permute.xlu2 %v753_v26  ;;  %v384_v32 = vld [vmem:[%s916_s1 + $0x8] sm:$0xff]  ;;  %v386_v38 = vld [vmem:[%s916_s1 + $0x18] sm:$0xff]  ;;  %v383_v41 = vld [vmem:[%s916_s1] sm:$0xff]  ;;  %vm498_vm4 = vcmask 7168   ;;  %vm553_vm5 = vcmask 1043456  }
   0xd   : > { %s813_s10 = scalar_lea.vmem %s915_s0, %s716_s29  ;;  %732 = vset.pattern.permute.xlu0 %v753_v26  ;;  %v385_v42 = vld [vmem:[%s916_s1 + $0x10] sm:$0xff]  ;;  %v472_v47 = vld [vmem:[%s918_s3] sm:$0x1]  ;;  %vm546_vm6 = vcmask 31744  }
   0xe   : > { %v360_v0 = vld [vmem:[%s813_s10 + $0x18] sm:$0xff]  ;;  %v348_v1 = vld [vmem:[%s813_s10 + $0x8] sm:$0xff]  ;;  %v335_v3 = vld [vmem:[%s813_s10 + $0x20] sm:$0xff]  ;;  %vm486_vm2 = vcmp.gt.f32.partialorder %v472_v47, 0.5 }
   0xf   : > { %365 = vrot.lane.b32.xlu0 %v360_v0, %s750_s11  ;;  %353 = vrot.lane.b32.xlu1 %v348_v1, %s750_s11  ;;  %v336_v2 = vld [vmem:[%s813_s10 + $0x28] sm:$0xff]  ;;  %314 = vst.msk [vmem:[#allocation2 + $0x18] sm:$0xff] %vm308_vm0, %v360_v0  ;;  %v359_v4 = vld [vmem:[%s813_s10 + $0x10] sm:$0xff]  ;;  %v487_v53 = vsel %vm486_vm2, 1, %v753_v26 }
  0x10   : > { %341 = vrot.lane.b32.xlu2 %v336_v2, %s751_s12  ;;  %330 = vst.msk [vmem:[#allocation2 + $0x38] sm:$0xff] %vm308_vm0, %v336_v2  ;;  %v347_v5 = vld [vmem:[%s813_s10] sm:$0xff]  ;;  %v332_v8 = vld [vmem:[%s813_s10 + $0x38] sm:$0xff]  ;;  %v331_v9 = vld [vmem:[%s813_s10 + $0x30] sm:$0xff]  ;;  %v488_v58 = vperm.slane %v487_v53, 0 }
  0x11   : > { %329 = vst.msk [vmem:[#allocation2 + $0x30] sm:$0xff] %vm308_vm0, %v335_v3  ;;  %v733_v49 = vld [vmem:[%s918_s3] ss:$0 sm:$0xff] }
  0x12   : > { %313 = vst.msk [vmem:[#allocation2 + $0x10] sm:$0xff] %vm308_vm0, %v359_v4  ;;  %vm489_vm3 = vcmp.eq.s32.totalorder %v488_v58, 1 }
  0x13   : > { %310 = vst.msk [vmem:[#allocation2 + $0x8] sm:$0xff] %vm308_vm0, %v348_v1 }
  0x14   : > { %309 = vst.msk [vmem:[#allocation2] sm:$0xff] %vm308_vm0, %v347_v5 }
  0x15   : > { %334 = vst.msk [vmem:[#allocation2 + $0x48] sm:$0xff] %vm308_vm0, %v332_v8 }
  0x16   : > { %333 = vst.msk [vmem:[#allocation2 + $0x40] sm:$0xff] %vm308_vm0, %v331_v9  ;;  %v390_v36 = vld [vmem:[#allocation2 + $0x18] sm:$0xff] }
  0x17   : > { %363 = vrot.lane.b32.xlu0 %v359_v4, %s750_s11  ;;  %351 = vrot.lane.b32.xlu1 %v347_v5, %s750_s11  ;;  %v394_v30 = vld [vmem:[#allocation2 + $0x38] sm:$0xff]  ;;  %v535_v4 = vld [vmem:[%s922_s7 + $0x8] sm:$0xff] }
  0x18   : > { %339 = vrot.lane.b32.xlu2 %v335_v3, %s751_s12  ;;  %v393_v31 = vld [vmem:[#allocation2 + $0x30] sm:$0xff]  ;;  %v534_v3 = vld [vmem:[%s922_s7] sm:$0xff] }
  0x19   : > { %v389_v37 = vld [vmem:[#allocation2 + $0x10] sm:$0xff] }
  0x1a   : > { %v388_v39 = vld [vmem:[#allocation2 + $0x8] sm:$0xff] }
  0x1b   : > { %v387_v40 = vld [vmem:[#allocation2] sm:$0xff] }
  0x1c   : > { %v396_v27 = vld [vmem:[#allocation2 + $0x48] sm:$0xff] }
  0x1d   : > { %v395_v29 = vld [vmem:[#allocation2 + $0x40] sm:$0xff] }
  0x1f   : > { %321 = vrot.lane.b32.xlu0 %v348_v1, %s751_s12  ;;  %319 = vrot.lane.b32.xlu1 %v347_v5, %s751_s12 }
  0x20   : > { %377 = vrot.lane.b32.xlu2 %v348_v1, %s752_s13 }
  0x27   : > { %375 = vrot.lane.b32.xlu0 %v347_v5, %s752_s13  ;;  %414 = vperm.xlu1 %730, %v406_v24   ;;  %v502_v5 = vld [vmem:[%s920_s5] sm:$0xf] }
  0x28   : > { %409 = vperm.xlu2 %731, %v405_v25  }
  0x6a   : > { %v342_v6 = vpop.permute.xlu2 %341 }
  0x6b   : > { %346 = vst.msk [vmem:[#allocation2 + $0x58] sm:$0xff] %vm308_vm0, %v342_v6 }
  0x72   : > { %v340_v7 = vpop.permute.xlu2 %339  ;;  %v398_v22 = vld [vmem:[#allocation2 + $0x58] sm:$0xff] }
  0x73   : > { %345 = vst.msk [vmem:[#allocation2 + $0x50] sm:$0xff] %vm308_vm0, %v340_v7 }
  0x7a   : > { %v378_v12 = vpop.permute.xlu2 %377  ;;  %v397_v23 = vld [vmem:[#allocation2 + $0x50] sm:$0xff] }
  0x7b   : > { %382 = vst.msk [vmem:[#allocation2 + $0x88] sm:$0xff] %vm308_vm0, %v378_v12 }
  0x81   : > { %v366_v10 = vpop.permute.xlu0 %365  ;;  %v354_v11 = vpop.permute.xlu1 %353 }
  0x82   : > { %370 = vst.msk [vmem:[#allocation2 + $0x78] sm:$0xff] %vm308_vm0, %v366_v10  ;;  %v404_v16 = vld [vmem:[#allocation2 + $0x88] sm:$0xff]  ;;  %v410_v43 = vpop.permute.xlu2 %409 }
  0x83   : > { %358 = vst.msk [vmem:[#allocation2 + $0x68] sm:$0xff] %vm308_vm0, %v354_v11  ;;  %461 = vmatpush.msra.mxu1 %v404_v16 }
  0x89   : > { %v364_v13 = vpop.permute.xlu0 %363  ;;  %v402_v14 = vld [vmem:[#allocation2 + $0x78] sm:$0xff]  ;;  %v352_v15 = vpop.permute.xlu1 %351 }
  0x8a   : > { %369 = vst.msk [vmem:[#allocation2 + $0x70] sm:$0xff] %vm308_vm0, %v364_v13  ;;  %424 = vmatpush.msra.mxu0 %v402_v14  ;;  %v400_v20 = vld [vmem:[#allocation2 + $0x68] sm:$0xff]  ;;  %v501_v13 = vld [vmem:[%s919_s4] sm:$0xf] }
  0x8b   : > { %357 = vst.msk [vmem:[#allocation2 + $0x60] sm:$0xff] %vm308_vm0, %v352_v15 }
  0x91   : > { %v401_v17 = vld [vmem:[#allocation2 + $0x70] sm:$0xff]  ;;  %v322_v18 = vpop.permute.xlu0 %321  ;;  %v320_v19 = vpop.permute.xlu1 %319 }
  0x92   : > { %425 = vmatpush.msra.mxu0 %v401_v17  ;;  %326 = vst.msk [vmem:[#allocation2 + $0x28] sm:$0xff] %vm308_vm0, %v322_v18  ;;  %v399_v21 = vld [vmem:[#allocation2 + $0x60] sm:$0xff] }
  0x93   : > { %325 = vst.msk [vmem:[#allocation2 + $0x20] sm:$0xff] %vm308_vm0, %v320_v19  ;;  %v532_v19 = vld [vmem:[%s921_s6] sm:$0xff] }
  0x94   : > { %426 = vmatpush.msra.mxu0 %v400_v20  ;;  %v533_v20 = vld [vmem:[%s921_s6 + $0x8] sm:$0xff] }
  0x96   : > { %427 = vmatpush.msra.mxu0 %v399_v21 }
  0x98   : > { %428 = vmatpush.msra.mxu0 %v398_v22 }
  0x99   : > { %v376_v28 = vpop.permute.xlu0 %375  ;;  %v392_v33 = vld [vmem:[#allocation2 + $0x28] sm:$0xff]  ;;  %v415_v51 = vpop.permute.xlu1 %414 }
  0x9a   : > { %429 = vmatpush.msra.mxu0 %v397_v23  ;;  %381 = vst.msk [vmem:[#allocation2 + $0x80] sm:$0xff] %vm308_vm0, %v376_v28  ;;  %v391_v35 = vld [vmem:[#allocation2 + $0x20] sm:$0xff] }
  0x9c   : > { %430 = vmatpush.msra.mxu0 %v396_v27 }
  0x9e   : > { %431 = vmatpush.msra.mxu0 %v395_v29 }
  0xa0   : > { %432 = vmatpush.msra.mxu0 %v394_v30 }
  0xa1   : > { %v403_v34 = vld [vmem:[#allocation2 + $0x80] sm:$0xff] }
  0xa2   : > { %433 = vmatpush.msra.mxu0 %v393_v31  ;;  %462 = vmatpush.msra.mxu1 %v403_v34 }
  0xa3   : > { %706 = vmatmul.msk.f32.vlgmr.msra.gmra.mxu1 %vm417_vm1, %v384_v32 }
  0xa4   : > { %434 = vmatpush.msra.mxu0 %v392_v33 }
  0xa6   : > { %435 = vmatpush.msra.mxu0 %v391_v35 }
  0xa8   : > { %436 = vmatpush.msra.mxu0 %v390_v36 }
  0xaa   : > { %437 = vmatpush.msra.mxu0 %v389_v37 }
  0xab   : > { %707 = vmatmul.msk.f32.gmra.mxu1 %vm417_vm1, %v386_v38 }
  0xac   : > { %438 = vmatpush.msra.mxu0 %v388_v39 }
  0xae   : > { %439 = vmatpush.msra.mxu0 %v387_v40 }
  0xaf   : > { %440 = vmatmul.f32.vlgmr.msra.gmra.mxu0 %v383_v41 }
  0xb7   : > { %443 = vmatmul.f32.gmra.mxu0 %v385_v42 }
 0x120   : > { %v464_v44 = vpop.f32.mrf.mxu1 }
 0x128   : > { %v467_v55 = vpop.f32.mrf.mxu1 }
 0x12c   : > { %v441_v45 = vpop.f32.mrf.mxu0 }
 0x12d   : > { %v442_v46 = vadd.f32 %v441_v45, %v410_v43 }
 0x12f   : > { %v465_v48 = vadd.f32 %v464_v44, %v442_v46 }
 0x131   : > { %v871_v50 = vmax.f32 %v465_v48, 0.0 }
 0x133   : > { %v476_v52 = vmul.f32 %v733_v49, %v871_v50  ;;  %v490_v1 = vsel %vm489_vm3, %v871_v50, -inf }
 0x134   : > { %v444_v54 = vpop.f32.mrf.mxu0  ;;  %v492_v2 = vsel %vm308_vm0, %v490_v1, -inf }
 0x135   : > { %v445_v56 = vadd.f32 %v444_v54, %v415_v51  ;;  %v478_v57 = vsel %vm308_vm0, %v476_v52, 0.0 }
 0x136   : > { %479 = vadd.xlane.f32.xlu1 %v478_v57 }
 0x137   : > { %v468_v59 = vadd.f32 %v467_v55, %v445_v56 }
 0x139   : > { %v875_v60 = vmax.f32 %v468_v59, 0.0 }
 0x13b   : > { %v491_v61 = vsel %vm489_vm3, %v875_v60, -inf  ;;  %v477_v62 = vmul.f32 %v733_v49, %v875_v60 }
 0x13c   : > { %v495_v63 = vsel %vm308_vm0, %v491_v61, -inf }
 0x13d   : > { %496 = vmax.xlane.f32.xlu2 %v495_v63  ;;  %v481_v0 = vsel %vm308_vm0, %v477_v62, 0.0 }
 0x13e   : > { %482 = vadd.xlane.f32.xlu0 %v481_v0 }
 0x145   : > { %493 = vmax.xlane.f32.xlu2 %v492_v2 }
 0x14f   : > { %538 = vperm.xlu1 %730, %v534_v3  }
 0x152   : > { %505 = vperm.xlu0 %732, %v502_v5  }
 0x15d   : > { %543 = vperm.xlu2 %731, %v535_v4  }
 0x1a9   : > { %v480_v9 = vpop.xlane.xlu1 %479 }
 0x1aa   : > { %v484_v11 = vmul.f32 0.0625, %v480_v9 }
 0x1b0   : > { %v497_v6 = vpop.xlane.xlu2 %496 }
 0x1b1   : > { %v483_v7 = vpop.xlane.xlu0 %482 }
 0x1b2   : > { %v485_v8 = vmul.f32 0.0625, %v483_v7 }
 0x1b4   : > { %v500_v10 = vsel %vm498_vm4, %v485_v8, %v497_v6 }
 0x1b5   : > { %525 = vmatpush.msra.mxu2 %v500_v10 }
 0x1b8   : > { %v494_v12 = vpop.xlane.xlu2 %493 }
 0x1b9   : > { %v499_v14 = vsel %vm498_vm4, %v484_v11, %v494_v12 }
 0x1ba   : > { %526 = vmatpush.msra.mxu2 %v499_v14 }
 0x1bb   : > { %708 = vmatmul.msk.f32.vlgmr.msra.gmra.mxu2 %vm417_vm1, %v501_v13 }
 0x1c0   : > { %v544_v24 = vpop.permute.xlu2 %543 }
 0x1c1   : > { %v539_v21 = vpop.permute.xlu1 %538 }
 0x1c4   : > { %v506_v15 = vpop.permute.xlu0 %505 }
 0x23e   : > { %v528_v16 = vpop.f32.mrf.mxu2 }
 0x23f   : > { %v529_v17 = vadd.f32 %v528_v16, %v506_v15 }
 0x241   : > { %v531_v18 = vmax.f32 %v529_v17, 0.0 }
 0x243   : > { %709 = vmatpush.msk.msra.mxu3 %vm553_vm5, %v531_v18 }
 0x244   : > { %710 = vmatmul.msk.f32.vlgmr.msra.gmra.mxu3 %vm546_vm6, %v532_v19 }
 0x24c   : > { %711 = vmatmul.msk.f32.gmra.mxu3 %vm546_vm6, %v533_v20 }
 0x2c7   : > { %v574_v22 = vpop.f32.mrf.mxu3 }
 0x2c8   : > { %v575_v23 = vadd.f32 %v574_v22, %v539_v21 }
 0x2ca   : > { %582 = vrot.lane.b32.xlu1 %v575_v23, %s751_s12 }
 0x2cf   : > { %v577_v25 = vpop.f32.mrf.mxu3 }
 0x2d0   : > { %v578_v26 = vadd.f32 %v577_v25, %v544_v24 }
 0x2d2   : > { %584 = vrot.lane.b32.xlu2 %v578_v26, %s751_s12  ;;  %s717_s12 = sshll.u32 %s925_s28, 4 }
 0x2d3   : > { %s305_s25 = scalar_lea.vmem %s923_s8, %s717_s12 }
 0x32c   : > { %v585_v27 = vpop.permute.xlu2 %584 }
 0x32d   : > { %v589_v28 = vadd.f32 %v585_v27, %v578_v26 }
 0x32f   : > { %v713_v29 = vmul.f32 -1.442695, %v589_v28 }
 0x331   : > { %734 = vpow2.f32 %v713_v29 }
 0x337   : > { %v735_v30 = vpop.eup %734 }
 0x338   : > { %v597_v31 = vadd.f32 1.0, %v735_v30 }
 0x33a   : > { %736 = vrcp.f32 %v597_v31  ;;  %v624_v38 = vand.u32 2147483648, %v597_v31  ;;  %v622_v40 = vand.u32 2147483647, %v597_v31  ;;  %vm618_vm8 = vweird.f32 %v597_v31 }
 0x33c   : > { %v583_v32 = vpop.permute.xlu1 %582  ;;  %v625_v44 = vor.u32 1.1754944e-38, %v624_v38  ;;  %vm623_vm10 = vcmp.eq.f32.partialorder %v622_v40, 8.507059e+37 }
 0x33d   : > { %v588_v33 = vadd.f32 %v583_v32, %v575_v23 }
 0x33f   : > { %v712_v34 = vmul.f32 -1.442695, %v588_v33 }
 0x340   : > { %v737_v35 = vpop.eup %736 }
 0x341   : > { %738 = vpow2.f32 %v712_v34  ;;  %v614_v36 = vmul.f32 %v737_v35, %v597_v31  ;;  %vm619_vm7 = vweird.f32 %v737_v35 }
 0x342   : > { %vm620_vm9 = vmor %vm618_vm8, %vm619_vm7 }
 0x343   : > { %v615_v37 = vsub.f32 1.0, %v614_v36 }
 0x345   : > { %v616_v39 = vmul.f32 %v737_v35, %v615_v37 }
 0x347   : > { %v739_v41 = vpop.eup %738  ;;  %v617_v42 = vadd.f32 %v737_v35, %v616_v39 }
 0x348   : > { %v596_v43 = vadd.f32 1.0, %v739_v41 }
 0x349   : > { %v621_v45 = vsel %vm620_vm9, %v737_v35, %v617_v42 }
 0x34a   : > { %740 = vrcp.f32 %v596_v43  ;;  %v626_v46 = vsel %vm623_vm10, %v625_v44, %v621_v45  ;;  %v609_v51 = vand.u32 2147483648, %v596_v43  ;;  %v607_v53 = vand.u32 2147483647, %v596_v43 }
 0x34b   : > { %635 = vperm.xlu2 %731, %v626_v46   ;;  %vm603_vm12 = vweird.f32 %v596_v43 }
 0x34c   : > { %v610_v55 = vor.u32 1.1754944e-38, %v609_v51  ;;  %vm608_vm14 = vcmp.eq.f32.partialorder %v607_v53, 8.507059e+37 }
 0x350   : > { %v741_v47 = vpop.eup %740 }
 0x351   : > { %v599_v48 = vmul.f32 %v741_v47, %v596_v43  ;;  %vm604_vm11 = vweird.f32 %v741_v47 }
 0x352   : > { %vm605_vm13 = vmor %vm603_vm12, %vm604_vm11 }
 0x353   : > { %v600_v49 = vsub.f32 1.0, %v599_v48 }
 0x355   : > { %v601_v52 = vmul.f32 %v741_v47, %v600_v49 }
 0x357   : > { %v602_v54 = vadd.f32 %v741_v47, %v601_v52 }
 0x359   : > { %v606_v56 = vsel %vm605_vm13, %v741_v47, %v602_v54 }
 0x35a   : > { %v611_v57 = vsel %vm608_vm14, %v610_v55, %v606_v56 }
 0x35b   : > { %630 = vperm.xlu1 %730, %v611_v57  }
 0x3a5   : > { %v636_v58 = vpop.permute.xlu2 %635 }
 0x3a6   : > { %v639_v59 = vmul.f32 %v636_v58, %v875_v60 }
 0x3a8   : > { %641 = vst.msk [vmem:[%s305_s25 + $0x8] sm:$0xff] %vm308_vm0, %v639_v59 }
 0x3cd   : > { %v631_v61 = vpop.permute.xlu1 %630 }
 0x3ce   : > { %v638_v62 = vmul.f32 %v631_v61, %v871_v50 }
 0x3d0   : > { %640 = vst.msk [vmem:[%s305_s25] sm:$0xff] %vm308_vm0, %v638_v62 }
 0x3d1 PF: > { %s18_s27 = sadd.s32 1, %s748_s27  }
 0x3d2   : > { %p15_p4 = scmp.ge.s32.totalorder %s18_s27, 4  }
 0x3d4   :  { %17 = sbr.rel (!%p15_p4) target bundleno = 1 (0x1), region = 82 }

// kernel: unet_forward.27
= control target key start
LH: loop header
LB: loop body
LE: loop exit
PB: predicated region body
PF: predicated region fallthrough
CT: control target
= control target key end

     0   :  { %s506_s12 = smov 0   ;;  %s568_s0 = inlined_call_operand.vmem [shape: f32[2,16,50], index: 0, kind: input, shape index: {}]   ;;  %s569_s1 = inlined_call_operand.vmem [shape: f32[16,144], index: 1, kind: input, shape index: {}]   ;;  %s570_s2 = inlined_call_operand.vmem [shape: f32[16,1], index: 2, kind: input, shape index: {}]   ;;  %s571_s3 = inlined_call_operand.vmem [shape: f32[2,16,36], index: 3, kind: output, shape index: {}]  }
   0x1 LB: > { %s418_s13 = sadd.s32 4294967295, %s475_s12   ;;  %p422_p0 = scmp.ge.s32.totalorder %s475_s12, 1  ;;  %s475_s12 = sphi %s506_s12, %s13_s12  }
   0x2   : > { %p137_p1 = scmp.lt.s32.totalorder %s475_s12, 3 }
   0x4   : > { %p138_p2 = pnand %p422_p0, %p137_p1 }
   0x5   : > { %p161_p3 = scmp.lt.s32.totalorder (!%p138_p2), %s418_s13, 1  ;;  %s477_s18 = smov (!%p138_p2), 115  }
   0x6   : > { %141 = sbr.rel (%p138_p2) target bundleno = 318 (0x13e), region = 32  ;;  %s478_s19 = smov (!%p138_p2), 116  }
   0x7   : > { %s479_s20 = smov (!%p138_p2), 120   ;;  %s480_s21 = smov (!%p138_p2), 121  }
   0x8   : > { %s481_s22 = smov (!%p138_p2), 122   ;;  %s482_s23 = smov (!%p138_p2), 126  }
   0x9   : > { %s483_s24 = smov (!%p138_p2), 127   ;;  %s484_s25 = smov (!%p138_p2), 114  }
   0xb   : > { %s573_s13 = smov (!%p161_p3, %s418_s13), 1  ;;  %vm173_vm0 = vcmask 293888   ;;  %v485_v18 = vmov 0   ;;  %v294_v25 = vld [vmem:[%s570_s2] sm:$0xff]  ;;  %v295_v26 = vld [vmem:[%s570_s2 + $0x8] sm:$0xff]  ;;  %v274_v39 = vld [vmem:[%s569_s1 + $0x10] sm:$0xff] }
   0xc   : > { %s431_s14 = sshll.u32 %s573_s13, 4  ;;  %466 = vset.pattern.permute.xlu1 %v485_v18  ;;  %467 = vset.pattern.permute.xlu2 %v485_v18  ;;  %v272_v38 = vld [vmem:[%s569_s1] sm:$0xff]  ;;  %v273_v40 = vld [vmem:[%s569_s1 + $0x8] sm:$0xff]  ;;  %vm306_vm1 = vcmask 130048   ;;  %v275_v42 = vld [vmem:[%s569_s1 + $0x18] sm:$0xff] }
   0xd   : > { %s165_s17 = scalar_lea.vmem %s568_s0, %s431_s14  ;;  %468 = vset.pattern.permute.xlu0 %v485_v18  ;;  %s170_s16 = scalar_lea.vmem %s571_s3, %s431_s14 }
   0xe   : > { %v249_v0 = vld [vmem:[%s165_s17 + $0x8] sm:$0xff]  ;;  %v248_v1 = vld [vmem:[%s165_s17] sm:$0xff] }
   0xf   : > { %254 = vrot.lane.b32.xlu0 %v249_v0, %s477_s18  ;;  %242 = vrot.lane.b32.xlu1 %v249_v0, %s478_s19  ;;  %175 = vst.msk [vmem:[#allocation2 + $0x8] sm:$0xff] %vm173_vm0, %v249_v0 }
  0x10   : > { %230 = vrot.lane.b32.xlu2 %v249_v0, %s479_s20  ;;  %174 = vst.msk [vmem:[#allocation2] sm:$0xff] %vm173_vm0, %v248_v1 }
  0x16   : > { %v277_v36 = vld [vmem:[#allocation2 + $0x8] sm:$0xff] }
  0x17   : > { %252 = vrot.lane.b32.xlu0 %v248_v1, %s477_s18  ;;  %240 = vrot.lane.b32.xlu1 %v248_v1, %s478_s19  ;;  %v276_v37 = vld [vmem:[#allocation2] sm:$0xff] }
  0x18   : > { %228 = vrot.lane.b32.xlu2 %v248_v1, %s479_s20 }
  0x1f   : > { %218 = vrot.lane.b32.xlu0 %v249_v0, %s480_s21  ;;  %216 = vrot.lane.b32.xlu1 %v248_v1, %s480_s21 }
  0x20   : > { %206 = vrot.lane.b32.xlu2 %v249_v0, %s481_s22 }
  0x27   : > { %204 = vrot.lane.b32.xlu0 %v248_v1, %s481_s22  ;;  %194 = vrot.lane.b32.xlu1 %v249_v0, %s482_s23 }
  0x28   : > { %192 = vrot.lane.b32.xlu2 %v248_v1, %s482_s23 }
  0x2f   : > { %182 = vrot.lane.b32.xlu0 %v249_v0, %s483_s24  ;;  %180 = vrot.lane.b32.xlu1 %v248_v1, %s483_s24 }
  0x30   : > { %266 = vrot.lane.b32.xlu2 %v249_v0, %s484_s25 }
  0x37   : > { %264 = vrot.lane.b32.xlu0 %v248_v1, %s484_s25  ;;  %298 = vperm.xlu1 %466, %v294_v25  }
  0x38   : > { %303 = vperm.xlu2 %467, %v295_v26  }
  0x6a   : > { %v231_v2 = vpop.permute.xlu2 %230 }
  0x6b   : > { %235 = vst.msk [vmem:[#allocation2 + $0x58] sm:$0xff] %vm173_vm0, %v231_v2 }
  0x72   : > { %v229_v3 = vpop.permute.xlu2 %228  ;;  %v287_v19 = vld [vmem:[#allocation2 + $0x58] sm:$0xff] }
  0x73   : > { %234 = vst.msk [vmem:[#allocation2 + $0x50] sm:$0xff] %vm173_vm0, %v229_v3 }
  0x7a   : > { %v207_v4 = vpop.permute.xlu2 %206  ;;  %v286_v21 = vld [vmem:[#allocation2 + $0x50] sm:$0xff] }
  0x7b   : > { %211 = vst.msk [vmem:[#allocation2 + $0x38] sm:$0xff] %vm173_vm0, %v207_v4 }
  0x81   : > { %v255_v5 = vpop.permute.xlu0 %254  ;;  %v243_v6 = vpop.permute.xlu1 %242 }
  0x82   : > { %259 = vst.msk [vmem:[#allocation2 + $0x78] sm:$0xff] %vm173_vm0, %v255_v5  ;;  %v193_v7 = vpop.permute.xlu2 %192  ;;  %v283_v27 = vld [vmem:[#allocation2 + $0x38] sm:$0xff] }
  0x83   : > { %247 = vst.msk [vmem:[#allocation2 + $0x68] sm:$0xff] %vm173_vm0, %v243_v6 }
  0x84   : > { %198 = vst.msk [vmem:[#allocation2 + $0x20] sm:$0xff] %vm173_vm0, %v193_v7 }
  0x89   : > { %v253_v8 = vpop.permute.xlu0 %252  ;;  %v291_v9 = vld [vmem:[#allocation2 + $0x78] sm:$0xff]  ;;  %v241_v10 = vpop.permute.xlu1 %240 }
  0x8a   : > { %258 = vst.msk [vmem:[#allocation2 + $0x70] sm:$0xff] %vm173_vm0, %v253_v8  ;;  %313 = vmatpush.msra.mxu0 %v291_v9  ;;  %433 = vmatpush.msra.mxu2 %v291_v9  ;;  %v267_v11 = vpop.permute.xlu2 %266  ;;  %v289_v15 = vld [vmem:[#allocation2 + $0x68] sm:$0xff] }
  0x8b   : > { %246 = vst.msk [vmem:[#allocation2 + $0x60] sm:$0xff] %vm173_vm0, %v241_v10  ;;  %v280_v32 = vld [vmem:[#allocation2 + $0x20] sm:$0xff] }
  0x8c   : > { %271 = vst.msk [vmem:[#allocation2 + $0x88] sm:$0xff] %vm173_vm0, %v267_v11 }
  0x91   : > { %v219_v12 = vpop.permute.xlu0 %218  ;;  %v290_v13 = vld [vmem:[#allocation2 + $0x70] sm:$0xff]  ;;  %v217_v14 = vpop.permute.xlu1 %216 }
  0x92   : > { %223 = vst.msk [vmem:[#allocation2 + $0x48] sm:$0xff] %vm173_vm0, %v219_v12  ;;  %314 = vmatpush.msra.mxu0 %v290_v13  ;;  %434 = vmatpush.msra.mxu2 %v290_v13  ;;  %v288_v16 = vld [vmem:[#allocation2 + $0x60] sm:$0xff]  ;;  %v304_v48 = vpop.permute.xlu2 %303 }
  0x93   : > { %222 = vst.msk [vmem:[#allocation2 + $0x40] sm:$0xff] %vm173_vm0, %v217_v14  ;;  %v293_v17 = vld [vmem:[#allocation2 + $0x88] sm:$0xff] }
  0x94   : > { %315 = vmatpush.msra.mxu0 %v289_v15  ;;  %435 = vmatpush.msra.mxu2 %v289_v15 }
  0x95   : > { %350 = vmatpush.msra.mxu1 %v293_v17 }
  0x96   : > { %316 = vmatpush.msra.mxu0 %v288_v16  ;;  %436 = vmatpush.msra.mxu2 %v288_v16 }
  0x98   : > { %317 = vmatpush.msra.mxu0 %v287_v19  ;;  %437 = vmatpush.msra.mxu2 %v287_v19 }
  0x99   : > { %v205_v20 = vpop.permute.xlu0 %204  ;;  %v195_v22 = vpop.permute.xlu1 %194  ;;  %v285_v23 = vld [vmem:[#allocation2 + $0x48] sm:$0xff] }
  0x9a   : > { %210 = vst.msk [vmem:[#allocation2 + $0x30] sm:$0xff] %vm173_vm0, %v205_v20  ;;  %318 = vmatpush.msra.mxu0 %v286_v21  ;;  %438 = vmatpush.msra.mxu2 %v286_v21  ;;  %v284_v24 = vld [vmem:[#allocation2 + $0x40] sm:$0xff] }
  0x9b   : > { %199 = vst.msk [vmem:[#allocation2 + $0x28] sm:$0xff] %vm173_vm0, %v195_v22 }
  0x9c   : > { %319 = vmatpush.msra.mxu0 %v285_v23  ;;  %439 = vmatpush.msra.mxu2 %v285_v23 }
  0x9e   : > { %320 = vmatpush.msra.mxu0 %v284_v24  ;;  %440 = vmatpush.msra.mxu2 %v284_v24 }
  0xa0   : > { %321 = vmatpush.msra.mxu0 %v283_v27  ;;  %441 = vmatpush.msra.mxu2 %v283_v27 }
  0xa1   : > { %v183_v28 = vpop.permute.xlu0 %182  ;;  %v282_v29 = vld [vmem:[#allocation2 + $0x30] sm:$0xff]  ;;  %v181_v30 = vpop.permute.xlu1 %180 }
  0xa2   : > { %187 = vst.msk [vmem:[#allocation2 + $0x18] sm:$0xff] %vm173_vm0, %v183_v28  ;;  %322 = vmatpush.msra.mxu0 %v282_v29  ;;  %442 = vmatpush.msra.mxu2 %v282_v29  ;;  %v281_v31 = vld [vmem:[#allocation2 + $0x28] sm:$0xff] }
  0xa3   : > { %186 = vst.msk [vmem:[#allocation2 + $0x10] sm:$0xff] %vm173_vm0, %v181_v30 }
  0xa4   : > { %323 = vmatpush.msra.mxu0 %v281_v31  ;;  %443 = vmatpush.msra.mxu2 %v281_v31 }
  0xa6   : > { %324 = vmatpush.msra.mxu0 %v280_v32  ;;  %444 = vmatpush.msra.mxu2 %v280_v32 }
  0xa9   : > { %v265_v33 = vpop.permute.xlu0 %264  ;;  %v279_v34 = vld [vmem:[#allocation2 + $0x18] sm:$0xff]  ;;  %v299_v43 = vpop.permute.xlu1 %298 }
  0xaa   : > { %270 = vst.msk [vmem:[#allocation2 + $0x80] sm:$0xff] %vm173_vm0, %v265_v33  ;;  %325 = vmatpush.msra.mxu0 %v279_v34  ;;  %445 = vmatpush.msra.mxu2 %v279_v34  ;;  %v278_v35 = vld [vmem:[#allocation2 + $0x10] sm:$0xff] }
  0xac   : > { %326 = vmatpush.msra.mxu0 %v278_v35  ;;  %446 = vmatpush.msra.mxu2 %v278_v35 }
  0xae   : > { %327 = vmatpush.msra.mxu0 %v277_v36  ;;  %447 = vmatpush.msra.mxu2 %v277_v36 }
  0xb0   : > { %328 = vmatpush.msra.mxu0 %v276_v37  ;;  %448 = vmatpush.msra.mxu2 %v276_v37 }
  0xb1   : > { %329 = vmatmul.f32.vlgmr.msra.gmra.mxu0 %v272_v38  ;;  %v292_v41 = vld [vmem:[#allocation2 + $0x80] sm:$0xff]  ;;  %332 = vmatmul.f32.vlgmr.msra.gmra.mxu2 %v274_v39 }
  0xb2   : > { %351 = vmatpush.msra.mxu1 %v292_v41 }
  0xb3   : > { %427 = vmatmul.msk.f32.vlgmr.msra.gmra.mxu1 %vm306_vm1, %v273_v40 }
  0xbb   : > { %428 = vmatmul.msk.f32.gmra.mxu1 %vm306_vm1, %v275_v42 }
 0x12e   : > { %v330_v44 = vpop.f32.mrf.mxu0 }
 0x12f   : > { %v331_v45 = vadd.f32 %v330_v44, %v299_v43 }
 0x130   : > { %v353_v46 = vpop.f32.mrf.mxu1 }
 0x131   : > { %v354_v47 = vadd.f32 %v353_v46, %v331_v45 }
 0x133   : > { %v359_v49 = vmax.f32 %v354_v47, 0.0 }
 0x134   : > { %v333_v50 = vpop.f32.mrf.mxu2 }
 0x135   : > { %361 = vst.msk [vmem:[%s170_s16] sm:$0xff] %vm173_vm0, %v359_v49  ;;  %v334_v51 = vadd.f32 %v333_v50, %v304_v48 }
 0x138   : > { %v356_v52 = vpop.f32.mrf.mxu1 }
 0x139   : > { %v357_v53 = vadd.f32 %v356_v52, %v334_v51 }
 0x13b   : > { %v360_v54 = vmax.f32 %v357_v53, 0.0 }
 0x13d   : > { %362 = vst.msk [vmem:[%s170_s16 + $0x8] sm:$0xff] %vm173_vm0, %v360_v54 }
 0x13e PF: > { %s13_s12 = sadd.s32 1, %s475_s12  }
 0x13f   : > { %p10_p4 = scmp.ge.s32.totalorder %s13_s12, 4  }
 0x141   :  { %12 = sbr.rel (!%p10_p4) target bundleno = 1 (0x1), region = 62 }

// kernel: unet_forward.28
= control target key start
LH: loop header
LB: loop body
LE: loop exit
PB: predicated region body
PF: predicated region fallthrough
CT: control target
= control target key end

     0   :  { %s831_s27 = smov 0   ;;  %s938_s0 = inlined_call_operand.vmem [shape: f32[2,16,50], index: 0, kind: input, shape index: {}]   ;;  %s939_s1 = inlined_call_operand.vmem [shape: f32[16,144], index: 1, kind: input, shape index: {}]   ;;  %s940_s2 = inlined_call_operand.vmem [shape: f32[16,1], index: 2, kind: input, shape index: {}]   ;;  %s941_s3 = inlined_call_operand.vmem [shape: f32[1,36], index: 3, kind: input, shape index: {}]   ;;  %s942_s4 = inlined_call_operand.vmem [shape: f32[4,16], index: 4, kind: input, shape index: {}]   ;;  %s943_s5 = inlined_call_operand.vmem [shape: f32[4,1], index: 5, kind: input, shape index: {}]   ;;  %s944_s6 = inlined_call_operand.vmem [shape: f32[16,4], index: 6, kind: input, shape index: {}]   ;;  %s945_s7 = inlined_call_operand.vmem [shape: f32[16,1], index: 7, kind: input, shape index: {}]   ;;  %s946_s8 = inlined_call_operand.vmem [shape: f32[2,16,36], index: 8, kind: output, shape index: {}]  }
   0x1 LB: > { %s719_s28 = sadd.s32 4294967295, %s775_s27   ;;  %p723_p0 = scmp.ge.s32.totalorder %s775_s27, 1  ;;  %s775_s27 = sphi %s831_s27, %s18_s27  }
   0x2   : > { %p262_p1 = scmp.lt.s32.totalorder %s775_s27, 3 }
   0x4   : > { %p263_p2 = pnand %p723_p0, %p262_p1 }
   0x5   : > { %p296_p3 = scmp.lt.s32.totalorder (!%p263_p2), %s719_s28, 1  ;;  %s777_s11 = smov (!%p263_p2), 115  }
   0x6   : > { %266 = sbr.rel (%p263_p2) target bundleno = 977 (0x3d1), region = 52  ;;  %s778_s12 = smov (!%p263_p2), 116  }
   0x7   : > { %s779_s13 = smov (!%p263_p2), 120   ;;  %s780_s14 = smov (!%p263_p2), 121  }
   0x8   : > { %s781_s15 = smov (!%p263_p2), 122   ;;  %s782_s16 = smov (!%p263_p2), 126  }
   0x9   : > { %s783_s17 = smov (!%p263_p2), 127   ;;  %s784_s18 = smov (!%p263_p2), 114  }
   0xb   : > { %s948_s28 = smov (!%p296_p3, %s719_s28), 1  ;;  %vm308_vm0 = vcmask 293888   ;;  %v430_v23 = vld [vmem:[%s940_s2 + $0x8] sm:$0xff]  ;;  %v429_v24 = vld [vmem:[%s940_s2] sm:$0xff]  ;;  %v785_v25 = vmov 0   ;;  %vm441_vm1 = vcmask 130048  }
   0xc   : > { %s738_s29 = sshll.u32 %s948_s28, 4  ;;  %757 = vset.pattern.permute.xlu1 %v785_v25  ;;  %758 = vset.pattern.permute.xlu2 %v785_v25  ;;  %v407_v38 = vld [vmem:[%s939_s1] sm:$0xff]  ;;  %v408_v39 = vld [vmem:[%s939_s1 + $0x8] sm:$0xff]  ;;  %v409_v41 = vld [vmem:[%s939_s1 + $0x10] sm:$0xff]  ;;  %vm520_vm4 = vcmask 7168   ;;  %vm575_vm5 = vcmask 1043456  }
   0xd   : > { %s300_s10 = scalar_lea.vmem %s938_s0, %s738_s29  ;;  %759 = vset.pattern.permute.xlu0 %v785_v25  ;;  %v410_v42 = vld [vmem:[%s939_s1 + $0x18] sm:$0xff]  ;;  %v494_v44 = vld [vmem:[%s941_s3] sm:$0x1]  ;;  %vm568_vm6 = vcmask 31744  }
   0xe   : > { %v384_v0 = vld [vmem:[%s300_s10 + $0x8] sm:$0xff]  ;;  %v383_v1 = vld [vmem:[%s300_s10] sm:$0xff]  ;;  %vm508_vm2 = vcmp.gt.f32.partialorder %v494_v44, 0.5 }
   0xf   : > { %389 = vrot.lane.b32.xlu0 %v384_v0, %s777_s11  ;;  %377 = vrot.lane.b32.xlu1 %v384_v0, %s778_s12  ;;  %310 = vst.msk [vmem:[#allocation2 + $0x8] sm:$0xff] %vm308_vm0, %v384_v0  ;;  %v760_v47 = vld [vmem:[%s941_s3] ss:$0 sm:$0xff]  ;;  %v509_v51 = vsel %vm508_vm2, 1, %v785_v25 }
  0x10   : > { %365 = vrot.lane.b32.xlu2 %v384_v0, %s779_s13  ;;  %309 = vst.msk [vmem:[#allocation2] sm:$0xff] %vm308_vm0, %v383_v1  ;;  %v510_v55 = vperm.slane %v509_v51, 0 }
  0x12   : > { %vm511_vm3 = vcmp.eq.s32.totalorder %v510_v55, 1 }
  0x16   : > { %v412_v36 = vld [vmem:[#allocation2 + $0x8] sm:$0xff] }
  0x17   : > { %387 = vrot.lane.b32.xlu0 %v383_v1, %s777_s11  ;;  %375 = vrot.lane.b32.xlu1 %v383_v1, %s778_s12  ;;  %v411_v37 = vld [vmem:[#allocation2] sm:$0xff]  ;;  %s305_s11 = scalar_lea.vmem %s946_s8, %s738_s29 }
  0x18   : > { %363 = vrot.lane.b32.xlu2 %v383_v1, %s779_s13 }
  0x1f   : > { %353 = vrot.lane.b32.xlu0 %v384_v0, %s780_s14  ;;  %351 = vrot.lane.b32.xlu1 %v383_v1, %s780_s14 }
  0x20   : > { %341 = vrot.lane.b32.xlu2 %v384_v0, %s781_s15 }
  0x27   : > { %339 = vrot.lane.b32.xlu0 %v383_v1, %s781_s15  ;;  %329 = vrot.lane.b32.xlu1 %v384_v0, %s782_s16 }
  0x28   : > { %327 = vrot.lane.b32.xlu2 %v383_v1, %s782_s16 }
  0x2f   : > { %317 = vrot.lane.b32.xlu0 %v384_v0, %s783_s17  ;;  %315 = vrot.lane.b32.xlu1 %v383_v1, %s783_s17 }
  0x30   : > { %401 = vrot.lane.b32.xlu2 %v384_v0, %s784_s18 }
  0x37   : > { %399 = vrot.lane.b32.xlu0 %v383_v1, %s784_s18  ;;  %438 = vperm.xlu1 %757, %v430_v23   ;;  %v556_v1 = vld [vmem:[%s945_s7] sm:$0xff] }
  0x38   : > { %433 = vperm.xlu2 %758, %v429_v24  }
  0x6a   : > { %v366_v2 = vpop.permute.xlu2 %365 }
  0x6b   : > { %370 = vst.msk [vmem:[#allocation2 + $0x58] sm:$0xff] %vm308_vm0, %v366_v2  ;;  %v557_v2 = vld [vmem:[%s945_s7 + $0x8] sm:$0xff] }
  0x72   : > { %v364_v3 = vpop.permute.xlu2 %363  ;;  %v422_v18 = vld [vmem:[#allocation2 + $0x58] sm:$0xff] }
  0x73   : > { %369 = vst.msk [vmem:[#allocation2 + $0x50] sm:$0xff] %vm308_vm0, %v364_v3  ;;  %v524_v3 = vld [vmem:[%s943_s5] sm:$0xf] }
  0x7a   : > { %v342_v4 = vpop.permute.xlu2 %341  ;;  %v421_v20 = vld [vmem:[#allocation2 + $0x50] sm:$0xff] }
  0x7b   : > { %346 = vst.msk [vmem:[#allocation2 + $0x38] sm:$0xff] %vm308_vm0, %v342_v4 }
  0x81   : > { %v390_v5 = vpop.permute.xlu0 %389  ;;  %v378_v6 = vpop.permute.xlu1 %377 }
  0x82   : > { %394 = vst.msk [vmem:[#allocation2 + $0x78] sm:$0xff] %vm308_vm0, %v390_v5  ;;  %v328_v7 = vpop.permute.xlu2 %327  ;;  %v418_v27 = vld [vmem:[#allocation2 + $0x38] sm:$0xff] }
  0x83   : > { %382 = vst.msk [vmem:[#allocation2 + $0x68] sm:$0xff] %vm308_vm0, %v378_v6 }
  0x84   : > { %333 = vst.msk [vmem:[#allocation2 + $0x20] sm:$0xff] %vm308_vm0, %v328_v7 }
  0x89   : > { %v388_v8 = vpop.permute.xlu0 %387  ;;  %v426_v9 = vld [vmem:[#allocation2 + $0x78] sm:$0xff]  ;;  %v376_v10 = vpop.permute.xlu1 %375 }
  0x8a   : > { %393 = vst.msk [vmem:[#allocation2 + $0x70] sm:$0xff] %vm308_vm0, %v388_v8  ;;  %448 = vmatpush.msra.mxu0 %v426_v9  ;;  %v402_v11 = vpop.permute.xlu2 %401  ;;  %v424_v15 = vld [vmem:[#allocation2 + $0x68] sm:$0xff] }
  0x8b   : > { %381 = vst.msk [vmem:[#allocation2 + $0x60] sm:$0xff] %vm308_vm0, %v376_v10  ;;  %v415_v32 = vld [vmem:[#allocation2 + $0x20] sm:$0xff] }
  0x8c   : > { %406 = vst.msk [vmem:[#allocation2 + $0x88] sm:$0xff] %vm308_vm0, %v402_v11  ;;  %v523_v11 = vld [vmem:[%s942_s4] sm:$0xf] }
  0x91   : > { %v354_v12 = vpop.permute.xlu0 %353  ;;  %v425_v13 = vld [vmem:[#allocation2 + $0x70] sm:$0xff]  ;;  %v352_v14 = vpop.permute.xlu1 %351 }
  0x92   : > { %358 = vst.msk [vmem:[#allocation2 + $0x48] sm:$0xff] %vm308_vm0, %v354_v12  ;;  %449 = vmatpush.msra.mxu0 %v425_v13  ;;  %v423_v17 = vld [vmem:[#allocation2 + $0x60] sm:$0xff]  ;;  %v434_v43 = vpop.permute.xlu2 %433 }
  0x93   : > { %357 = vst.msk [vmem:[#allocation2 + $0x40] sm:$0xff] %vm308_vm0, %v352_v14  ;;  %v428_v16 = vld [vmem:[#allocation2 + $0x88] sm:$0xff] }
  0x94   : > { %450 = vmatpush.msra.mxu0 %v424_v15  ;;  %485 = vmatpush.msra.mxu1 %v428_v16 }
  0x96   : > { %451 = vmatpush.msra.mxu0 %v423_v17  ;;  %v554_v17 = vld [vmem:[%s944_s6] sm:$0xff] }
  0x98   : > { %452 = vmatpush.msra.mxu0 %v422_v18  ;;  %v555_v18 = vld [vmem:[%s944_s6 + $0x8] sm:$0xff] }
  0x99   : > { %v340_v19 = vpop.permute.xlu0 %339  ;;  %v330_v21 = vpop.permute.xlu1 %329  ;;  %v420_v22 = vld [vmem:[#allocation2 + $0x48] sm:$0xff] }
  0x9a   : > { %345 = vst.msk [vmem:[#allocation2 + $0x30] sm:$0xff] %vm308_vm0, %v340_v19  ;;  %453 = vmatpush.msra.mxu0 %v421_v20  ;;  %v419_v26 = vld [vmem:[#allocation2 + $0x40] sm:$0xff] }
  0x9b   : > { %334 = vst.msk [vmem:[#allocation2 + $0x28] sm:$0xff] %vm308_vm0, %v330_v21 }
  0x9c   : > { %454 = vmatpush.msra.mxu0 %v420_v22 }
  0x9e   : > { %455 = vmatpush.msra.mxu0 %v419_v26 }
  0xa0   : > { %456 = vmatpush.msra.mxu0 %v418_v27 }
  0xa1   : > { %v318_v28 = vpop.permute.xlu0 %317  ;;  %v417_v29 = vld [vmem:[#allocation2 + $0x30] sm:$0xff]  ;;  %v316_v30 = vpop.permute.xlu1 %315 }
  0xa2   : > { %322 = vst.msk [vmem:[#allocation2 + $0x18] sm:$0xff] %vm308_vm0, %v318_v28  ;;  %457 = vmatpush.msra.mxu0 %v417_v29  ;;  %v416_v31 = vld [vmem:[#allocation2 + $0x28] sm:$0xff] }
  0xa3   : > { %321 = vst.msk [vmem:[#allocation2 + $0x10] sm:$0xff] %vm308_vm0, %v316_v30 }
  0xa4   : > { %458 = vmatpush.msra.mxu0 %v416_v31 }
  0xa6   : > { %459 = vmatpush.msra.mxu0 %v415_v32 }
  0xa9   : > { %v400_v33 = vpop.permute.xlu0 %399  ;;  %v414_v34 = vld [vmem:[#allocation2 + $0x18] sm:$0xff]  ;;  %v439_v52 = vpop.permute.xlu1 %438 }
  0xaa   : > { %405 = vst.msk [vmem:[#allocation2 + $0x80] sm:$0xff] %vm308_vm0, %v400_v33  ;;  %460 = vmatpush.msra.mxu0 %v414_v34  ;;  %v413_v35 = vld [vmem:[#allocation2 + $0x10] sm:$0xff] }
  0xac   : > { %461 = vmatpush.msra.mxu0 %v413_v35 }
  0xae   : > { %462 = vmatpush.msra.mxu0 %v412_v36 }
  0xb0   : > { %463 = vmatpush.msra.mxu0 %v411_v37 }
  0xb1   : > { %464 = vmatmul.f32.vlgmr.msra.gmra.mxu0 %v407_v38  ;;  %v427_v40 = vld [vmem:[#allocation2 + $0x80] sm:$0xff] }
  0xb2   : > { %486 = vmatpush.msra.mxu1 %v427_v40 }
  0xb3   : > { %728 = vmatmul.msk.f32.vlgmr.msra.gmra.mxu1 %vm441_vm1, %v408_v39 }
  0xb9   : > { %467 = vmatmul.f32.gmra.mxu0 %v409_v41 }
  0xbb   : > { %729 = vmatmul.msk.f32.gmra.mxu1 %vm441_vm1, %v410_v42 }
 0x12e   : > { %v465_v45 = vpop.f32.mrf.mxu0 }
 0x12f   : > { %v466_v46 = vadd.f32 %v465_v45, %v434_v43 }
 0x130   : > { %v488_v48 = vpop.f32.mrf.mxu1 }
 0x131   : > { %v893_v49 = vadd.f32 %v488_v48, %v466_v46 }
 0x133   : > { %v498_v50 = vmul.f32 %v760_v47, %v893_v49  ;;  %v512_v63 = vsel %vm511_vm3, %v893_v49, -inf }
 0x134   : > { %v514_v0 = vsel %vm308_vm0, %v512_v63, -inf }
 0x135   : > { %v500_v53 = vsel %vm308_vm0, %v498_v50, 0.0 }
 0x136   : > { %v468_v54 = vpop.f32.mrf.mxu0  ;;  %501 = vadd.xlane.f32.xlu1 %v500_v53 }
 0x137   : > { %v469_v56 = vadd.f32 %v468_v54, %v439_v52 }
 0x138   : > { %v491_v57 = vpop.f32.mrf.mxu1 }
 0x139   : > { %v897_v58 = vadd.f32 %v491_v57, %v469_v56 }
 0x13b   : > { %v513_v59 = vsel %vm511_vm3, %v897_v58, -inf  ;;  %v499_v60 = vmul.f32 %v760_v47, %v897_v58 }
 0x13c   : > { %v517_v61 = vsel %vm308_vm0, %v513_v59, -inf }
 0x13d   : > { %518 = vmax.xlane.f32.xlu2 %v517_v61  ;;  %v503_v62 = vsel %vm308_vm0, %v499_v60, 0.0 }
 0x13e   : > { %504 = vadd.xlane.f32.xlu0 %v503_v62 }
 0x145   : > { %515 = vmax.xlane.f32.xlu2 %v514_v0 }
 0x14f   : > { %560 = vperm.xlu1 %757, %v556_v1  }
 0x152   : > { %527 = vperm.xlu0 %759, %v524_v3  }
 0x15d   : > { %565 = vperm.xlu2 %758, %v557_v2  }
 0x1a9   : > { %v502_v7 = vpop.xlane.xlu1 %501 }
 0x1aa   : > { %v506_v9 = vmul.f32 0.0625, %v502_v7 }
 0x1b0   : > { %v519_v4 = vpop.xlane.xlu2 %518 }
 0x1b1   : > { %v505_v5 = vpop.xlane.xlu0 %504 }
 0x1b2   : > { %v507_v6 = vmul.f32 0.0625, %v505_v5 }
 0x1b4   : > { %v522_v8 = vsel %vm520_vm4, %v507_v6, %v519_v4 }
 0x1b5   : > { %547 = vmatpush.msra.mxu2 %v522_v8 }
 0x1b8   : > { %v516_v10 = vpop.xlane.xlu2 %515 }
 0x1b9   : > { %v521_v12 = vsel %vm520_vm4, %v506_v9, %v516_v10 }
 0x1ba   : > { %548 = vmatpush.msra.mxu2 %v521_v12 }
 0x1bb   : > { %730 = vmatmul.msk.f32.vlgmr.msra.gmra.mxu2 %vm441_vm1, %v523_v11 }
 0x1c0   : > { %v566_v22 = vpop.permute.xlu2 %565 }
 0x1c1   : > { %v561_v19 = vpop.permute.xlu1 %560 }
 0x1c4   : > { %v528_v13 = vpop.permute.xlu0 %527 }
 0x23e   : > { %v550_v14 = vpop.f32.mrf.mxu2 }
 0x23f   : > { %v551_v15 = vadd.f32 %v550_v14, %v528_v13 }
 0x241   : > { %v553_v16 = vmax.f32 %v551_v15, 0.0 }
 0x243   : > { %731 = vmatpush.msk.msra.mxu3 %vm575_vm5, %v553_v16 }
 0x244   : > { %732 = vmatmul.msk.f32.vlgmr.msra.gmra.mxu3 %vm568_vm6, %v554_v17 }
 0x24c   : > { %733 = vmatmul.msk.f32.gmra.mxu3 %vm568_vm6, %v555_v18 }
 0x2c7   : > { %v596_v20 = vpop.f32.mrf.mxu3 }
 0x2c8   : > { %v597_v21 = vadd.f32 %v596_v20, %v561_v19 }
 0x2ca   : > { %604 = vrot.lane.b32.xlu1 %v597_v21, %s783_s17 }
 0x2cf   : > { %v599_v23 = vpop.f32.mrf.mxu3 }
 0x2d0   : > { %v600_v24 = vadd.f32 %v599_v23, %v566_v22 }
 0x2d2   : > { %606 = vrot.lane.b32.xlu2 %v600_v24, %s783_s17 }
 0x32c   : > { %v607_v25 = vpop.permute.xlu2 %606 }
 0x32d   : > { %v611_v26 = vadd.f32 %v607_v25, %v600_v24 }
 0x32f   : > { %v735_v27 = vmul.f32 -1.442695, %v611_v26 }
 0x331   : > { %761 = vpow2.f32 %v735_v27 }
 0x337   : > { %v762_v28 = vpop.eup %761 }
 0x338   : > { %v619_v29 = vadd.f32 1.0, %v762_v28 }
 0x33a   : > { %763 = vrcp.f32 %v619_v29  ;;  %v646_v36 = vand.u32 2147483648, %v619_v29  ;;  %v644_v38 = vand.u32 2147483647, %v619_v29  ;;  %vm640_vm8 = vweird.f32 %v619_v29 }
 0x33c   : > { %v605_v30 = vpop.permute.xlu1 %604  ;;  %v647_v42 = vor.u32 1.1754944e-38, %v646_v36  ;;  %vm645_vm10 = vcmp.eq.f32.partialorder %v644_v38, 8.507059e+37 }
 0x33d   : > { %v610_v31 = vadd.f32 %v605_v30, %v597_v21 }
 0x33f   : > { %v734_v32 = vmul.f32 -1.442695, %v610_v31 }
 0x340   : > { %v764_v33 = vpop.eup %763 }
 0x341   : > { %765 = vpow2.f32 %v734_v32  ;;  %v636_v34 = vmul.f32 %v764_v33, %v619_v29  ;;  %vm641_vm7 = vweird.f32 %v764_v33 }
 0x342   : > { %vm642_vm9 = vmor %vm640_vm8, %vm641_vm7 }
 0x343   : > { %v637_v35 = vsub.f32 1.0, %v636_v34 }
 0x345   : > { %v638_v37 = vmul.f32 %v764_v33, %v637_v35 }
 0x347   : > { %v766_v39 = vpop.eup %765  ;;  %v639_v40 = vadd.f32 %v764_v33, %v638_v37 }
 0x348   : > { %v618_v41 = vadd.f32 1.0, %v766_v39 }
 0x349   : > { %v643_v43 = vsel %vm642_vm9, %v764_v33, %v639_v40 }
 0x34a   : > { %767 = vrcp.f32 %v618_v41  ;;  %v648_v44 = vsel %vm645_vm10, %v647_v42, %v643_v43  ;;  %v631_v48 = vand.u32 2147483648, %v618_v41  ;;  %v629_v51 = vand.u32 2147483647, %v618_v41 }
 0x34b   : > { %657 = vperm.xlu2 %758, %v648_v44   ;;  %vm625_vm12 = vweird.f32 %v618_v41 }
 0x34c   : > { %v632_v53 = vor.u32 1.1754944e-38, %v631_v48  ;;  %vm630_vm14 = vcmp.eq.f32.partialorder %v629_v51, 8.507059e+37 }
 0x350   : > { %v768_v45 = vpop.eup %767 }
 0x351   : > { %v621_v46 = vmul.f32 %v768_v45, %v618_v41  ;;  %vm626_vm11 = vweird.f32 %v768_v45 }
 0x352   : > { %vm627_vm13 = vmor %vm625_vm12, %vm626_vm11 }
 0x353   : > { %v622_v47 = vsub.f32 1.0, %v621_v46 }
 0x355   : > { %v623_v50 = vmul.f32 %v768_v45, %v622_v47 }
 0x357   : > { %v624_v52 = vadd.f32 %v768_v45, %v623_v50 }
 0x359   : > { %v628_v54 = vsel %vm627_vm13, %v768_v45, %v624_v52 }
 0x35a   : > { %v633_v55 = vsel %vm630_vm14, %v632_v53, %v628_v54 }
 0x35b   : > { %652 = vperm.xlu1 %757, %v633_v55  }
 0x3a5   : > { %v658_v56 = vpop.permute.xlu2 %657 }
 0x3a6   : > { %v661_v57 = vmul.f32 %v658_v56, %v897_v58 }
 0x3a8   : > { %663 = vst.msk [vmem:[%s305_s11 + $0x8] sm:$0xff] %vm308_vm0, %v661_v57 }
 0x3cd   : > { %v653_v59 = vpop.permute.xlu1 %652 }
 0x3ce   : > { %v660_v60 = vmul.f32 %v653_v59, %v893_v49 }
 0x3d0   : > { %662 = vst.msk [vmem:[%s305_s11] sm:$0xff] %vm308_vm0, %v660_v60 }
 0x3d1 PF: > { %s18_s27 = sadd.s32 1, %s775_s27  }
 0x3d2   : > { %p15_p4 = scmp.ge.s32.totalorder %s18_s27, 4  }
 0x3d4   :  { %17 = sbr.rel (!%p15_p4) target bundleno = 1 (0x1), region = 82 }

// kernel: unet_forward.33
= control target key start
LH: loop header
LB: loop body
LE: loop exit
PB: predicated region body
PF: predicated region fallthrough
CT: control target
= control target key end

     0   :  { %s378_s12 = smov 0   ;;  %s418_s0 = inlined_call_operand.vmem [shape: f32[2,8,122], index: 0, kind: input, shape index: {}]   ;;  %s419_s1 = inlined_call_operand.vmem [shape: f32[8,72], index: 1, kind: input, shape index: {}]   ;;  %s420_s2 = inlined_call_operand.vmem [shape: f32[8,1], index: 2, kind: input, shape index: {}]   ;;  %s421_s3 = inlined_call_operand.vmem [shape: f32[2,8,100], index: 3, kind: output, shape index: {}]  }
   0x1 LB: > { %s312_s13 = sadd.s32 4294967295, %s347_s12   ;;  %p316_p0 = scmp.ge.s32.totalorder %s347_s12, 1  ;;  %s347_s12 = sphi %s378_s12, %s13_s12  }
   0x2   : > { %p136_p1 = scmp.lt.s32.totalorder %s347_s12, 3 }
   0x4   : > { %p137_p2 = pnand %p316_p0, %p136_p1 }
   0x5   : > { %p158_p3 = scmp.lt.s32.totalorder (!%p137_p2), %s312_s13, 1  ;;  %s349_s18 = smov (!%p137_p2), 106  }
   0x6   : > { %140 = sbr.rel (%p137_p2) target bundleno = 292 (0x124), region = 32  ;;  %s350_s19 = smov (!%p137_p2), 108  }
   0x7   : > { %s351_s20 = smov (!%p137_p2), 117   ;;  %s352_s21 = smov (!%p137_p2), 107  }
   0x8   : > { %s353_s22 = smov (!%p137_p2), 116   ;;  %s354_s23 = smov (!%p137_p2), 118  }
   0x9   : > { %s355_s24 = smov (!%p137_p2), 126   ;;  %s356_s25 = smov (!%p137_p2), 127  }
   0xb   : > { %s423_s13 = smov (!%p158_p3, %s312_s13), 1  ;;  %vm167_vm0 = vcmask 818176   ;;  %v227_v5 = vld [vmem:[%s420_s2] sm:$0xff]  ;;  %v357_v6 = vmov 0   ;;  %vm233_vm1 = vcmask 588800  }
   0xc   : > { %s317_s14 = sshll.u32 %s423_s13, 3  ;;  %339 = vset.pattern.permute.xlu2 %v357_v6  ;;  %340 = vset.pattern.permute.xlu0 %v357_v6  ;;  %v217_v20 = vld [vmem:[%s419_s1] sm:$0xff] }
   0xd   : > { %s161_s17 = scalar_lea.vmem %s418_s0, %s317_s14  ;;  %s165_s5 = scalar_lea.vmem %s421_s3, %s317_s14 }
   0xe   : > { %v211_v0 = vld [vmem:[%s161_s17] sm:$0xff] }
   0xf   : > { %213 = vrot.lane.b32.xlu0 %v211_v0, %s349_s18  ;;  %201 = vrot.lane.b32.xlu1 %v211_v0, %s350_s19  ;;  %168 = vst.msk [vmem:[#allocation2] sm:$0xff] %vm167_vm0, %v211_v0 }
  0x10   : > { %189 = vrot.lane.b32.xlu2 %v211_v0, %s351_s20 }
  0x16   : > { %v218_v19 = vld [vmem:[#allocation2] sm:$0xff] }
  0x17   : > { %207 = vrot.lane.b32.xlu0 %v211_v0, %s352_s21  ;;  %195 = vrot.lane.b32.xlu1 %v211_v0, %s353_s22 }
  0x18   : > { %183 = vrot.lane.b32.xlu2 %v211_v0, %s354_s23 }
  0x1f   : > { %177 = vrot.lane.b32.xlu0 %v211_v0, %s355_s24  ;;  %171 = vrot.lane.b32.xlu1 %v211_v0, %s356_s25 }
  0x20   : > { %230 = vperm.xlu2 %339, %v227_v5  }
  0x6a   : > { %v190_v1 = vpop.permute.xlu2 %189 }
  0x6b   : > { %192 = vst.msk [vmem:[#allocation2 + $0x20] sm:$0xff] %vm167_vm0, %v190_v1 }
  0x72   : > { %v184_v2 = vpop.permute.xlu2 %183  ;;  %v222_v15 = vld [vmem:[#allocation2 + $0x20] sm:$0xff] }
  0x73   : > { %186 = vst.msk [vmem:[#allocation2 + $0x18] sm:$0xff] %vm167_vm0, %v184_v2 }
  0x7a   : > { %v221_v16 = vld [vmem:[#allocation2 + $0x18] sm:$0xff]  ;;  %v231_v21 = vpop.permute.xlu2 %230 }
  0x81   : > { %v214_v3 = vpop.permute.xlu0 %213  ;;  %v202_v4 = vpop.permute.xlu1 %201 }
  0x82   : > { %216 = vst.msk [vmem:[#allocation2 + $0x40] sm:$0xff] %vm167_vm0, %v214_v3 }
  0x83   : > { %204 = vst.msk [vmem:[#allocation2 + $0x30] sm:$0xff] %vm167_vm0, %v202_v4 }
  0x89   : > { %v208_v7 = vpop.permute.xlu0 %207  ;;  %v226_v8 = vld [vmem:[#allocation2 + $0x40] sm:$0xff]  ;;  %v196_v9 = vpop.permute.xlu1 %195 }
  0x8a   : > { %210 = vst.msk [vmem:[#allocation2 + $0x38] sm:$0xff] %vm167_vm0, %v208_v7  ;;  %244 = vmatpush.msra.mxu0 %v226_v8  ;;  %v224_v13 = vld [vmem:[#allocation2 + $0x30] sm:$0xff] }
  0x8b   : > { %198 = vst.msk [vmem:[#allocation2 + $0x28] sm:$0xff] %vm167_vm0, %v196_v9 }
  0x91   : > { %v225_v10 = vld [vmem:[#allocation2 + $0x38] sm:$0xff]  ;;  %v178_v11 = vpop.permute.xlu0 %177  ;;  %v172_v12 = vpop.permute.xlu1 %171 }
  0x92   : > { %245 = vmatpush.msra.mxu0 %v225_v10  ;;  %180 = vst.msk [vmem:[#allocation2 + $0x10] sm:$0xff] %vm167_vm0, %v178_v11  ;;  %v223_v14 = vld [vmem:[#allocation2 + $0x28] sm:$0xff] }
  0x93   : > { %174 = vst.msk [vmem:[#allocation2 + $0x8] sm:$0xff] %vm167_vm0, %v172_v12 }
  0x94   : > { %246 = vmatpush.msra.mxu0 %v224_v13 }
  0x96   : > { %247 = vmatpush.msra.mxu0 %v223_v14 }
  0x98   : > { %248 = vmatpush.msra.mxu0 %v222_v15 }
  0x99   : > { %v220_v17 = vld [vmem:[#allocation2 + $0x10] sm:$0xff] }
  0x9a   : > { %249 = vmatpush.msra.mxu0 %v221_v16  ;;  %v219_v18 = vld [vmem:[#allocation2 + $0x8] sm:$0xff] }
  0x9c   : > { %250 = vmatpush.msra.mxu0 %v220_v17 }
  0x9e   : > { %251 = vmatpush.msra.mxu0 %v219_v18 }
  0xa0   : > { %252 = vmatpush.msra.mxu0 %v218_v19 }
  0xa1   : > { %319 = vmatmul.msk.f32.vlgmr.msra.gmra.mxu0 %vm233_vm1, %v217_v20 }
 0x11e   : > { %v254_v22 = vpop.f32.mrf.mxu0 }
 0x11f   : > { %v255_v23 = vadd.f32 %v254_v22, %v231_v21 }
 0x121   : > { %v257_v24 = vmax.f32 %v255_v23, 0.0 }
 0x123   : > { %258 = vst.msk [vmem:[%s165_s5] sm:$0xff] %vm167_vm0, %v257_v24 }
 0x124 PF: > { %s13_s12 = sadd.s32 1, %s347_s12  }
 0x125   : > { %p10_p4 = scmp.ge.s32.totalorder %s13_s12, 4  }
 0x127   :  { %12 = sbr.rel (!%p10_p4) target bundleno = 1 (0x1), region = 62 }

// kernel: unet_forward.32
= control target key start
LH: loop header
LB: loop body
LE: loop exit
PB: predicated region body
PF: predicated region fallthrough
CT: control target
= control target key end

     0   :  { %s887_s27 = smov 0   ;;  %s982_s0 = inlined_call_operand.vmem [shape: f32[2,32,122], index: 0, kind: input, shape index: {}]   ;;  %s983_s1 = inlined_call_operand.vmem [shape: f32[8,288], index: 1, kind: input, shape index: {}]   ;;  %s984_s2 = inlined_call_operand.vmem [shape: f32[8,1], index: 2, kind: input, shape index: {}]   ;;  %s985_s3 = inlined_call_operand.vmem [shape: f32[1,100], index: 3, kind: input, shape index: {}]   ;;  %s986_s4 = inlined_call_operand.vmem [shape: f32[2,8], index: 4, kind: input, shape index: {}]   ;;  %s987_s5 = inlined_call_operand.vmem [shape: f32[2,1], index: 5, kind: input, shape index: {}]   ;;  %s988_s6 = inlined_call_operand.vmem [shape: f32[8,2], index: 6, kind: input, shape index: {}]   ;;  %s989_s7 = inlined_call_operand.vmem [shape: f32[8,1], index: 7, kind: input, shape index: {}]   ;;  %s990_s8 = inlined_call_operand.vmem [shape: f32[2,8,100], index: 8, kind: output, shape index: {}]  }
   0x1 LB: > { %s785_s28 = sadd.s32 4294967295, %s831_s27   ;;  %p789_p0 = scmp.ge.s32.totalorder %s831_s27, 1  ;;  %s831_s27 = sphi %s887_s27, %s18_s27  }
   0x2   : > { %p262_p1 = scmp.lt.s32.totalorder %s831_s27, 3 }
   0x4   : > { %p263_p2 = pnand %p789_p0, %p262_p1 }
   0x5   : > { %p295_p3 = scmp.lt.s32.totalorder (!%p263_p2), %s785_s28, 1  ;;  %s833_s11 = smov (!%p263_p2), 118  }
   0x6   : > { %266 = sbr.rel (%p263_p2) target bundleno = 962 (0x3c2), region = 52  ;;  %s834_s12 = smov (!%p263_p2), 107  }
   0x7   : > { %s835_s13 = smov (!%p263_p2), 126   ;;  %s836_s14 = smov (!%p263_p2), 108  }
   0x8   : > { %s837_s15 = smov (!%p263_p2), 127   ;;  %s838_s16 = smov (!%p263_p2), 116  }
   0x9   : > { %s839_s17 = smov (!%p263_p2), 106   ;;  %s840_s18 = smov (!%p263_p2), 117  }
   0xb   : > { %s992_s28 = smov (!%p295_p3, %s785_s28), 1  ;;  %vm308_vm0 = vcmask 818176   ;;  %v544_v52 = vld [vmem:[%s984_s2] sm:$0xff]  ;;  %v841_v53 = vmov 0   ;;  %vm550_vm1 = vcmask 261120   ;;  %vm632_vm4 = vcmask 7168  }
   0xc   : > { %s800_s29 = sshll.u32 %s992_s28, 5  ;;  %818 = vset.pattern.permute.xlu2 %v841_v53  ;;  %819 = vset.pattern.permute.xlu0 %v841_v53  ;;  %v635_v60 = vld [vmem:[%s987_s5] sm:$0x3]  ;;  %vm641_vm5 = vcmask 64512   ;;  %vm677_vm6 = vcmask 1041408   ;;  %vm673_vm7 = vcmask 15360  }
   0xd   : > { %s299_s10 = scalar_lea.vmem %s982_s0, %s800_s29  ;;  %v505_v63 = vld [vmem:[%s983_s1] sm:$0xff] }
   0xe   : > { %v364_v0 = vld [vmem:[%s299_s10 + $0x18] sm:$0xff]  ;;  %v363_v1 = vld [vmem:[%s299_s10 + $0x10] sm:$0xff]  ;;  %v362_v2 = vld [vmem:[%s299_s10 + $0x8] sm:$0xff] }
   0xf   : > { %375 = vrot.lane.b32.xlu0 %v364_v0, %s833_s11  ;;  %471 = vrot.lane.b32.xlu1 %v364_v0, %s834_s12  ;;  %v337_v3 = vld [vmem:[%s299_s10] sm:$0xff]  ;;  %312 = vst.msk [vmem:[#allocation2 + $0x18] sm:$0xff] %vm308_vm0, %v364_v0 }
  0x10   : > { %469 = vrot.lane.b32.xlu2 %v363_v1, %s834_s12  ;;  %311 = vst.msk [vmem:[#allocation2 + $0x10] sm:$0xff] %vm308_vm0, %v363_v1 }
  0x11   : > { %310 = vst.msk [vmem:[#allocation2 + $0x8] sm:$0xff] %vm308_vm0, %v362_v2 }
  0x12   : > { %309 = vst.msk [vmem:[#allocation2] sm:$0xff] %vm308_vm0, %v337_v3 }
  0x16   : > { %v511_v57 = vld [vmem:[#allocation2 + $0x18] sm:$0xff] }
  0x17   : > { %373 = vrot.lane.b32.xlu0 %v363_v1, %s833_s11  ;;  %371 = vrot.lane.b32.xlu1 %v362_v2, %s833_s11  ;;  %v510_v59 = vld [vmem:[#allocation2 + $0x10] sm:$0xff] }
  0x18   : > { %369 = vrot.lane.b32.xlu2 %v337_v3, %s833_s11  ;;  %v509_v61 = vld [vmem:[#allocation2 + $0x8] sm:$0xff] }
  0x19   : > { %v508_v62 = vld [vmem:[#allocation2] sm:$0xff] }
  0x1f   : > { %467 = vrot.lane.b32.xlu0 %v362_v2, %s834_s12  ;;  %351 = vrot.lane.b32.xlu1 %v364_v0, %s835_s13 }
  0x20   : > { %465 = vrot.lane.b32.xlu2 %v337_v3, %s834_s12 }
  0x27   : > { %349 = vrot.lane.b32.xlu0 %v363_v1, %s835_s13  ;;  %447 = vrot.lane.b32.xlu1 %v364_v0, %s836_s14 }
  0x28   : > { %347 = vrot.lane.b32.xlu2 %v362_v2, %s835_s13 }
  0x2f   : > { %445 = vrot.lane.b32.xlu0 %v363_v1, %s836_s14  ;;  %345 = vrot.lane.b32.xlu1 %v337_v3, %s835_s13 }
  0x30   : > { %443 = vrot.lane.b32.xlu2 %v362_v2, %s836_s14 }
  0x37   : > { %327 = vrot.lane.b32.xlu0 %v364_v0, %s837_s15  ;;  %441 = vrot.lane.b32.xlu1 %v337_v3, %s836_s14 }
  0x38   : > { %325 = vrot.lane.b32.xlu2 %v363_v1, %s837_s15 }
  0x3f   : > { %423 = vrot.lane.b32.xlu0 %v364_v0, %s838_s16  ;;  %323 = vrot.lane.b32.xlu1 %v362_v2, %s837_s15 }
  0x40   : > { %421 = vrot.lane.b32.xlu2 %v363_v1, %s838_s16 }
  0x47   : > { %321 = vrot.lane.b32.xlu0 %v337_v3, %s837_s15  ;;  %419 = vrot.lane.b32.xlu1 %v362_v2, %s838_s16 }
  0x48   : > { %495 = vrot.lane.b32.xlu2 %v364_v0, %s839_s17 }
  0x4f   : > { %417 = vrot.lane.b32.xlu0 %v337_v3, %s838_s16  ;;  %493 = vrot.lane.b32.xlu1 %v363_v1, %s839_s17 }
  0x50   : > { %399 = vrot.lane.b32.xlu2 %v364_v0, %s840_s18 }
  0x57   : > { %491 = vrot.lane.b32.xlu0 %v362_v2, %s839_s17  ;;  %397 = vrot.lane.b32.xlu1 %v363_v1, %s840_s18 }
  0x58   : > { %489 = vrot.lane.b32.xlu2 %v337_v3, %s839_s17 }
  0x5f   : > { %395 = vrot.lane.b32.xlu0 %v362_v2, %s840_s18  ;;  %393 = vrot.lane.b32.xlu1 %v337_v3, %s840_s18 }
  0x60   : > { %547 = vperm.xlu2 %818, %v544_v52  }
  0x68   : > { %638 = vperm.xlu2 %818, %v635_v60  }
  0x6a   : > { %v470_v4 = vpop.permute.xlu2 %469 }
  0x6b   : > { %479 = vst.msk [vmem:[#allocation2 + $0xf0] sm:$0xff] %vm308_vm0, %v470_v4 }
  0x72   : > { %v370_v5 = vpop.permute.xlu2 %369  ;;  %v538_v14 = vld [vmem:[#allocation2 + $0xf0] sm:$0xff] }
  0x73   : > { %381 = vst.msk [vmem:[#allocation2 + $0x60] sm:$0xff] %vm308_vm0, %v370_v5  ;;  %v667_v5 = vld [vmem:[%s989_s7] sm:$0xff] }
  0x74   : > { %670 = vperm.xlu2 %818, %v667_v5  }
  0x7a   : > { %v466_v6 = vpop.permute.xlu2 %465  ;;  %v520_v21 = vld [vmem:[#allocation2 + $0x60] sm:$0xff] }
  0x7b   : > { %477 = vst.msk [vmem:[#allocation2 + $0xe0] sm:$0xff] %vm308_vm0, %v466_v6 }
  0x81   : > { %v376_v7 = vpop.permute.xlu0 %375  ;;  %v472_v8 = vpop.permute.xlu1 %471 }
  0x82   : > { %384 = vst.msk [vmem:[#allocation2 + $0x78] sm:$0xff] %vm308_vm0, %v376_v7  ;;  %v348_v9 = vpop.permute.xlu2 %347  ;;  %v536_v25 = vld [vmem:[#allocation2 + $0xe0] sm:$0xff] }
  0x83   : > { %480 = vst.msk [vmem:[#allocation2 + $0xf8] sm:$0xff] %vm308_vm0, %v472_v8 }
  0x84   : > { %358 = vst.msk [vmem:[#allocation2 + $0x48] sm:$0xff] %vm308_vm0, %v348_v9 }
  0x89   : > { %v374_v10 = vpop.permute.xlu0 %373  ;;  %v523_v11 = vld [vmem:[#allocation2 + $0x78] sm:$0xff]  ;;  %v372_v12 = vpop.permute.xlu1 %371 }
  0x8a   : > { %383 = vst.msk [vmem:[#allocation2 + $0x70] sm:$0xff] %vm308_vm0, %v374_v10  ;;  %554 = vmatpush.msra.mxu0 %v523_v11  ;;  %v539_v13 = vld [vmem:[#allocation2 + $0xf8] sm:$0xff]  ;;  %v444_v15 = vpop.permute.xlu2 %443  ;;  %v507_v11 = vld [vmem:[%s983_s1 + $0x10] sm:$0xff] }
  0x8b   : > { %382 = vst.msk [vmem:[#allocation2 + $0x68] sm:$0xff] %vm308_vm0, %v372_v12  ;;  %574 = vmatpush.msra.mxu1 %v539_v13  ;;  %v517_v31 = vld [vmem:[#allocation2 + $0x48] sm:$0xff] }
  0x8c   : > { %454 = vst.msk [vmem:[#allocation2 + $0xc8] sm:$0xff] %vm308_vm0, %v444_v15  ;;  %v615_v15 = vld [vmem:[%s985_s3] sm:$0x1] }
  0x8d   : > { %575 = vmatpush.msra.mxu1 %v538_v14  ;;  %v506_v14 = vld [vmem:[%s983_s1 + $0x8] sm:$0xff]  ;;  %vm624_vm2 = vcmp.gt.f32.partialorder %v615_v15, 0.5 }
  0x91   : > { %v468_v16 = vpop.permute.xlu0 %467  ;;  %v522_v17 = vld [vmem:[#allocation2 + $0x70] sm:$0xff]  ;;  %v352_v18 = vpop.permute.xlu1 %351 }
  0x92   : > { %478 = vst.msk [vmem:[#allocation2 + $0xe8] sm:$0xff] %vm308_vm0, %v468_v16  ;;  %555 = vmatpush.msra.mxu0 %v522_v17  ;;  %v521_v19 = vld [vmem:[#allocation2 + $0x68] sm:$0xff]  ;;  %v326_v20 = vpop.permute.xlu2 %325 }
  0x93   : > { %360 = vst.msk [vmem:[#allocation2 + $0x58] sm:$0xff] %vm308_vm0, %v352_v18  ;;  %v533_v37 = vld [vmem:[#allocation2 + $0xc8] sm:$0xff] }
  0x94   : > { %556 = vmatpush.msra.mxu0 %v521_v19  ;;  %335 = vst.msk [vmem:[#allocation2 + $0x30] sm:$0xff] %vm308_vm0, %v326_v20  ;;  %v625_v19 = vsel %vm624_vm2, 1, %v841_v53 }
  0x96   : > { %557 = vmatpush.msra.mxu0 %v520_v21 }
  0x99   : > { %v350_v22 = vpop.permute.xlu0 %349  ;;  %v537_v23 = vld [vmem:[#allocation2 + $0xe8] sm:$0xff]  ;;  %v448_v24 = vpop.permute.xlu1 %447 }
  0x9a   : > { %359 = vst.msk [vmem:[#allocation2 + $0x50] sm:$0xff] %vm308_vm0, %v350_v22  ;;  %576 = vmatpush.msra.mxu1 %v537_v23  ;;  %v519_v26 = vld [vmem:[#allocation2 + $0x58] sm:$0xff]  ;;  %v422_v27 = vpop.permute.xlu2 %421  ;;  %v626_v22 = vperm.slane %v625_v19, 0 }
  0x9b   : > { %456 = vst.msk [vmem:[#allocation2 + $0xd8] sm:$0xff] %vm308_vm0, %v448_v24  ;;  %558 = vmatpush.msra.mxu0 %v519_v26  ;;  %v514_v44 = vld [vmem:[#allocation2 + $0x30] sm:$0xff] }
  0x9c   : > { %577 = vmatpush.msra.mxu1 %v536_v25  ;;  %431 = vst.msk [vmem:[#allocation2 + $0xb0] sm:$0xff] %vm308_vm0, %v422_v27  ;;  %v820_v25 = vld [vmem:[%s985_s3] ss:$0 sm:$0xff]  ;;  %vm627_vm3 = vcmp.eq.s32.totalorder %v626_v22, 1 }
  0xa1   : > { %v446_v28 = vpop.permute.xlu0 %445  ;;  %v518_v29 = vld [vmem:[#allocation2 + $0x50] sm:$0xff]  ;;  %v346_v30 = vpop.permute.xlu1 %345 }
  0xa2   : > { %455 = vst.msk [vmem:[#allocation2 + $0xd0] sm:$0xff] %vm308_vm0, %v446_v28  ;;  %559 = vmatpush.msra.mxu0 %v518_v29  ;;  %v535_v32 = vld [vmem:[#allocation2 + $0xd8] sm:$0xff]  ;;  %v496_v33 = vpop.permute.xlu2 %495 }
  0xa3   : > { %357 = vst.msk [vmem:[#allocation2 + $0x40] sm:$0xff] %vm308_vm0, %v346_v30  ;;  %578 = vmatpush.msra.mxu1 %v535_v32  ;;  %v530_v50 = vld [vmem:[#allocation2 + $0xb0] sm:$0xff] }
  0xa4   : > { %560 = vmatpush.msra.mxu0 %v517_v31  ;;  %504 = vst.msk [vmem:[#allocation2 + $0x118] sm:$0xff] %vm308_vm0, %v496_v33 }
  0xa9   : > { %v328_v34 = vpop.permute.xlu0 %327  ;;  %v534_v35 = vld [vmem:[#allocation2 + $0xd0] sm:$0xff]  ;;  %v442_v36 = vpop.permute.xlu1 %441 }
  0xaa   : > { %336 = vst.msk [vmem:[#allocation2 + $0x38] sm:$0xff] %vm308_vm0, %v328_v34  ;;  %579 = vmatpush.msra.mxu1 %v534_v35  ;;  %v516_v38 = vld [vmem:[#allocation2 + $0x40] sm:$0xff]  ;;  %v400_v39 = vpop.permute.xlu2 %399 }
  0xab   : > { %453 = vst.msk [vmem:[#allocation2 + $0xc0] sm:$0xff] %vm308_vm0, %v442_v36  ;;  %561 = vmatpush.msra.mxu0 %v516_v38  ;;  %v543_v40 = vld [vmem:[#allocation2 + $0x118] sm:$0xff]  ;;  %v634_v34 = vld [vmem:[%s986_s4] sm:$0x3] }
  0xac   : > { %580 = vmatpush.msra.mxu1 %v533_v37  ;;  %408 = vst.msk [vmem:[#allocation2 + $0x98] sm:$0xff] %vm308_vm0, %v400_v39  ;;  %606 = vmatpush.msra.mxu2 %v543_v40  ;;  %v666_v40 = vld [vmem:[%s988_s6] sm:$0xff] }
  0xb1   : > { %v424_v41 = vpop.permute.xlu0 %423  ;;  %v515_v42 = vld [vmem:[#allocation2 + $0x38] sm:$0xff]  ;;  %v324_v43 = vpop.permute.xlu1 %323 }
  0xb2   : > { %432 = vst.msk [vmem:[#allocation2 + $0xb8] sm:$0xff] %vm308_vm0, %v424_v41  ;;  %562 = vmatpush.msra.mxu0 %v515_v42  ;;  %v532_v45 = vld [vmem:[#allocation2 + $0xc0] sm:$0xff]  ;;  %v490_v46 = vpop.permute.xlu2 %489 }
  0xb3   : > { %334 = vst.msk [vmem:[#allocation2 + $0x28] sm:$0xff] %vm308_vm0, %v324_v43  ;;  %581 = vmatpush.msra.mxu1 %v532_v45  ;;  %v527_v3 = vld [vmem:[#allocation2 + $0x98] sm:$0xff] }
  0xb4   : > { %563 = vmatpush.msra.mxu0 %v514_v44  ;;  %501 = vst.msk [vmem:[#allocation2 + $0x100] sm:$0xff] %vm308_vm0, %v490_v46 }
  0xb9   : > { %v322_v47 = vpop.permute.xlu0 %321  ;;  %v531_v48 = vld [vmem:[#allocation2 + $0xb8] sm:$0xff]  ;;  %v420_v49 = vpop.permute.xlu1 %419 }
  0xba   : > { %333 = vst.msk [vmem:[#allocation2 + $0x20] sm:$0xff] %vm308_vm0, %v322_v47  ;;  %582 = vmatpush.msra.mxu1 %v531_v48  ;;  %v513_v51 = vld [vmem:[#allocation2 + $0x28] sm:$0xff]  ;;  %v548_v17 = vpop.permute.xlu2 %547 }
  0xbb   : > { %430 = vst.msk [vmem:[#allocation2 + $0xa8] sm:$0xff] %vm308_vm0, %v420_v49  ;;  %564 = vmatpush.msra.mxu0 %v513_v51  ;;  %v540_v9 = vld [vmem:[#allocation2 + $0x100] sm:$0xff] }
  0xbc   : > { %583 = vmatpush.msra.mxu1 %v530_v50 }
  0xc1   : > { %v418_v54 = vpop.permute.xlu0 %417  ;;  %v512_v55 = vld [vmem:[#allocation2 + $0x20] sm:$0xff]  ;;  %v494_v56 = vpop.permute.xlu1 %493 }
  0xc2   : > { %429 = vst.msk [vmem:[#allocation2 + $0xa0] sm:$0xff] %vm308_vm0, %v418_v54  ;;  %565 = vmatpush.msra.mxu0 %v512_v55  ;;  %v529_v58 = vld [vmem:[#allocation2 + $0xa8] sm:$0xff]  ;;  %v639_v36 = vpop.permute.xlu2 %638 }
  0xc3   : > { %503 = vst.msk [vmem:[#allocation2 + $0x110] sm:$0xff] %vm308_vm0, %v494_v56  ;;  %584 = vmatpush.msra.mxu1 %v529_v58 }
  0xc4   : > { %566 = vmatpush.msra.mxu0 %v511_v57 }
  0xc6   : > { %567 = vmatpush.msra.mxu0 %v510_v59 }
  0xc8   : > { %568 = vmatpush.msra.mxu0 %v509_v61 }
  0xc9   : > { %v492_v0 = vpop.permute.xlu0 %491  ;;  %v528_v1 = vld [vmem:[#allocation2 + $0xa0] sm:$0xff]  ;;  %v398_v2 = vpop.permute.xlu1 %397 }
  0xca   : > { %502 = vst.msk [vmem:[#allocation2 + $0x108] sm:$0xff] %vm308_vm0, %v492_v0  ;;  %585 = vmatpush.msra.mxu1 %v528_v1  ;;  %v542_v4 = vld [vmem:[#allocation2 + $0x110] sm:$0xff]  ;;  %569 = vmatpush.msra.mxu0 %v508_v62 }
  0xcb   : > { %407 = vst.msk [vmem:[#allocation2 + $0x90] sm:$0xff] %vm308_vm0, %v398_v2  ;;  %607 = vmatpush.msra.mxu2 %v542_v4  ;;  %570 = vmatmul.f32.vlgmr.msra.gmra.mxu0 %v505_v63 }
  0xcc   : > { %586 = vmatpush.msra.mxu1 %v527_v3 }
  0xce   : > { %v671_v41 = vpop.permute.xlu2 %670 }
  0xd1   : > { %v396_v6 = vpop.permute.xlu0 %395  ;;  %v541_v7 = vld [vmem:[#allocation2 + $0x108] sm:$0xff]  ;;  %v394_v8 = vpop.permute.xlu1 %393 }
  0xd2   : > { %406 = vst.msk [vmem:[#allocation2 + $0x88] sm:$0xff] %vm308_vm0, %v396_v6  ;;  %608 = vmatpush.msra.mxu2 %v541_v7  ;;  %v526_v10 = vld [vmem:[#allocation2 + $0x90] sm:$0xff] }
  0xd3   : > { %405 = vst.msk [vmem:[#allocation2 + $0x80] sm:$0xff] %vm308_vm0, %v394_v8  ;;  %587 = vmatpush.msra.mxu1 %v526_v10 }
  0xd4   : > { %609 = vmatpush.msra.mxu2 %v540_v9 }
  0xd5   : > { %793 = vmatmul.msk.f32.vlgmr.msra.gmra.mxu2 %vm550_vm1, %v507_v11 }
  0xd9   : > { %v525_v12 = vld [vmem:[#allocation2 + $0x88] sm:$0xff] }
  0xda   : > { %588 = vmatpush.msra.mxu1 %v525_v12  ;;  %v524_v13 = vld [vmem:[#allocation2 + $0x80] sm:$0xff] }
  0xdc   : > { %589 = vmatpush.msra.mxu1 %v524_v13 }
  0xdd   : > { %590 = vmatmul.f32.vlgmr.msra.gmra.mxu1 %v506_v14 }
 0x148   : > { %v571_v16 = vpop.f32.mrf.mxu0 }
 0x149   : > { %v572_v18 = vadd.f32 %v571_v16, %v548_v17 }
 0x158   : > { %v611_v21 = vpop.f32.mrf.mxu2 }
 0x15a   : > { %v591_v20 = vpop.f32.mrf.mxu1 }
 0x15b   : > { %v592_v23 = vadd.f32 %v591_v20, %v572_v18 }
 0x15d   : > { %v612_v24 = vadd.f32 %v611_v21, %v592_v23 }
 0x15f   : > { %v614_v26 = vmax.f32 %v612_v24, 0.0 }
 0x161   : > { %v628_v27 = vsel %vm627_vm3, %v614_v26, -inf  ;;  %v619_v28 = vmul.f32 %v820_v25, %v614_v26 }
 0x162   : > { %v629_v29 = vsel %vm308_vm0, %v628_v27, -inf }
 0x163   : > { %630 = vmax.xlane.f32.xlu1 %v629_v29  ;;  %v620_v30 = vsel %vm308_vm0, %v619_v28, 0.0 }
 0x164   : > { %621 = vadd.xlane.f32.xlu0 %v620_v30 }
 0x1d6   : > { %v631_v33 = vpop.xlane.xlu1 %630 }
 0x1d7   : > { %v622_v31 = vpop.xlane.xlu0 %621 }
 0x1d8   : > { %v623_v32 = vmul.f32 0.015625, %v622_v31 }
 0x1da   : > { %v633_v35 = vsel %vm632_vm4, %v623_v32, %v631_v33 }
 0x1db   : > { %660 = vmatpush.msra.mxu3 %v633_v35 }
 0x1dc   : > { %794 = vmatmul.msk.f32.vlgmr.msra.gmra.mxu3 %vm641_vm5, %v634_v34 }
 0x25f   : > { %v662_v37 = vpop.f32.mrf.mxu3 }
 0x260   : > { %v663_v38 = vadd.f32 %v662_v37, %v639_v36 }
 0x262   : > { %v665_v39 = vmax.f32 %v663_v38, 0.0 }
 0x264   : > { %795 = vmatpush.msk.msrb.mxu3 %vm677_vm6, %v665_v39 }
 0x265   : > { %796 = vmatmul.msk.f32.vlgmr.msrb.gmra.mxu3 %vm673_vm7, %v666_v40 }
 0x2e8   : > { %v698_v42 = vpop.f32.mrf.mxu3 }
 0x2e9   : > { %v699_v43 = vadd.f32 %v698_v42, %v671_v41 }
 0x2eb   : > { %702 = vrot.lane.b32.xlu2 %v699_v43, %s837_s15  ;;  %s792_s15 = sshll.u32 %s992_s28, 3 }
 0x2ec   : > { %s303_s22 = scalar_lea.vmem %s990_s8, %s792_s15 }
 0x345   : > { %v703_v44 = vpop.permute.xlu2 %702 }
 0x346   : > { %v705_v45 = vadd.f32 %v703_v44, %v699_v43 }
 0x348   : > { %v797_v46 = vmul.f32 -1.442695, %v705_v45 }
 0x34a   : > { %821 = vpow2.f32 %v797_v46 }
 0x350   : > { %v822_v47 = vpop.eup %821 }
 0x351   : > { %v709_v48 = vadd.f32 1.0, %v822_v47 }
 0x353   : > { %823 = vrcp.f32 %v709_v48  ;;  %v721_v52 = vand.u32 2147483648, %v709_v48  ;;  %v719_v54 = vand.u32 2147483647, %v709_v48  ;;  %vm715_vm9 = vweird.f32 %v709_v48 }
 0x355   : > { %v722_v56 = vor.u32 1.1754944e-38, %v721_v52  ;;  %vm720_vm11 = vcmp.eq.f32.partialorder %v719_v54, 8.507059e+37 }
 0x359   : > { %v824_v49 = vpop.eup %823 }
 0x35a   : > { %v711_v50 = vmul.f32 %v824_v49, %v709_v48  ;;  %vm716_vm8 = vweird.f32 %v824_v49 }
 0x35b   : > { %vm717_vm10 = vmor %vm715_vm9, %vm716_vm8 }
 0x35c   : > { %v712_v51 = vsub.f32 1.0, %v711_v50 }
 0x35e   : > { %v713_v53 = vmul.f32 %v824_v49, %v712_v51 }
 0x360   : > { %v714_v55 = vadd.f32 %v824_v49, %v713_v53 }
 0x362   : > { %v718_v57 = vsel %vm717_vm10, %v824_v49, %v714_v55 }
 0x363   : > { %v723_v58 = vsel %vm720_vm11, %v722_v56, %v718_v57 }
 0x364   : > { %727 = vperm.xlu2 %818, %v723_v58  }
 0x3be   : > { %v728_v59 = vpop.permute.xlu2 %727 }
 0x3bf   : > { %v730_v60 = vmul.f32 %v728_v59, %v614_v26 }
 0x3c1   : > { %731 = vst.msk [vmem:[%s303_s22] sm:$0xff] %vm308_vm0, %v730_v60 }
 0x3c2 PF: > { %s18_s27 = sadd.s32 1, %s831_s27  }
 0x3c3   : > { %p15_p4 = scmp.ge.s32.totalorder %s18_s27, 4  }
 0x3c5   :  { %17 = sbr.rel (!%p15_p4) target bundleno = 1 (0x1), region = 82 }

// kernel: unet_forward.34
= control target key start
LH: loop header
LB: loop body
LE: loop exit
PB: predicated region body
PF: predicated region fallthrough
CT: control target
= control target key end

     0   :  { %s662_s27 = smov 0   ;;  %s724_s0 = inlined_call_operand.vmem [shape: f32[2,8,122], index: 0, kind: input, shape index: {}]   ;;  %s725_s1 = inlined_call_operand.vmem [shape: f32[8,72], index: 1, kind: input, shape index: {}]   ;;  %s726_s2 = inlined_call_operand.vmem [shape: f32[8,1], index: 2, kind: input, shape index: {}]   ;;  %s727_s3 = inlined_call_operand.vmem [shape: f32[1,100], index: 3, kind: input, shape index: {}]   ;;  %s728_s4 = inlined_call_operand.vmem [shape: f32[2,8], index: 4, kind: input, shape index: {}]   ;;  %s729_s5 = inlined_call_operand.vmem [shape: f32[2,1], index: 5, kind: input, shape index: {}]   ;;  %s730_s6 = inlined_call_operand.vmem [shape: f32[8,2], index: 6, kind: input, shape index: {}]   ;;  %s731_s7 = inlined_call_operand.vmem [shape: f32[8,1], index: 7, kind: input, shape index: {}]   ;;  %s732_s8 = inlined_call_operand.vmem [shape: f32[2,8,100], index: 8, kind: output, shape index: {}]  }
   0x1 LB: > { %s562_s28 = sadd.s32 4294967295, %s606_s27   ;;  %p566_p0 = scmp.ge.s32.totalorder %s606_s27, 1  ;;  %s606_s27 = sphi %s662_s27, %s18_s27  }
   0x2   : > { %p261_p1 = scmp.lt.s32.totalorder %s606_s27, 3 }
   0x4   : > { %p262_p2 = pnand %p566_p0, %p261_p1 }
   0x5   : > { %p293_p3 = scmp.lt.s32.totalorder (!%p262_p2), %s562_s28, 1  ;;  %s608_s11 = smov (!%p262_p2), 106  }
   0x6   : > { %265 = sbr.rel (%p262_p2) target bundleno = 892 (0x37c), region = 52  ;;  %s609_s12 = smov (!%p262_p2), 108  }
   0x7   : > { %s610_s13 = smov (!%p262_p2), 117   ;;  %s611_s14 = smov (!%p262_p2), 107  }
   0x8   : > { %s612_s15 = smov (!%p262_p2), 116   ;;  %s613_s16 = smov (!%p262_p2), 118  }
   0x9   : > { %s614_s17 = smov (!%p262_p2), 126   ;;  %s615_s18 = smov (!%p262_p2), 127  }
   0xb   : > { %s734_s28 = smov (!%p293_p3, %s562_s28), 1  ;;  %vm302_vm0 = vcmask 818176   ;;  %v362_v5 = vld [vmem:[%s726_s2] sm:$0xff]  ;;  %v616_v6 = vmov 0   ;;  %vm368_vm1 = vcmask 588800   ;;  %vm409_vm4 = vcmask 7168  }
   0xc   : > { %s567_s29 = sshll.u32 %s734_s28, 3  ;;  %593 = vset.pattern.permute.xlu2 %v616_v6  ;;  %594 = vset.pattern.permute.xlu0 %v616_v6  ;;  %v412_v7 = vld [vmem:[%s729_s5] sm:$0x3]  ;;  %vm418_vm5 = vcmask 64512   ;;  %vm454_vm6 = vcmask 1041408   ;;  %vm450_vm7 = vcmask 15360  }
   0xd   : > { %s296_s10 = scalar_lea.vmem %s724_s0, %s567_s29  ;;  %v444_v11 = vld [vmem:[%s731_s7] sm:$0xff] }
   0xe   : > { %v346_v0 = vld [vmem:[%s296_s10] sm:$0xff] }
   0xf   : > { %348 = vrot.lane.b32.xlu0 %v346_v0, %s608_s11  ;;  %336 = vrot.lane.b32.xlu1 %v346_v0, %s609_s12  ;;  %303 = vst.msk [vmem:[#allocation2] sm:$0xff] %vm302_vm0, %v346_v0  ;;  %v352_v22 = vld [vmem:[%s725_s1] sm:$0xff] }
  0x10   : > { %324 = vrot.lane.b32.xlu2 %v346_v0, %s610_s13  ;;  %v392_v23 = vld [vmem:[%s727_s3] sm:$0x1] }
  0x11   : > { %vm401_vm2 = vcmp.gt.f32.partialorder %v392_v23, 0.5  ;;  %v595_v26 = vld [vmem:[%s727_s3] ss:$0 sm:$0xff] }
  0x12   : > { %v402_v24 = vsel %vm401_vm2, 1, %v616_v6  ;;  %v411_v37 = vld [vmem:[%s728_s4] sm:$0x3] }
  0x13   : > { %v403_v25 = vperm.slane %v402_v24, 0  ;;  %v443_v43 = vld [vmem:[%s730_s6] sm:$0xff] }
  0x15   : > { %vm404_vm3 = vcmp.eq.s32.totalorder %v403_v25, 1 }
  0x16   : > { %v353_v21 = vld [vmem:[#allocation2] sm:$0xff] }
  0x17   : > { %342 = vrot.lane.b32.xlu0 %v346_v0, %s611_s14  ;;  %330 = vrot.lane.b32.xlu1 %v346_v0, %s612_s15 }
  0x18   : > { %318 = vrot.lane.b32.xlu2 %v346_v0, %s613_s16 }
  0x1f   : > { %312 = vrot.lane.b32.xlu0 %v346_v0, %s614_s17  ;;  %306 = vrot.lane.b32.xlu1 %v346_v0, %s615_s18 }
  0x20   : > { %365 = vperm.xlu2 %593, %v362_v5  }
  0x28   : > { %415 = vperm.xlu2 %593, %v412_v7  }
  0x30   : > { %447 = vperm.xlu2 %593, %v444_v11  }
  0x6a   : > { %v325_v1 = vpop.permute.xlu2 %324 }
  0x6b   : > { %327 = vst.msk [vmem:[#allocation2 + $0x20] sm:$0xff] %vm302_vm0, %v325_v1 }
  0x72   : > { %v319_v2 = vpop.permute.xlu2 %318  ;;  %v357_v17 = vld [vmem:[#allocation2 + $0x20] sm:$0xff] }
  0x73   : > { %321 = vst.msk [vmem:[#allocation2 + $0x18] sm:$0xff] %vm302_vm0, %v319_v2 }
  0x7a   : > { %v356_v18 = vld [vmem:[#allocation2 + $0x18] sm:$0xff]  ;;  %v366_v27 = vpop.permute.xlu2 %365 }
  0x81   : > { %v349_v3 = vpop.permute.xlu0 %348  ;;  %v337_v4 = vpop.permute.xlu1 %336 }
  0x82   : > { %351 = vst.msk [vmem:[#allocation2 + $0x40] sm:$0xff] %vm302_vm0, %v349_v3  ;;  %v416_v39 = vpop.permute.xlu2 %415 }
  0x83   : > { %339 = vst.msk [vmem:[#allocation2 + $0x30] sm:$0xff] %vm302_vm0, %v337_v4 }
  0x89   : > { %v343_v8 = vpop.permute.xlu0 %342  ;;  %v361_v9 = vld [vmem:[#allocation2 + $0x40] sm:$0xff]  ;;  %v331_v10 = vpop.permute.xlu1 %330 }
  0x8a   : > { %345 = vst.msk [vmem:[#allocation2 + $0x38] sm:$0xff] %vm302_vm0, %v343_v8  ;;  %379 = vmatpush.msra.mxu0 %v361_v9  ;;  %v359_v15 = vld [vmem:[#allocation2 + $0x30] sm:$0xff]  ;;  %v448_v44 = vpop.permute.xlu2 %447 }
  0x8b   : > { %333 = vst.msk [vmem:[#allocation2 + $0x28] sm:$0xff] %vm302_vm0, %v331_v10 }
  0x91   : > { %v360_v12 = vld [vmem:[#allocation2 + $0x38] sm:$0xff]  ;;  %v313_v13 = vpop.permute.xlu0 %312  ;;  %v307_v14 = vpop.permute.xlu1 %306 }
  0x92   : > { %380 = vmatpush.msra.mxu0 %v360_v12  ;;  %315 = vst.msk [vmem:[#allocation2 + $0x10] sm:$0xff] %vm302_vm0, %v313_v13  ;;  %v358_v16 = vld [vmem:[#allocation2 + $0x28] sm:$0xff] }
  0x93   : > { %309 = vst.msk [vmem:[#allocation2 + $0x8] sm:$0xff] %vm302_vm0, %v307_v14 }
  0x94   : > { %381 = vmatpush.msra.mxu0 %v359_v15 }
  0x96   : > { %382 = vmatpush.msra.mxu0 %v358_v16 }
  0x98   : > { %383 = vmatpush.msra.mxu0 %v357_v17 }
  0x99   : > { %v355_v19 = vld [vmem:[#allocation2 + $0x10] sm:$0xff] }
  0x9a   : > { %384 = vmatpush.msra.mxu0 %v356_v18  ;;  %v354_v20 = vld [vmem:[#allocation2 + $0x8] sm:$0xff] }
  0x9c   : > { %385 = vmatpush.msra.mxu0 %v355_v19 }
  0x9e   : > { %386 = vmatpush.msra.mxu0 %v354_v20 }
  0xa0   : > { %387 = vmatpush.msra.mxu0 %v353_v21 }
  0xa1   : > { %569 = vmatmul.msk.f32.vlgmr.msra.gmra.mxu0 %vm368_vm1, %v352_v22 }
 0x11e   : > { %v389_v28 = vpop.f32.mrf.mxu0 }
 0x11f   : > { %v390_v29 = vadd.f32 %v389_v28, %v366_v27 }
 0x121   : > { %v405_v30 = vsel %vm404_vm3, %v390_v29, -inf  ;;  %v396_v31 = vmul.f32 %v595_v26, %v390_v29 }
 0x122   : > { %v406_v32 = vsel %vm302_vm0, %v405_v30, -inf }
 0x123   : > { %407 = vmax.xlane.f32.xlu1 %v406_v32  ;;  %v397_v33 = vsel %vm302_vm0, %v396_v31, 0.0 }
 0x124   : > { %398 = vadd.xlane.f32.xlu0 %v397_v33 }
 0x196   : > { %v408_v36 = vpop.xlane.xlu1 %407 }
 0x197   : > { %v399_v34 = vpop.xlane.xlu0 %398 }
 0x198   : > { %v400_v35 = vmul.f32 0.015625, %v399_v34 }
 0x19a   : > { %v410_v38 = vsel %vm409_vm4, %v400_v35, %v408_v36 }
 0x19b   : > { %437 = vmatpush.msra.mxu1 %v410_v38 }
 0x19c   : > { %570 = vmatmul.msk.f32.vlgmr.msra.gmra.mxu1 %vm418_vm5, %v411_v37 }
 0x219   : > { %v439_v40 = vpop.f32.mrf.mxu1 }
 0x21a   : > { %v440_v41 = vadd.f32 %v439_v40, %v416_v39 }
 0x21c   : > { %v442_v42 = vmax.f32 %v440_v41, 0.0 }
 0x21e   : > { %571 = vmatpush.msk.msra.mxu2 %vm454_vm6, %v442_v42 }
 0x21f   : > { %572 = vmatmul.msk.f32.vlgmr.msra.gmra.mxu2 %vm450_vm7, %v443_v43 }
 0x2a2   : > { %v475_v45 = vpop.f32.mrf.mxu2 }
 0x2a3   : > { %v476_v46 = vadd.f32 %v475_v45, %v448_v44 }
 0x2a5   : > { %479 = vrot.lane.b32.xlu2 %v476_v46, %s615_s18  ;;  %s300_s18 = scalar_lea.vmem %s732_s8, %s567_s29 }
 0x2ff   : > { %v480_v47 = vpop.permute.xlu2 %479 }
 0x300   : > { %v482_v48 = vadd.f32 %v480_v47, %v476_v46 }
 0x302   : > { %v573_v49 = vmul.f32 -1.442695, %v482_v48 }
 0x304   : > { %596 = vpow2.f32 %v573_v49 }
 0x30a   : > { %v597_v50 = vpop.eup %596 }
 0x30b   : > { %v486_v51 = vadd.f32 1.0, %v597_v50 }
 0x30d   : > { %598 = vrcp.f32 %v486_v51  ;;  %v498_v55 = vand.u32 2147483648, %v486_v51  ;;  %v496_v57 = vand.u32 2147483647, %v486_v51  ;;  %vm492_vm9 = vweird.f32 %v486_v51 }
 0x30f   : > { %v499_v59 = vor.u32 1.1754944e-38, %v498_v55  ;;  %vm497_vm11 = vcmp.eq.f32.partialorder %v496_v57, 8.507059e+37 }
 0x313   : > { %v599_v52 = vpop.eup %598 }
 0x314   : > { %v488_v53 = vmul.f32 %v599_v52, %v486_v51  ;;  %vm493_vm8 = vweird.f32 %v599_v52 }
 0x315   : > { %vm494_vm10 = vmor %vm492_vm9, %vm493_vm8 }
 0x316   : > { %v489_v54 = vsub.f32 1.0, %v488_v53 }
 0x318   : > { %v490_v56 = vmul.f32 %v599_v52, %v489_v54 }
 0x31a   : > { %v491_v58 = vadd.f32 %v599_v52, %v490_v56 }
 0x31c   : > { %v495_v60 = vsel %vm494_vm10, %v599_v52, %v491_v58 }
 0x31d   : > { %v500_v61 = vsel %vm497_vm11, %v499_v59, %v495_v60 }
 0x31e   : > { %504 = vperm.xlu2 %593, %v500_v61  }
 0x378   : > { %v505_v62 = vpop.permute.xlu2 %504 }
 0x379   : > { %v507_v63 = vmul.f32 %v505_v62, %v390_v29 }
 0x37b   : > { %508 = vst.msk [vmem:[%s300_s18] sm:$0xff] %vm302_vm0, %v507_v63 }
 0x37c PF: > { %s18_s27 = sadd.s32 1, %s606_s27  }
 0x37d   : > { %p15_p4 = scmp.ge.s32.totalorder %s18_s27, 4  }
 0x37f   :  { %17 = sbr.rel (!%p15_p4) target bundleno = 1 (0x1), region = 82 }

// kernel: unet_forward.39
= control target key start
LH: loop header
LB: loop body
LE: loop exit
PB: predicated region body
PF: predicated region fallthrough
CT: control target
= control target key end

     0   :  { %s335_s12 = smov 0   ;;  %s358_s0 = inlined_call_operand.vmem [shape: f32[2,8,256], index: 0, kind: input, shape index: {}]   ;;  %s359_s1 = inlined_call_operand.vmem [shape: f32[8,8], index: 1, kind: input, shape index: {}]   ;;  %s360_s2 = inlined_call_operand.vmem [shape: f32[8,1], index: 2, kind: input, shape index: {}]   ;;  %s361_s3 = inlined_call_operand.vmem [shape: f32[2,8,256], index: 3, kind: output, shape index: {}]  }
   0x1 LB: > { %s281_s13 = sadd.s32 4294967295, %s312_s12   ;;  %p285_p0 = scmp.ge.s32.totalorder %s312_s12, 1  ;;  %s312_s12 = sphi %s335_s12, %s13_s12  }
   0x2   : > { %p137_p1 = scmp.lt.s32.totalorder %s312_s12, 3 }
   0x4   : > { %p138_p2 = pnand %p285_p0, %p137_p1 }
   0x5   : > { %p161_p3 = scmp.lt.s32.totalorder (!%p138_p2), %s281_s13, 1 }
   0x6   : > { %141 = sbr.rel (%p138_p2) target bundleno = 146 (0x92), region = 32 }
   0xb   : > { %v174_v0 = vld [vmem:[%s360_s2] sm:$0xff]  ;;  %v314_v1 = vmov 0   ;;  %s363_s13 = smov (!%p161_p3, %s281_s13), 1  ;;  %vm180_vm0 = vcmask 64512  }
   0xc   : > { %305 = vset.pattern.permute.xlu0 %v314_v1  ;;  %s294_s16 = sshll.u32 %s363_s13, 4  ;;  %v171_v2 = vld [vmem:[%s359_s1] sm:$0xff] }
   0xd   : > { %177 = vperm.xlu0 %305, %v174_v0   ;;  %s165_s19 = scalar_lea.vmem %s358_s0, %s294_s16  ;;  %s170_s24 = scalar_lea.vmem %s361_s3, %s294_s16 }
   0xe   : > { %v172_v3 = vld [vmem:[%s165_s19] sm:$0xff]  ;;  %v173_v4 = vld [vmem:[%s165_s19 + $0x8] sm:$0xff] }
   0xf   : > { %199 = vmatpush.msra.mxu0 %v172_v3  ;;  %219 = vmatpush.msra.mxu1 %v173_v4 }
  0x10   : > { %290 = vmatmul.msk.f32.vlgmr.msra.gmra.mxu0 %vm180_vm0, %v171_v2  ;;  %291 = vmatmul.msk.f32.vlgmr.msra.gmra.mxu1 %vm180_vm0, %v171_v2 }
  0x7f   : > { %v178_v5 = vpop.permute.xlu0 %177 }
  0x8d   : > { %v201_v6 = vpop.f32.mrf.mxu0  ;;  %v221_v7 = vpop.f32.mrf.mxu1 }
  0x8e   : > { %v202_v8 = vadd.f32 %v201_v6, %v178_v5  ;;  %v222_v9 = vadd.f32 %v221_v7, %v178_v5 }
  0x90   : > { %224 = vst [vmem:[%s170_s24] sm:$0xff] %v202_v8 }
  0x91   : > { %225 = vst [vmem:[%s170_s24 + $0x8] sm:$0xff] %v222_v9 }
  0x92 PF: > { %s13_s12 = sadd.s32 1, %s312_s12  }
  0x93   : > { %p10_p4 = scmp.ge.s32.totalorder %s13_s12, 4  }
  0x95   :  { %12 = sbr.rel (!%p10_p4) target bundleno = 1 (0x1), region = 62 }

// kernel: unet_forward.36
= control target key start
LH: loop header
LB: loop body
LE: loop exit
PB: predicated region body
PF: predicated region fallthrough
CT: control target
= control target key end

     0   :  { %s1130_s27 = smov 0   ;;  %s1295_s0 = inlined_call_operand.vmem [shape: f32[2,16,362], index: 0, kind: input, shape index: {}]   ;;  %s1296_s1 = inlined_call_operand.vmem [shape: f32[8,144], index: 1, kind: input, shape index: {}]   ;;  %s1297_s2 = inlined_call_operand.vmem [shape: f32[8,1], index: 2, kind: input, shape index: {}]   ;;  %s1298_s3 = inlined_call_operand.vmem [shape: f32[1,324], index: 3, kind: input, shape index: {}]   ;;  %s1299_s4 = inlined_call_operand.vmem [shape: f32[2,8], index: 4, kind: input, shape index: {}]   ;;  %s1300_s5 = inlined_call_operand.vmem [shape: f32[2,1], index: 5, kind: input, shape index: {}]   ;;  %s1301_s6 = inlined_call_operand.vmem [shape: f32[8,2], index: 6, kind: input, shape index: {}]   ;;  %s1302_s7 = inlined_call_operand.vmem [shape: f32[8,1], index: 7, kind: input, shape index: {}]   ;;  %s1303_s8 = inlined_call_operand.vmem [shape: f32[2,8,324], index: 8, kind: output, shape index: {}]  }
   0x1 LB: > { %s1028_s28 = sadd.s32 4294967295, %s1074_s27   ;;  %p1032_p0 = scmp.ge.s32.totalorder %s1074_s27, 1  ;;  %s1074_s27 = sphi %s1130_s27, %s18_s27  }
   0x2   : > { %p262_p1 = scmp.lt.s32.totalorder %s1074_s27, 3 }
   0x4   : > { %p263_p2 = pnand %p1032_p0, %p262_p1 }
   0x5   : > { %p296_p3 = scmp.lt.s32.totalorder (!%p263_p2), %s1028_s28, 1  ;;  %s1076_s11 = smov (!%p263_p2), 91  }
   0x6   : > { %266 = sbr.rel (%p263_p2) target bundleno = 1078 (0x436), region = 52  ;;  %s1077_s12 = smov (!%p263_p2), 92  }
   0x7   : > { %s1078_s13 = smov (!%p263_p2), 108   ;;  %s1079_s14 = smov (!%p263_p2), 109  }
   0x8   : > { %s1080_s15 = smov (!%p263_p2), 110   ;;  %s1081_s16 = smov (!%p263_p2), 126  }
   0x9   : > { %s1082_s17 = smov (!%p263_p2), 90   ;;  %s1083_s18 = smov (!%p263_p2), 127  }
   0xb   : > { %s1305_s28 = smov (!%p296_p3, %s1028_s28), 1  ;;  %vm314_vm0 = vcmask 556032   ;;  %vm548_vm1 = vcmask 752640   ;;  %vm589_vm2 = vcmask 744448   ;;  %vm507_vm3 = vcmask 883712  }
   0xc   : > { %s1044_s29 = smul.u32 48, %s1305_s28  ;;  %vm466_vm4 = vcmask 891904   ;;  %vm425_vm5 = vcmask 900096   ;;  %vm384_vm6 = vcmask 1031168   ;;  %vm630_vm7 = vcmask 736256  }
   0xd   : > { %vm343_vm8 = vcmask 1039360   ;;  %vm709_vm9 = vcmask 130048   ;;  %vm869_vm14 = vcmask 7168   ;;  %vm878_vm15 = vcmask 64512  }
   0xe   : > { %s300_s10 = scalar_lea.vmem %s1295_s0, %s1044_s29 }
   0xf   : > { %v1144_v0 = vld [vmem:[%s300_s10 + $0x20] sm:$0xff]  ;;  %v1146_v1 = vld [vmem:[%s300_s10 + $0x8] sm:$0xff]  ;;  %v1151_v2 = vld [vmem:[%s300_s10 + $0x18] sm:$0xff] }
  0x10   : > { %585 = vrot.lane.b32.xlu0 %v1144_v0, %s1076_s11  ;;  %579 = vrot.lane.b32.xlu1 %v1146_v1, %s1076_s11  ;;  %v1153_v3 = vld [vmem:[%s300_s10] sm:$0xff]  ;;  %v570_v4 = vld [vmem:[%s300_s10 + $0x28] sm:$0xff] }
  0x11   : > { %544 = vrot.lane.b32.xlu2 %v1144_v0, %s1077_s12  ;;  %v567_v5 = vld [vmem:[%s300_s10 + $0x10] sm:$0xff]  ;;  %318 = vst.msk [vmem:[#allocation2 + $0x28] sm:$0xff] %vm314_vm0, %v570_v4 }
  0x12   : > { %315 = vst.msk [vmem:[#allocation2 + $0x10] sm:$0xff] %vm314_vm0, %v567_v5 }
  0x18   : > { %587 = vrot.lane.b32.xlu0 %v570_v4, %s1076_s11  ;;  %581 = vrot.lane.b32.xlu1 %v567_v5, %s1076_s11 }
  0x19   : > { %546 = vrot.lane.b32.xlu2 %v570_v4, %s1077_s12 }
  0x20   : > { %540 = vrot.lane.b32.xlu1 %v567_v5, %s1077_s12  ;;  %538 = vrot.lane.b32.xlu0 %v1146_v1, %s1077_s12 }
  0x21   : > { %583 = vrot.lane.b32.xlu2 %v1151_v2, %s1076_s11 }
  0x28   : > { %505 = vrot.lane.b32.xlu1 %v570_v4, %s1078_s13  ;;  %503 = vrot.lane.b32.xlu0 %v1144_v0, %s1078_s13 }
  0x29   : > { %577 = vrot.lane.b32.xlu2 %v1153_v3, %s1076_s11 }
  0x30   : > { %499 = vrot.lane.b32.xlu1 %v567_v5, %s1078_s13  ;;  %497 = vrot.lane.b32.xlu0 %v1146_v1, %s1078_s13 }
  0x31   : > { %542 = vrot.lane.b32.xlu2 %v1151_v2, %s1077_s12 }
  0x38   : > { %464 = vrot.lane.b32.xlu1 %v570_v4, %s1079_s14  ;;  %462 = vrot.lane.b32.xlu0 %v1144_v0, %s1079_s14 }
  0x39   : > { %536 = vrot.lane.b32.xlu2 %v1153_v3, %s1077_s12 }
  0x40   : > { %458 = vrot.lane.b32.xlu1 %v567_v5, %s1079_s14  ;;  %456 = vrot.lane.b32.xlu0 %v1146_v1, %s1079_s14 }
  0x41   : > { %501 = vrot.lane.b32.xlu2 %v1151_v2, %s1078_s13 }
  0x48   : > { %423 = vrot.lane.b32.xlu1 %v570_v4, %s1080_s15  ;;  %421 = vrot.lane.b32.xlu0 %v1144_v0, %s1080_s15 }
  0x49   : > { %495 = vrot.lane.b32.xlu2 %v1153_v3, %s1078_s13 }
  0x50   : > { %417 = vrot.lane.b32.xlu1 %v567_v5, %s1080_s15  ;;  %415 = vrot.lane.b32.xlu0 %v1146_v1, %s1080_s15 }
  0x51   : > { %460 = vrot.lane.b32.xlu2 %v1151_v2, %s1079_s14 }
  0x58   : > { %382 = vrot.lane.b32.xlu1 %v570_v4, %s1081_s16  ;;  %380 = vrot.lane.b32.xlu0 %v1144_v0, %s1081_s16 }
  0x59   : > { %454 = vrot.lane.b32.xlu2 %v1153_v3, %s1079_s14 }
  0x60   : > { %376 = vrot.lane.b32.xlu1 %v567_v5, %s1081_s16  ;;  %374 = vrot.lane.b32.xlu0 %v1146_v1, %s1081_s16 }
  0x61   : > { %419 = vrot.lane.b32.xlu2 %v1151_v2, %s1080_s15 }
  0x68   : > { %628 = vrot.lane.b32.xlu1 %v570_v4, %s1082_s17  ;;  %626 = vrot.lane.b32.xlu0 %v1144_v0, %s1082_s17 }
  0x69   : > { %339 = vrot.lane.b32.xlu2 %v1144_v0, %s1083_s18 }
  0x6b   : > { %v545_v6 = vpop.permute.xlu2 %544 }
  0x70   : > { %413 = vrot.lane.b32.xlu1 %v1153_v3, %s1080_s15  ;;  %341 = vrot.lane.b32.xlu0 %v570_v4, %s1083_s18  ;;  %s1045_s15 = smul.u32 24, %s1305_s28 }
  0x71   : > { %620 = vrot.lane.b32.xlu2 %v1146_v1, %s1082_s17 }
  0x73   : > { %v547_v7 = vpop.permute.xlu2 %546 }
  0x74   : > { %v552_v8 = vsel %vm548_vm1, %v545_v6, %v547_v7  ;;  %564 = vst.msk [vmem:[#allocation2 + $0x148] sm:$0xff] %vm314_vm0, %v547_v7 }
  0x78   : > { %622 = vrot.lane.b32.xlu0 %v567_v5, %s1082_s17  ;;  %333 = vrot.lane.b32.xlu1 %v1146_v1, %s1083_s18 }
  0x79   : > { %335 = vrot.lane.b32.xlu2 %v567_v5, %s1083_s18 }
  0x7b   : > { %v584_v9 = vpop.permute.xlu2 %583 }
  0x80   : > { %378 = vrot.lane.b32.xlu0 %v1151_v2, %s1081_s16  ;;  %624 = vrot.lane.b32.xlu1 %v1151_v2, %s1082_s17 }
  0x81   : > { %372 = vrot.lane.b32.xlu2 %v1153_v3, %s1081_s16 }
  0x82   : > { %v586_v10 = vpop.permute.xlu0 %585  ;;  %v580_v11 = vpop.permute.xlu1 %579 }
  0x83   : > { %v592_v12 = vsel %vm589_vm2, %v584_v9, %v586_v10  ;;  %v578_v13 = vpop.permute.xlu2 %577 }
  0x84   : > { %v590_v14 = vsel %vm589_vm2, %v578_v13, %v580_v11  ;;  %713 = vmatpush.msra.mxu0 %v592_v12 }
  0x86   : > { %714 = vmatpush.msra.mxu0 %v590_v14 }
  0x88   : > { %618 = vrot.lane.b32.xlu0 %v1153_v3, %s1082_s17  ;;  %337 = vrot.lane.b32.xlu1 %v1151_v2, %s1083_s18 }
  0x89   : > { %331 = vrot.lane.b32.xlu2 %v1153_v3, %s1083_s18 }
  0x8a   : > { %v588_v15 = vpop.permute.xlu0 %587  ;;  %v582_v16 = vpop.permute.xlu1 %581 }
  0x8b   : > { %v593_v17 = vsel %vm589_vm2, %v586_v10, %v588_v15  ;;  %605 = vst.msk [vmem:[#allocation2 + $0x178] sm:$0xff] %vm314_vm0, %v588_v15  ;;  %v591_v18 = vsel %vm589_vm2, %v580_v11, %v582_v16  ;;  %v543_v19 = vpop.permute.xlu2 %542  ;;  %vm910_vm2 = vcmask 15360  }
  0x8c   : > { %v551_v20 = vsel %vm548_vm1, %v543_v19, %v545_v6  ;;  %753 = vmatpush.msra.mxu2 %v593_v17  ;;  %602 = vst.msk [vmem:[#allocation2 + $0x160] sm:$0xff] %vm314_vm0, %v582_v16  ;;  %v648_v19 = vld [vmem:[%s1296_s1 + $0x8] sm:$0xff] }
  0x8d   : > { %715 = vmatpush.msra.mxu0 %v551_v20  ;;  %v1238_v20 = vld [vmem:[%s1296_s1] sm:$0xff] }
  0x8e   : > { %754 = vmatpush.msra.mxu2 %v591_v18 }
  0x90   : > { %755 = vmatpush.msra.mxu2 %v552_v8 }
  0x92   : > { %v541_v21 = vpop.permute.xlu1 %540  ;;  %v539_v22 = vpop.permute.xlu0 %538 }
  0x93   : > { %561 = vst.msk [vmem:[#allocation2 + $0x130] sm:$0xff] %vm314_vm0, %v541_v21  ;;  %v550_v23 = vsel %vm548_vm1, %v539_v22, %v541_v21  ;;  %v537_v24 = vpop.permute.xlu2 %536 }
  0x94   : > { %v549_v25 = vsel %vm548_vm1, %v537_v24, %v539_v22  ;;  %756 = vmatpush.msra.mxu2 %v550_v23  ;;  %vm914_vm1 = vcmask 1041408  }
  0x95   : > { %716 = vmatpush.msra.mxu0 %v549_v25 }
  0x9a   : > { %v506_v26 = vpop.permute.xlu1 %505  ;;  %v504_v27 = vpop.permute.xlu0 %503 }
  0x9b   : > { %523 = vst.msk [vmem:[#allocation2 + $0x118] sm:$0xff] %vm314_vm0, %v506_v26  ;;  %v511_v28 = vsel %vm507_vm3, %v504_v27, %v506_v26  ;;  %v502_v29 = vpop.permute.xlu2 %501  ;;  %v703_v26 = vld [vmem:[%s1297_s2] sm:$0xff] }
  0x9c   : > { %v510_v30 = vsel %vm507_vm3, %v502_v29, %v504_v27  ;;  %757 = vmatpush.msra.mxu2 %v511_v28 }
  0x9d   : > { %717 = vmatpush.msra.mxu0 %v510_v30  ;;  %v696_v30 = vld [vmem:[#allocation2 + $0x178] sm:$0xff] }
  0xa2   : > { %v500_v31 = vpop.permute.xlu1 %499  ;;  %v498_v32 = vpop.permute.xlu0 %497 }
  0xa3   : > { %520 = vst.msk [vmem:[#allocation2 + $0x100] sm:$0xff] %vm314_vm0, %v500_v31  ;;  %v509_v33 = vsel %vm507_vm3, %v498_v32, %v500_v31  ;;  %v496_v34 = vpop.permute.xlu2 %495  ;;  %v872_v31 = vld [vmem:[%s1300_s5] sm:$0x3] }
  0xa4   : > { %v508_v35 = vsel %vm507_vm3, %v496_v34, %v498_v32  ;;  %758 = vmatpush.msra.mxu2 %v509_v33  ;;  %v693_v32 = vld [vmem:[#allocation2 + $0x160] sm:$0xff]  ;;  %v690_v33 = vld [vmem:[#allocation2 + $0x148] sm:$0xff]  ;;  %v687_v34 = vld [vmem:[#allocation2 + $0x130] sm:$0xff] }
  0xa5   : > { %718 = vmatpush.msra.mxu0 %v508_v35  ;;  %v684_v35 = vld [vmem:[#allocation2 + $0x118] sm:$0xff] }
  0xaa   : > { %v465_v36 = vpop.permute.xlu1 %464  ;;  %v463_v37 = vpop.permute.xlu0 %462 }
  0xab   : > { %482 = vst.msk [vmem:[#allocation2 + $0xe8] sm:$0xff] %vm314_vm0, %v465_v36  ;;  %v470_v38 = vsel %vm466_vm4, %v463_v37, %v465_v36  ;;  %v461_v39 = vpop.permute.xlu2 %460  ;;  %v904_v36 = vld [vmem:[%s1302_s7] sm:$0xff] }
  0xac   : > { %v469_v40 = vsel %vm466_vm4, %v461_v39, %v463_v37  ;;  %759 = vmatpush.msra.mxu2 %v470_v38  ;;  %v681_v37 = vld [vmem:[#allocation2 + $0x100] sm:$0xff] }
  0xad   : > { %719 = vmatpush.msra.mxu0 %v469_v40 }
  0xb2   : > { %v459_v41 = vpop.permute.xlu1 %458  ;;  %v457_v42 = vpop.permute.xlu0 %456  ;;  %v678_v38 = vld [vmem:[#allocation2 + $0xe8] sm:$0xff] }
  0xb3   : > { %479 = vst.msk [vmem:[#allocation2 + $0xd0] sm:$0xff] %vm314_vm0, %v459_v41  ;;  %v468_v43 = vsel %vm466_vm4, %v457_v42, %v459_v41  ;;  %v455_v44 = vpop.permute.xlu2 %454 }
  0xb4   : > { %v467_v45 = vsel %vm466_vm4, %v455_v44, %v457_v42  ;;  %760 = vmatpush.msra.mxu2 %v468_v43  ;;  %v654_v44 = vld [vmem:[#allocation2 + $0x28] sm:$0xff] }
  0xb5   : > { %720 = vmatpush.msra.mxu0 %v467_v45  ;;  %v651_v45 = vld [vmem:[#allocation2 + $0x10] sm:$0xff] }
  0xba   : > { %v424_v46 = vpop.permute.xlu1 %423  ;;  %v422_v47 = vpop.permute.xlu0 %421  ;;  %v675_v39 = vld [vmem:[#allocation2 + $0xd0] sm:$0xff] }
  0xbb   : > { %441 = vst.msk [vmem:[#allocation2 + $0xb8] sm:$0xff] %vm314_vm0, %v424_v46  ;;  %v429_v48 = vsel %vm425_vm5, %v422_v47, %v424_v46  ;;  %v420_v49 = vpop.permute.xlu2 %419  ;;  %v836_v46 = vld [vmem:[%s1298_s3] sm:$0x7] }
  0xbc   : > { %v428_v50 = vsel %vm425_vm5, %v420_v49, %v422_v47  ;;  %761 = vmatpush.msra.mxu2 %v429_v48  ;;  %vm853_vm10 = vcmp.gt.f32.partialorder %v836_v46, 0.5 }
  0xbd   : > { %721 = vmatpush.msra.mxu0 %v428_v50 }
  0xc2   : > { %v418_v51 = vpop.permute.xlu1 %417  ;;  %v416_v52 = vpop.permute.xlu0 %415 }
  0xc3   : > { %438 = vst.msk [vmem:[#allocation2 + $0xa0] sm:$0xff] %vm314_vm0, %v418_v51  ;;  %v427_v53 = vsel %vm425_vm5, %v416_v52, %v418_v51  ;;  %v1213_v54 = vpop.permute.xlu2 %339 }
  0xc4   : > { %762 = vmatpush.msra.mxu2 %v427_v53 }
  0xca   : > { %v383_v55 = vpop.permute.xlu1 %382  ;;  %v381_v56 = vpop.permute.xlu0 %380  ;;  %v669_v40 = vld [vmem:[#allocation2 + $0xa0] sm:$0xff] }
  0xcb   : > { %400 = vst.msk [vmem:[#allocation2 + $0x88] sm:$0xff] %vm314_vm0, %v383_v55  ;;  %v388_v57 = vsel %vm384_vm6, %v381_v56, %v383_v55  ;;  %v621_v58 = vpop.permute.xlu2 %620 }
  0xcc   : > { %763 = vmatpush.msra.mxu2 %v388_v57 }
  0xd2   : > { %v377_v59 = vpop.permute.xlu1 %376  ;;  %v375_v60 = vpop.permute.xlu0 %374 }
  0xd3   : > { %397 = vst.msk [vmem:[#allocation2 + $0x70] sm:$0xff] %vm314_vm0, %v377_v59  ;;  %v386_v61 = vsel %vm384_vm6, %v375_v60, %v377_v59  ;;  %v336_v62 = vpop.permute.xlu2 %335 }
  0xd4   : > { %764 = vmatpush.msra.mxu2 %v386_v61  ;;  %356 = vst.msk [vmem:[#allocation2 + $0x40] sm:$0xff] %vm314_vm0, %v336_v62 }
  0xda   : > { %v629_v63 = vpop.permute.xlu1 %628  ;;  %v627_v4 = vpop.permute.xlu0 %626  ;;  %v663_v41 = vld [vmem:[#allocation2 + $0x70] sm:$0xff] }
  0xdb   : > { %646 = vst.msk [vmem:[#allocation2 + $0x1a8] sm:$0xff] %vm314_vm0, %v629_v63  ;;  %v634_v5 = vsel %vm630_vm7, %v627_v4, %v629_v63  ;;  %v373_v6 = vpop.permute.xlu2 %372  ;;  %v657_v43 = vld [vmem:[#allocation2 + $0x40] sm:$0xff] }
  0xdc   : > { %v385_v7 = vsel %vm384_vm6, %v373_v6, %v375_v60  ;;  %787 = vmatpush.msra.mxu3 %v634_v5  ;;  %v839_v5 = vperm.slane %v836_v46, 1 }
  0xe2   : > { %v414_v8 = vpop.permute.xlu1 %413  ;;  %v342_v9 = vpop.permute.xlu0 %341  ;;  %v702_v18 = vld [vmem:[#allocation2 + $0x1a8] sm:$0xff] }
  0xe3   : > { %v426_v10 = vsel %vm425_vm5, %v414_v8, %v416_v52  ;;  %v347_v11 = vsel %vm343_vm8, %v1213_v54, %v342_v9  ;;  %359 = vst.msk [vmem:[#allocation2 + $0x58] sm:$0xff] %vm314_vm0, %v342_v9  ;;  %v332_v12 = vpop.permute.xlu2 %331  ;;  %v840_v8 = vperm.slane %v836_v46, 2 }
  0xe4   : > { %722 = vmatpush.msra.mxu0 %v426_v10  ;;  %765 = vmatpush.msra.mxu2 %v347_v11 }
  0xea   : > { %v623_v13 = vpop.permute.xlu0 %622  ;;  %v334_v14 = vpop.permute.xlu1 %333  ;;  %v660_v42 = vld [vmem:[#allocation2 + $0x58] sm:$0xff] }
  0xeb   : > { %v632_v15 = vsel %vm630_vm7, %v621_v58, %v623_v13  ;;  %643 = vst.msk [vmem:[#allocation2 + $0x190] sm:$0xff] %vm314_vm0, %v623_v13  ;;  %v345_v16 = vsel %vm343_vm8, %v334_v14, %v336_v62  ;;  %v344_v17 = vsel %vm343_vm8, %v332_v12, %v334_v14 }
  0xec   : > { %788 = vmatpush.msra.mxu3 %v632_v15  ;;  %766 = vmatpush.msra.mxu2 %v345_v16 }
  0xed   : > { %1036 = vmatmul.msk.f32.vlgmr.msra.gmra.mxu3 %vm709_vm9, %v648_v19 }
  0xee   : > { %827 = vmatpush.msrb.mxu3 %v702_v18  ;;  %767 = vmatpush.msra.mxu2 %v1144_v0  ;;  %v1084_v0 = vmov 0  }
  0xef   : > { %1063 = vset.pattern.permute.xlu0 %v1084_v0 }
  0xf0   : > { %768 = vmatpush.msra.mxu2 %v1146_v1  ;;  %706 = vperm.xlu0 %1063, %v703_v26  }
  0xf1   : > { %769 = vmatmul.f32.vlgmr.msra.gmra.mxu2 %v1238_v20 }
  0xf2   : > { %v379_v21 = vpop.permute.xlu0 %378  ;;  %v625_v22 = vpop.permute.xlu1 %624  ;;  %v699_v23 = vld [vmem:[#allocation2 + $0x190] sm:$0xff] }
  0xf3   : > { %v387_v24 = vsel %vm384_vm6, %v379_v21, %v381_v56  ;;  %v633_v25 = vsel %vm630_vm7, %v625_v22, %v627_v4  ;;  %828 = vmatpush.msrb.mxu3 %v699_v23  ;;  %v838_v4 = vperm.slane %v836_v46, 0 }
  0xf4   : > { %723 = vmatpush.msra.mxu0 %v387_v24  ;;  %747 = vmatpush.msra.mxu1 %v633_v25  ;;  %v871_v25 = vld [vmem:[%s1299_s4] sm:$0x3] }
  0xf5   : > { %1037 = vmatmul.msk.f32.vlgmr.msrb.gmra.mxu3 %vm709_vm9, %v648_v19 }
  0xf6   : > { %724 = vmatpush.msra.mxu0 %v385_v7 }
  0xf8   : > { %875 = vperm.xlu0 %1063, %v872_v31  }
  0xfa   : > { %v619_v1 = vpop.permute.xlu0 %618  ;;  %v338_v27 = vpop.permute.xlu1 %337 }
  0xfb   : > { %v631_v28 = vsel %vm630_vm7, %v619_v1, %v621_v58  ;;  %v346_v29 = vsel %vm343_vm8, %v338_v27, %v1213_v54  ;;  %v854_v54 = vsel %vm853_vm10, 1, %v1084_v0 }
  0xfc   : > { %725 = vmatpush.msra.mxu0 %v346_v29  ;;  %748 = vmatpush.msra.mxu1 %v631_v28  ;;  %v855_v57 = vperm.slane %v854_v54, 0  ;;  %v856_v58 = vperm.slane %v854_v54, 1  ;;  %v857_v59 = vperm.slane %v854_v54, 2  ;;  %v903_v29 = vld [vmem:[%s1301_s6] sm:$0xff] }
  0xfd   : > { %1035 = vmatmul.msk.f32.vlgmr.msra.gmra.mxu1 %vm709_vm9, %v648_v19 }
  0xfe   : > { %793 = vmatpush.msrb.mxu1 %v696_v30  ;;  %726 = vmatpush.msra.mxu0 %v344_v17  ;;  %vm858_vm11 = vcmp.eq.s32.totalorder %v855_v57, 1  ;;  %vm859_vm12 = vcmp.eq.s32.totalorder %v856_v58, 1  ;;  %vm860_vm13 = vcmp.eq.s32.totalorder %v857_v59, 1 }
 0x100   : > { %794 = vmatpush.msrb.mxu1 %v693_v32  ;;  %727 = vmatpush.msra.mxu0 %v1151_v2  ;;  %v672_v2 = vld [vmem:[#allocation2 + $0xb8] sm:$0xff] }
 0x101   : > { %907 = vperm.xlu0 %1063, %v904_v36  }
 0x102   : > { %795 = vmatpush.msrb.mxu1 %v690_v33  ;;  %728 = vmatpush.msra.mxu0 %v1153_v3  ;;  %v666_v3 = vld [vmem:[#allocation2 + $0x88] sm:$0xff] }
 0x103   : > { %729 = vmatmul.f32.vlgmr.msra.gmra.mxu0 %v1238_v20 }
 0x104   : > { %796 = vmatpush.msrb.mxu1 %v687_v34 }
 0x106   : > { %797 = vmatpush.msrb.mxu1 %v684_v35 }
 0x108   : > { %798 = vmatpush.msrb.mxu1 %v681_v37 }
 0x10a   : > { %799 = vmatpush.msrb.mxu1 %v678_v38 }
 0x10c   : > { %800 = vmatpush.msrb.mxu1 %v675_v39 }
 0x10e   : > { %801 = vmatpush.msrb.mxu1 %v672_v2 }
 0x110   : > { %802 = vmatpush.msrb.mxu1 %v669_v40 }
 0x112   : > { %803 = vmatpush.msrb.mxu1 %v666_v3 }
 0x114   : > { %804 = vmatpush.msrb.mxu1 %v663_v41 }
 0x116   : > { %805 = vmatpush.msrb.mxu1 %v660_v42 }
 0x118   : > { %806 = vmatpush.msrb.mxu1 %v657_v43 }
 0x11a   : > { %807 = vmatpush.msrb.mxu1 %v654_v44 }
 0x11c   : > { %808 = vmatpush.msrb.mxu1 %v651_v45 }
 0x11d   : > { %809 = vmatmul.f32.vlgmr.msrb.gmra.mxu1 %v1238_v20 }
 0x162   : > { %v707_v50 = vpop.permute.xlu0 %706 }
 0x16a   : > { %v876_v26 = vpop.permute.xlu0 %875 }
 0x170   : > { %v790_v53 = vpop.f32.mrf.mxu3 }
 0x173   : > { %v908_v30 = vpop.permute.xlu0 %907 }
 0x174   : > { %v770_v48 = vpop.f32.mrf.mxu2 }
 0x175   : > { %v771_v52 = vadd.f32 %v770_v48, %v707_v50 }
 0x177   : > { %v791_v56 = vadd.f32 %v790_v53, %v771_v52 }
 0x178   : > { %v830_v63 = vpop.f32.mrf.mxu3 }
 0x179   : > { %v1270_v61 = vmax.f32 %v791_v56, 0.0 }
 0x17a   : > { %v750_v49 = vpop.f32.mrf.mxu1 }
 0x17b   : > { %v862_v10 = vsel %vm859_vm12, %v1270_v61, -inf  ;;  %v845_v12 = vmul.f32 %v839_v5, %v1270_v61 }
 0x180   : > { %v730_v47 = vpop.f32.mrf.mxu0 }
 0x181   : > { %v731_v51 = vadd.f32 %v730_v47, %v707_v50 }
 0x183   : > { %v751_v55 = vadd.f32 %v750_v49, %v731_v51 }
 0x185   : > { %v1268_v60 = vmax.f32 %v751_v55, 0.0 }
 0x187   : > { %v861_v9 = vsel %vm858_vm11, %v1268_v60, -inf  ;;  %v844_v11 = vmul.f32 %v838_v4, %v1268_v60 }
 0x188   : > { %v865_v15 = vmax.f32 %v861_v9, %v862_v10 }
 0x189   : > { %v847_v18 = vadd.f32 %v845_v12, %v844_v11 }
 0x19a   : > { %v810_v62 = vpop.f32.mrf.mxu1 }
 0x19b   : > { %v811_v6 = vadd.f32 %v810_v62, %v707_v50 }
 0x19d   : > { %v831_v7 = vadd.f32 %v830_v63, %v811_v6 }
 0x19f   : > { %v835_v13 = vmax.f32 %v831_v7, 0.0 }
 0x1a1   : > { %v863_v14 = vsel %vm860_vm13, %v835_v13, -inf  ;;  %v846_v16 = vmul.f32 %v840_v8, %v835_v13 }
 0x1a2   : > { %v864_v17 = vsel %vm314_vm0, %v863_v14, -inf }
 0x1a3   : > { %v866_v19 = vmax.f32 %v865_v15, %v864_v17  ;;  %v848_v20 = vsel %vm314_vm0, %v846_v16, 0.0 }
 0x1a4   : > { %v849_v21 = vadd.f32 %v848_v20, %v847_v18 }
 0x1a5   : > { %867 = vmax.xlane.f32.xlu2 %v866_v19 }
 0x1a6   : > { %850 = vadd.xlane.f32.xlu1 %v849_v21 }
 0x218   : > { %v868_v24 = vpop.xlane.xlu2 %867 }
 0x219   : > { %v851_v22 = vpop.xlane.xlu1 %850 }
 0x21a   : > { %v852_v23 = vmul.f32 0.00390625, %v851_v22 }
 0x21c   : > { %v870_v0 = vsel %vm869_vm14, %v852_v23, %v868_v24 }
 0x21d   : > { %897 = vmatpush.msra.mxu3 %v870_v0 }
 0x21e   : > { %1038 = vmatmul.msk.f32.vlgmr.msra.gmra.mxu3 %vm878_vm15, %v871_v25 }
 0x2a1   : > { %v899_v1 = vpop.f32.mrf.mxu3 }
 0x2a2   : > { %v900_v27 = vadd.f32 %v899_v1, %v876_v26 }
 0x2a4   : > { %v902_v28 = vmax.f32 %v900_v27, 0.0 }
 0x2a6   : > { %1039 = vmatpush.msk.msrb.mxu3 %vm914_vm1, %v902_v28 }
 0x2a7   : > { %1040 = vmatmul.msk.f32.vlgmr.msrb.gmra.mxu3 %vm910_vm2, %v903_v29 }
 0x32a   : > { %v935_v31 = vpop.f32.mrf.mxu3 }
 0x32b   : > { %v936_v32 = vadd.f32 %v935_v31, %v908_v30 }
 0x32d   : > { %939 = vrot.lane.b32.xlu0 %v936_v32, %s1083_s18  ;;  %s305_s18 = scalar_lea.vmem %s1303_s8, %s1045_s15 }
 0x39f   : > { %v940_v33 = vpop.permute.xlu0 %939 }
 0x3a0   : > { %v942_v34 = vadd.f32 %v940_v33, %v936_v32 }
 0x3a2   : > { %v1041_v35 = vmul.f32 -1.442695, %v942_v34 }
 0x3a4   : > { %1064 = vpow2.f32 %v1041_v35 }
 0x3aa   : > { %v1065_v36 = vpop.eup %1064 }
 0x3ab   : > { %v946_v37 = vadd.f32 1.0, %v1065_v36 }
 0x3ad   : > { %1066 = vrcp.f32 %v946_v37  ;;  %v958_v40 = vand.u32 2147483648, %v946_v37  ;;  %v956_v41 = vand.u32 2147483647, %v946_v37  ;;  %vm952_vm4 = vweird.f32 %v946_v37 }
 0x3af   : > { %v959_v43 = vor.u32 1.1754944e-38, %v958_v40  ;;  %vm957_vm6 = vcmp.eq.f32.partialorder %v956_v41, 8.507059e+37 }
 0x3b3   : > { %v1067_v38 = vpop.eup %1066 }
 0x3b4   : > { %v948_v39 = vmul.f32 %v1067_v38, %v946_v37  ;;  %vm953_vm3 = vweird.f32 %v1067_v38 }
 0x3b5   : > { %vm954_vm5 = vmor %vm952_vm4, %vm953_vm3 }
 0x3b6   : > { %v949_v2 = vsub.f32 1.0, %v948_v39 }
 0x3b8   : > { %v950_v3 = vmul.f32 %v1067_v38, %v949_v2 }
 0x3ba   : > { %v951_v42 = vadd.f32 %v1067_v38, %v950_v3 }
 0x3bc   : > { %v955_v44 = vsel %vm954_vm5, %v1067_v38, %v951_v42 }
 0x3bd   : > { %v960_v45 = vsel %vm957_vm6, %v959_v43, %v955_v44 }
 0x3be   : > { %964 = vperm.xlu0 %1063, %v960_v45  }
 0x430   : > { %v965_v46 = vpop.permute.xlu0 %964 }
 0x431   : > { %v967_v47 = vmul.f32 %v965_v46, %v1268_v60  ;;  %v968_v48 = vmul.f32 %v965_v46, %v1270_v61  ;;  %v969_v49 = vmul.f32 %v965_v46, %v835_v13 }
 0x433   : > { %970 = vst [vmem:[%s305_s18] sm:$0xff] %v967_v47 }
 0x434   : > { %971 = vst [vmem:[%s305_s18 + $0x8] sm:$0xff] %v968_v48 }
 0x435   : > { %972 = vst.msk [vmem:[%s305_s18 + $0x10] sm:$0xff] %vm314_vm0, %v969_v49 }
 0x436 PF: > { %s18_s27 = sadd.s32 1, %s1074_s27  }
 0x437   : > { %p15_p4 = scmp.ge.s32.totalorder %s18_s27, 4  }
 0x439   :  { %17 = sbr.rel (!%p15_p4) target bundleno = 1 (0x1), region = 82 }

</bundles_post_ra>
